<compile_context>
chip_gen: v7x
topology: tpu7x:2x2x1
jax: 0.10.0
libtpu: 0.0.40
codegen_flags: <defaults>
</compile_context>

<pallas_src>
import functools

import jax
import jax.numpy as jnp
from jax.experimental import pallas as pl
from jax.experimental.pallas import tpu as pltpu


def _round_up(x, m):
    return ((x + m - 1) // m) * m


# --------------------------------------------------------------------------
# Kernel (runs once per time chunk; h/c scratch persists across the grid)
# --------------------------------------------------------------------------
def _lstm_kernel(layer_dim, hp, tt, t_total, *refs):
    # refs layout:
    #   x_ref      (Tt, Bp, D+1) bf16   (last column is 1.0 -> layer-0 bias fold)
    #   wih0b      (D+1, 4Hp)  bf16     (W_ih0^T with bias row appended)
    #   whh0       (Hp, 4Hp)   bf16
    #   [wcat_l (2Hp, 4Hp) bf16, b_l (1, 4Hp) f32]  for l = 1..L-1
    #   wfc        (Hp, Op)    bf16
    #   bfc        (1, Op)     f32
    #   out_ref    (Bp, Op)    f32
    #   xg_ref     (Tt*Bp, 4Hp) bf16  scratch   (layer-0 gate slab, this chunk)
    #   h_ref      (Bp, L*Hp)   f32   scratch   (persists across chunks)
    #   c_ref      (Bp, L*Hp)   f32   scratch   (persists across chunks)
    x_ref = refs[0]
    wih0b_ref, whh0_ref = refs[1], refs[2]
    n_lr = 2 * (layer_dim - 1)
    layer_refs = refs[3:3 + n_lr]
    wfc_ref = refs[3 + n_lr]
    bfc_ref = refs[4 + n_lr]
    out_ref = refs[5 + n_lr]
    xg_ref = refs[6 + n_lr]
    h_ref = refs[7 + n_lr]
    c_ref = refs[8 + n_lr]

    _, bp, dp1 = x_ref.shape
    g = 4 * hp
    chunk = pl.program_id(0)
    n_chunks = pl.num_programs(0)

    # ---- init state on the first chunk (scratch persists across the grid) ---
    @pl.when(chunk == 0)
    def _():
        h_ref[...] = jnp.zeros_like(h_ref)
        c_ref[...] = jnp.zeros_like(c_ref)

    # ---- layer-0 input projection (+bias via ones column): one MXU GEMM -----
    # x arrives in bf16; no in-kernel cast.  Bp % 16 == 0 keeps this reshape
    # layout-preserving (merge of the two leading dims).
    x_flat = x_ref[...].reshape(tt * bp, dp1)
    xg = jnp.dot(x_flat, wih0b_ref[...], preferred_element_type=jnp.float32)
    xg_ref[...] = xg.astype(jnp.bfloat16)          # bf16 slab: half VMEM / vld

    # ---- loop-invariant weights / pre-broadcast biases (hoisted once) -------
    upper_wcats = [layer_refs[2 * i] for i in range(layer_dim - 1)]   # refs
    upper_biases = [jnp.broadcast_to(layer_refs[2 * i + 1][...], (bp, g))
                    for i in range(layer_dim - 1)]

    def cell_update(l, gates):
        # gates: (Bp, 4Hp) f32; all slices are 128-lane aligned (hp % 128 == 0).
        i_g = jax.nn.sigmoid(gates[:, 0 * hp:1 * hp])
        f_g = jax.nn.sigmoid(gates[:, 1 * hp:2 * hp])
        g_g = jnp.tanh(gates[:, 2 * hp:3 * hp])
        o_g = jax.nn.sigmoid(gates[:, 3 * hp:4 * hp])
        c_new = f_g * c_ref[:, l * hp:(l + 1) * hp] + i_g * g_g
        h_new = o_g * jnp.tanh(c_new)
        c_ref[:, l * hp:(l + 1) * hp] = c_new
        h_ref[:, l * hp:(l + 1) * hp] = h_new

    def step(t_i, carry):
        # Layer 0: only the recurrent matmul is on the serial path.
        row0 = pl.multiple_of(t_i * bp, bp)
        xg_t = xg_ref[pl.ds(row0, bp), :]                    # (Bp, 4Hp) bf16
        h0 = h_ref[:, 0:hp].astype(jnp.bfloat16)
        gates0 = xg_t + jnp.dot(h0, whh0_ref[...],
                                preferred_element_type=jnp.float32)
        cell_update(0, gates0)
        # Layers >= 1: fused [input ; hidden] matmul.  h_ref stores layers
        # contiguously, so [h_{l-1}, h_l] is one static lane-aligned slice.
        for l in range(1, layer_dim):
            hh = h_ref[:, (l - 1) * hp:(l + 1) * hp].astype(jnp.bfloat16)
            gates = jnp.dot(hh, upper_wcats[l - 1][...],
                            preferred_element_type=jnp.float32)
            gates = gates + upper_biases[l - 1]
            cell_update(l, gates)
        return carry

    if t_total % tt == 0:
        # Static trip count -> partial unroll so step t+1's MXU push can
        # overlap step t's upper-layer EUP/VPU gate work.
        jax.lax.fori_loop(0, tt, step, 0, unroll=(tt if tt <= 8 else 4))
    else:
        # Ragged last chunk: dynamic bound (no unroll).
        n_valid = jnp.minimum(tt, t_total - chunk * tt)
        jax.lax.fori_loop(0, n_valid, step, 0)

    # ---- final fc on the last layer's hidden state (lane-dense output) ------
    @pl.when(chunk == n_chunks - 1)
    def _():
        h_last = h_ref[:, (layer_dim - 1) * hp:layer_dim * hp].astype(jnp.bfloat16)
        out = jnp.dot(h_last, wfc_ref[...], preferred_element_type=jnp.float32)
        out_ref[...] = (out + bfc_ref[...]).astype(out_ref.dtype)


# --------------------------------------------------------------------------
# One-time parameter preparation (transpose / fuse / pad / bf16-cast)
# --------------------------------------------------------------------------
def _pad_gate_rows(w, H, Hp):
    # w: (4H, K) -> (4Hp, K), zero-padding each gate block from H to Hp rows.
    K = w.shape[1]
    w4 = w.reshape(4, H, K)
    w4 = jnp.pad(w4, ((0, 0), (0, Hp - H), (0, 0)))
    return w4.reshape(4 * Hp, K)


def _pad_gate_vec(b, H, Hp):
    b4 = b.reshape(4, H)
    b4 = jnp.pad(b4, ((0, 0), (0, Hp - H)))
    return b4.reshape(4 * Hp)


def prepare_params(params, *, input_dim, hidden_dim, layer_dim, output_dim):
    """Done ONCE (not per forward call). PyTorch-convention param shapes in."""
    H = hidden_dim
    Hp = _round_up(H, 128)
    Op = _round_up(output_dim, 128)

    args = []
    # Layer 0: W_ih^T with the combined bias appended as an extra ROW, so the
    # ones column appended to x folds the bias into the big GEMM.
    wih0 = _pad_gate_rows(params["w_ih_0"], H, Hp).T                  # (D, 4Hp)
    b0 = _pad_gate_vec(params["b_ih_0"] + params["b_hh_0"], H, Hp)    # (4Hp,)
    wih0b = jnp.concatenate([wih0, b0[None, :]], axis=0)              # (D+1, 4Hp)
    args.append(wih0b.astype(jnp.bfloat16))
    whh0 = _pad_gate_rows(params["w_hh_0"], H, Hp)                    # (4Hp, H)
    whh0 = jnp.pad(whh0, ((0, 0), (0, Hp - H)))                       # (4Hp, Hp)
    args.append(whh0.T.astype(jnp.bfloat16))                          # (Hp, 4Hp)

    # Layers >= 1: fuse [W_ih^T ; W_hh^T] into one (2Hp, 4Hp) matrix.
    for l in range(1, layer_dim):
        wih = _pad_gate_rows(params[f"w_ih_{l}"], H, Hp)
        wih = jnp.pad(wih, ((0, 0), (0, Hp - H)))                     # (4Hp, Hp)
        whh = _pad_gate_rows(params[f"w_hh_{l}"], H, Hp)
        whh = jnp.pad(whh, ((0, 0), (0, Hp - H)))                     # (4Hp, Hp)
        wcat = jnp.concatenate([wih.T, whh.T], axis=0)                # (2Hp, 4Hp)
        args.append(wcat.astype(jnp.bfloat16))
        b = _pad_gate_vec(params[f"b_ih_{l}"] + params[f"b_hh_{l}"], H, Hp)
        args.append(b.reshape(1, 4 * Hp).astype(jnp.float32))

    # Final fc: pad input dim to Hp and output dim to a lane-dense Op.
    wfc = jnp.pad(params["w_fc"],
                  ((0, Op - output_dim), (0, Hp - H)))                # (Op, Hp)
    args.append(wfc.T.astype(jnp.bfloat16))                          # (Hp, Op)
    bfc = jnp.pad(params["b_fc"], (0, Op - output_dim))
    args.append(bfc.reshape(1, Op).astype(jnp.float32))

    meta = dict(hidden_p=Hp, out_p=Op)
    return tuple(args), meta


# --------------------------------------------------------------------------
# Forward wrapper
# --------------------------------------------------------------------------
def lstm_forward(x, prepared, *, hidden_dim, layer_dim, output_dim,
                 time_chunk=128):
    flat_w, meta = prepared
    Hp, Op = meta["hidden_p"], meta["out_p"]
    B, T, D = x.shape
    Bp = _round_up(B, 16)           # bf16 sublane pack (16,128)
    Dp1 = D + 1                     # ones column for the layer-0 bias fold

    # Time-chunk size: prefer an exact divisor of T (static inner trip count
    # -> unrollable); otherwise fall back to a ragged last chunk.
    Tt = min(T, time_chunk)
    if T % Tt != 0:
        for cand in range(Tt, 0, -1):
            if T % cand == 0 and cand >= max(8, Tt // 2):
                Tt = cand
                break
    num_chunks = pl.cdiv(T, Tt)

    # x: (B,T,D) f32 -> (T,Bp,D+1) bf16.  Pad + transpose + ones column + bf16
    # cast all fuse into a single wrapper-side copy (half the HBM bytes the
    # kernel has to stream compared to f32).
    x_t = jnp.transpose(x, (1, 0, 2))
    x_t = jnp.pad(x_t, ((0, 0), (0, Bp - B), (0, 0)))
    ones = jnp.ones((T, Bp, 1), x_t.dtype)
    x_p = jnp.concatenate([x_t, ones], axis=-1).astype(jnp.bfloat16)

    kernel = functools.partial(_lstm_kernel, layer_dim, Hp, Tt, T)

    # Weights: full-array blocks with constant index maps -> DMA'd once,
    # resident in VMEM across all time chunks.
    w_specs = [pl.BlockSpec(w.shape, lambda i: (0, 0)) for w in flat_w]
    in_specs = [pl.BlockSpec((Tt, Bp, Dp1), lambda i: (i, 0, 0))] + w_specs
    out_spec = pl.BlockSpec((Bp, Op), lambda i: (0, 0))

    scratch = [
        pltpu.VMEM((Tt * Bp, 4 * Hp), jnp.bfloat16),      # layer-0 gate slab
        pltpu.VMEM((Bp, layer_dim * Hp), jnp.float32),    # h (all layers)
        pltpu.VMEM((Bp, layer_dim * Hp), jnp.float32),    # c (all layers)
    ]

    # VMEM budget: double-buffered x chunk + bf16 gate slab + weights + state.
    est = (2 * Tt * Bp * Dp1 * 2
           + Tt * Bp * 4 * Hp * 2
           + sum(int(w.size) * w.dtype.itemsize for w in flat_w)
           + 2 * Bp * layer_dim * Hp * 4
           + Bp * Op * 4)
    vmem_limit = int(min(max(2 * est, 32 * 1024 * 1024), 64 * 1024 * 1024))

    out_p = pl.pallas_call(
        kernel,
        out_shape=jax.ShapeDtypeStruct((Bp, Op), jnp.float32),
        grid=(num_chunks,),
        in_specs=in_specs,
        out_specs=out_spec,
        scratch_shapes=scratch,
        compiler_params=pltpu.CompilerParams(
            dimension_semantics=("arbitrary",),
            vmem_limit_bytes=vmem_limit),
    )(x_p, *flat_w)

    return out_p[:B, :output_dim]


# --------------------------------------------------------------------------
# Pure-JAX f32 reference (mirrors the PyTorch module exactly)
# --------------------------------------------------------------------------
def _reference_lstm(x, params, *, hidden_dim, layer_dim, output_dim):
    B, T, _ = x.shape
    H = hidden_dim
    h = [jnp.zeros((B, H), jnp.float32) for _ in range(layer_dim)]
    c = [jnp.zeros((B, H), jnp.float32) for _ in range(layer_dim)]
    for t in range(T):
        inp = x[:, t, :]
        for l in range(layer_dim):
            gates = (inp @ params[f"w_ih_{l}"].T + params[f"b_ih_{l}"]
                     + h[l] @ params[f"w_hh_{l}"].T + params[f"b_hh_{l}"])
            i_g = jax.nn.sigmoid(gates[:, 0 * H:1 * H])
            f_g = jax.nn.sigmoid(gates[:, 1 * H:2 * H])
            g_g = jnp.tanh(gates[:, 2 * H:3 * H])
            o_g = jax.nn.sigmoid(gates[:, 3 * H:4 * H])
            c[l] = f_g * c[l] + i_g * g_g
            h[l] = o_g * jnp.tanh(c[l])
            inp = h[l]
    return h[-1] @ params["w_fc"].T + params["b_fc"]


def init_params(key, input_dim, hidden_dim, layer_dim, output_dim):
    params = {}
    k = 1.0 / jnp.sqrt(hidden_dim)
    for l in range(layer_dim):
        d_in = input_dim if l == 0 else hidden_dim
        key, k1, k2, k3, k4 = jax.random.split(key, 5)
        params[f"w_ih_{l}"] = jax.random.uniform(k1, (4 * hidden_dim, d_in),
                                                 jnp.float32, -k, k)
        params[f"w_hh_{l}"] = jax.random.uniform(k2, (4 * hidden_dim, hidden_dim),
                                                 jnp.float32, -k, k)
        params[f"b_ih_{l}"] = jax.random.uniform(k3, (4 * hidden_dim,),
                                                 jnp.float32, -k, k)
        params[f"b_hh_{l}"] = jax.random.uniform(k4, (4 * hidden_dim,),
                                                 jnp.float32, -k, k)
    key, k5, k6 = jax.random.split(key, 3)
    params["w_fc"] = jax.random.uniform(k5, (output_dim, hidden_dim),
                                        jnp.float32, -k, k)
    params["b_fc"] = jax.random.uniform(k6, (output_dim,), jnp.float32, -k, k)
    return params


if __name__ == "__main__":
    input_dim, hidden_dim, layer_dim, output_dim = 16, 32, 2, 8
    batch, seq = 2, 8

    key = jax.random.PRNGKey(0)
    key, kx = jax.random.split(key)
    x = jax.random.normal(kx, (batch, seq, input_dim), jnp.float32)
    params = init_params(key, input_dim, hidden_dim, layer_dim, output_dim)

    # One-time parameter packing (transpose / fuse / pad / bias-fold / bf16).
    prepared = prepare_params(params, input_dim=input_dim, hidden_dim=hidden_dim,
                              layer_dim=layer_dim, output_dim=output_dim)

    out = lstm_forward(x, prepared, hidden_dim=hidden_dim,
                       layer_dim=layer_dim, output_dim=output_dim)
    out = jax.block_until_ready(out)

    ref = _reference_lstm(x, params, hidden_dim=hidden_dim,
                          layer_dim=layer_dim, output_dim=output_dim)
    assert out.shape == (batch, output_dim)
    # Matmul operands (including x) are bf16 with f32 accumulation, so the
    # tolerance is looser than a pure-f32 comparison.
    assert jnp.allclose(out, ref, atol=3e-2, rtol=3e-2), (
        f"max abs err = {jnp.max(jnp.abs(out - ref))}")

    print("KERNEL_OK")
</pallas_src>

<mosaic_0001>
module attributes {stable_mosaic.version = 11 : i64} {
  func.func @_lstm_kernel(%arg0: i32, %arg1: memref<8x16x17xbf16, #tpu.memory_space<vmem>>, %arg2: memref<17x512xbf16, #tpu.memory_space<vmem>>, %arg3: memref<128x512xbf16, #tpu.memory_space<vmem>>, %arg4: memref<256x512xbf16, #tpu.memory_space<vmem>>, %arg5: memref<1x512xf32, #tpu.memory_space<vmem>>, %arg6: memref<128x128xbf16, #tpu.memory_space<vmem>>, %arg7: memref<1x128xf32, #tpu.memory_space<vmem>>, %arg8: memref<16x128xf32, #tpu.memory_space<vmem>>, %arg9: memref<128x512xbf16, #tpu.memory_space<vmem>>, %arg10: memref<16x256xf32, #tpu.memory_space<vmem>>, %arg11: memref<16x256xf32, #tpu.memory_space<vmem>>) attributes {dimension_semantics = [#tpu.dimension_semantics<arbitrary>], iteration_bounds = array<i64: 1>, scalar_prefetch = 0 : i64, scratch_operands = 3 : i64, tpu.core_type = #tpu.core_type<tc>, window_params = [{transform_indices = @transform_0, window_bounds = array<i64: 8, 16, 17>}, {pipeline_mode = #tpu.pipeline_mode<synchronous>, transform_indices = @transform_1, window_bounds = array<i64: 17, 512>}, {pipeline_mode = #tpu.pipeline_mode<synchronous>, transform_indices = @transform_2, window_bounds = array<i64: 128, 512>}, {pipeline_mode = #tpu.pipeline_mode<synchronous>, transform_indices = @transform_3, window_bounds = array<i64: 256, 512>}, {pipeline_mode = #tpu.pipeline_mode<synchronous>, transform_indices = @transform_4, window_bounds = array<i64: 1, 512>}, {pipeline_mode = #tpu.pipeline_mode<synchronous>, transform_indices = @transform_5, window_bounds = array<i64: 128, 128>}, {pipeline_mode = #tpu.pipeline_mode<synchronous>, transform_indices = @transform_6, window_bounds = array<i64: 1, 128>}, {pipeline_mode = #tpu.pipeline_mode<synchronous>, transform_indices = @transform_7, window_bounds = array<i64: 16, 128>}]} {
    %c0_i32 = arith.constant 0 : i32
    %0 = arith.cmpi eq, %arg0, %c0_i32 : i32
    %1 = arith.extui %0 : i1 to i32
    %c0_i32_0 = arith.constant 0 : i32
    %2 = arith.cmpi ne, %1, %c0_i32_0 : i32
    scf.if %2 {
      %cst_250 = arith.constant 0.000000e+00 : f32
      %583 = vector.broadcast %cst_250 : f32 to vector<16x256xf32>
      %c0_251 = arith.constant 0 : index
      %c0_252 = arith.constant 0 : index
      %584 = vector.load %arg10[%c0_251, %c0_252] : memref<16x256xf32, #tpu.memory_space<vmem>>, vector<16x256xf32>
      tpu.vector_store %arg10[%c0_251, %c0_252], %583 {strides = array<i32>} : memref<16x256xf32, #tpu.memory_space<vmem>>, vector<16x256xf32>,
      %cst_253 = arith.constant 0.000000e+00 : f32
      %585 = vector.broadcast %cst_253 : f32 to vector<16x256xf32>
      %c0_254 = arith.constant 0 : index
      %c0_255 = arith.constant 0 : index
      %586 = vector.load %arg11[%c0_254, %c0_255] : memref<16x256xf32, #tpu.memory_space<vmem>>, vector<16x256xf32>
      tpu.vector_store %arg11[%c0_254, %c0_255], %585 {strides = array<i32>} : memref<16x256xf32, #tpu.memory_space<vmem>>, vector<16x256xf32>,
    } else {
    }
    %c0 = arith.constant 0 : index
    %c0_1 = arith.constant 0 : index
    %c0_2 = arith.constant 0 : index
    %3 = vector.load %arg1[%c0, %c0_1, %c0_2] : memref<8x16x17xbf16, #tpu.memory_space<vmem>>, vector<8x16x17xbf16>
    %4 = vector.shape_cast %3 : vector<8x16x17xbf16> to vector<128x17xbf16>
    %c0_3 = arith.constant 0 : index
    %c0_4 = arith.constant 0 : index
    %5 = vector.load %arg2[%c0_3, %c0_4] : memref<17x512xbf16, #tpu.memory_space<vmem>>, vector<17x512xbf16>
    %cst = arith.constant dense<0.000000e+00> : vector<128x512xf32>
    %6 = tpu.matmul %4, %5, %cst {dimension_numbers = #tpu.dot_dimension_numbers<[1], [0], [0], [1], [0, 0, 1, 1], [], []>} : vector<128x17xbf16>, vector<17x512xbf16>, vector<128x512xf32> -> vector<128x512xf32>
    %7 = arith.truncf %6 : vector<128x512xf32> to vector<128x512xbf16>
    %c0_5 = arith.constant 0 : index
    %c0_6 = arith.constant 0 : index
    %8 = vector.load %arg9[%c0_5, %c0_6] : memref<128x512xbf16, #tpu.memory_space<vmem>>, vector<128x512xbf16>
    tpu.vector_store %arg9[%c0_5, %c0_6], %7 {strides = array<i32>} : memref<128x512xbf16, #tpu.memory_space<vmem>>, vector<128x512xbf16>,
    %c0_7 = arith.constant 0 : index
    %c0_8 = arith.constant 0 : index
    %9 = vector.load %arg5[%c0_7, %c0_8] : memref<1x512xf32, #tpu.memory_space<vmem>>, vector<1x512xf32>
    %10 = vector.shape_cast %9 : vector<1x512xf32> to vector<1x512xf32>
    %11 = vector.broadcast %10 : vector<1x512xf32> to vector<16x512xf32>
    %c0_i32_9 = arith.constant 0 : i32
    %c16_i32 = arith.constant 16 : i32
    %12 = arith.muli %c0_i32_9, %c16_i32 : i32
    %13 = tpu.assume_multiple %12, 16 : i32
    %14 = arith.index_cast %13 : i32 to index
    %c0_10 = arith.constant 0 : index
    %15 = vector.load %arg9[%14, %c0_10] : memref<128x512xbf16, #tpu.memory_space<vmem>>, vector<16x512xbf16>
    %c0_11 = arith.constant 0 : index
    %c0_12 = arith.constant 0 : index
    %16 = vector.load %arg10[%c0_11, %c0_12] : memref<16x256xf32, #tpu.memory_space<vmem>>, vector<16x128xf32>
    %17 = arith.truncf %16 : vector<16x128xf32> to vector<16x128xbf16>
    %c0_13 = arith.constant 0 : index
    %c0_14 = arith.constant 0 : index
    %18 = vector.load %arg3[%c0_13, %c0_14] : memref<128x512xbf16, #tpu.memory_space<vmem>>, vector<128x512xbf16>
    %cst_15 = arith.constant dense<0.000000e+00> : vector<16x512xf32>
    %19 = tpu.matmul %17, %18, %cst_15 {dimension_numbers = #tpu.dot_dimension_numbers<[1], [0], [0], [1], [0, 0, 1, 1], [], []>} : vector<16x128xbf16>, vector<128x512xbf16>, vector<16x512xf32> -> vector<16x512xf32>
    %20 = arith.extf %15 : vector<16x512xbf16> to vector<16x512xf32>
    %21 = arith.addf %20, %19 : vector<16x512xf32>
    %22 = vector.extract_strided_slice %21 {offsets = [0, 0], sizes = [16, 128], strides = [1, 1]} : vector<16x512xf32> to vector<16x128xf32>
    %23 = arith.negf %22 : vector<16x128xf32>
    %24 = math.exp %23 : vector<16x128xf32>
    %cst_16 = arith.constant 1.000000e+00 : f32
    %25 = vector.broadcast %cst_16 : f32 to vector<16x128xf32>
    %26 = arith.addf %25, %24 : vector<16x128xf32>
    %27 = arith.divf %25, %26 : vector<16x128xf32>
    %28 = vector.extract_strided_slice %21 {offsets = [0, 128], sizes = [16, 128], strides = [1, 1]} : vector<16x512xf32> to vector<16x128xf32>
    %29 = arith.negf %28 : vector<16x128xf32>
    %30 = math.exp %29 : vector<16x128xf32>
    %cst_17 = arith.constant 1.000000e+00 : f32
    %31 = vector.broadcast %cst_17 : f32 to vector<16x128xf32>
    %32 = arith.addf %31, %30 : vector<16x128xf32>
    %33 = arith.divf %31, %32 : vector<16x128xf32>
    %34 = vector.extract_strided_slice %21 {offsets = [0, 256], sizes = [16, 128], strides = [1, 1]} : vector<16x512xf32> to vector<16x128xf32>
    %35 = math.tanh %34 : vector<16x128xf32>
    %36 = vector.extract_strided_slice %21 {offsets = [0, 384], sizes = [16, 128], strides = [1, 1]} : vector<16x512xf32> to vector<16x128xf32>
    %37 = arith.negf %36 : vector<16x128xf32>
    %38 = math.exp %37 : vector<16x128xf32>
    %cst_18 = arith.constant 1.000000e+00 : f32
    %39 = vector.broadcast %cst_18 : f32 to vector<16x128xf32>
    %40 = arith.addf %39, %38 : vector<16x128xf32>
    %41 = arith.divf %39, %40 : vector<16x128xf32>
    %c0_19 = arith.constant 0 : index
    %c0_20 = arith.constant 0 : index
    %42 = vector.load %arg11[%c0_19, %c0_20] : memref<16x256xf32, #tpu.memory_space<vmem>>, vector<16x128xf32>
    %43 = arith.mulf %33, %42 : vector<16x128xf32>
    %44 = arith.mulf %27, %35 : vector<16x128xf32>
    %45 = arith.addf %43, %44 : vector<16x128xf32>
    %46 = math.tanh %45 : vector<16x128xf32>
    %47 = arith.mulf %41, %46 : vector<16x128xf32>
    %c0_21 = arith.constant 0 : index
    %c0_22 = arith.constant 0 : index
    %48 = vector.load %arg11[%c0_21, %c0_22] : memref<16x256xf32, #tpu.memory_space<vmem>>, vector<16x128xf32>
    tpu.vector_store %arg11[%c0_21, %c0_22], %45 {strides = array<i32>} : memref<16x256xf32, #tpu.memory_space<vmem>>, vector<16x128xf32>,
    %c0_23 = arith.constant 0 : index
    %c0_24 = arith.constant 0 : index
    %49 = vector.load %arg10[%c0_23, %c0_24] : memref<16x256xf32, #tpu.memory_space<vmem>>, vector<16x128xf32>
    tpu.vector_store %arg10[%c0_23, %c0_24], %47 {strides = array<i32>} : memref<16x256xf32, #tpu.memory_space<vmem>>, vector<16x128xf32>,
    %c0_25 = arith.constant 0 : index
    %c0_26 = arith.constant 0 : index
    %50 = vector.load %arg10[%c0_25, %c0_26] : memref<16x256xf32, #tpu.memory_space<vmem>>, vector<16x256xf32>
    %51 = arith.truncf %50 : vector<16x256xf32> to vector<16x256xbf16>
    %c0_27 = arith.constant 0 : index
    %c0_28 = arith.constant 0 : index
    %52 = vector.load %arg4[%c0_27, %c0_28] : memref<256x512xbf16, #tpu.memory_space<vmem>>, vector<256x512xbf16>
    %cst_29 = arith.constant dense<0.000000e+00> : vector<16x512xf32>
    %53 = tpu.matmul %51, %52, %cst_29 {dimension_numbers = #tpu.dot_dimension_numbers<[1], [0], [0], [1], [0, 0, 1, 1], [], []>} : vector<16x256xbf16>, vector<256x512xbf16>, vector<16x512xf32> -> vector<16x512xf32>
    %54 = arith.addf %53, %11 : vector<16x512xf32>
    %55 = vector.extract_strided_slice %54 {offsets = [0, 0], sizes = [16, 128], strides = [1, 1]} : vector<16x512xf32> to vector<16x128xf32>
    %56 = arith.negf %55 : vector<16x128xf32>
    %57 = math.exp %56 : vector<16x128xf32>
    %cst_30 = arith.constant 1.000000e+00 : f32
    %58 = vector.broadcast %cst_30 : f32 to vector<16x128xf32>
    %59 = arith.addf %58, %57 : vector<16x128xf32>
    %60 = arith.divf %58, %59 : vector<16x128xf32>
    %61 = vector.extract_strided_slice %54 {offsets = [0, 128], sizes = [16, 128], strides = [1, 1]} : vector<16x512xf32> to vector<16x128xf32>
    %62 = arith.negf %61 : vector<16x128xf32>
    %63 = math.exp %62 : vector<16x128xf32>
    %cst_31 = arith.constant 1.000000e+00 : f32
    %64 = vector.broadcast %cst_31 : f32 to vector<16x128xf32>
    %65 = arith.addf %64, %63 : vector<16x128xf32>
    %66 = arith.divf %64, %65 : vector<16x128xf32>
    %67 = vector.extract_strided_slice %54 {offsets = [0, 256], sizes = [16, 128], strides = [1, 1]} : vector<16x512xf32> to vector<16x128xf32>
    %68 = math.tanh %67 : vector<16x128xf32>
    %69 = vector.extract_strided_slice %54 {offsets = [0, 384], sizes = [16, 128], strides = [1, 1]} : vector<16x512xf32> to vector<16x128xf32>
    %70 = arith.negf %69 : vector<16x128xf32>
    %71 = math.exp %70 : vector<16x128xf32>
    %cst_32 = arith.constant 1.000000e+00 : f32
    %72 = vector.broadcast %cst_32 : f32 to vector<16x128xf32>
    %73 = arith.addf %72, %71 : vector<16x128xf32>
    %74 = arith.divf %72, %73 : vector<16x128xf32>
    %c0_33 = arith.constant 0 : index
    %c128 = arith.constant 128 : index
    %75 = vector.load %arg11[%c0_33, %c128] : memref<16x256xf32, #tpu.memory_space<vmem>>, vector<16x128xf32>
    %76 = arith.mulf %66, %75 : vector<16x128xf32>
    %77 = arith.mulf %60, %68 : vector<16x128xf32>
    %78 = arith.addf %76, %77 : vector<16x128xf32>
    %79 = math.tanh %78 : vector<16x128xf32>
    %80 = arith.mulf %74, %79 : vector<16x128xf32>
    %c0_34 = arith.constant 0 : index
    %c128_35 = arith.constant 128 : index
    %81 = vector.load %arg11[%c0_34, %c128_35] : memref<16x256xf32, #tpu.memory_space<vmem>>, vector<16x128xf32>
    tpu.vector_store %arg11[%c0_34, %c128_35], %78 {strides = array<i32>} : memref<16x256xf32, #tpu.memory_space<vmem>>, vector<16x128xf32>,
    %c0_36 = arith.constant 0 : index
    %c128_37 = arith.constant 128 : index
    %82 = vector.load %arg10[%c0_36, %c128_37] : memref<16x256xf32, #tpu.memory_space<vmem>>, vector<16x128xf32>
    tpu.vector_store %arg10[%c0_36, %c128_37], %80 {strides = array<i32>} : memref<16x256xf32, #tpu.memory_space<vmem>>, vector<16x128xf32>,
    %c1_i32 = arith.constant 1 : i32
    %c16_i32_38 = arith.constant 16 : i32
    %83 = arith.muli %c1_i32, %c16_i32_38 : i32
    %84 = tpu.assume_multiple %83, 16 : i32
    %85 = arith.index_cast %84 : i32 to index
    %c0_39 = arith.constant 0 : index
    %86 = vector.load %arg9[%85, %c0_39] : memref<128x512xbf16, #tpu.memory_space<vmem>>, vector<16x512xbf16>
    %c0_40 = arith.constant 0 : index
    %c0_41 = arith.constant 0 : index
    %87 = vector.load %arg10[%c0_40, %c0_41] : memref<16x256xf32, #tpu.memory_space<vmem>>, vector<16x128xf32>
    %88 = arith.truncf %87 : vector<16x128xf32> to vector<16x128xbf16>
    %c0_42 = arith.constant 0 : index
    %c0_43 = arith.constant 0 : index
    %89 = vector.load %arg3[%c0_42, %c0_43] : memref<128x512xbf16, #tpu.memory_space<vmem>>, vector<128x512xbf16>
    %cst_44 = arith.constant dense<0.000000e+00> : vector<16x512xf32>
    %90 = tpu.matmul %88, %89, %cst_44 {dimension_numbers = #tpu.dot_dimension_numbers<[1], [0], [0], [1], [0, 0, 1, 1], [], []>} : vector<16x128xbf16>, vector<128x512xbf16>, vector<16x512xf32> -> vector<16x512xf32>
    %91 = arith.extf %86 : vector<16x512xbf16> to vector<16x512xf32>
    %92 = arith.addf %91, %90 : vector<16x512xf32>
    %93 = vector.extract_strided_slice %92 {offsets = [0, 0], sizes = [16, 128], strides = [1, 1]} : vector<16x512xf32> to vector<16x128xf32>
    %94 = arith.negf %93 : vector<16x128xf32>
    %95 = math.exp %94 : vector<16x128xf32>
    %cst_45 = arith.constant 1.000000e+00 : f32
    %96 = vector.broadcast %cst_45 : f32 to vector<16x128xf32>
    %97 = arith.addf %96, %95 : vector<16x128xf32>
    %98 = arith.divf %96, %97 : vector<16x128xf32>
    %99 = vector.extract_strided_slice %92 {offsets = [0, 128], sizes = [16, 128], strides = [1, 1]} : vector<16x512xf32> to vector<16x128xf32>
    %100 = arith.negf %99 : vector<16x128xf32>
    %101 = math.exp %100 : vector<16x128xf32>
    %cst_46 = arith.constant 1.000000e+00 : f32
    %102 = vector.broadcast %cst_46 : f32 to vector<16x128xf32>
    %103 = arith.addf %102, %101 : vector<16x128xf32>
    %104 = arith.divf %102, %103 : vector<16x128xf32>
    %105 = vector.extract_strided_slice %92 {offsets = [0, 256], sizes = [16, 128], strides = [1, 1]} : vector<16x512xf32> to vector<16x128xf32>
    %106 = math.tanh %105 : vector<16x128xf32>
    %107 = vector.extract_strided_slice %92 {offsets = [0, 384], sizes = [16, 128], strides = [1, 1]} : vector<16x512xf32> to vector<16x128xf32>
    %108 = arith.negf %107 : vector<16x128xf32>
    %109 = math.exp %108 : vector<16x128xf32>
    %cst_47 = arith.constant 1.000000e+00 : f32
    %110 = vector.broadcast %cst_47 : f32 to vector<16x128xf32>
    %111 = arith.addf %110, %109 : vector<16x128xf32>
    %112 = arith.divf %110, %111 : vector<16x128xf32>
    %c0_48 = arith.constant 0 : index
    %c0_49 = arith.constant 0 : index
    %113 = vector.load %arg11[%c0_48, %c0_49] : memref<16x256xf32, #tpu.memory_space<vmem>>, vector<16x128xf32>
    %114 = arith.mulf %104, %113 : vector<16x128xf32>
    %115 = arith.mulf %98, %106 : vector<16x128xf32>
    %116 = arith.addf %114, %115 : vector<16x128xf32>
    %117 = math.tanh %116 : vector<16x128xf32>
    %118 = arith.mulf %112, %117 : vector<16x128xf32>
    %c0_50 = arith.constant 0 : index
    %c0_51 = arith.constant 0 : index
    %119 = vector.load %arg11[%c0_50, %c0_51] : memref<16x256xf32, #tpu.memory_space<vmem>>, vector<16x128xf32>
    tpu.vector_store %arg11[%c0_50, %c0_51], %116 {strides = array<i32>} : memref<16x256xf32, #tpu.memory_space<vmem>>, vector<16x128xf32>,
    %c0_52 = arith.constant 0 : index
    %c0_53 = arith.constant 0 : index
    %120 = vector.load %arg10[%c0_52, %c0_53] : memref<16x256xf32, #tpu.memory_space<vmem>>, vector<16x128xf32>
    tpu.vector_store %arg10[%c0_52, %c0_53], %118 {strides = array<i32>} : memref<16x256xf32, #tpu.memory_space<vmem>>, vector<16x128xf32>,
    %c0_54 = arith.constant 0 : index
    %c0_55 = arith.constant 0 : index
    %121 = vector.load %arg10[%c0_54, %c0_55] : memref<16x256xf32, #tpu.memory_space<vmem>>, vector<16x256xf32>
    %122 = arith.truncf %121 : vector<16x256xf32> to vector<16x256xbf16>
    %c0_56 = arith.constant 0 : index
    %c0_57 = arith.constant 0 : index
    %123 = vector.load %arg4[%c0_56, %c0_57] : memref<256x512xbf16, #tpu.memory_space<vmem>>, vector<256x512xbf16>
    %cst_58 = arith.constant dense<0.000000e+00> : vector<16x512xf32>
    %124 = tpu.matmul %122, %123, %cst_58 {dimension_numbers = #tpu.dot_dimension_numbers<[1], [0], [0], [1], [0, 0, 1, 1], [], []>} : vector<16x256xbf16>, vector<256x512xbf16>, vector<16x512xf32> -> vector<16x512xf32>
    %125 = arith.addf %124, %11 : vector<16x512xf32>
    %126 = vector.extract_strided_slice %125 {offsets = [0, 0], sizes = [16, 128], strides = [1, 1]} : vector<16x512xf32> to vector<16x128xf32>
    %127 = arith.negf %126 : vector<16x128xf32>
    %128 = math.exp %127 : vector<16x128xf32>
    %cst_59 = arith.constant 1.000000e+00 : f32
    %129 = vector.broadcast %cst_59 : f32 to vector<16x128xf32>
    %130 = arith.addf %129, %128 : vector<16x128xf32>
    %131 = arith.divf %129, %130 : vector<16x128xf32>
    %132 = vector.extract_strided_slice %125 {offsets = [0, 128], sizes = [16, 128], strides = [1, 1]} : vector<16x512xf32> to vector<16x128xf32>
    %133 = arith.negf %132 : vector<16x128xf32>
    %134 = math.exp %133 : vector<16x128xf32>
    %cst_60 = arith.constant 1.000000e+00 : f32
    %135 = vector.broadcast %cst_60 : f32 to vector<16x128xf32>
    %136 = arith.addf %135, %134 : vector<16x128xf32>
    %137 = arith.divf %135, %136 : vector<16x128xf32>
    %138 = vector.extract_strided_slice %125 {offsets = [0, 256], sizes = [16, 128], strides = [1, 1]} : vector<16x512xf32> to vector<16x128xf32>
    %139 = math.tanh %138 : vector<16x128xf32>
    %140 = vector.extract_strided_slice %125 {offsets = [0, 384], sizes = [16, 128], strides = [1, 1]} : vector<16x512xf32> to vector<16x128xf32>
    %141 = arith.negf %140 : vector<16x128xf32>
    %142 = math.exp %141 : vector<16x128xf32>
    %cst_61 = arith.constant 1.000000e+00 : f32
    %143 = vector.broadcast %cst_61 : f32 to vector<16x128xf32>
    %144 = arith.addf %143, %142 : vector<16x128xf32>
    %145 = arith.divf %143, %144 : vector<16x128xf32>
    %c0_62 = arith.constant 0 : index
    %c128_63 = arith.constant 128 : index
    %146 = vector.load %arg11[%c0_62, %c128_63] : memref<16x256xf32, #tpu.memory_space<vmem>>, vector<16x128xf32>
    %147 = arith.mulf %137, %146 : vector<16x128xf32>
    %148 = arith.mulf %131, %139 : vector<16x128xf32>
    %149 = arith.addf %147, %148 : vector<16x128xf32>
    %150 = math.tanh %149 : vector<16x128xf32>
    %151 = arith.mulf %145, %150 : vector<16x128xf32>
    %c0_64 = arith.constant 0 : index
    %c128_65 = arith.constant 128 : index
    %152 = vector.load %arg11[%c0_64, %c128_65] : memref<16x256xf32, #tpu.memory_space<vmem>>, vector<16x128xf32>
    tpu.vector_store %arg11[%c0_64, %c128_65], %149 {strides = array<i32>} : memref<16x256xf32, #tpu.memory_space<vmem>>, vector<16x128xf32>,
    %c0_66 = arith.constant 0 : index
    %c128_67 = arith.constant 128 : index
    %153 = vector.load %arg10[%c0_66, %c128_67] : memref<16x256xf32, #tpu.memory_space<vmem>>, vector<16x128xf32>
    tpu.vector_store %arg10[%c0_66, %c128_67], %151 {strides = array<i32>} : memref<16x256xf32, #tpu.memory_space<vmem>>, vector<16x128xf32>,
    %c2_i32 = arith.constant 2 : i32
    %c16_i32_68 = arith.constant 16 : i32
    %154 = arith.muli %c2_i32, %c16_i32_68 : i32
    %155 = tpu.assume_multiple %154, 16 : i32
    %156 = arith.index_cast %155 : i32 to index
    %c0_69 = arith.constant 0 : index
    %157 = vector.load %arg9[%156, %c0_69] : memref<128x512xbf16, #tpu.memory_space<vmem>>, vector<16x512xbf16>
    %c0_70 = arith.constant 0 : index
    %c0_71 = arith.constant 0 : index
    %158 = vector.load %arg10[%c0_70, %c0_71] : memref<16x256xf32, #tpu.memory_space<vmem>>, vector<16x128xf32>
    %159 = arith.truncf %158 : vector<16x128xf32> to vector<16x128xbf16>
    %c0_72 = arith.constant 0 : index
    %c0_73 = arith.constant 0 : index
    %160 = vector.load %arg3[%c0_72, %c0_73] : memref<128x512xbf16, #tpu.memory_space<vmem>>, vector<128x512xbf16>
    %cst_74 = arith.constant dense<0.000000e+00> : vector<16x512xf32>
    %161 = tpu.matmul %159, %160, %cst_74 {dimension_numbers = #tpu.dot_dimension_numbers<[1], [0], [0], [1], [0, 0, 1, 1], [], []>} : vector<16x128xbf16>, vector<128x512xbf16>, vector<16x512xf32> -> vector<16x512xf32>
    %162 = arith.extf %157 : vector<16x512xbf16> to vector<16x512xf32>
    %163 = arith.addf %162, %161 : vector<16x512xf32>
    %164 = vector.extract_strided_slice %163 {offsets = [0, 0], sizes = [16, 128], strides = [1, 1]} : vector<16x512xf32> to vector<16x128xf32>
    %165 = arith.negf %164 : vector<16x128xf32>
    %166 = math.exp %165 : vector<16x128xf32>
    %cst_75 = arith.constant 1.000000e+00 : f32
    %167 = vector.broadcast %cst_75 : f32 to vector<16x128xf32>
    %168 = arith.addf %167, %166 : vector<16x128xf32>
    %169 = arith.divf %167, %168 : vector<16x128xf32>
    %170 = vector.extract_strided_slice %163 {offsets = [0, 128], sizes = [16, 128], strides = [1, 1]} : vector<16x512xf32> to vector<16x128xf32>
    %171 = arith.negf %170 : vector<16x128xf32>
    %172 = math.exp %171 : vector<16x128xf32>
    %cst_76 = arith.constant 1.000000e+00 : f32
    %173 = vector.broadcast %cst_76 : f32 to vector<16x128xf32>
    %174 = arith.addf %173, %172 : vector<16x128xf32>
    %175 = arith.divf %173, %174 : vector<16x128xf32>
    %176 = vector.extract_strided_slice %163 {offsets = [0, 256], sizes = [16, 128], strides = [1, 1]} : vector<16x512xf32> to vector<16x128xf32>
    %177 = math.tanh %176 : vector<16x128xf32>
    %178 = vector.extract_strided_slice %163 {offsets = [0, 384], sizes = [16, 128], strides = [1, 1]} : vector<16x512xf32> to vector<16x128xf32>
    %179 = arith.negf %178 : vector<16x128xf32>
    %180 = math.exp %179 : vector<16x128xf32>
    %cst_77 = arith.constant 1.000000e+00 : f32
    %181 = vector.broadcast %cst_77 : f32 to vector<16x128xf32>
    %182 = arith.addf %181, %180 : vector<16x128xf32>
    %183 = arith.divf %181, %182 : vector<16x128xf32>
    %c0_78 = arith.constant 0 : index
    %c0_79 = arith.constant 0 : index
    %184 = vector.load %arg11[%c0_78, %c0_79] : memref<16x256xf32, #tpu.memory_space<vmem>>, vector<16x128xf32>
    %185 = arith.mulf %175, %184 : vector<16x128xf32>
    %186 = arith.mulf %169, %177 : vector<16x128xf32>
    %187 = arith.addf %185, %186 : vector<16x128xf32>
    %188 = math.tanh %187 : vector<16x128xf32>
    %189 = arith.mulf %183, %188 : vector<16x128xf32>
    %c0_80 = arith.constant 0 : index
    %c0_81 = arith.constant 0 : index
    %190 = vector.load %arg11[%c0_80, %c0_81] : memref<16x256xf32, #tpu.memory_space<vmem>>, vector<16x128xf32>
    tpu.vector_store %arg11[%c0_80, %c0_81], %187 {strides = array<i32>} : memref<16x256xf32, #tpu.memory_space<vmem>>, vector<16x128xf32>,
    %c0_82 = arith.constant 0 : index
    %c0_83 = arith.constant 0 : index
    %191 = vector.load %arg10[%c0_82, %c0_83] : memref<16x256xf32, #tpu.memory_space<vmem>>, vector<16x128xf32>
    tpu.vector_store %arg10[%c0_82, %c0_83], %189 {strides = array<i32>} : memref<16x256xf32, #tpu.memory_space<vmem>>, vector<16x128xf32>,
    %c0_84 = arith.constant 0 : index
    %c0_85 = arith.constant 0 : index
    %192 = vector.load %arg10[%c0_84, %c0_85] : memref<16x256xf32, #tpu.memory_space<vmem>>, vector<16x256xf32>
    %193 = arith.truncf %192 : vector<16x256xf32> to vector<16x256xbf16>
    %c0_86 = arith.constant 0 : index
    %c0_87 = arith.constant 0 : index
    %194 = vector.load %arg4[%c0_86, %c0_87] : memref<256x512xbf16, #tpu.memory_space<vmem>>, vector<256x512xbf16>
    %cst_88 = arith.constant dense<0.000000e+00> : vector<16x512xf32>
    %195 = tpu.matmul %193, %194, %cst_88 {dimension_numbers = #tpu.dot_dimension_numbers<[1], [0], [0], [1], [0, 0, 1, 1], [], []>} : vector<16x256xbf16>, vector<256x512xbf16>, vector<16x512xf32> -> vector<16x512xf32>
    %196 = arith.addf %195, %11 : vector<16x512xf32>
    %197 = vector.extract_strided_slice %196 {offsets = [0, 0], sizes = [16, 128], strides = [1, 1]} : vector<16x512xf32> to vector<16x128xf32>
    %198 = arith.negf %197 : vector<16x128xf32>
    %199 = math.exp %198 : vector<16x128xf32>
    %cst_89 = arith.constant 1.000000e+00 : f32
    %200 = vector.broadcast %cst_89 : f32 to vector<16x128xf32>
    %201 = arith.addf %200, %199 : vector<16x128xf32>
    %202 = arith.divf %200, %201 : vector<16x128xf32>
    %203 = vector.extract_strided_slice %196 {offsets = [0, 128], sizes = [16, 128], strides = [1, 1]} : vector<16x512xf32> to vector<16x128xf32>
    %204 = arith.negf %203 : vector<16x128xf32>
    %205 = math.exp %204 : vector<16x128xf32>
    %cst_90 = arith.constant 1.000000e+00 : f32
    %206 = vector.broadcast %cst_90 : f32 to vector<16x128xf32>
    %207 = arith.addf %206, %205 : vector<16x128xf32>
    %208 = arith.divf %206, %207 : vector<16x128xf32>
    %209 = vector.extract_strided_slice %196 {offsets = [0, 256], sizes = [16, 128], strides = [1, 1]} : vector<16x512xf32> to vector<16x128xf32>
    %210 = math.tanh %209 : vector<16x128xf32>
    %211 = vector.extract_strided_slice %196 {offsets = [0, 384], sizes = [16, 128], strides = [1, 1]} : vector<16x512xf32> to vector<16x128xf32>
    %212 = arith.negf %211 : vector<16x128xf32>
    %213 = math.exp %212 : vector<16x128xf32>
    %cst_91 = arith.constant 1.000000e+00 : f32
    %214 = vector.broadcast %cst_91 : f32 to vector<16x128xf32>
    %215 = arith.addf %214, %213 : vector<16x128xf32>
    %216 = arith.divf %214, %215 : vector<16x128xf32>
    %c0_92 = arith.constant 0 : index
    %c128_93 = arith.constant 128 : index
    %217 = vector.load %arg11[%c0_92, %c128_93] : memref<16x256xf32, #tpu.memory_space<vmem>>, vector<16x128xf32>
    %218 = arith.mulf %208, %217 : vector<16x128xf32>
    %219 = arith.mulf %202, %210 : vector<16x128xf32>
    %220 = arith.addf %218, %219 : vector<16x128xf32>
    %221 = math.tanh %220 : vector<16x128xf32>
    %222 = arith.mulf %216, %221 : vector<16x128xf32>
    %c0_94 = arith.constant 0 : index
    %c128_95 = arith.constant 128 : index
    %223 = vector.load %arg11[%c0_94, %c128_95] : memref<16x256xf32, #tpu.memory_space<vmem>>, vector<16x128xf32>
    tpu.vector_store %arg11[%c0_94, %c128_95], %220 {strides = array<i32>} : memref<16x256xf32, #tpu.memory_space<vmem>>, vector<16x128xf32>,
    %c0_96 = arith.constant 0 : index
    %c128_97 = arith.constant 128 : index
    %224 = vector.load %arg10[%c0_96, %c128_97] : memref<16x256xf32, #tpu.memory_space<vmem>>, vector<16x128xf32>
    tpu.vector_store %arg10[%c0_96, %c128_97], %222 {strides = array<i32>} : memref<16x256xf32, #tpu.memory_space<vmem>>, vector<16x128xf32>,
    %c3_i32 = arith.constant 3 : i32
    %c16_i32_98 = arith.constant 16 : i32
    %225 = arith.muli %c3_i32, %c16_i32_98 : i32
    %226 = tpu.assume_multiple %225, 16 : i32
    %227 = arith.index_cast %226 : i32 to index
    %c0_99 = arith.constant 0 : index
    %228 = vector.load %arg9[%227, %c0_99] : memref<128x512xbf16, #tpu.memory_space<vmem>>, vector<16x512xbf16>
    %c0_100 = arith.constant 0 : index
    %c0_101 = arith.constant 0 : index
    %229 = vector.load %arg10[%c0_100, %c0_101] : memref<16x256xf32, #tpu.memory_space<vmem>>, vector<16x128xf32>
    %230 = arith.truncf %229 : vector<16x128xf32> to vector<16x128xbf16>
    %c0_102 = arith.constant 0 : index
    %c0_103 = arith.constant 0 : index
    %231 = vector.load %arg3[%c0_102, %c0_103] : memref<128x512xbf16, #tpu.memory_space<vmem>>, vector<128x512xbf16>
    %cst_104 = arith.constant dense<0.000000e+00> : vector<16x512xf32>
    %232 = tpu.matmul %230, %231, %cst_104 {dimension_numbers = #tpu.dot_dimension_numbers<[1], [0], [0], [1], [0, 0, 1, 1], [], []>} : vector<16x128xbf16>, vector<128x512xbf16>, vector<16x512xf32> -> vector<16x512xf32>
    %233 = arith.extf %228 : vector<16x512xbf16> to vector<16x512xf32>
    %234 = arith.addf %233, %232 : vector<16x512xf32>
    %235 = vector.extract_strided_slice %234 {offsets = [0, 0], sizes = [16, 128], strides = [1, 1]} : vector<16x512xf32> to vector<16x128xf32>
    %236 = arith.negf %235 : vector<16x128xf32>
    %237 = math.exp %236 : vector<16x128xf32>
    %cst_105 = arith.constant 1.000000e+00 : f32
    %238 = vector.broadcast %cst_105 : f32 to vector<16x128xf32>
    %239 = arith.addf %238, %237 : vector<16x128xf32>
    %240 = arith.divf %238, %239 : vector<16x128xf32>
    %241 = vector.extract_strided_slice %234 {offsets = [0, 128], sizes = [16, 128], strides = [1, 1]} : vector<16x512xf32> to vector<16x128xf32>
    %242 = arith.negf %241 : vector<16x128xf32>
    %243 = math.exp %242 : vector<16x128xf32>
    %cst_106 = arith.constant 1.000000e+00 : f32
    %244 = vector.broadcast %cst_106 : f32 to vector<16x128xf32>
    %245 = arith.addf %244, %243 : vector<16x128xf32>
    %246 = arith.divf %244, %245 : vector<16x128xf32>
    %247 = vector.extract_strided_slice %234 {offsets = [0, 256], sizes = [16, 128], strides = [1, 1]} : vector<16x512xf32> to vector<16x128xf32>
    %248 = math.tanh %247 : vector<16x128xf32>
    %249 = vector.extract_strided_slice %234 {offsets = [0, 384], sizes = [16, 128], strides = [1, 1]} : vector<16x512xf32> to vector<16x128xf32>
    %250 = arith.negf %249 : vector<16x128xf32>
    %251 = math.exp %250 : vector<16x128xf32>
    %cst_107 = arith.constant 1.000000e+00 : f32
    %252 = vector.broadcast %cst_107 : f32 to vector<16x128xf32>
    %253 = arith.addf %252, %251 : vector<16x128xf32>
    %254 = arith.divf %252, %253 : vector<16x128xf32>
    %c0_108 = arith.constant 0 : index
    %c0_109 = arith.constant 0 : index
    %255 = vector.load %arg11[%c0_108, %c0_109] : memref<16x256xf32, #tpu.memory_space<vmem>>, vector<16x128xf32>
    %256 = arith.mulf %246, %255 : vector<16x128xf32>
    %257 = arith.mulf %240, %248 : vector<16x128xf32>
    %258 = arith.addf %256, %257 : vector<16x128xf32>
    %259 = math.tanh %258 : vector<16x128xf32>
    %260 = arith.mulf %254, %259 : vector<16x128xf32>
    %c0_110 = arith.constant 0 : index
    %c0_111 = arith.constant 0 : index
    %261 = vector.load %arg11[%c0_110, %c0_111] : memref<16x256xf32, #tpu.memory_space<vmem>>, vector<16x128xf32>
    tpu.vector_store %arg11[%c0_110, %c0_111], %258 {strides = array<i32>} : memref<16x256xf32, #tpu.memory_space<vmem>>, vector<16x128xf32>,
    %c0_112 = arith.constant 0 : index
    %c0_113 = arith.constant 0 : index
    %262 = vector.load %arg10[%c0_112, %c0_113] : memref<16x256xf32, #tpu.memory_space<vmem>>, vector<16x128xf32>
    tpu.vector_store %arg10[%c0_112, %c0_113], %260 {strides = array<i32>} : memref<16x256xf32, #tpu.memory_space<vmem>>, vector<16x128xf32>,
    %c0_114 = arith.constant 0 : index
    %c0_115 = arith.constant 0 : index
    %263 = vector.load %arg10[%c0_114, %c0_115] : memref<16x256xf32, #tpu.memory_space<vmem>>, vector<16x256xf32>
    %264 = arith.truncf %263 : vector<16x256xf32> to vector<16x256xbf16>
    %c0_116 = arith.constant 0 : index
    %c0_117 = arith.constant 0 : index
    %265 = vector.load %arg4[%c0_116, %c0_117] : memref<256x512xbf16, #tpu.memory_space<vmem>>, vector<256x512xbf16>
    %cst_118 = arith.constant dense<0.000000e+00> : vector<16x512xf32>
    %266 = tpu.matmul %264, %265, %cst_118 {dimension_numbers = #tpu.dot_dimension_numbers<[1], [0], [0], [1], [0, 0, 1, 1], [], []>} : vector<16x256xbf16>, vector<256x512xbf16>, vector<16x512xf32> -> vector<16x512xf32>
    %267 = arith.addf %266, %11 : vector<16x512xf32>
    %268 = vector.extract_strided_slice %267 {offsets = [0, 0], sizes = [16, 128], strides = [1, 1]} : vector<16x512xf32> to vector<16x128xf32>
    %269 = arith.negf %268 : vector<16x128xf32>
    %270 = math.exp %269 : vector<16x128xf32>
    %cst_119 = arith.constant 1.000000e+00 : f32
    %271 = vector.broadcast %cst_119 : f32 to vector<16x128xf32>
    %272 = arith.addf %271, %270 : vector<16x128xf32>
    %273 = arith.divf %271, %272 : vector<16x128xf32>
    %274 = vector.extract_strided_slice %267 {offsets = [0, 128], sizes = [16, 128], strides = [1, 1]} : vector<16x512xf32> to vector<16x128xf32>
    %275 = arith.negf %274 : vector<16x128xf32>
    %276 = math.exp %275 : vector<16x128xf32>
    %cst_120 = arith.constant 1.000000e+00 : f32
    %277 = vector.broadcast %cst_120 : f32 to vector<16x128xf32>
    %278 = arith.addf %277, %276 : vector<16x128xf32>
    %279 = arith.divf %277, %278 : vector<16x128xf32>
    %280 = vector.extract_strided_slice %267 {offsets = [0, 256], sizes = [16, 128], strides = [1, 1]} : vector<16x512xf32> to vector<16x128xf32>
    %281 = math.tanh %280 : vector<16x128xf32>
    %282 = vector.extract_strided_slice %267 {offsets = [0, 384], sizes = [16, 128], strides = [1, 1]} : vector<16x512xf32> to vector<16x128xf32>
    %283 = arith.negf %282 : vector<16x128xf32>
    %284 = math.exp %283 : vector<16x128xf32>
    %cst_121 = arith.constant 1.000000e+00 : f32
    %285 = vector.broadcast %cst_121 : f32 to vector<16x128xf32>
    %286 = arith.addf %285, %284 : vector<16x128xf32>
    %287 = arith.divf %285, %286 : vector<16x128xf32>
    %c0_122 = arith.constant 0 : index
    %c128_123 = arith.constant 128 : index
    %288 = vector.load %arg11[%c0_122, %c128_123] : memref<16x256xf32, #tpu.memory_space<vmem>>, vector<16x128xf32>
    %289 = arith.mulf %279, %288 : vector<16x128xf32>
    %290 = arith.mulf %273, %281 : vector<16x128xf32>
    %291 = arith.addf %289, %290 : vector<16x128xf32>
    %292 = math.tanh %291 : vector<16x128xf32>
    %293 = arith.mulf %287, %292 : vector<16x128xf32>
    %c0_124 = arith.constant 0 : index
    %c128_125 = arith.constant 128 : index
    %294 = vector.load %arg11[%c0_124, %c128_125] : memref<16x256xf32, #tpu.memory_space<vmem>>, vector<16x128xf32>
    tpu.vector_store %arg11[%c0_124, %c128_125], %291 {strides = array<i32>} : memref<16x256xf32, #tpu.memory_space<vmem>>, vector<16x128xf32>,
    %c0_126 = arith.constant 0 : index
    %c128_127 = arith.constant 128 : index
    %295 = vector.load %arg10[%c0_126, %c128_127] : memref<16x256xf32, #tpu.memory_space<vmem>>, vector<16x128xf32>
    tpu.vector_store %arg10[%c0_126, %c128_127], %293 {strides = array<i32>} : memref<16x256xf32, #tpu.memory_space<vmem>>, vector<16x128xf32>,
    %c4_i32 = arith.constant 4 : i32
    %c16_i32_128 = arith.constant 16 : i32
    %296 = arith.muli %c4_i32, %c16_i32_128 : i32
    %297 = tpu.assume_multiple %296, 16 : i32
    %298 = arith.index_cast %297 : i32 to index
    %c0_129 = arith.constant 0 : index
    %299 = vector.load %arg9[%298, %c0_129] : memref<128x512xbf16, #tpu.memory_space<vmem>>, vector<16x512xbf16>
    %c0_130 = arith.constant 0 : index
    %c0_131 = arith.constant 0 : index
    %300 = vector.load %arg10[%c0_130, %c0_131] : memref<16x256xf32, #tpu.memory_space<vmem>>, vector<16x128xf32>
    %301 = arith.truncf %300 : vector<16x128xf32> to vector<16x128xbf16>
    %c0_132 = arith.constant 0 : index
    %c0_133 = arith.constant 0 : index
    %302 = vector.load %arg3[%c0_132, %c0_133] : memref<128x512xbf16, #tpu.memory_space<vmem>>, vector<128x512xbf16>
    %cst_134 = arith.constant dense<0.000000e+00> : vector<16x512xf32>
    %303 = tpu.matmul %301, %302, %cst_134 {dimension_numbers = #tpu.dot_dimension_numbers<[1], [0], [0], [1], [0, 0, 1, 1], [], []>} : vector<16x128xbf16>, vector<128x512xbf16>, vector<16x512xf32> -> vector<16x512xf32>
    %304 = arith.extf %299 : vector<16x512xbf16> to vector<16x512xf32>
    %305 = arith.addf %304, %303 : vector<16x512xf32>
    %306 = vector.extract_strided_slice %305 {offsets = [0, 0], sizes = [16, 128], strides = [1, 1]} : vector<16x512xf32> to vector<16x128xf32>
    %307 = arith.negf %306 : vector<16x128xf32>
    %308 = math.exp %307 : vector<16x128xf32>
    %cst_135 = arith.constant 1.000000e+00 : f32
    %309 = vector.broadcast %cst_135 : f32 to vector<16x128xf32>
    %310 = arith.addf %309, %308 : vector<16x128xf32>
    %311 = arith.divf %309, %310 : vector<16x128xf32>
    %312 = vector.extract_strided_slice %305 {offsets = [0, 128], sizes = [16, 128], strides = [1, 1]} : vector<16x512xf32> to vector<16x128xf32>
    %313 = arith.negf %312 : vector<16x128xf32>
    %314 = math.exp %313 : vector<16x128xf32>
    %cst_136 = arith.constant 1.000000e+00 : f32
    %315 = vector.broadcast %cst_136 : f32 to vector<16x128xf32>
    %316 = arith.addf %315, %314 : vector<16x128xf32>
    %317 = arith.divf %315, %316 : vector<16x128xf32>
    %318 = vector.extract_strided_slice %305 {offsets = [0, 256], sizes = [16, 128], strides = [1, 1]} : vector<16x512xf32> to vector<16x128xf32>
    %319 = math.tanh %318 : vector<16x128xf32>
    %320 = vector.extract_strided_slice %305 {offsets = [0, 384], sizes = [16, 128], strides = [1, 1]} : vector<16x512xf32> to vector<16x128xf32>
    %321 = arith.negf %320 : vector<16x128xf32>
    %322 = math.exp %321 : vector<16x128xf32>
    %cst_137 = arith.constant 1.000000e+00 : f32
    %323 = vector.broadcast %cst_137 : f32 to vector<16x128xf32>
    %324 = arith.addf %323, %322 : vector<16x128xf32>
    %325 = arith.divf %323, %324 : vector<16x128xf32>
    %c0_138 = arith.constant 0 : index
    %c0_139 = arith.constant 0 : index
    %326 = vector.load %arg11[%c0_138, %c0_139] : memref<16x256xf32, #tpu.memory_space<vmem>>, vector<16x128xf32>
    %327 = arith.mulf %317, %326 : vector<16x128xf32>
    %328 = arith.mulf %311, %319 : vector<16x128xf32>
    %329 = arith.addf %327, %328 : vector<16x128xf32>
    %330 = math.tanh %329 : vector<16x128xf32>
    %331 = arith.mulf %325, %330 : vector<16x128xf32>
    %c0_140 = arith.constant 0 : index
    %c0_141 = arith.constant 0 : index
    %332 = vector.load %arg11[%c0_140, %c0_141] : memref<16x256xf32, #tpu.memory_space<vmem>>, vector<16x128xf32>
    tpu.vector_store %arg11[%c0_140, %c0_141], %329 {strides = array<i32>} : memref<16x256xf32, #tpu.memory_space<vmem>>, vector<16x128xf32>,
    %c0_142 = arith.constant 0 : index
    %c0_143 = arith.constant 0 : index
    %333 = vector.load %arg10[%c0_142, %c0_143] : memref<16x256xf32, #tpu.memory_space<vmem>>, vector<16x128xf32>
    tpu.vector_store %arg10[%c0_142, %c0_143], %331 {strides = array<i32>} : memref<16x256xf32, #tpu.memory_space<vmem>>, vector<16x128xf32>,
    %c0_144 = arith.constant 0 : index
    %c0_145 = arith.constant 0 : index
    %334 = vector.load %arg10[%c0_144, %c0_145] : memref<16x256xf32, #tpu.memory_space<vmem>>, vector<16x256xf32>
    %335 = arith.truncf %334 : vector<16x256xf32> to vector<16x256xbf16>
    %c0_146 = arith.constant 0 : index
    %c0_147 = arith.constant 0 : index
    %336 = vector.load %arg4[%c0_146, %c0_147] : memref<256x512xbf16, #tpu.memory_space<vmem>>, vector<256x512xbf16>
    %cst_148 = arith.constant dense<0.000000e+00> : vector<16x512xf32>
    %337 = tpu.matmul %335, %336, %cst_148 {dimension_numbers = #tpu.dot_dimension_numbers<[1], [0], [0], [1], [0, 0, 1, 1], [], []>} : vector<16x256xbf16>, vector<256x512xbf16>, vector<16x512xf32> -> vector<16x512xf32>
    %338 = arith.addf %337, %11 : vector<16x512xf32>
    %339 = vector.extract_strided_slice %338 {offsets = [0, 0], sizes = [16, 128], strides = [1, 1]} : vector<16x512xf32> to vector<16x128xf32>
    %340 = arith.negf %339 : vector<16x128xf32>
    %341 = math.exp %340 : vector<16x128xf32>
    %cst_149 = arith.constant 1.000000e+00 : f32
    %342 = vector.broadcast %cst_149 : f32 to vector<16x128xf32>
    %343 = arith.addf %342, %341 : vector<16x128xf32>
    %344 = arith.divf %342, %343 : vector<16x128xf32>
    %345 = vector.extract_strided_slice %338 {offsets = [0, 128], sizes = [16, 128], strides = [1, 1]} : vector<16x512xf32> to vector<16x128xf32>
    %346 = arith.negf %345 : vector<16x128xf32>
    %347 = math.exp %346 : vector<16x128xf32>
    %cst_150 = arith.constant 1.000000e+00 : f32
    %348 = vector.broadcast %cst_150 : f32 to vector<16x128xf32>
    %349 = arith.addf %348, %347 : vector<16x128xf32>
    %350 = arith.divf %348, %349 : vector<16x128xf32>
    %351 = vector.extract_strided_slice %338 {offsets = [0, 256], sizes = [16, 128], strides = [1, 1]} : vector<16x512xf32> to vector<16x128xf32>
    %352 = math.tanh %351 : vector<16x128xf32>
    %353 = vector.extract_strided_slice %338 {offsets = [0, 384], sizes = [16, 128], strides = [1, 1]} : vector<16x512xf32> to vector<16x128xf32>
    %354 = arith.negf %353 : vector<16x128xf32>
    %355 = math.exp %354 : vector<16x128xf32>
    %cst_151 = arith.constant 1.000000e+00 : f32
    %356 = vector.broadcast %cst_151 : f32 to vector<16x128xf32>
    %357 = arith.addf %356, %355 : vector<16x128xf32>
    %358 = arith.divf %356, %357 : vector<16x128xf32>
    %c0_152 = arith.constant 0 : index
    %c128_153 = arith.constant 128 : index
    %359 = vector.load %arg11[%c0_152, %c128_153] : memref<16x256xf32, #tpu.memory_space<vmem>>, vector<16x128xf32>
    %360 = arith.mulf %350, %359 : vector<16x128xf32>
    %361 = arith.mulf %344, %352 : vector<16x128xf32>
    %362 = arith.addf %360, %361 : vector<16x128xf32>
    %363 = math.tanh %362 : vector<16x128xf32>
    %364 = arith.mulf %358, %363 : vector<16x128xf32>
    %c0_154 = arith.constant 0 : index
    %c128_155 = arith.constant 128 : index
    %365 = vector.load %arg11[%c0_154, %c128_155] : memref<16x256xf32, #tpu.memory_space<vmem>>, vector<16x128xf32>
    tpu.vector_store %arg11[%c0_154, %c128_155], %362 {strides = array<i32>} : memref<16x256xf32, #tpu.memory_space<vmem>>, vector<16x128xf32>,
    %c0_156 = arith.constant 0 : index
    %c128_157 = arith.constant 128 : index
    %366 = vector.load %arg10[%c0_156, %c128_157] : memref<16x256xf32, #tpu.memory_space<vmem>>, vector<16x128xf32>
    tpu.vector_store %arg10[%c0_156, %c128_157], %364 {strides = array<i32>} : memref<16x256xf32, #tpu.memory_space<vmem>>, vector<16x128xf32>,
    %c5_i32 = arith.constant 5 : i32
    %c16_i32_158 = arith.constant 16 : i32
    %367 = arith.muli %c5_i32, %c16_i32_158 : i32
    %368 = tpu.assume_multiple %367, 16 : i32
    %369 = arith.index_cast %368 : i32 to index
    %c0_159 = arith.constant 0 : index
    %370 = vector.load %arg9[%369, %c0_159] : memref<128x512xbf16, #tpu.memory_space<vmem>>, vector<16x512xbf16>
    %c0_160 = arith.constant 0 : index
    %c0_161 = arith.constant 0 : index
    %371 = vector.load %arg10[%c0_160, %c0_161] : memref<16x256xf32, #tpu.memory_space<vmem>>, vector<16x128xf32>
    %372 = arith.truncf %371 : vector<16x128xf32> to vector<16x128xbf16>
    %c0_162 = arith.constant 0 : index
    %c0_163 = arith.constant 0 : index
    %373 = vector.load %arg3[%c0_162, %c0_163] : memref<128x512xbf16, #tpu.memory_space<vmem>>, vector<128x512xbf16>
    %cst_164 = arith.constant dense<0.000000e+00> : vector<16x512xf32>
    %374 = tpu.matmul %372, %373, %cst_164 {dimension_numbers = #tpu.dot_dimension_numbers<[1], [0], [0], [1], [0, 0, 1, 1], [], []>} : vector<16x128xbf16>, vector<128x512xbf16>, vector<16x512xf32> -> vector<16x512xf32>
    %375 = arith.extf %370 : vector<16x512xbf16> to vector<16x512xf32>
    %376 = arith.addf %375, %374 : vector<16x512xf32>
    %377 = vector.extract_strided_slice %376 {offsets = [0, 0], sizes = [16, 128], strides = [1, 1]} : vector<16x512xf32> to vector<16x128xf32>
    %378 = arith.negf %377 : vector<16x128xf32>
    %379 = math.exp %378 : vector<16x128xf32>
    %cst_165 = arith.constant 1.000000e+00 : f32
    %380 = vector.broadcast %cst_165 : f32 to vector<16x128xf32>
    %381 = arith.addf %380, %379 : vector<16x128xf32>
    %382 = arith.divf %380, %381 : vector<16x128xf32>
    %383 = vector.extract_strided_slice %376 {offsets = [0, 128], sizes = [16, 128], strides = [1, 1]} : vector<16x512xf32> to vector<16x128xf32>
    %384 = arith.negf %383 : vector<16x128xf32>
    %385 = math.exp %384 : vector<16x128xf32>
    %cst_166 = arith.constant 1.000000e+00 : f32
    %386 = vector.broadcast %cst_166 : f32 to vector<16x128xf32>
    %387 = arith.addf %386, %385 : vector<16x128xf32>
    %388 = arith.divf %386, %387 : vector<16x128xf32>
    %389 = vector.extract_strided_slice %376 {offsets = [0, 256], sizes = [16, 128], strides = [1, 1]} : vector<16x512xf32> to vector<16x128xf32>
    %390 = math.tanh %389 : vector<16x128xf32>
    %391 = vector.extract_strided_slice %376 {offsets = [0, 384], sizes = [16, 128], strides = [1, 1]} : vector<16x512xf32> to vector<16x128xf32>
    %392 = arith.negf %391 : vector<16x128xf32>
    %393 = math.exp %392 : vector<16x128xf32>
    %cst_167 = arith.constant 1.000000e+00 : f32
    %394 = vector.broadcast %cst_167 : f32 to vector<16x128xf32>
    %395 = arith.addf %394, %393 : vector<16x128xf32>
    %396 = arith.divf %394, %395 : vector<16x128xf32>
    %c0_168 = arith.constant 0 : index
    %c0_169 = arith.constant 0 : index
    %397 = vector.load %arg11[%c0_168, %c0_169] : memref<16x256xf32, #tpu.memory_space<vmem>>, vector<16x128xf32>
    %398 = arith.mulf %388, %397 : vector<16x128xf32>
    %399 = arith.mulf %382, %390 : vector<16x128xf32>
    %400 = arith.addf %398, %399 : vector<16x128xf32>
    %401 = math.tanh %400 : vector<16x128xf32>
    %402 = arith.mulf %396, %401 : vector<16x128xf32>
    %c0_170 = arith.constant 0 : index
    %c0_171 = arith.constant 0 : index
    %403 = vector.load %arg11[%c0_170, %c0_171] : memref<16x256xf32, #tpu.memory_space<vmem>>, vector<16x128xf32>
    tpu.vector_store %arg11[%c0_170, %c0_171], %400 {strides = array<i32>} : memref<16x256xf32, #tpu.memory_space<vmem>>, vector<16x128xf32>,
    %c0_172 = arith.constant 0 : index
    %c0_173 = arith.constant 0 : index
    %404 = vector.load %arg10[%c0_172, %c0_173] : memref<16x256xf32, #tpu.memory_space<vmem>>, vector<16x128xf32>
    tpu.vector_store %arg10[%c0_172, %c0_173], %402 {strides = array<i32>} : memref<16x256xf32, #tpu.memory_space<vmem>>, vector<16x128xf32>,
    %c0_174 = arith.constant 0 : index
    %c0_175 = arith.constant 0 : index
    %405 = vector.load %arg10[%c0_174, %c0_175] : memref<16x256xf32, #tpu.memory_space<vmem>>, vector<16x256xf32>
    %406 = arith.truncf %405 : vector<16x256xf32> to vector<16x256xbf16>
    %c0_176 = arith.constant 0 : index
    %c0_177 = arith.constant 0 : index
    %407 = vector.load %arg4[%c0_176, %c0_177] : memref<256x512xbf16, #tpu.memory_space<vmem>>, vector<256x512xbf16>
    %cst_178 = arith.constant dense<0.000000e+00> : vector<16x512xf32>
    %408 = tpu.matmul %406, %407, %cst_178 {dimension_numbers = #tpu.dot_dimension_numbers<[1], [0], [0], [1], [0, 0, 1, 1], [], []>} : vector<16x256xbf16>, vector<256x512xbf16>, vector<16x512xf32> -> vector<16x512xf32>
    %409 = arith.addf %408, %11 : vector<16x512xf32>
    %410 = vector.extract_strided_slice %409 {offsets = [0, 0], sizes = [16, 128], strides = [1, 1]} : vector<16x512xf32> to vector<16x128xf32>
    %411 = arith.negf %410 : vector<16x128xf32>
    %412 = math.exp %411 : vector<16x128xf32>
    %cst_179 = arith.constant 1.000000e+00 : f32
    %413 = vector.broadcast %cst_179 : f32 to vector<16x128xf32>
    %414 = arith.addf %413, %412 : vector<16x128xf32>
    %415 = arith.divf %413, %414 : vector<16x128xf32>
    %416 = vector.extract_strided_slice %409 {offsets = [0, 128], sizes = [16, 128], strides = [1, 1]} : vector<16x512xf32> to vector<16x128xf32>
    %417 = arith.negf %416 : vector<16x128xf32>
    %418 = math.exp %417 : vector<16x128xf32>
    %cst_180 = arith.constant 1.000000e+00 : f32
    %419 = vector.broadcast %cst_180 : f32 to vector<16x128xf32>
    %420 = arith.addf %419, %418 : vector<16x128xf32>
    %421 = arith.divf %419, %420 : vector<16x128xf32>
    %422 = vector.extract_strided_slice %409 {offsets = [0, 256], sizes = [16, 128], strides = [1, 1]} : vector<16x512xf32> to vector<16x128xf32>
    %423 = math.tanh %422 : vector<16x128xf32>
    %424 = vector.extract_strided_slice %409 {offsets = [0, 384], sizes = [16, 128], strides = [1, 1]} : vector<16x512xf32> to vector<16x128xf32>
    %425 = arith.negf %424 : vector<16x128xf32>
    %426 = math.exp %425 : vector<16x128xf32>
    %cst_181 = arith.constant 1.000000e+00 : f32
    %427 = vector.broadcast %cst_181 : f32 to vector<16x128xf32>
    %428 = arith.addf %427, %426 : vector<16x128xf32>
    %429 = arith.divf %427, %428 : vector<16x128xf32>
    %c0_182 = arith.constant 0 : index
    %c128_183 = arith.constant 128 : index
    %430 = vector.load %arg11[%c0_182, %c128_183] : memref<16x256xf32, #tpu.memory_space<vmem>>, vector<16x128xf32>
    %431 = arith.mulf %421, %430 : vector<16x128xf32>
    %432 = arith.mulf %415, %423 : vector<16x128xf32>
    %433 = arith.addf %431, %432 : vector<16x128xf32>
    %434 = math.tanh %433 : vector<16x128xf32>
    %435 = arith.mulf %429, %434 : vector<16x128xf32>
    %c0_184 = arith.constant 0 : index
    %c128_185 = arith.constant 128 : index
    %436 = vector.load %arg11[%c0_184, %c128_185] : memref<16x256xf32, #tpu.memory_space<vmem>>, vector<16x128xf32>
    tpu.vector_store %arg11[%c0_184, %c128_185], %433 {strides = array<i32>} : memref<16x256xf32, #tpu.memory_space<vmem>>, vector<16x128xf32>,
    %c0_186 = arith.constant 0 : index
    %c128_187 = arith.constant 128 : index
    %437 = vector.load %arg10[%c0_186, %c128_187] : memref<16x256xf32, #tpu.memory_space<vmem>>, vector<16x128xf32>
    tpu.vector_store %arg10[%c0_186, %c128_187], %435 {strides = array<i32>} : memref<16x256xf32, #tpu.memory_space<vmem>>, vector<16x128xf32>,
    %c6_i32 = arith.constant 6 : i32
    %c16_i32_188 = arith.constant 16 : i32
    %438 = arith.muli %c6_i32, %c16_i32_188 : i32
    %439 = tpu.assume_multiple %438, 16 : i32
    %440 = arith.index_cast %439 : i32 to index
    %c0_189 = arith.constant 0 : index
    %441 = vector.load %arg9[%440, %c0_189] : memref<128x512xbf16, #tpu.memory_space<vmem>>, vector<16x512xbf16>
    %c0_190 = arith.constant 0 : index
    %c0_191 = arith.constant 0 : index
    %442 = vector.load %arg10[%c0_190, %c0_191] : memref<16x256xf32, #tpu.memory_space<vmem>>, vector<16x128xf32>
    %443 = arith.truncf %442 : vector<16x128xf32> to vector<16x128xbf16>
    %c0_192 = arith.constant 0 : index
    %c0_193 = arith.constant 0 : index
    %444 = vector.load %arg3[%c0_192, %c0_193] : memref<128x512xbf16, #tpu.memory_space<vmem>>, vector<128x512xbf16>
    %cst_194 = arith.constant dense<0.000000e+00> : vector<16x512xf32>
    %445 = tpu.matmul %443, %444, %cst_194 {dimension_numbers = #tpu.dot_dimension_numbers<[1], [0], [0], [1], [0, 0, 1, 1], [], []>} : vector<16x128xbf16>, vector<128x512xbf16>, vector<16x512xf32> -> vector<16x512xf32>
    %446 = arith.extf %441 : vector<16x512xbf16> to vector<16x512xf32>
    %447 = arith.addf %446, %445 : vector<16x512xf32>
    %448 = vector.extract_strided_slice %447 {offsets = [0, 0], sizes = [16, 128], strides = [1, 1]} : vector<16x512xf32> to vector<16x128xf32>
    %449 = arith.negf %448 : vector<16x128xf32>
    %450 = math.exp %449 : vector<16x128xf32>
    %cst_195 = arith.constant 1.000000e+00 : f32
    %451 = vector.broadcast %cst_195 : f32 to vector<16x128xf32>
    %452 = arith.addf %451, %450 : vector<16x128xf32>
    %453 = arith.divf %451, %452 : vector<16x128xf32>
    %454 = vector.extract_strided_slice %447 {offsets = [0, 128], sizes = [16, 128], strides = [1, 1]} : vector<16x512xf32> to vector<16x128xf32>
    %455 = arith.negf %454 : vector<16x128xf32>
    %456 = math.exp %455 : vector<16x128xf32>
    %cst_196 = arith.constant 1.000000e+00 : f32
    %457 = vector.broadcast %cst_196 : f32 to vector<16x128xf32>
    %458 = arith.addf %457, %456 : vector<16x128xf32>
    %459 = arith.divf %457, %458 : vector<16x128xf32>
    %460 = vector.extract_strided_slice %447 {offsets = [0, 256], sizes = [16, 128], strides = [1, 1]} : vector<16x512xf32> to vector<16x128xf32>
    %461 = math.tanh %460 : vector<16x128xf32>
    %462 = vector.extract_strided_slice %447 {offsets = [0, 384], sizes = [16, 128], strides = [1, 1]} : vector<16x512xf32> to vector<16x128xf32>
    %463 = arith.negf %462 : vector<16x128xf32>
    %464 = math.exp %463 : vector<16x128xf32>
    %cst_197 = arith.constant 1.000000e+00 : f32
    %465 = vector.broadcast %cst_197 : f32 to vector<16x128xf32>
    %466 = arith.addf %465, %464 : vector<16x128xf32>
    %467 = arith.divf %465, %466 : vector<16x128xf32>
    %c0_198 = arith.constant 0 : index
    %c0_199 = arith.constant 0 : index
    %468 = vector.load %arg11[%c0_198, %c0_199] : memref<16x256xf32, #tpu.memory_space<vmem>>, vector<16x128xf32>
    %469 = arith.mulf %459, %468 : vector<16x128xf32>
    %470 = arith.mulf %453, %461 : vector<16x128xf32>
    %471 = arith.addf %469, %470 : vector<16x128xf32>
    %472 = math.tanh %471 : vector<16x128xf32>
    %473 = arith.mulf %467, %472 : vector<16x128xf32>
    %c0_200 = arith.constant 0 : index
    %c0_201 = arith.constant 0 : index
    %474 = vector.load %arg11[%c0_200, %c0_201] : memref<16x256xf32, #tpu.memory_space<vmem>>, vector<16x128xf32>
    tpu.vector_store %arg11[%c0_200, %c0_201], %471 {strides = array<i32>} : memref<16x256xf32, #tpu.memory_space<vmem>>, vector<16x128xf32>,
    %c0_202 = arith.constant 0 : index
    %c0_203 = arith.constant 0 : index
    %475 = vector.load %arg10[%c0_202, %c0_203] : memref<16x256xf32, #tpu.memory_space<vmem>>, vector<16x128xf32>
    tpu.vector_store %arg10[%c0_202, %c0_203], %473 {strides = array<i32>} : memref<16x256xf32, #tpu.memory_space<vmem>>, vector<16x128xf32>,
    %c0_204 = arith.constant 0 : index
    %c0_205 = arith.constant 0 : index
    %476 = vector.load %arg10[%c0_204, %c0_205] : memref<16x256xf32, #tpu.memory_space<vmem>>, vector<16x256xf32>
    %477 = arith.truncf %476 : vector<16x256xf32> to vector<16x256xbf16>
    %c0_206 = arith.constant 0 : index
    %c0_207 = arith.constant 0 : index
    %478 = vector.load %arg4[%c0_206, %c0_207] : memref<256x512xbf16, #tpu.memory_space<vmem>>, vector<256x512xbf16>
    %cst_208 = arith.constant dense<0.000000e+00> : vector<16x512xf32>
    %479 = tpu.matmul %477, %478, %cst_208 {dimension_numbers = #tpu.dot_dimension_numbers<[1], [0], [0], [1], [0, 0, 1, 1], [], []>} : vector<16x256xbf16>, vector<256x512xbf16>, vector<16x512xf32> -> vector<16x512xf32>
    %480 = arith.addf %479, %11 : vector<16x512xf32>
    %481 = vector.extract_strided_slice %480 {offsets = [0, 0], sizes = [16, 128], strides = [1, 1]} : vector<16x512xf32> to vector<16x128xf32>
    %482 = arith.negf %481 : vector<16x128xf32>
    %483 = math.exp %482 : vector<16x128xf32>
    %cst_209 = arith.constant 1.000000e+00 : f32
    %484 = vector.broadcast %cst_209 : f32 to vector<16x128xf32>
    %485 = arith.addf %484, %483 : vector<16x128xf32>
    %486 = arith.divf %484, %485 : vector<16x128xf32>
    %487 = vector.extract_strided_slice %480 {offsets = [0, 128], sizes = [16, 128], strides = [1, 1]} : vector<16x512xf32> to vector<16x128xf32>
    %488 = arith.negf %487 : vector<16x128xf32>
    %489 = math.exp %488 : vector<16x128xf32>
    %cst_210 = arith.constant 1.000000e+00 : f32
    %490 = vector.broadcast %cst_210 : f32 to vector<16x128xf32>
    %491 = arith.addf %490, %489 : vector<16x128xf32>
    %492 = arith.divf %490, %491 : vector<16x128xf32>
    %493 = vector.extract_strided_slice %480 {offsets = [0, 256], sizes = [16, 128], strides = [1, 1]} : vector<16x512xf32> to vector<16x128xf32>
    %494 = math.tanh %493 : vector<16x128xf32>
    %495 = vector.extract_strided_slice %480 {offsets = [0, 384], sizes = [16, 128], strides = [1, 1]} : vector<16x512xf32> to vector<16x128xf32>
    %496 = arith.negf %495 : vector<16x128xf32>
    %497 = math.exp %496 : vector<16x128xf32>
    %cst_211 = arith.constant 1.000000e+00 : f32
    %498 = vector.broadcast %cst_211 : f32 to vector<16x128xf32>
    %499 = arith.addf %498, %497 : vector<16x128xf32>
    %500 = arith.divf %498, %499 : vector<16x128xf32>
    %c0_212 = arith.constant 0 : index
    %c128_213 = arith.constant 128 : index
    %501 = vector.load %arg11[%c0_212, %c128_213] : memref<16x256xf32, #tpu.memory_space<vmem>>, vector<16x128xf32>
    %502 = arith.mulf %492, %501 : vector<16x128xf32>
    %503 = arith.mulf %486, %494 : vector<16x128xf32>
    %504 = arith.addf %502, %503 : vector<16x128xf32>
    %505 = math.tanh %504 : vector<16x128xf32>
    %506 = arith.mulf %500, %505 : vector<16x128xf32>
    %c0_214 = arith.constant 0 : index
    %c128_215 = arith.constant 128 : index
    %507 = vector.load %arg11[%c0_214, %c128_215] : memref<16x256xf32, #tpu.memory_space<vmem>>, vector<16x128xf32>
    tpu.vector_store %arg11[%c0_214, %c128_215], %504 {strides = array<i32>} : memref<16x256xf32, #tpu.memory_space<vmem>>, vector<16x128xf32>,
    %c0_216 = arith.constant 0 : index
    %c128_217 = arith.constant 128 : index
    %508 = vector.load %arg10[%c0_216, %c128_217] : memref<16x256xf32, #tpu.memory_space<vmem>>, vector<16x128xf32>
    tpu.vector_store %arg10[%c0_216, %c128_217], %506 {strides = array<i32>} : memref<16x256xf32, #tpu.memory_space<vmem>>, vector<16x128xf32>,
    %c7_i32 = arith.constant 7 : i32
    %c16_i32_218 = arith.constant 16 : i32
    %509 = arith.muli %c7_i32, %c16_i32_218 : i32
    %510 = tpu.assume_multiple %509, 16 : i32
    %511 = arith.index_cast %510 : i32 to index
    %c0_219 = arith.constant 0 : index
    %512 = vector.load %arg9[%511, %c0_219] : memref<128x512xbf16, #tpu.memory_space<vmem>>, vector<16x512xbf16>
    %c0_220 = arith.constant 0 : index
    %c0_221 = arith.constant 0 : index
    %513 = vector.load %arg10[%c0_220, %c0_221] : memref<16x256xf32, #tpu.memory_space<vmem>>, vector<16x128xf32>
    %514 = arith.truncf %513 : vector<16x128xf32> to vector<16x128xbf16>
    %c0_222 = arith.constant 0 : index
    %c0_223 = arith.constant 0 : index
    %515 = vector.load %arg3[%c0_222, %c0_223] : memref<128x512xbf16, #tpu.memory_space<vmem>>, vector<128x512xbf16>
    %cst_224 = arith.constant dense<0.000000e+00> : vector<16x512xf32>
    %516 = tpu.matmul %514, %515, %cst_224 {dimension_numbers = #tpu.dot_dimension_numbers<[1], [0], [0], [1], [0, 0, 1, 1], [], []>} : vector<16x128xbf16>, vector<128x512xbf16>, vector<16x512xf32> -> vector<16x512xf32>
    %517 = arith.extf %512 : vector<16x512xbf16> to vector<16x512xf32>
    %518 = arith.addf %517, %516 : vector<16x512xf32>
    %519 = vector.extract_strided_slice %518 {offsets = [0, 0], sizes = [16, 128], strides = [1, 1]} : vector<16x512xf32> to vector<16x128xf32>
    %520 = arith.negf %519 : vector<16x128xf32>
    %521 = math.exp %520 : vector<16x128xf32>
    %cst_225 = arith.constant 1.000000e+00 : f32
    %522 = vector.broadcast %cst_225 : f32 to vector<16x128xf32>
    %523 = arith.addf %522, %521 : vector<16x128xf32>
    %524 = arith.divf %522, %523 : vector<16x128xf32>
    %525 = vector.extract_strided_slice %518 {offsets = [0, 128], sizes = [16, 128], strides = [1, 1]} : vector<16x512xf32> to vector<16x128xf32>
    %526 = arith.negf %525 : vector<16x128xf32>
    %527 = math.exp %526 : vector<16x128xf32>
    %cst_226 = arith.constant 1.000000e+00 : f32
    %528 = vector.broadcast %cst_226 : f32 to vector<16x128xf32>
    %529 = arith.addf %528, %527 : vector<16x128xf32>
    %530 = arith.divf %528, %529 : vector<16x128xf32>
    %531 = vector.extract_strided_slice %518 {offsets = [0, 256], sizes = [16, 128], strides = [1, 1]} : vector<16x512xf32> to vector<16x128xf32>
    %532 = math.tanh %531 : vector<16x128xf32>
    %533 = vector.extract_strided_slice %518 {offsets = [0, 384], sizes = [16, 128], strides = [1, 1]} : vector<16x512xf32> to vector<16x128xf32>
    %534 = arith.negf %533 : vector<16x128xf32>
    %535 = math.exp %534 : vector<16x128xf32>
    %cst_227 = arith.constant 1.000000e+00 : f32
    %536 = vector.broadcast %cst_227 : f32 to vector<16x128xf32>
    %537 = arith.addf %536, %535 : vector<16x128xf32>
    %538 = arith.divf %536, %537 : vector<16x128xf32>
    %c0_228 = arith.constant 0 : index
    %c0_229 = arith.constant 0 : index
    %539 = vector.load %arg11[%c0_228, %c0_229] : memref<16x256xf32, #tpu.memory_space<vmem>>, vector<16x128xf32>
    %540 = arith.mulf %530, %539 : vector<16x128xf32>
    %541 = arith.mulf %524, %532 : vector<16x128xf32>
    %542 = arith.addf %540, %541 : vector<16x128xf32>
    %543 = math.tanh %542 : vector<16x128xf32>
    %544 = arith.mulf %538, %543 : vector<16x128xf32>
    %c0_230 = arith.constant 0 : index
    %c0_231 = arith.constant 0 : index
    %545 = vector.load %arg11[%c0_230, %c0_231] : memref<16x256xf32, #tpu.memory_space<vmem>>, vector<16x128xf32>
    tpu.vector_store %arg11[%c0_230, %c0_231], %542 {strides = array<i32>} : memref<16x256xf32, #tpu.memory_space<vmem>>, vector<16x128xf32>,
    %c0_232 = arith.constant 0 : index
    %c0_233 = arith.constant 0 : index
    %546 = vector.load %arg10[%c0_232, %c0_233] : memref<16x256xf32, #tpu.memory_space<vmem>>, vector<16x128xf32>
    tpu.vector_store %arg10[%c0_232, %c0_233], %544 {strides = array<i32>} : memref<16x256xf32, #tpu.memory_space<vmem>>, vector<16x128xf32>,
    %c0_234 = arith.constant 0 : index
    %c0_235 = arith.constant 0 : index
    %547 = vector.load %arg10[%c0_234, %c0_235] : memref<16x256xf32, #tpu.memory_space<vmem>>, vector<16x256xf32>
    %548 = arith.truncf %547 : vector<16x256xf32> to vector<16x256xbf16>
    %c0_236 = arith.constant 0 : index
    %c0_237 = arith.constant 0 : index
    %549 = vector.load %arg4[%c0_236, %c0_237] : memref<256x512xbf16, #tpu.memory_space<vmem>>, vector<256x512xbf16>
    %cst_238 = arith.constant dense<0.000000e+00> : vector<16x512xf32>
    %550 = tpu.matmul %548, %549, %cst_238 {dimension_numbers = #tpu.dot_dimension_numbers<[1], [0], [0], [1], [0, 0, 1, 1], [], []>} : vector<16x256xbf16>, vector<256x512xbf16>, vector<16x512xf32> -> vector<16x512xf32>
    %551 = arith.addf %550, %11 : vector<16x512xf32>
    %552 = vector.extract_strided_slice %551 {offsets = [0, 0], sizes = [16, 128], strides = [1, 1]} : vector<16x512xf32> to vector<16x128xf32>
    %553 = arith.negf %552 : vector<16x128xf32>
    %554 = math.exp %553 : vector<16x128xf32>
    %cst_239 = arith.constant 1.000000e+00 : f32
    %555 = vector.broadcast %cst_239 : f32 to vector<16x128xf32>
    %556 = arith.addf %555, %554 : vector<16x128xf32>
    %557 = arith.divf %555, %556 : vector<16x128xf32>
    %558 = vector.extract_strided_slice %551 {offsets = [0, 128], sizes = [16, 128], strides = [1, 1]} : vector<16x512xf32> to vector<16x128xf32>
    %559 = arith.negf %558 : vector<16x128xf32>
    %560 = math.exp %559 : vector<16x128xf32>
    %cst_240 = arith.constant 1.000000e+00 : f32
    %561 = vector.broadcast %cst_240 : f32 to vector<16x128xf32>
    %562 = arith.addf %561, %560 : vector<16x128xf32>
    %563 = arith.divf %561, %562 : vector<16x128xf32>
    %564 = vector.extract_strided_slice %551 {offsets = [0, 256], sizes = [16, 128], strides = [1, 1]} : vector<16x512xf32> to vector<16x128xf32>
    %565 = math.tanh %564 : vector<16x128xf32>
    %566 = vector.extract_strided_slice %551 {offsets = [0, 384], sizes = [16, 128], strides = [1, 1]} : vector<16x512xf32> to vector<16x128xf32>
    %567 = arith.negf %566 : vector<16x128xf32>
    %568 = math.exp %567 : vector<16x128xf32>
    %cst_241 = arith.constant 1.000000e+00 : f32
    %569 = vector.broadcast %cst_241 : f32 to vector<16x128xf32>
    %570 = arith.addf %569, %568 : vector<16x128xf32>
    %571 = arith.divf %569, %570 : vector<16x128xf32>
    %c0_242 = arith.constant 0 : index
    %c128_243 = arith.constant 128 : index
    %572 = vector.load %arg11[%c0_242, %c128_243] : memref<16x256xf32, #tpu.memory_space<vmem>>, vector<16x128xf32>
    %573 = arith.mulf %563, %572 : vector<16x128xf32>
    %574 = arith.mulf %557, %565 : vector<16x128xf32>
    %575 = arith.addf %573, %574 : vector<16x128xf32>
    %576 = math.tanh %575 : vector<16x128xf32>
    %577 = arith.mulf %571, %576 : vector<16x128xf32>
    %c0_244 = arith.constant 0 : index
    %c128_245 = arith.constant 128 : index
    %578 = vector.load %arg11[%c0_244, %c128_245] : memref<16x256xf32, #tpu.memory_space<vmem>>, vector<16x128xf32>
    tpu.vector_store %arg11[%c0_244, %c128_245], %575 {strides = array<i32>} : memref<16x256xf32, #tpu.memory_space<vmem>>, vector<16x128xf32>,
    %c0_246 = arith.constant 0 : index
    %c128_247 = arith.constant 128 : index
    %579 = vector.load %arg10[%c0_246, %c128_247] : memref<16x256xf32, #tpu.memory_space<vmem>>, vector<16x128xf32>
    tpu.vector_store %arg10[%c0_246, %c128_247], %577 {strides = array<i32>} : memref<16x256xf32, #tpu.memory_space<vmem>>, vector<16x128xf32>,
    %c8_i32 = arith.constant 8 : i32
    %c0_i32_248 = arith.constant 0 : i32
    %580 = arith.cmpi eq, %arg0, %c0_i32_248 : i32
    %581 = arith.extui %580 : i1 to i32
    %c0_i32_249 = arith.constant 0 : i32
    %582 = arith.cmpi ne, %581, %c0_i32_249 : i32
    scf.if %582 {
      %c0_250 = arith.constant 0 : index
      %c128_251 = arith.constant 128 : index
      %583 = vector.load %arg10[%c0_250, %c128_251] : memref<16x256xf32, #tpu.memory_space<vmem>>, vector<16x128xf32>
      %584 = arith.truncf %583 : vector<16x128xf32> to vector<16x128xbf16>
      %c0_252 = arith.constant 0 : index
      %c0_253 = arith.constant 0 : index
      %585 = vector.load %arg6[%c0_252, %c0_253] : memref<128x128xbf16, #tpu.memory_space<vmem>>, vector<128x128xbf16>
      %cst_254 = arith.constant dense<0.000000e+00> : vector<16x128xf32>
      %586 = tpu.matmul %584, %585, %cst_254 {dimension_numbers = #tpu.dot_dimension_numbers<[1], [0], [0], [1], [0, 0, 1, 1], [], []>} : vector<16x128xbf16>, vector<128x128xbf16>, vector<16x128xf32> -> vector<16x128xf32>
      %c0_255 = arith.constant 0 : index
      %c0_256 = arith.constant 0 : index
      %587 = vector.load %arg7[%c0_255, %c0_256] : memref<1x128xf32, #tpu.memory_space<vmem>>, vector<1x128xf32>
      %588 = vector.broadcast %587 : vector<1x128xf32> to vector<16x128xf32>
      %589 = arith.addf %586, %588 : vector<16x128xf32>
      %c0_257 = arith.constant 0 : index
      %c0_258 = arith.constant 0 : index
      %590 = vector.load %arg8[%c0_257, %c0_258] : memref<16x128xf32, #tpu.memory_space<vmem>>, vector<16x128xf32>
      tpu.vector_store %arg8[%c0_257, %c0_258], %589 {strides = array<i32>} : memref<16x128xf32, #tpu.memory_space<vmem>>, vector<16x128xf32>,
    } else {
    }
    return
  }
  func.func @transform_0(%arg0: i32) -> (i32, i32, i32) {
    %c0_i32 = arith.constant 0 : i32
    %c0_i32_0 = arith.constant 0 : i32
    %c0_i32_1 = arith.constant 0 : i32
    return %arg0, %c0_i32, %c0_i32_0 : i32, i32, i32
  }
  func.func @transform_1(%arg0: i32) -> (i32, i32) {
    %c0_i32 = arith.constant 0 : i32
    %c0_i32_0 = arith.constant 0 : i32
    %c0_i32_1 = arith.constant 0 : i32
    return %c0_i32, %c0_i32_0 : i32, i32
  }
  func.func @transform_2(%arg0: i32) -> (i32, i32) {
    %c0_i32 = arith.constant 0 : i32
    %c0_i32_0 = arith.constant 0 : i32
    %c0_i32_1 = arith.constant 0 : i32
    return %c0_i32, %c0_i32_0 : i32, i32
  }
  func.func @transform_3(%arg0: i32) -> (i32, i32) {
    %c0_i32 = arith.constant 0 : i32
    %c0_i32_0 = arith.constant 0 : i32
    %c0_i32_1 = arith.constant 0 : i32
    return %c0_i32, %c0_i32_0 : i32, i32
  }
  func.func @transform_4(%arg0: i32) -> (i32, i32) {
    %c0_i32 = arith.constant 0 : i32
    %c0_i32_0 = arith.constant 0 : i32
    %c0_i32_1 = arith.constant 0 : i32
    return %c0_i32, %c0_i32_0 : i32, i32
  }
  func.func @transform_5(%arg0: i32) -> (i32, i32) {
    %c0_i32 = arith.constant 0 : i32
    %c0_i32_0 = arith.constant 0 : i32
    %c0_i32_1 = arith.constant 0 : i32
    return %c0_i32, %c0_i32_0 : i32, i32
  }
  func.func @transform_6(%arg0: i32) -> (i32, i32) {
    %c0_i32 = arith.constant 0 : i32
    %c0_i32_0 = arith.constant 0 : i32
    %c0_i32_1 = arith.constant 0 : i32
    return %c0_i32, %c0_i32_0 : i32, i32
  }
  func.func @transform_7(%arg0: i32) -> (i32, i32) {
    %c0_i32 = arith.constant 0 : i32
    %c0_i32_0 = arith.constant 0 : i32
    %c0_i32_1 = arith.constant 0 : i32
    return %c0_i32, %c0_i32_0 : i32, i32
  }
}

</mosaic_0001>

<bundles_post_ra>
// kernel: tpu_custom_call.1
= control target key start
LH: loop header
LB: loop body
LE: loop exit
PB: predicated region body
PF: predicated region fallthrough
CT: control target
= control target key end

     0   :  { %12 = vsyncpa [#allocation6], 0  ;;  %s11992_s0 = inlined_call_operand.hbm [shape: bf16[8,16,17], index: 0, kind: input, shape index: {}]   ;;  %s11993_s1 = inlined_call_operand.hbm [shape: bf16[17,512], index: 1, kind: input, shape index: {}]   ;;  %s11994_s2 = inlined_call_operand.hbm [shape: bf16[128,512], index: 2, kind: input, shape index: {}]   ;;  %s11995_s3 = inlined_call_operand.hbm [shape: bf16[256,512], index: 3, kind: input, shape index: {}]   ;;  %s11996_s4 = inlined_call_operand.vmem [shape: f32[1,512], index: 4, kind: input, shape index: {}]   ;;  %s11997_s5 = inlined_call_operand.hbm [shape: bf16[128,128], index: 5, kind: input, shape index: {}]   ;;  %s11998_s6 = inlined_call_operand.vmem [shape: f32[1,128], index: 6, kind: input, shape index: {}]   ;;  %s11999_s7 = inlined_call_operand.hbm [shape: f32[16,128], index: 7, kind: output, shape index: {}]  }
   0x1   :  { %13 = vsyncpa [#allocation9], 0 }
   0x2   :  { %14 = vsyncpa [#allocation12], 0 }
   0x3   :  { %15 = vsyncpa [#allocation7], 0  ;;  %s10042_s24 = smov [#allocation8]   ;;  %s9902_s28 = scalar_lea.hbm %s11993_s1, 768 }
   0x4   :  { %s33_s25 = sshll.u32 %s10042_s24, 4  ;;  %p9903_p0 = scmp.ne.s32.totalorder %s11993_s1, %s9902_s28  ;;  %s34_s25 = int_to_ptr.vmem [resolvable:$true] %s33_s25 }
   0x5   :  { %p9906_p1 = scmp.lt.u32.totalorder %s9902_s28, %s11993_s1 }
   0x7   :  { %p9908_p2 = pnand %p9906_p1, %p9903_p0 }
   0x9   :  { %9911 = shalt.err (!%p9908_p2)
}
   0xa   :  { %s9912_s10 = scalar_lea.vmem %s34_s25, 768  ;;  %p9917_p4 = scmp.lt.s32.totalorder %s34_s25, %s34_s25 }
   0xb   :  { %p9913_p3 = scmp.ne.s32.totalorder %s34_s25, %s9912_s10  ;;  %p9918_p5 = scmp.lt.s32.totalorder %s9912_s10, %s9912_s10 }
   0xd   :  { %p9919_p6 = por %p9918_p5, %p9917_p4 }
   0xf   :  { %p9920_p7 = pnand %p9919_p6, %p9913_p3 }
  0x11   :  { %9923 = shalt.err (!%p9920_p7)
}
  0x12   :  { %s10043_s11 = smov 256   ;;  %s10044_s12 = smov 16  }
  0x13   :  { %39 = dma.hbm_to_vmem [thread:$0]  %s11993_s1, 768, %s34_s25, [#allocation9], %s10043_s11, %s10043_s11, %s10044_s12  }
  0x14   :  { %s10045_s15 = smov [#allocation11]   ;;  %s10046_s17 = smov [#allocation5]  }
  0x15   :  { %s57_s16 = sshll.u32 %s10045_s15, 4  ;;  %s21_s18 = sshll.u32 %s10046_s17, 4  ;;  %s58_s16 = int_to_ptr.vmem [resolvable:$true] %s57_s16  ;;  %s22_s18 = int_to_ptr.vmem [resolvable:$true] %s21_s18 }
  0x16   :  { %s9924_s21 = scalar_lea.hbm %s11995_s3, 8192 }
  0x17   :  { %p9925_p8 = scmp.ne.s32.totalorder %s11995_s3, %s9924_s21  ;;  %p9928_p9 = scmp.lt.u32.totalorder %s9924_s21, %s11995_s3 }
  0x19   :  { %p9930_p10 = pnand %p9928_p9, %p9925_p8 }
  0x1b   :  { %9933 = shalt.err (!%p9930_p10)
}
  0x1c   :  { %s9934_s1 = scalar_lea.vmem %s58_s16, 8192  ;;  %p9939_p12 = scmp.lt.s32.totalorder %s58_s16, %s58_s16 }
  0x1d   :  { %p9935_p11 = scmp.ne.s32.totalorder %s58_s16, %s9934_s1  ;;  %p9940_p13 = scmp.lt.s32.totalorder %s9934_s1, %s9934_s1 }
  0x1f   :  { %p9941_p0 = por %p9940_p13, %p9939_p12 }
  0x21   :  { %p9942_p1 = pnand %p9941_p0, %p9935_p11 }
  0x23   :  { %9945 = shalt.err (!%p9942_p1)
}
  0x24   :  { %63 = dma.hbm_to_vmem [thread:$0]  %s11995_s3, 8192, %s58_s16, [#allocation12], %s10043_s11, %s10043_s11, %s10044_s12  }
  0x25   :  { %s9946_s30 = scalar_lea.hbm %s11992_s0, 1024 }
  0x26   :  { %p9947_p2 = scmp.ne.s32.totalorder %s11992_s0, %s9946_s30  ;;  %p9950_p3 = scmp.lt.u32.totalorder %s9946_s30, %s11992_s0 }
  0x28   :  { %p9952_p4 = pnand %p9950_p3, %p9947_p2 }
  0x2a   :  { %9955 = shalt.err (!%p9952_p4)
}
  0x2b   :  { %s9956_s14 = scalar_lea.vmem %s22_s18, 1024  ;;  %p9961_p6 = scmp.lt.s32.totalorder %s22_s18, %s22_s18 }
  0x2c   :  { %p9957_p5 = scmp.ne.s32.totalorder %s22_s18, %s9956_s14  ;;  %p9962_p7 = scmp.lt.s32.totalorder %s9956_s14, %s9956_s14 }
  0x2e   :  { %p9963_p8 = por %p9962_p7, %p9961_p6 }
  0x30   :  { %p9964_p9 = pnand %p9963_p8, %p9957_p5 }
  0x32   :  { %9967 = shalt.err (!%p9964_p9)
}
  0x33   :  { %s10047_s3 = smov 64   ;;  %s10048_s15 = smov 4  }
  0x34   :  { %27 = dma.hbm_to_vmem [thread:$0]  %s11992_s0, 1024, %s22_s18, [#allocation6], %s10047_s3, %s10047_s3, %s10048_s15  }
  0x35   :  { %s10049_s19 = smov [#allocation10]   ;;  %s10050_s21 = smov [#allocation13]  }
  0x36   :  { %s45_s20 = sshll.u32 %s10049_s19, 4  ;;  %s71_s22 = sshll.u32 %s10050_s21, 4  ;;  %s46_s20 = int_to_ptr.vmem [resolvable:$true] %s45_s20  ;;  %s72_s22 = int_to_ptr.vmem [resolvable:$true] %s71_s22 }
  0x37   :  { %s9968_s26 = scalar_lea.hbm %s11994_s2, 4096 }
  0x38   :  { %p9969_p10 = scmp.ne.s32.totalorder %s11994_s2, %s9968_s26  ;;  %p9972_p11 = scmp.lt.u32.totalorder %s9968_s26, %s11994_s2 }
  0x3a   :  { %p9974_p12 = pnand %p9972_p11, %p9969_p10 }
  0x3c   :  { %9977 = shalt.err (!%p9974_p12)
}
  0x3d   :  { %s9978_s0 = scalar_lea.vmem %s46_s20, 4096  ;;  %p9983_p0 = scmp.lt.s32.totalorder %s46_s20, %s46_s20 }
  0x3e   :  { %p9979_p13 = scmp.ne.s32.totalorder %s46_s20, %s9978_s0  ;;  %p9984_p1 = scmp.lt.s32.totalorder %s9978_s0, %s9978_s0 }
  0x40   :  { %p9985_p2 = por %p9984_p1, %p9983_p0 }
  0x42   :  { %p9986_p3 = pnand %p9985_p2, %p9979_p13 }
  0x44   :  { %9989 = shalt.err (!%p9986_p3)
}
  0x45   :  { %51 = dma.hbm_to_vmem [thread:$0]  %s11994_s2, 4096, %s46_s20, [#allocation9], %s10043_s11, %s10043_s11, %s10044_s12  }
  0x46   :  { %s9990_s9 = scalar_lea.hbm %s11997_s5, 1024 }
  0x47   :  { %p9991_p4 = scmp.ne.s32.totalorder %s11997_s5, %s9990_s9  ;;  %p9994_p5 = scmp.lt.u32.totalorder %s9990_s9, %s11997_s5 }
  0x49   :  { %p9996_p6 = pnand %p9994_p5, %p9991_p4 }
  0x4b   :  { %9999 = shalt.err (!%p9996_p6)
}
  0x4c   :  { %s10000_s17 = scalar_lea.vmem %s72_s22, 1024  ;;  %p10005_p8 = scmp.lt.s32.totalorder %s72_s22, %s72_s22 }
  0x4d   :  { %p10001_p7 = scmp.ne.s32.totalorder %s72_s22, %s10000_s17  ;;  %p10006_p9 = scmp.lt.s32.totalorder %s10000_s17, %s10000_s17 }
  0x4f   :  { %p10007_p10 = por %p10006_p9, %p10005_p8 }
  0x51   :  { %p10008_p11 = pnand %p10007_p10, %p10001_p7 }
  0x53   :  { %10011 = shalt.err (!%p10008_p11)
}
  0x54   :  { %77 = dma.hbm_to_vmem [thread:$0]  %s11997_s5, 1024, %s72_s22, [#allocation12], %s10047_s3, %s10047_s3, %s10048_s15  }
  0x55   :  { %10034 = dma.done.wait [#allocation6], 1024  }
  0x56   :  { %10035 = vsyncadd [#allocation6], 4294966272 }
  0x57   :  { %10036 = dma.done.wait [#allocation9], 4864  }
  0x58   :  { %10037 = vsyncadd [#allocation9], 4294962432 }
  0x59   :  { %10038 = dma.done.wait [#allocation12], 9216  }
  0x5a   :  { %10039 = vsyncadd [#allocation12], 4294958080  ;;  %v12000_v0 = vmov 0   ;;  %vm225_vm0 = vcmask 1040384   ;;  %v8756_v1 = vld [vmem:[#allocation8 + $0x4] ss:$16 sps:$4 sm:$0xff]  }
  0x5b   :  { %272 = vmatprep.mubr.bf16.mxu0 %v12000_v0  ;;  %332 = vmatprep.mubr.bf16.mxu1 %v12000_v0  ;;  %v227_v2 = vsel %vm225_vm0, 65535, %v12000_v0  ;;  %v8758_v3 = vld [vmem:[#allocation8] ss:$16 sps:$4 sm:$0xff]   ;;  %v8765_v10 = vld [vmem:[#allocation8 + $0xc] ss:$16 sps:$4 sm:$0xff]   ;;  %vm200_vm1 = vcmask 138240  }
  0x5c   :  { %v128_v4 = vld [vmem:[#allocation8 + $0x20] sm:$0x11]  ;;  %240 = vmatprep.subr.bf16.mxu0 %v8756_v1  ;;  %8736 = vmatprep.subr.bf16.mxu1 %v8756_v1  ;;  %v10176_v11 = vld [vmem:[#allocation5 + $0x30] sm:$0xff]   ;;  %v8763_v12 = vld [vmem:[#allocation8 + $0x8] ss:$16 sps:$4 sm:$0xff]   ;;  %v10052_v56 = vmov 0.0|0.0  }
  0x5d   :  { %v7815_v5 = vcombine.high %v128_v4, %v128_v4  ;;  %v7814_v6 = vcombine.low %v128_v4, %v128_v4  ;;  %241 = vmatpush1.bf16.msra.mxu0 %v8758_v3  ;;  %8738 = vmatpush1.bf16.msra.mxu1 %v8758_v3  ;;  %v8761_v9 = vld [vmem:[#allocation5] sm:$0xff]   ;;  %v129_v13 = vld [vmem:[#allocation8 + $0x28] sm:$0x11]  ;;  %v10183_v23 = vld [vmem:[#allocation5 + $0x38] sm:$0xff]   ;;  %vm10054_vm2 = vmmov 0   ;;  %s10055_s15 = smov [#allocation14]  }
  0x5e   :  { %v7816_v14 = vcombine.low %v129_v13, %v129_v13  ;;  %v7817_v15 = vcombine.high %v129_v13, %v129_v13  ;;  %v8773_v16 = vld [vmem:[#allocation10 + $0x4] ss:$16 sps:$4 sm:$0xff]   ;;  %v8771_v18 = vld [vmem:[#allocation10] ss:$16 sps:$4 sm:$0xff]   ;;  %v8776_v20 = vld [vmem:[#allocation10 + $0xc] ss:$16 sps:$4 sm:$0xff]  }
  0x5f   :  { %v232_v7 = vand.u32 %v7815_v5, %v227_v2  ;;  %v229_v8 = vand.u32 %v7814_v6, %v227_v2  ;;  %v8779_v21 = vld [vmem:[#allocation10 + $0x24] ss:$16 sps:$4 sm:$0xff]   ;;  %v8766_v22 = vld [vmem:[#allocation5 + $0x8] sm:$0xff]   ;;  %v8777_v24 = vld [vmem:[#allocation10 + $0x20] ss:$16 sps:$4 sm:$0xff]   ;;  %s7781_s19 = sshll.u32 %s10055_s15, 4  ;;  %s7782_s19 = int_to_ptr.vmem [resolvable:$true] %s7781_s19 }
  0x60   :  { %v238_v17 = vand.u32 %v7817_v15, %v227_v2  ;;  %v235_v19 = vand.u32 %v7816_v14, %v227_v2  ;;  %v8783_v25 = vld [vmem:[#allocation10 + $0x44] ss:$16 sps:$4 sm:$0xff]   ;;  %v8781_v26 = vld [vmem:[#allocation10 + $0x40] ss:$16 sps:$4 sm:$0xff]   ;;  %v8774_v29 = vld [vmem:[#allocation10 + $0x8] ss:$16 sps:$4 sm:$0xff]   ;;  %p10017_p13 = scmp.lt.s32.totalorder %s7782_s19, %s7782_s19 }
  0x61   :  { %242 = vmatprep.subr.bf16.mxu0 %v232_v7  ;;  %8737 = vmatprep.subr.bf16.mxu1 %v232_v7  ;;  %v8789_v27 = vld [vmem:[#allocation10 + $0x64] ss:$16 sps:$4 sm:$0xff]   ;;  %v8786_v30 = vld [vmem:[#allocation10 + $0x2c] ss:$16 sps:$4 sm:$0xff]   ;;  %v8787_v31 = vld [vmem:[#allocation10 + $0x60] ss:$16 sps:$4 sm:$0xff]  }
  0x62   :  { %243 = vmatpush1.bf16.msra.mxu0 %v229_v8  ;;  %8739 = vmatpush1.bf16.msra.mxu1 %v229_v8  ;;  %v8770_v28 = vld [vmem:[#allocation5 + $0x10] sm:$0xff]   ;;  %v8784_v33 = vld [vmem:[#allocation10 + $0x28] ss:$16 sps:$4 sm:$0xff]   ;;  %v8796_v34 = vld [vmem:[#allocation10 + $0x4c] ss:$16 sps:$4 sm:$0xff]   ;;  %s10012_s20 = scalar_lea.vmem %s7782_s19, 256 }
  0x63   :  { %353 = vmatprep.subr.bf16.mxu1 %v8765_v10  ;;  %754 = vmatprep.subr.bf16.mxu0 %v8773_v16  ;;  %v8793_v32 = vld [vmem:[#allocation10 + $0x84] ss:$16 sps:$4 sm:$0xff]   ;;  %v8780_v35 = vld [vmem:[#allocation5 + $0x18] sm:$0xff]   ;;  %v8791_v36 = vld [vmem:[#allocation10 + $0x80] ss:$16 sps:$4 sm:$0xff]   ;;  %p10013_p12 = scmp.ne.s32.totalorder %s7782_s19, %s10012_s20  ;;  %p10018_p0 = scmp.lt.s32.totalorder %s10012_s20, %s10012_s20 }
  0x64   :  { %v8794_v37 = vld [vmem:[#allocation10 + $0x48] ss:$16 sps:$4 sm:$0xff]   ;;  %v8797_v38 = vld [vmem:[#allocation10 + $0xa0] ss:$16 sps:$4 sm:$0xff]   ;;  %v8799_v39 = vld [vmem:[#allocation10 + $0xa4] ss:$16 sps:$4 sm:$0xff]  }
  0x65   :  { %7818 = vmatmul.mubr.msk.bf16.vlgmr.msra.gmra.mrb[0].mxu0 %vm200_vm1, %v8761_v9  ;;  %7824 = vmatmul.mubr.msk.bf16.vlgmr.msra.gmra.mrb[0].mxu1 %vm200_vm1, %v10176_v11  ;;  %v8803_v40 = vld [vmem:[#allocation10 + $0xc4] ss:$16 sps:$4 sm:$0xff]   ;;  %v8806_v41 = vld [vmem:[#allocation10 + $0x6c] ss:$16 sps:$4 sm:$0xff]   ;;  %v8804_v42 = vld [vmem:[#allocation10 + $0x68] ss:$16 sps:$4 sm:$0xff]   ;;  %p10019_p1 = por %p10018_p0, %p10017_p13 }
  0x66   :  { %354 = vmatpush1.bf16.msra.mxu1 %v8763_v12  ;;  %282 = vmatprep.mubr.bf16.mxu0 %v12000_v0  ;;  %v8801_v43 = vld [vmem:[#allocation10 + $0xc0] ss:$16 sps:$4 sm:$0xff]   ;;  %v8812_v44 = vld [vmem:[#allocation10 + $0x8c] ss:$16 sps:$4 sm:$0xff]   ;;  %v8809_v46 = vld [vmem:[#allocation10 + $0xe4] ss:$16 sps:$4 sm:$0xff]  }
  0x67   :  { %342 = vmatprep.mubr.bf16.mxu1 %v12000_v0  ;;  %355 = vmatprep.subr.bf16.mxu1 %v238_v17  ;;  %v8790_v45 = vld [vmem:[#allocation5 + $0x20] sm:$0xff]   ;;  %v8810_v47 = vld [vmem:[#allocation10 + $0x88] ss:$16 sps:$4 sm:$0xff]   ;;  %v8815_v49 = vld [vmem:[#allocation10 + $0xac] ss:$16 sps:$4 sm:$0xff]   ;;  %p10020_p2 = pnand %p10019_p1, %p10013_p12 }
  0x68   :  { %755 = vmatpush1.bf16.msra.mxu0 %v8771_v18  ;;  %v8807_v48 = vld [vmem:[#allocation10 + $0xe0] ss:$16 sps:$4 sm:$0xff]   ;;  %v8813_v50 = vld [vmem:[#allocation10 + $0xa8] ss:$16 sps:$4 sm:$0xff]   ;;  %v8818_v51 = vld [vmem:[#allocation10 + $0xcc] ss:$16 sps:$4 sm:$0xff]  }
  0x69   :  { %756 = vmatprep.subr.bf16.mxu0 %v8779_v21  ;;  %v8800_v52 = vld [vmem:[#allocation5 + $0x28] sm:$0xff]   ;;  %v10216_v57 = vld [vmem:[#allocation11 + $0x4] ss:$16 sps:$4 sm:$0xff]   ;;  %v10220_v59 = vld [vmem:[#allocation11] ss:$16 sps:$4 sm:$0xff]  }
  0x6a   :  { %356 = vmatpush1.bf16.msra.mxu1 %v235_v19  ;;  %v8816_v53 = vld [vmem:[#allocation10 + $0xc8] ss:$16 sps:$4 sm:$0xff]   ;;  %v8821_v54 = vld [vmem:[#allocation10 + $0xec] ss:$16 sps:$4 sm:$0xff]   ;;  %v10228_v61 = vld [vmem:[#allocation11 + $0x24] ss:$16 sps:$4 sm:$0xff]  }
  0x6b   :  { %797 = vmatprep.subr.bf16.mxu1 %v8776_v20  ;;  %v8819_v55 = vld [vmem:[#allocation10 + $0xe8] ss:$16 sps:$4 sm:$0xff]   ;;  %v10218_v58 = vld [vmem:[#allocation11 + $0xc] ss:$16 sps:$4 sm:$0xff]   ;;  %v10232_v63 = vld [vmem:[#allocation11 + $0x20] ss:$16 sps:$4 sm:$0xff]  }
  0x6c   :  { %757 = vmatpush1.bf16.msra.mxu0 %v8777_v24  ;;  %v10222_v60 = vld [vmem:[#allocation11 + $0x8] ss:$16 sps:$4 sm:$0xff]   ;;  %v10230_v62 = vld [vmem:[#allocation11 + $0x2c] ss:$16 sps:$4 sm:$0xff]   ;;  %v10240_v2 = vld [vmem:[#allocation11 + $0x44] ss:$16 sps:$4 sm:$0xff]  }
  0x6d   :  { %7819 = vmatmul.mubr.msk.bf16.gmra.mrb[4].mxu0 %vm200_vm1, %v8766_v22  ;;  %7825 = vmatmul.mubr.msk.bf16.gmra.mrb[4].mxu1 %vm200_vm1, %v10183_v23  ;;  %v10234_v1 = vld [vmem:[#allocation11 + $0x28] ss:$16 sps:$4 sm:$0xff]   ;;  %v10242_v3 = vld [vmem:[#allocation11 + $0x4c] ss:$16 sps:$4 sm:$0xff]   ;;  %v10244_v4 = vld [vmem:[#allocation11 + $0x40] ss:$16 sps:$4 sm:$0xff]  }
  0x6e   :  { %292 = vmatprep.mubr.bf16.mxu0 %v12000_v0  ;;  %385 = vmatprep.mubr.bf16.mxu1 %v12000_v0  ;;  %v10246_v5 = vld [vmem:[#allocation11 + $0x48] ss:$16 sps:$4 sm:$0xff]   ;;  %v10252_v6 = vld [vmem:[#allocation11 + $0x64] ss:$16 sps:$4 sm:$0xff]   ;;  %v10254_v7 = vld [vmem:[#allocation11 + $0x6c] ss:$16 sps:$4 sm:$0xff]  }
  0x6f   :  { %758 = vmatprep.subr.bf16.mxu0 %v8783_v25  ;;  %v10256_v8 = vld [vmem:[#allocation11 + $0x60] ss:$16 sps:$4 sm:$0xff]   ;;  %v10264_v10 = vld [vmem:[#allocation11 + $0x84] ss:$16 sps:$4 sm:$0xff]   ;;  %v10270_v13 = vld [vmem:[#allocation11 + $0x88] ss:$16 sps:$4 sm:$0xff]  }
  0x70   :  { %759 = vmatpush1.bf16.msra.mxu0 %v8781_v26  ;;  %v10268_v12 = vld [vmem:[#allocation11 + $0x80] ss:$16 sps:$4 sm:$0xff]   ;;  %v10276_v14 = vld [vmem:[#allocation11 + $0xa4] ss:$16 sps:$4 sm:$0xff]   ;;  %v10278_v15 = vld [vmem:[#allocation11 + $0xac] ss:$16 sps:$4 sm:$0xff]  }
  0x71   :  { %760 = vmatprep.subr.bf16.mxu0 %v8789_v27  ;;  %v10280_v16 = vld [vmem:[#allocation11 + $0xa0] ss:$16 sps:$4 sm:$0xff]   ;;  %v10282_v17 = vld [vmem:[#allocation11 + $0xa8] ss:$16 sps:$4 sm:$0xff]   ;;  %v10288_v18 = vld [vmem:[#allocation11 + $0xc4] ss:$16 sps:$4 sm:$0xff]  }
  0x72   :  { %v10290_v19 = vld [vmem:[#allocation11 + $0xcc] ss:$16 sps:$4 sm:$0xff]   ;;  %v10292_v20 = vld [vmem:[#allocation11 + $0xc0] ss:$16 sps:$4 sm:$0xff]   ;;  %v10294_v21 = vld [vmem:[#allocation11 + $0xc8] ss:$16 sps:$4 sm:$0xff]  }
  0x73   :  { %v10304_v24 = vld [vmem:[#allocation11 + $0xe0] ss:$16 sps:$4 sm:$0xff]   ;;  %v10306_v25 = vld [vmem:[#allocation11 + $0xe8] ss:$16 sps:$4 sm:$0xff]   ;;  %v10312_v26 = vld [vmem:[#allocation11 + $0x104] ss:$16 sps:$4 sm:$0xff]  }
  0x74   :  { %761 = vmatpush1.bf16.msra.mxu0 %v8787_v31  ;;  %v10314_v27 = vld [vmem:[#allocation11 + $0x10c] ss:$16 sps:$4 sm:$0xff]  }
  0x75   :  { %7820 = vmatmul.mubr.msk.bf16.gmra.mrb[8].mxu0 %vm200_vm1, %v8770_v28  ;;  %7826 = vmatmul.mubr.msk.bf16.vlgmr.msra.gmra.mrb[8].mxu1 %vm200_vm1, %v8761_v9  ;;  %v10258_v9 = vld [vmem:[#allocation11 + $0x68] ss:$16 sps:$4 sm:$0xff]   ;;  %v10326_v31 = vld [vmem:[#allocation11 + $0x12c] ss:$16 sps:$4 sm:$0xff]  }
  0x76   :  { %798 = vmatpush1.bf16.msra.mxu1 %v8774_v29  ;;  %302 = vmatprep.mubr.bf16.mxu0 %v12000_v0  ;;  %v10318_v29 = vld [vmem:[#allocation11 + $0x108] ss:$16 sps:$4 sm:$0xff]  }
  0x77   :  { %395 = vmatprep.mubr.bf16.mxu1 %v12000_v0  ;;  %799 = vmatprep.subr.bf16.mxu1 %v8786_v30  ;;  %v10324_v30 = vld [vmem:[#allocation11 + $0x124] ss:$16 sps:$4 sm:$0xff]  }
  0x78   :  { %762 = vmatprep.subr.bf16.mxu0 %v8793_v32  ;;  %v10328_v32 = vld [vmem:[#allocation11 + $0x120] ss:$16 sps:$4 sm:$0xff]  }
  0x79   :  { %763 = vmatpush1.bf16.msra.mxu0 %v8791_v36  ;;  %12267 = vst [vmem:[#allocation19_spill] sm:$0xff] %v10328_v32  ;;  %v10340_v36 = vld [vmem:[#allocation11 + $0x140] ss:$16 sps:$4 sm:$0xff]  }
  0x7a   :  { %800 = vmatpush1.bf16.msra.mxu1 %v8784_v33  ;;  %764 = vmatprep.subr.bf16.mxu0 %v8799_v39  ;;  %v10330_v33 = vld [vmem:[#allocation11 + $0x128] ss:$16 sps:$4 sm:$0xff]   ;;  %12271 = vst [vmem:[#allocation23_spill] sm:$0xff] %v10340_v36  ;;  %v10350_v39 = vld [vmem:[#allocation11 + $0x16c] ss:$16 sps:$4 sm:$0xff]  }
  0x7b   :  { %801 = vmatprep.subr.bf16.mxu1 %v8796_v34  ;;  %12268 = vst [vmem:[#allocation20_spill] sm:$0xff] %v10330_v33  ;;  %v10336_v34 = vld [vmem:[#allocation11 + $0x144] ss:$16 sps:$4 sm:$0xff]   ;;  %12274 = vst [vmem:[#allocation26_spill] sm:$0xff] %v10350_v39 }
  0x7c   :  { %12269 = vst [vmem:[#allocation21_spill] sm:$0xff] %v10336_v34 }
  0x7d   :  { %7821 = vmatmul.mubr.msk.bf16.gmra.mrb[12].mxu0 %vm200_vm1, %v8780_v35  ;;  %7827 = vmatmul.mubr.msk.bf16.gmra.mrb[12].mxu1 %vm200_vm1, %v8766_v22  ;;  %v10300_v22 = vld [vmem:[#allocation11 + $0xe4] ss:$16 sps:$4 sm:$0xff]  }
  0x7e   :  { %312 = vmatprep.mubr.bf16.mxu0 %v12000_v0  ;;  %405 = vmatprep.mubr.bf16.mxu1 %v12000_v0 }
  0x7f   :  { %802 = vmatpush1.bf16.msra.mxu1 %v8794_v37  ;;  %765 = vmatpush1.bf16.msra.mxu0 %v8797_v38  ;;  %v10342_v37 = vld [vmem:[#allocation11 + $0x148] ss:$16 sps:$4 sm:$0xff]   ;;  %v10348_v38 = vld [vmem:[#allocation11 + $0x164] ss:$16 sps:$4 sm:$0xff]  }
  0x80   :  { %803 = vmatprep.subr.bf16.mxu1 %v8806_v41  ;;  %766 = vmatprep.subr.bf16.mxu0 %v8803_v40  ;;  %12272 = vst [vmem:[#allocation24_spill] sm:$0xff] %v10342_v37  ;;  %12273 = vst [vmem:[#allocation25_spill] sm:$0xff] %v10348_v38  ;;  %v10352_v40 = vld [vmem:[#allocation11 + $0x160] ss:$16 sps:$4 sm:$0xff]   ;;  %v10354_v41 = vld [vmem:[#allocation11 + $0x168] ss:$16 sps:$4 sm:$0xff]  }
  0x81   :  { %12275 = vst [vmem:[#allocation27_spill] sm:$0xff] %v10352_v40  ;;  %12276 = vst [vmem:[#allocation28_spill] sm:$0xff] %v10354_v41 }
  0x83   :  { %804 = vmatpush1.bf16.msra.mxu1 %v8804_v42  ;;  %767 = vmatpush1.bf16.msra.mxu0 %v8801_v43  ;;  %v10360_v42 = vld [vmem:[#allocation11 + $0x184] ss:$16 sps:$4 sm:$0xff]   ;;  %v10362_v43 = vld [vmem:[#allocation11 + $0x18c] ss:$16 sps:$4 sm:$0xff]  }
  0x84   :  { %805 = vmatprep.subr.bf16.mxu1 %v8812_v44  ;;  %768 = vmatprep.subr.bf16.mxu0 %v8809_v46  ;;  %12277 = vst [vmem:[#allocation29_spill] sm:$0xff] %v10360_v42  ;;  %12278 = vst [vmem:[#allocation30_spill] sm:$0xff] %v10362_v43  ;;  %v10364_v44 = vld [vmem:[#allocation11 + $0x180] ss:$16 sps:$4 sm:$0xff]  }
  0x85   :  { %7822 = vmatmul.mubr.msk.bf16.gmra.mrb[16].mxu0 %vm200_vm1, %v8790_v45  ;;  %7828 = vmatmul.mubr.msk.bf16.gmra.mrb[16].mxu1 %vm200_vm1, %v8770_v28  ;;  %v10316_v28 = vld [vmem:[#allocation11 + $0x100] ss:$16 sps:$4 sm:$0xff]   ;;  %12279 = vst [vmem:[#allocation31_spill] sm:$0xff] %v10364_v44 }
  0x86   :  { %322 = vmatprep.mubr.bf16.mxu0 %v12000_v0  ;;  %415 = vmatprep.mubr.bf16.mxu1 %v12000_v0  ;;  %v10372_v46 = vld [vmem:[#allocation11 + $0x1a0] ss:$16 sps:$4 sm:$0xff]  }
  0x87   :  { %806 = vmatpush1.bf16.msra.mxu1 %v8810_v47  ;;  %769 = vmatpush1.bf16.msra.mxu0 %v8807_v48  ;;  %12281 = vst [vmem:[#allocation33_spill] sm:$0xff] %v10372_v46  ;;  %v10374_v47 = vld [vmem:[#allocation11 + $0x1a4] ss:$16 sps:$4 sm:$0xff]   ;;  %v10376_v48 = vld [vmem:[#allocation11 + $0x1a8] ss:$16 sps:$4 sm:$0xff]  }
  0x88   :  { %807 = vmatprep.subr.bf16.mxu1 %v8815_v49  ;;  %1300 = vmatprep.subr.bf16.mxu0 %v10216_v57  ;;  %12282 = vst [vmem:[#allocation34_spill] sm:$0xff] %v10374_v47  ;;  %12283 = vst [vmem:[#allocation35_spill] sm:$0xff] %v10376_v48  ;;  %v10378_v49 = vld [vmem:[#allocation11 + $0x1ac] ss:$16 sps:$4 sm:$0xff]  }
  0x89   :  { %12284 = vst [vmem:[#allocation36_spill] sm:$0xff] %v10378_v49 }
  0x8b   :  { %808 = vmatpush1.bf16.msra.mxu1 %v8813_v50  ;;  %v10380_v50 = vld [vmem:[#allocation11 + $0x1c4] ss:$16 sps:$4 sm:$0xff]  }
  0x8c   :  { %809 = vmatprep.subr.bf16.mxu1 %v8818_v51  ;;  %12285 = vst [vmem:[#allocation37_spill] sm:$0xff] %v10380_v50  ;;  %v10383_v51 = vld [vmem:[#allocation11 + $0x1cc] ss:$16 sps:$4 sm:$0xff]  }
  0x8d   :  { %7823 = vmatmul.mubr.msk.bf16.gmra.mrb[20].mxu0 %vm200_vm1, %v8800_v52  ;;  %7829 = vmatmul.mubr.msk.bf16.gmra.mrb[20].mxu1 %vm200_vm1, %v8780_v35  ;;  %v10338_v35 = vld [vmem:[#allocation11 + $0x14c] ss:$16 sps:$4 sm:$0xff]   ;;  %12286 = vst [vmem:[#allocation38_spill] sm:$0xff] %v10383_v51 }
  0x8e   :  { %425 = vmatprep.mubr.bf16.mxu1 %v12000_v0  ;;  %786 = vmatprep.mubr.bf16.mxu0 %v12000_v0  ;;  %12270 = vst [vmem:[#allocation22_spill] sm:$0xff] %v10338_v35 }
  0x8f   :  { %810 = vmatpush1.bf16.msra.mxu1 %v8816_v53  ;;  %v10391_v53 = vld [vmem:[#allocation11 + $0x1c8] ss:$16 sps:$4 sm:$0xff]  }
  0x90   :  { %811 = vmatprep.subr.bf16.mxu1 %v8821_v54  ;;  %12288 = vst [vmem:[#allocation40_spill] sm:$0xff] %v10391_v53  ;;  %v10393_v54 = vld [vmem:[#allocation11 + $0x1e4] ss:$16 sps:$4 sm:$0xff]  }
  0x91   :  { %12289 = vst [vmem:[#allocation41_spill] sm:$0xff] %v10393_v54 }
  0x93   :  { %812 = vmatpush1.bf16.msra.mxu1 %v8819_v55  ;;  %v10396_v55 = vld [vmem:[#allocation11 + $0x1ec] ss:$16 sps:$4 sm:$0xff]  }
  0x94   :  { %1343 = vmatprep.subr.bf16.mxu1 %v10218_v58  ;;  %12290 = vst [vmem:[#allocation42_spill] sm:$0xff] %v10396_v55 }
  0x95   :  { %7830 = vmatmul.mubr.msk.bf16.gmra.mrb[24].mxu1 %vm200_vm1, %v8790_v45  ;;  %787 = vmatmul.mubr.bf16.vlgmr.msra.gmra.mrb[24].mxu0 %v10052_v56  ;;  %v10366_v45 = vld [vmem:[#allocation11 + $0x188] ss:$16 sps:$4 sm:$0xff]  }
  0x96   :  { %435 = vmatprep.mubr.bf16.mxu1 %v12000_v0  ;;  %1332 = vmatprep.mubr.bf16.mxu0 %v10052_v56  ;;  %12280 = vst [vmem:[#allocation32_spill] sm:$0xff] %v10366_v45 }
  0x97   :  { %1301 = vmatpush1.bf16.msra.mxu0 %v10220_v59 }
  0x98   :  { %1302 = vmatprep.subr.bf16.mxu0 %v10228_v61 }
  0x9b   :  { %1303 = vmatpush1.bf16.msra.mxu0 %v10232_v63 }
  0x9c   :  { %1304 = vmatprep.subr.bf16.mxu0 %v10240_v2 }
  0x9d   :  { %7831 = vmatmul.mubr.msk.bf16.gmra.mrb[28].mxu1 %vm200_vm1, %v8800_v52  ;;  %v10387_v52 = vld [vmem:[#allocation11 + $0x1c0] ss:$16 sps:$4 sm:$0xff]  }
  0x9e   :  { %445 = vmatprep.mubr.bf16.mxu1 %v12000_v0  ;;  %12287 = vst [vmem:[#allocation39_spill] sm:$0xff] %v10387_v52 }
  0x9f   :  { %1305 = vmatpush1.bf16.msra.mxu0 %v10244_v4 }
  0xa0   :  { %1306 = vmatprep.subr.bf16.mxu0 %v10252_v6 }
  0xa3   :  { %1307 = vmatpush1.bf16.msra.mxu0 %v10256_v8 }
  0xa4   :  { %1308 = vmatprep.subr.bf16.mxu0 %v10264_v10 }
  0xa5   :  { %7832 = vmatmul.mubr.msk.bf16.gmra.mrb[32].mxu1 %vm200_vm1, %v10176_v11  ;;  %v10266_v11 = vld [vmem:[#allocation11 + $0x8c] ss:$16 sps:$4 sm:$0xff]  }
  0xa6   :  { %455 = vmatprep.mubr.bf16.mxu1 %v12000_v0 }
  0xa7   :  { %1309 = vmatpush1.bf16.msra.mxu0 %v10268_v12 }
  0xa8   :  { %1310 = vmatprep.subr.bf16.mxu0 %v10276_v14 }
  0xab   :  { %1311 = vmatpush1.bf16.msra.mxu0 %v10280_v16 }
  0xac   :  { %1312 = vmatprep.subr.bf16.mxu0 %v10288_v18 }
  0xad   :  { %7833 = vmatmul.mubr.msk.bf16.gmra.mrb[36].mxu1 %vm200_vm1, %v10183_v23  ;;  %v10302_v23 = vld [vmem:[#allocation11 + $0xec] ss:$16 sps:$4 sm:$0xff]  }
  0xae   :  { %829 = vmatprep.mubr.bf16.mxu1 %v12000_v0  ;;  %v10403_v0 = vld [vmem:[#allocation11 + $0x1e8] ss:$16 sps:$4 sm:$0xff]  }
  0xaf   :  { %1313 = vmatpush1.bf16.msra.mxu0 %v10292_v20  ;;  %12292 = vst [vmem:[#allocation44_spill] sm:$0xff] %v10403_v0 }
  0xb0   :  { %1314 = vmatprep.subr.bf16.mxu0 %v10300_v22 }
  0xb3   :  { %1315 = vmatpush1.bf16.msra.mxu0 %v10304_v24 }
  0xb4   :  { %1316 = vmatprep.subr.bf16.mxu0 %v10312_v26 }
  0xb5   :  { %830 = vmatmul.mubr.bf16.vlgmr.msra.gmra.mrb[40].mxu1 %v10052_v56 }
  0xb6   :  { %1375 = vmatprep.mubr.bf16.mxu1 %v10052_v56  ;;  %1344 = vmatpush1.bf16.msra.mxu1 %v10222_v60  ;;  %v10399_v56 = vld [vmem:[#allocation11 + $0x1e0] ss:$16 sps:$4 sm:$0xff]  }
  0xb7   :  { %1345 = vmatprep.subr.bf16.mxu1 %v10230_v62  ;;  %1317 = vmatpush1.bf16.msra.mxu0 %v10316_v28  ;;  %12291 = vst [vmem:[#allocation43_spill] sm:$0xff] %v10399_v56 }
  0xb8   :  { %1318 = vmatprep.subr.bf16.mxu0 %v10324_v30 }
  0xba   :  { %1346 = vmatpush1.bf16.msra.mxu1 %v10234_v1 }
  0xbb   :  { %1347 = vmatprep.subr.bf16.mxu1 %v10242_v3  ;;  %1319 = vmatpush1.bf16.msra.mxu0 %v10328_v32 }
  0xbc   :  { %1320 = vmatprep.subr.bf16.mxu0 %v10336_v34 }
  0xbe   :  { %1348 = vmatpush1.bf16.msra.mxu1 %v10246_v5 }
  0xbf   :  { %1349 = vmatprep.subr.bf16.mxu1 %v10254_v7  ;;  %1321 = vmatpush1.bf16.msra.mxu0 %v10340_v36 }
  0xc0   :  { %1322 = vmatprep.subr.bf16.mxu0 %v10348_v38 }
  0xc2   :  { %1350 = vmatpush1.bf16.msra.mxu1 %v10258_v9 }
  0xc3   :  { %1351 = vmatprep.subr.bf16.mxu1 %v10266_v11  ;;  %1323 = vmatpush1.bf16.msra.mxu0 %v10352_v40 }
  0xc4   :  { %1324 = vmatprep.subr.bf16.mxu0 %v10360_v42 }
  0xc6   :  { %1352 = vmatpush1.bf16.msra.mxu1 %v10270_v13 }
  0xc7   :  { %1353 = vmatprep.subr.bf16.mxu1 %v10278_v15  ;;  %1325 = vmatpush1.bf16.msra.mxu0 %v10364_v44 }
  0xc8   :  { %1326 = vmatprep.subr.bf16.mxu0 %v10374_v47 }
  0xca   :  { %1354 = vmatpush1.bf16.msra.mxu1 %v10282_v17 }
  0xcb   :  { %1355 = vmatprep.subr.bf16.mxu1 %v10290_v19  ;;  %1327 = vmatpush1.bf16.msra.mxu0 %v10372_v46 }
  0xcc   :  { %1328 = vmatprep.subr.bf16.mxu0 %v10380_v50  ;;  %v9870_v50 = vld [vmem:[#allocation10 + $0x4] ss:$16 sps:$4 sm:$0xff]  }
  0xce   :  { %1356 = vmatpush1.bf16.msra.mxu1 %v10294_v21 }
  0xcf   :  { %1357 = vmatprep.subr.bf16.mxu1 %v10302_v23  ;;  %1329 = vmatpush1.bf16.msra.mxu0 %v10387_v52 }
  0xd0   :  { %1330 = vmatprep.subr.bf16.mxu0 %v10393_v54 }
  0xd2   :  { %1358 = vmatpush1.bf16.msra.mxu1 %v10306_v25 }
  0xd3   :  { %1359 = vmatprep.subr.bf16.mxu1 %v10314_v27  ;;  %1331 = vmatpush1.bf16.msra.mxu0 %v10399_v56 }
  0xd4   :  { %1642 = vmatprep.subr.bf16.mxu0 %v9870_v50 }
  0xd6   :  { %1360 = vmatpush1.bf16.msra.mxu1 %v10318_v29 }
  0xd7   :  { %1361 = vmatprep.subr.bf16.mxu1 %v10326_v31 }
  0xda   :  { %1362 = vmatpush1.bf16.msra.mxu1 %v10330_v33 }
  0xdb   :  { %1363 = vmatprep.subr.bf16.mxu1 %v10338_v35 }
  0xde   :  { %1364 = vmatpush1.bf16.msra.mxu1 %v10342_v37 }
  0xdf   :  { %1365 = vmatprep.subr.bf16.mxu1 %v10350_v39 }
  0xe2   :  { %1366 = vmatpush1.bf16.msra.mxu1 %v10354_v41 }
  0xe3   :  { %1367 = vmatprep.subr.bf16.mxu1 %v10362_v43 }
  0xe6   :  { %1368 = vmatpush1.bf16.msra.mxu1 %v10366_v45 }
  0xe7   :  { %1369 = vmatprep.subr.bf16.mxu1 %v10378_v49 }
  0xea   :  { %1370 = vmatpush1.bf16.msra.mxu1 %v10376_v48 }
  0xeb   :  { %1371 = vmatprep.subr.bf16.mxu1 %v10383_v51  ;;  %v9871_v51 = vld [vmem:[#allocation10 + $0xc] ss:$16 sps:$4 sm:$0xff]  }
  0xee   :  { %1372 = vmatpush1.bf16.msra.mxu1 %v10391_v53 }
  0xef   :  { %1373 = vmatprep.subr.bf16.mxu1 %v10396_v55 }
  0xf2   :  { %1374 = vmatpush1.bf16.msra.mxu1 %v10403_v0 }
  0xf3   :  { %1685 = vmatprep.subr.bf16.mxu1 %v9871_v51 }
 0x138   :  { %v334_v48 = vpop.f32.mrb[0].mxu1  ;;  %v274_v52 = vpop.f32.mrb[0].mxu0 }
 0x139   :  { %v336_v46 = vpop.f32.mrb[1].mxu1  ;;  %v276_v49 = vpop.f32.mrb[1].mxu0 }
 0x13a   :  { %v338_v47 = vpop.f32.mrb[2].mxu1  ;;  %v278_v53 = vpop.f32.mrb[2].mxu0 }
 0x13b   :  { %v10408_v45 = vpack.c.bf16 %v338_v47, %v334_v48  ;;  %v340_v54 = vpop.f32.mrb[3].mxu1  ;;  %v10410_v44 = vpack.c.bf16 %v278_v53, %v274_v52  ;;  %v280_v55 = vpop.f32.mrb[3].mxu0 }
 0x13c   :  { %v10412_v43 = vpack.c.bf16 %v340_v54, %v336_v46  ;;  %v10414_v56 = vpack.c.bf16 %v280_v55, %v276_v49 }
 0x13d   :  { %12293 = vst [vmem:[#allocation45_spill] sm:$0xff] %v10408_v45 }
 0x13e   :  { %12294 = vst [vmem:[#allocation46_spill] sm:$0xff] %v10412_v43 }
 0x140   :  { %v344_v0 = vpop.f32.mrb[4].mxu1  ;;  %v284_v50 = vpop.f32.mrb[4].mxu0 }
 0x141   :  { %v346_v42 = vpop.f32.mrb[5].mxu1  ;;  %v286_v51 = vpop.f32.mrb[5].mxu0 }
 0x142   :  { %v348_v41 = vpop.f32.mrb[6].mxu1  ;;  %v288_v40 = vpop.f32.mrb[6].mxu0 }
 0x143   :  { %v10416_v39 = vpack.c.bf16 %v348_v41, %v344_v0  ;;  %v350_v38 = vpop.f32.mrb[7].mxu1  ;;  %v10418_v37 = vpack.c.bf16 %v288_v40, %v284_v50  ;;  %v290_v47 = vpop.f32.mrb[7].mxu0 }
 0x144   :  { %v10420_v48 = vpack.c.bf16 %v350_v38, %v346_v42  ;;  %v10422_v52 = vpack.c.bf16 %v290_v47, %v286_v51 }
 0x145   :  { %12295 = vst [vmem:[#allocation47_spill] sm:$0xff] %v10416_v39  ;;  %12296 = vst [vmem:[#allocation48_spill] sm:$0xff] %v10418_v37 }
 0x146   :  { %12297 = vst [vmem:[#allocation49_spill] sm:$0xff] %v10420_v48  ;;  %12298 = vst [vmem:[#allocation50_spill] sm:$0xff] %v10422_v52 }
 0x148   :  { %v387_v46 = vpop.f32.mrb[8].mxu1  ;;  %v294_v53 = vpop.f32.mrb[8].mxu0 }
 0x149   :  { %v389_v49 = vpop.f32.mrb[9].mxu1  ;;  %v296_v54 = vpop.f32.mrb[9].mxu0 }
 0x14a   :  { %v391_v55 = vpop.f32.mrb[10].mxu1  ;;  %v298_v43 = vpop.f32.mrb[10].mxu0 }
 0x14b   :  { %v10424_v45 = vpack.c.bf16 %v391_v55, %v387_v46  ;;  %v393_v36 = vpop.f32.mrb[11].mxu1  ;;  %v10426_v35 = vpack.c.bf16 %v298_v43, %v294_v53  ;;  %v300_v0 = vpop.f32.mrb[11].mxu0 }
 0x14c   :  { %v10428_v41 = vpack.c.bf16 %v393_v36, %v389_v49  ;;  %v10430_v40 = vpack.c.bf16 %v300_v0, %v296_v54 }
 0x14d   :  { %12299 = vst [vmem:[#allocation51_spill] sm:$0xff] %v10426_v35 }
 0x14e   :  { %12300 = vst [vmem:[#allocation52_spill] sm:$0xff] %v10430_v40 }
 0x150   :  { %v397_v38 = vpop.f32.mrb[12].mxu1  ;;  %v304_v42 = vpop.f32.mrb[12].mxu0 }
 0x151   :  { %v399_v50 = vpop.f32.mrb[13].mxu1  ;;  %v306_v51 = vpop.f32.mrb[13].mxu0 }
 0x152   :  { %v401_v47 = vpop.f32.mrb[14].mxu1  ;;  %v308_v48 = vpop.f32.mrb[14].mxu0 }
 0x153   :  { %v10432_v39 = vpack.c.bf16 %v401_v47, %v397_v38  ;;  %v403_v52 = vpop.f32.mrb[15].mxu1  ;;  %v10434_v37 = vpack.c.bf16 %v308_v48, %v304_v42  ;;  %v310_v46 = vpop.f32.mrb[15].mxu0 }
 0x154   :  { %v10436_v55 = vpack.c.bf16 %v403_v52, %v399_v50  ;;  %v10438_v43 = vpack.c.bf16 %v310_v46, %v306_v51 }
 0x155   :  { %12301 = vst [vmem:[#allocation53_spill] sm:$0xff] %v10432_v39  ;;  %12302 = vst [vmem:[#allocation54_spill] sm:$0xff] %v10434_v37 }
 0x156   :  { %12303 = vst [vmem:[#allocation55_spill] sm:$0xff] %v10436_v55  ;;  %12304 = vst [vmem:[#allocation56_spill] sm:$0xff] %v10438_v43 }
 0x158   :  { %v407_v36 = vpop.f32.mrb[16].mxu1  ;;  %v314_v53 = vpop.f32.mrb[16].mxu0 }
 0x159   :  { %v409_v49 = vpop.f32.mrb[17].mxu1  ;;  %v316_v54 = vpop.f32.mrb[17].mxu0 }
 0x15a   :  { %v411_v0 = vpop.f32.mrb[18].mxu1  ;;  %v318_v40 = vpop.f32.mrb[18].mxu0 }
 0x15b   :  { %v10440_v35 = vpack.c.bf16 %v411_v0, %v407_v36  ;;  %v413_v34 = vpop.f32.mrb[19].mxu1  ;;  %v10442_v33 = vpack.c.bf16 %v318_v40, %v314_v53  ;;  %v320_v38 = vpop.f32.mrb[19].mxu0 }
 0x15c   :  { %v10444_v47 = vpack.c.bf16 %v413_v34, %v409_v49  ;;  %v10446_v48 = vpack.c.bf16 %v320_v38, %v316_v54  ;;  %v840_v34 = vunpack.c.l.bf16 %v10410_v44  ;;  %v841_v54 = vunpack.c.l.bf16 %v10414_v56 }
 0x15d   :  { %12305 = vst [vmem:[#allocation57_spill] sm:$0xff] %v10440_v35  ;;  %12306 = vst [vmem:[#allocation58_spill] sm:$0xff] %v10442_v33 }
 0x15e   :  { %12307 = vst [vmem:[#allocation59_spill] sm:$0xff] %v10444_v47  ;;  %12308 = vst [vmem:[#allocation60_spill] sm:$0xff] %v10446_v48 }
 0x160   :  { %v417_v52 = vpop.f32.mrb[20].mxu1  ;;  %v324_v42 = vpop.f32.mrb[20].mxu0 }
 0x161   :  { %v419_v50 = vpop.f32.mrb[21].mxu1  ;;  %v326_v51 = vpop.f32.mrb[21].mxu0 }
 0x162   :  { %v421_v46 = vpop.f32.mrb[22].mxu1  ;;  %v328_v43 = vpop.f32.mrb[22].mxu0 }
 0x163   :  { %v10448_v37 = vpack.c.bf16 %v421_v46, %v417_v52  ;;  %v423_v55 = vpop.f32.mrb[23].mxu1  ;;  %v10450_v39 = vpack.c.bf16 %v328_v43, %v324_v42  ;;  %v330_v36 = vpop.f32.mrb[23].mxu0  ;;  %v844_v52 = vunpack.c.h.bf16 %v10410_v44  ;;  %v845_v42 = vunpack.c.h.bf16 %v10414_v56 }
 0x164   :  { %v10452_v0 = vpack.c.bf16 %v423_v55, %v419_v50  ;;  %v10454_v40 = vpack.c.bf16 %v330_v36, %v326_v51 }
 0x165   :  { %12309 = vst [vmem:[#allocation61_spill] sm:$0xff] %v10448_v37  ;;  %12310 = vst [vmem:[#allocation62_spill] sm:$0xff] %v10450_v39 }
 0x166   :  { %12311 = vst [vmem:[#allocation63_spill] sm:$0xff] %v10452_v0  ;;  %12312 = vst [vmem:[#allocation64_spill] sm:$0xff] %v10454_v40 }
 0x168   :  { %v427_v53 = vpop.f32.mrb[24].mxu1  ;;  %v788_v49 = vpop.f32.mrb[24].mxu0 }
 0x169   :  { %v848_v38 = vadd.f32 %v840_v34, %v788_v49  ;;  %v429_v48 = vpop.f32.mrb[25].mxu1  ;;  %v790_v33 = vpop.f32.mrb[25].mxu0 }
 0x16a   :  { %v849_v46 = vadd.f32 %v841_v54, %v790_v33  ;;  %v431_v37 = vpop.f32.mrb[26].mxu1  ;;  %v792_v43 = vpop.f32.mrb[26].mxu0 }
 0x16b   :  { %v10460_v55 = vpack.c.bf16 %v431_v37, %v427_v53  ;;  %v852_v50 = vadd.f32 %v844_v52, %v792_v43  ;;  %v433_v51 = vpop.f32.mrb[27].mxu1  ;;  %v794_v36 = vpop.f32.mrb[27].mxu0  ;;  %v7866_v49 = vmul.f32 -1.442695, %v848_v38 }
 0x16c   :  { %v10462_v40 = vpack.c.bf16 %v433_v51, %v429_v48  ;;  %v853_v39 = vadd.f32 %v845_v42, %v794_v36  ;;  %v7868_v33 = vmul.f32 -1.442695, %v849_v46 }
 0x16d   :  { %12313 = vst [vmem:[#allocation65_spill] sm:$0xff] %v10460_v55  ;;  %9358 = vpow2.f32 %v7866_v49  ;;  %v7867_v37 = vmul.f32 -1.442695, %v852_v50  ;;  %v10767_v55 = vld [vmem:[#allocation11 + $0xa0] ss:$16 sps:$4 sm:$0xff]  }
 0x16e   :  { %12314 = vst [vmem:[#allocation66_spill] sm:$0xff] %v10462_v40  ;;  %v7869_v32 = vmul.f32 -1.442695, %v853_v39  ;;  %9360 = vpow2.f32 %v7868_v33  ;;  %v10765_v40 = vld [vmem:[#allocation11 + $0xac] ss:$16 sps:$4 sm:$0xff]  }
 0x170   :  { %v437_v0 = vpop.f32.mrb[28].mxu1  ;;  %9362 = vpow2.f32 %v7869_v32 }
 0x171   :  { %v439_v47 = vpop.f32.mrb[29].mxu1  ;;  %9364 = vpow2.f32 %v7867_v37  ;;  %v842_v37 = vunpack.c.l.bf16 %v10424_v45 }
 0x172   :  { %v441_v34 = vpop.f32.mrb[30].mxu1 }
 0x173   :  { %v10464_v35 = vpack.c.bf16 %v441_v34, %v437_v0  ;;  %v443_v44 = vpop.f32.mrb[31].mxu1 }
 0x174   :  { %v10466_v54 = vpack.c.bf16 %v443_v44, %v439_v47 }
 0x175   :  { %12315 = vst [vmem:[#allocation67_spill] sm:$0xff] %v10464_v35  ;;  %v10763_v35 = vld [vmem:[#allocation11 + $0xa4] ss:$16 sps:$4 sm:$0xff]  }
 0x176   :  { %12316 = vst [vmem:[#allocation68_spill] sm:$0xff] %v10466_v54  ;;  %v10757_v54 = vld [vmem:[#allocation11 + $0x88] ss:$16 sps:$4 sm:$0xff]  }
 0x177   :  { %v9359_v38 = vpop.eup %9358 }
 0x178   :  { %v447_v56 = vpop.f32.mrb[32].mxu1  ;;  %v9361_v46 = vpop.eup %9360  ;;  %v862_v34 = vadd.f32 1.0, %v9359_v38 }
 0x179   :  { %v449_v53 = vpop.f32.mrb[33].mxu1  ;;  %v874_v44 = vadd.f32 1.0, %v9361_v46 }
 0x17a   :  { %v451_v48 = vpop.f32.mrb[34].mxu1  ;;  %v9363_v36 = vpop.eup %9362  ;;  %9366 = vrcp.f32 %v862_v34 }
 0x17b   :  { %v10468_v52 = vpack.c.bf16 %v451_v48, %v447_v56  ;;  %v453_v43 = vpop.f32.mrb[35].mxu1  ;;  %v9365_v32 = vpop.eup %9364  ;;  %v875_v33 = vadd.f32 1.0, %v9363_v36  ;;  %v843_v48 = vunpack.c.l.bf16 %v10428_v41  ;;  %9368 = vrcp.f32 %v874_v44 }
 0x17c   :  { %v10470_v42 = vpack.c.bf16 %v453_v43, %v449_v53  ;;  %v863_v56 = vadd.f32 1.0, %v9365_v32 }
 0x17d   :  { %12317 = vst [vmem:[#allocation69_spill] sm:$0xff] %v10468_v52  ;;  %9370 = vrcp.f32 %v875_v33  ;;  %v10755_v52 = vld [vmem:[#allocation11 + $0x80] ss:$16 sps:$4 sm:$0xff]  }
 0x17e   :  { %12318 = vst [vmem:[#allocation70_spill] sm:$0xff] %v10470_v42 }
 0x180   :  { %v457_v0 = vpop.f32.mrb[36].mxu1 }
 0x181   :  { %v459_v51 = vpop.f32.mrb[37].mxu1 }
 0x182   :  { %v461_v47 = vpop.f32.mrb[38].mxu1 }
 0x183   :  { %v10472_v39 = vpack.c.bf16 %v461_v47, %v457_v0  ;;  %v463_v50 = vpop.f32.mrb[39].mxu1  ;;  %v846_v0 = vunpack.c.h.bf16 %v10424_v45 }
 0x184   :  { %v10474_v49 = vpack.c.bf16 %v463_v50, %v459_v51  ;;  %v847_v51 = vunpack.c.h.bf16 %v10428_v41  ;;  %v9367_v44 = vpop.eup %9366 }
 0x185   :  { %12319 = vst [vmem:[#allocation71_spill] sm:$0xff] %v10472_v39 }
 0x186   :  { %12320 = vst [vmem:[#allocation72_spill] sm:$0xff] %v10474_v49 }
 0x188   :  { %v831_v53 = vpop.f32.mrb[40].mxu1 }
 0x189   :  { %v850_v43 = vadd.f32 %v842_v37, %v831_v53  ;;  %v833_v42 = vpop.f32.mrb[41].mxu1  ;;  %v9369_v37 = vpop.eup %9368 }
 0x18a   :  { %v851_v47 = vadd.f32 %v843_v48, %v833_v42  ;;  %v835_v38 = vpop.f32.mrb[42].mxu1  ;;  %v9371_v53 = vpop.eup %9370  ;;  %v896_v33 = vmul.f32 0.0, %v9369_v37  ;;  %v9873_v37 = vld [vmem:[#allocation10 + $0x8] ss:$16 sps:$4 sm:$0xff]  }
 0x18b   :  { %9372 = vtanh.f32 %v850_v43  ;;  %v854_v46 = vadd.f32 %v846_v0, %v835_v38  ;;  %v837_v36 = vpop.f32.mrb[43].mxu1  ;;  %v897_v41 = vmul.f32 0.0, %v9371_v53  ;;  %v9874_v53 = vld [vmem:[#allocation10 + $0x24] ss:$16 sps:$4 sm:$0xff]  }
 0x18c   :  { %9374 = vrcp.f32 %v863_v56  ;;  %v7870_v50 = vmul.f32 -1.442695, %v851_v47  ;;  %v855_v34 = vadd.f32 %v847_v51, %v837_v36 }
 0x18d   :  { %9376 = vtanh.f32 %v854_v46 }
 0x18e   :  { %9378 = vpow2.f32 %v7870_v50  ;;  %v7871_v32 = vmul.f32 -1.442695, %v855_v34 }
 0x190   :  { %9380 = vpow2.f32 %v7871_v32 }
 0x195   :  { %v9373_v49 = vpop.eup %9372 }
 0x196   :  { %v9375_v45 = vpop.eup %9374  ;;  %v898_v42 = vmul.f32 %v9373_v49, %v9367_v44 }
 0x197   :  { %v9377_v48 = vpop.eup %9376 }
 0x198   :  { %v9379_v39 = vpop.eup %9378  ;;  %v10480_v43 = vadd.f32 %v898_v42, %v896_v33  ;;  %v899_v0 = vmul.f32 %v9377_v48, %v9375_v45  ;;  %v9875_v45 = vld [vmem:[#allocation10 + $0x2c] ss:$16 sps:$4 sm:$0xff]   ;;  %v12321_v33 = vmov 0   ;;  %v9876_v42 = vld [vmem:[#allocation10 + $0x20] ss:$16 sps:$4 sm:$0xff]  }
 0x199   :  { %v888_v56 = vadd.f32 1.0, %v9379_v39  ;;  %v9872_v39 = vld [vmem:[#allocation10] ss:$16 sps:$4 sm:$0xff]   ;;  %v9877_v48 = vld [vmem:[#allocation10 + $0x28] ss:$16 sps:$4 sm:$0xff]  }
 0x19a   :  { %v9381_v47 = vpop.eup %9380  ;;  %9382 = vtanh.f32 %v10480_v43  ;;  %v10483_v38 = vadd.f32 %v899_v0, %v897_v41  ;;  %v9878_v41 = vld [vmem:[#allocation10 + $0x44] ss:$16 sps:$4 sm:$0xff]   ;;  %v9879_v0 = vld [vmem:[#allocation10 + $0x4c] ss:$16 sps:$4 sm:$0xff]  }
 0x19b   :  { %9384 = vrcp.f32 %v888_v56  ;;  %v889_v51 = vadd.f32 1.0, %v9381_v47  ;;  %v9880_v56 = vld [vmem:[#allocation10 + $0x40] ss:$16 sps:$4 sm:$0xff]   ;;  %v9881_v47 = vld [vmem:[#allocation10 + $0x48] ss:$16 sps:$4 sm:$0xff]  }
 0x19c   :  { %9386 = vtanh.f32 %v10483_v38 }
 0x19d   :  { %9388 = vrcp.f32 %v889_v51  ;;  %v9882_v51 = vld [vmem:[#allocation10 + $0x64] ss:$16 sps:$4 sm:$0xff]  }
 0x1a4   :  { %v9383_v46 = vpop.eup %9382 }
 0x1a5   :  { %v9385_v36 = vpop.eup %9384 }
 0x1a6   :  { %v9387_v49 = vpop.eup %9386  ;;  %v904_v34 = vmul.f32 %v9385_v36, %v9383_v46  ;;  %v9883_v46 = vld [vmem:[#allocation10 + $0x6c] ss:$16 sps:$4 sm:$0xff]   ;;  %v9884_v36 = vld [vmem:[#allocation10 + $0x60] ss:$16 sps:$4 sm:$0xff]  }
 0x1a7   :  { %v9389_v50 = vpop.eup %9388 }
 0x1a8   :  { %v905_v32 = vmul.f32 %v9389_v50, %v9387_v49  ;;  %v9885_v49 = vld [vmem:[#allocation10 + $0x68] ss:$16 sps:$4 sm:$0xff]   ;;  %v9886_v50 = vld [vmem:[#allocation10 + $0x84] ss:$16 sps:$4 sm:$0xff]  }
 0x1aa   :  { %v10486_v44 = vpack.c.bf16 %v905_v32, %v904_v34  ;;  %v9887_v34 = vld [vmem:[#allocation10 + $0x8c] ss:$16 sps:$4 sm:$0xff]   ;;  %v9888_v32 = vld [vmem:[#allocation10 + $0x80] ss:$16 sps:$4 sm:$0xff]  }
 0x1ac   :  { %1333 = vmatmul.mubr.bf16.vlgmr.msra.gmra.mrb[28].mxu0 %v10486_v44  ;;  %1376 = vmatmul.mubr.bf16.vlgmr.msra.gmra.mrb[44].mxu1 %v10486_v44 }
 0x1ad   :  { %1643 = vmatpush1.bf16.msra.mxu0 %v9872_v39  ;;  %1686 = vmatpush1.bf16.msra.mxu1 %v9873_v37  ;;  %v9889_v39 = vld [vmem:[#allocation10 + $0x88] ss:$16 sps:$4 sm:$0xff]   ;;  %v9890_v37 = vld [vmem:[#allocation10 + $0xa4] ss:$16 sps:$4 sm:$0xff]  }
 0x1ae   :  { %1644 = vmatprep.subr.bf16.mxu0 %v9874_v53  ;;  %1687 = vmatprep.subr.bf16.mxu1 %v9875_v45  ;;  %v9891_v53 = vld [vmem:[#allocation10 + $0xac] ss:$16 sps:$4 sm:$0xff]   ;;  %v9892_v45 = vld [vmem:[#allocation10 + $0xa0] ss:$16 sps:$4 sm:$0xff]  }
 0x1af   :  { %1674 = vmatprep.mubr.bf16.mxu0 %v12321_v33  ;;  %1717 = vmatprep.mubr.bf16.mxu1 %v12321_v33 }
 0x1b1   :  { %1645 = vmatpush1.bf16.msra.mxu0 %v9876_v42  ;;  %1688 = vmatpush1.bf16.msra.mxu1 %v9877_v48  ;;  %v9893_v42 = vld [vmem:[#allocation10 + $0xa8] ss:$16 sps:$4 sm:$0xff]   ;;  %v9894_v48 = vld [vmem:[#allocation10 + $0xc4] ss:$16 sps:$4 sm:$0xff]  }
 0x1b2   :  { %1646 = vmatprep.subr.bf16.mxu0 %v9878_v41  ;;  %1689 = vmatprep.subr.bf16.mxu1 %v9879_v0  ;;  %v9895_v41 = vld [vmem:[#allocation10 + $0xcc] ss:$16 sps:$4 sm:$0xff]   ;;  %v9896_v0 = vld [vmem:[#allocation10 + $0xc0] ss:$16 sps:$4 sm:$0xff]  }
 0x1b5   :  { %1647 = vmatpush1.bf16.msra.mxu0 %v9880_v56  ;;  %1690 = vmatpush1.bf16.msra.mxu1 %v9881_v47  ;;  %v9897_v56 = vld [vmem:[#allocation10 + $0xc8] ss:$16 sps:$4 sm:$0xff]   ;;  %v9898_v47 = vld [vmem:[#allocation10 + $0xe4] ss:$16 sps:$4 sm:$0xff]  }
 0x1b6   :  { %1648 = vmatprep.subr.bf16.mxu0 %v9882_v51  ;;  %1691 = vmatprep.subr.bf16.mxu1 %v9883_v46  ;;  %v9899_v51 = vld [vmem:[#allocation10 + $0xec] ss:$16 sps:$4 sm:$0xff]   ;;  %v9900_v46 = vld [vmem:[#allocation10 + $0xe0] ss:$16 sps:$4 sm:$0xff]  }
 0x1b9   :  { %1649 = vmatpush1.bf16.msra.mxu0 %v9884_v36  ;;  %1692 = vmatpush1.bf16.msra.mxu1 %v9885_v49  ;;  %v9901_v36 = vld [vmem:[#allocation10 + $0xe8] ss:$16 sps:$4 sm:$0xff]  }
 0x1ba   :  { %1650 = vmatprep.subr.bf16.mxu0 %v9886_v50  ;;  %1693 = vmatprep.subr.bf16.mxu1 %v9887_v34 }
 0x1bd   :  { %1651 = vmatpush1.bf16.msra.mxu0 %v9888_v32  ;;  %1694 = vmatpush1.bf16.msra.mxu1 %v9889_v39 }
 0x1be   :  { %1652 = vmatprep.subr.bf16.mxu0 %v9890_v37  ;;  %1695 = vmatprep.subr.bf16.mxu1 %v9891_v53 }
 0x1c1   :  { %1653 = vmatpush1.bf16.msra.mxu0 %v9892_v45  ;;  %1696 = vmatpush1.bf16.msra.mxu1 %v9893_v42 }
 0x1c2   :  { %1654 = vmatprep.subr.bf16.mxu0 %v9894_v48  ;;  %1697 = vmatprep.subr.bf16.mxu1 %v9895_v41 }
 0x1c5   :  { %1655 = vmatpush1.bf16.msra.mxu0 %v9896_v0  ;;  %1698 = vmatpush1.bf16.msra.mxu1 %v9897_v56 }
 0x1c6   :  { %1656 = vmatprep.subr.bf16.mxu0 %v9898_v47  ;;  %1699 = vmatprep.subr.bf16.mxu1 %v9899_v51 }
 0x1c9   :  { %1657 = vmatpush1.bf16.msra.mxu0 %v9900_v46  ;;  %1700 = vmatpush1.bf16.msra.mxu1 %v9901_v36 }
 0x1ca   :  { %2188 = vmatprep.subr.bf16.mxu0 %v10216_v57  ;;  %2231 = vmatprep.subr.bf16.mxu1 %v10218_v58  ;;  %v12322_v57 = vld [vmem:[#allocation19_spill] sm:$0xff]  ;;  %v12323_v58 = vld [vmem:[#allocation20_spill] sm:$0xff] }
 0x1cc   :  { %1675 = vmatmul.mubr.bf16.vlgmr.msra.gmra.mrb[32].mxu0 %v10486_v44  ;;  %1718 = vmatmul.mubr.bf16.vlgmr.msra.gmra.mrb[48].mxu1 %v10486_v44 }
 0x1cd   :  { %2189 = vmatpush1.bf16.msra.mxu0 %v10220_v59  ;;  %2232 = vmatpush1.bf16.msra.mxu1 %v10222_v60  ;;  %v12324_v59 = vld [vmem:[#allocation21_spill] sm:$0xff]  ;;  %v12325_v60 = vld [vmem:[#allocation22_spill] sm:$0xff] }
 0x1ce   :  { %2190 = vmatprep.subr.bf16.mxu0 %v10228_v61  ;;  %2233 = vmatprep.subr.bf16.mxu1 %v10230_v62  ;;  %v12326_v61 = vld [vmem:[#allocation23_spill] sm:$0xff]  ;;  %v12327_v62 = vld [vmem:[#allocation24_spill] sm:$0xff] }
 0x1d1   :  { %2191 = vmatpush1.bf16.msra.mxu0 %v10232_v63  ;;  %2234 = vmatpush1.bf16.msra.mxu1 %v10234_v1  ;;  %v12328_v63 = vld [vmem:[#allocation25_spill] sm:$0xff]  ;;  %v12329_v1 = vld [vmem:[#allocation26_spill] sm:$0xff] }
 0x1d2   :  { %2192 = vmatprep.subr.bf16.mxu0 %v10240_v2  ;;  %2235 = vmatprep.subr.bf16.mxu1 %v10242_v3  ;;  %v12330_v2 = vld [vmem:[#allocation27_spill] sm:$0xff]  ;;  %v12331_v3 = vld [vmem:[#allocation28_spill] sm:$0xff] }
 0x1d5   :  { %2193 = vmatpush1.bf16.msra.mxu0 %v10244_v4  ;;  %2236 = vmatpush1.bf16.msra.mxu1 %v10246_v5  ;;  %v12332_v4 = vld [vmem:[#allocation29_spill] sm:$0xff]  ;;  %v12333_v5 = vld [vmem:[#allocation30_spill] sm:$0xff] }
 0x1d6   :  { %2194 = vmatprep.subr.bf16.mxu0 %v10252_v6  ;;  %2237 = vmatprep.subr.bf16.mxu1 %v10254_v7  ;;  %v12334_v6 = vld [vmem:[#allocation31_spill] sm:$0xff]  ;;  %v12335_v7 = vld [vmem:[#allocation32_spill] sm:$0xff] }
 0x1d9   :  { %2195 = vmatpush1.bf16.msra.mxu0 %v10256_v8  ;;  %2238 = vmatpush1.bf16.msra.mxu1 %v10258_v9  ;;  %v12336_v8 = vld [vmem:[#allocation34_spill] sm:$0xff]  ;;  %v12337_v9 = vld [vmem:[#allocation36_spill] sm:$0xff] }
 0x1da   :  { %2196 = vmatprep.subr.bf16.mxu0 %v10264_v10  ;;  %2239 = vmatprep.subr.bf16.mxu1 %v10266_v11  ;;  %v12338_v10 = vld [vmem:[#allocation33_spill] sm:$0xff]  ;;  %v12339_v11 = vld [vmem:[#allocation35_spill] sm:$0xff] }
 0x1dd   :  { %2197 = vmatpush1.bf16.msra.mxu0 %v10268_v12  ;;  %2240 = vmatpush1.bf16.msra.mxu1 %v10270_v13  ;;  %v12340_v12 = vld [vmem:[#allocation37_spill] sm:$0xff]  ;;  %v12341_v13 = vld [vmem:[#allocation38_spill] sm:$0xff] }
 0x1de   :  { %2198 = vmatprep.subr.bf16.mxu0 %v10276_v14  ;;  %2241 = vmatprep.subr.bf16.mxu1 %v10278_v15  ;;  %v12342_v14 = vld [vmem:[#allocation39_spill] sm:$0xff]  ;;  %v12343_v15 = vld [vmem:[#allocation40_spill] sm:$0xff] }
 0x1e1   :  { %2199 = vmatpush1.bf16.msra.mxu0 %v10280_v16  ;;  %2242 = vmatpush1.bf16.msra.mxu1 %v10282_v17  ;;  %v12344_v16 = vld [vmem:[#allocation41_spill] sm:$0xff]  ;;  %v12345_v17 = vld [vmem:[#allocation42_spill] sm:$0xff] }
 0x1e2   :  { %2200 = vmatprep.subr.bf16.mxu0 %v10288_v18  ;;  %2243 = vmatprep.subr.bf16.mxu1 %v10290_v19  ;;  %v12346_v18 = vld [vmem:[#allocation43_spill] sm:$0xff]  ;;  %v12347_v19 = vld [vmem:[#allocation44_spill] sm:$0xff]  ;;  %12375 = vst [vmem:[#allocation42_spill] sm:$0xff] %v10755_v52 }
 0x1e3   :  { %12376 = vst [vmem:[#allocation43_spill] sm:$0xff] %v10757_v54  ;;  %12377 = vst [vmem:[#allocation44_spill] sm:$0xff] %v10763_v35 }
 0x1e5   :  { %2201 = vmatpush1.bf16.msra.mxu0 %v10292_v20  ;;  %2244 = vmatpush1.bf16.msra.mxu1 %v10294_v21  ;;  %v10558_v20 = vld [vmem:[#allocation10 + $0x4] ss:$16 sps:$4 sm:$0xff]   ;;  %v10560_v21 = vld [vmem:[#allocation10 + $0xc] ss:$16 sps:$4 sm:$0xff]  }
 0x1e6   :  { %2202 = vmatprep.subr.bf16.mxu0 %v10300_v22  ;;  %2245 = vmatprep.subr.bf16.mxu1 %v10302_v23  ;;  %v532_v22 = vlaneseq }
 0x1e8   :  { %v533_v23 = vshrl.u32 %v532_v22, 7  ;;  %v12353_v22 = vld [vmem:[#allocation53_spill] sm:$0xff] }
 0x1e9   :  { %2203 = vmatpush1.bf16.msra.mxu0 %v10304_v24  ;;  %2246 = vmatpush1.bf16.msra.mxu1 %v10306_v25  ;;  %v530_v25 = vld [vmem:[%s11996_s4] sm:$0xf]  ;;  %12379 = vst [vmem:[#allocation53_spill] sm:$0xff] %v10767_v55 }
 0x1ea   :  { %2204 = vmatprep.subr.bf16.mxu0 %v10312_v26  ;;  %2247 = vmatprep.subr.bf16.mxu1 %v10314_v27  ;;  %v534_v24 = vsub.s32 0, %v533_v23  ;;  %v538_v26 = vsub.s32 1, %v533_v23  ;;  %v542_v53 = vsub.s32 2, %v533_v23 }
 0x1ec   :  { %v10567_v27 = vrot.slane %v530_v25, %v534_v24  ;;  %v10577_v46 = vrot.slane %v530_v25, %v542_v53  ;;  %v12354_v24 = vld [vmem:[#allocation50_spill] sm:$0xff] }
 0x1ed   :  { %2205 = vmatpush1.bf16.msra.mxu0 %v10316_v28  ;;  %2248 = vmatpush1.bf16.msra.mxu1 %v10318_v29  ;;  %v10569_v28 = vrot.slane %v530_v25, %v538_v26 }
 0x1ee   :  { %2206 = vmatprep.subr.bf16.mxu0 %v10324_v30  ;;  %2249 = vmatprep.subr.bf16.mxu1 %v10326_v31  ;;  %12348 = vst [vmem:[#allocation19_spill] sm:$0xff] %v10567_v27  ;;  %v546_v31 = vsub.s32 3, %v533_v23  ;;  %12351 = vst [vmem:[#allocation22_spill] sm:$0xff] %v10577_v46  ;;  %v1730_v23 = vunpack.c.l.bf16 %v12353_v22 }
 0x1ef   :  { %12349 = vst [vmem:[#allocation20_spill] sm:$0xff] %v10569_v28 }
 0x1f0   :  { %v10574_v0 = vrot.slane %v530_v25, %v546_v31  ;;  %v1729_v25 = vunpack.c.l.bf16 %v12354_v24 }
 0x1f1   :  { %2207 = vmatpush1.bf16.msra.mxu0 %v12322_v57  ;;  %2250 = vmatpush1.bf16.msra.mxu1 %v12323_v58 }
 0x1f2   :  { %2208 = vmatprep.subr.bf16.mxu0 %v12324_v59  ;;  %2251 = vmatprep.subr.bf16.mxu1 %v12325_v60  ;;  %12350 = vst [vmem:[#allocation21_spill] sm:$0xff] %v10574_v0 }
 0x1f5   :  { %2209 = vmatpush1.bf16.msra.mxu0 %v12326_v61  ;;  %2252 = vmatpush1.bf16.msra.mxu1 %v12327_v62 }
 0x1f6   :  { %2210 = vmatprep.subr.bf16.mxu0 %v12328_v63  ;;  %2253 = vmatprep.subr.bf16.mxu1 %v12329_v1 }
 0x1f9   :  { %2211 = vmatpush1.bf16.msra.mxu0 %v12330_v2  ;;  %2254 = vmatpush1.bf16.msra.mxu1 %v12331_v3 }
 0x1fa   :  { %2212 = vmatprep.subr.bf16.mxu0 %v12332_v4  ;;  %2255 = vmatprep.subr.bf16.mxu1 %v12333_v5 }
 0x1fd   :  { %2213 = vmatpush1.bf16.msra.mxu0 %v12334_v6  ;;  %2256 = vmatpush1.bf16.msra.mxu1 %v12335_v7 }
 0x1fe   :  { %2214 = vmatprep.subr.bf16.mxu0 %v12336_v8  ;;  %2257 = vmatprep.subr.bf16.mxu1 %v12337_v9 }
 0x201   :  { %2215 = vmatpush1.bf16.msra.mxu0 %v12338_v10  ;;  %2258 = vmatpush1.bf16.msra.mxu1 %v12339_v11 }
 0x202   :  { %2216 = vmatprep.subr.bf16.mxu0 %v12340_v12  ;;  %2259 = vmatprep.subr.bf16.mxu1 %v12341_v13 }
 0x205   :  { %2217 = vmatpush1.bf16.msra.mxu0 %v12342_v14  ;;  %2260 = vmatpush1.bf16.msra.mxu1 %v12343_v15 }
 0x206   :  { %2218 = vmatprep.subr.bf16.mxu0 %v12344_v16  ;;  %2261 = vmatprep.subr.bf16.mxu1 %v12345_v17  ;;  %v12352_v16 = vld [vmem:[#allocation48_spill] sm:$0xff] }
 0x207   :  { %v1728_v17 = vunpack.c.l.bf16 %v12352_v16  ;;  %v1732_v26 = vunpack.c.h.bf16 %v12352_v16  ;;  %12378 = vst [vmem:[#allocation48_spill] sm:$0xff] %v10765_v40 }
 0x209   :  { %2219 = vmatpush1.bf16.msra.mxu0 %v12346_v18  ;;  %2262 = vmatpush1.bf16.msra.mxu1 %v12347_v19 }
 0x20a   :  { %2530 = vmatprep.subr.bf16.mxu0 %v10558_v20  ;;  %2573 = vmatprep.subr.bf16.mxu1 %v10560_v21 }
 0x27f   :  { %v1334_v29 = vpop.f32.mrb[28].mxu0  ;;  %v1377_v30 = vpop.f32.mrb[44].mxu1 }
 0x280   :  { %v1335_v44 = vadd.f32 %v1334_v29, %v10567_v27  ;;  %v1336_v49 = vpop.f32.mrb[29].mxu0  ;;  %v1379_v50 = vpop.f32.mrb[45].mxu1  ;;  %v1378_v58 = vadd.f32 %v1377_v30, %v10577_v46 }
 0x281   :  { %v1337_v34 = vadd.f32 %v1336_v49, %v10569_v28  ;;  %v1338_v32 = vpop.f32.mrb[30].mxu0  ;;  %v1381_v39 = vpop.f32.mrb[46].mxu1  ;;  %v1380_v36 = vadd.f32 %v1379_v50, %v10574_v0  ;;  %v12355_v49 = vld [vmem:[#allocation55_spill] sm:$0xff] }
 0x282   :  { %v7936_v37 = vmul.f32 -1.442695, %v1335_v44  ;;  %v1339_v45 = vadd.f32 %v1338_v32, %v10567_v27  ;;  %v1340_v42 = vpop.f32.mrb[31].mxu0  ;;  %v1383_v48 = vpop.f32.mrb[47].mxu1  ;;  %v1382_v1 = vadd.f32 %v1381_v39, %v10577_v46  ;;  %v1731_v50 = vunpack.c.l.bf16 %v12355_v49 }
 0x283   :  { %v7938_v41 = vmul.f32 -1.442695, %v1337_v34  ;;  %v1341_v56 = vadd.f32 %v1340_v42, %v10569_v28  ;;  %v1384_v57 = vadd.f32 %v1383_v48, %v10574_v0  ;;  %v7940_v59 = vmul.f32 -1.442695, %v1380_v36 }
 0x284   :  { %9390 = vpow2.f32 %v7936_v37  ;;  %v7937_v47 = vmul.f32 -1.442695, %v1339_v45  ;;  %v1733_v34 = vunpack.c.h.bf16 %v12354_v24  ;;  %v1734_v42 = vunpack.c.h.bf16 %v12353_v22 }
 0x285   :  { %9392 = vpow2.f32 %v7938_v41  ;;  %v7939_v51 = vmul.f32 -1.442695, %v1341_v56  ;;  %v7941_v60 = vmul.f32 -1.442695, %v1384_v57  ;;  %v1735_v48 = vunpack.c.h.bf16 %v12355_v49 }
 0x286   :  { %9394 = vpow2.f32 %v7937_v47 }
 0x287   :  { %9396 = vpow2.f32 %v7939_v51 }
 0x288   :  { %9398 = vtanh.f32 %v1378_v58 }
 0x289   :  { %9400 = vpow2.f32 %v7940_v59 }
 0x28a   :  { %9402 = vpow2.f32 %v7941_v60 }
 0x28e   :  { %v9391_v61 = vpop.eup %9390 }
 0x28f   :  { %v9393_v62 = vpop.eup %9392  ;;  %v1392_v63 = vadd.f32 1.0, %v9391_v61 }
 0x290   :  { %v1404_v2 = vadd.f32 1.0, %v9393_v62  ;;  %v9395_v3 = vpop.eup %9394 }
 0x291   :  { %9404 = vrcp.f32 %v1392_v63  ;;  %v1393_v4 = vadd.f32 1.0, %v9395_v3  ;;  %v9397_v5 = vpop.eup %9396 }
 0x292   :  { %9406 = vrcp.f32 %v1404_v2  ;;  %v1405_v6 = vadd.f32 1.0, %v9397_v5  ;;  %v9399_v7 = vpop.eup %9398 }
 0x293   :  { %9408 = vtanh.f32 %v1382_v1  ;;  %v9401_v8 = vpop.eup %9400 }
 0x294   :  { %9410 = vrcp.f32 %v1393_v4  ;;  %v9403_v9 = vpop.eup %9402  ;;  %v1418_v15 = vadd.f32 1.0, %v9401_v8 }
 0x295   :  { %9412 = vrcp.f32 %v1405_v6  ;;  %v1419_v19 = vadd.f32 1.0, %v9403_v9 }
 0x296   :  { %9414 = vrcp.f32 %v1418_v15 }
 0x297   :  { %9416 = vrcp.f32 %v1419_v19 }
 0x29b   :  { %v9405_v10 = vpop.eup %9404 }
 0x29c   :  { %v9407_v11 = vpop.eup %9406  ;;  %v1428_v12 = vmul.f32 %v9405_v10, %v9399_v7 }
 0x29d   :  { %v9409_v13 = vpop.eup %9408  ;;  %v1426_v14 = vmul.f32 0.0, %v9407_v11 }
 0x29e   :  { %v9411_v18 = vpop.eup %9410 }
 0x29f   :  { %v10587_v29 = vadd.f32 %v1428_v12, %v1426_v14  ;;  %v1429_v30 = vmul.f32 %v9411_v18, %v9409_v13  ;;  %v1676_v31 = vpop.f32.mrb[32].mxu0  ;;  %v1719_v44 = vpop.f32.mrb[48].mxu1 }
 0x2a0   :  { %v9413_v32 = vpop.eup %9412  ;;  %v1736_v39 = vadd.f32 %v1728_v17, %v1676_v31  ;;  %v1738_v37 = vadd.f32 %v1730_v23, %v1719_v44  ;;  %v1678_v53 = vpop.f32.mrb[33].mxu0 }
 0x2a1   :  { %v1721_v45 = vpop.f32.mrb[49].mxu1  ;;  %v1427_v41 = vmul.f32 0.0, %v9413_v32  ;;  %v1737_v56 = vadd.f32 %v1729_v25, %v1678_v53  ;;  %v1680_v51 = vpop.f32.mrb[34].mxu0  ;;  %9418 = vtanh.f32 %v10587_v29 }
 0x2a2   :  { %v1739_v47 = vadd.f32 %v1731_v50, %v1721_v45  ;;  %v1723_v36 = vpop.f32.mrb[50].mxu1  ;;  %v7974_v57 = vmul.f32 -1.442695, %v1736_v39  ;;  %v1740_v58 = vadd.f32 %v1732_v26, %v1680_v51  ;;  %v1682_v60 = vpop.f32.mrb[35].mxu0 }
 0x2a3   :  { %v1742_v59 = vadd.f32 %v1734_v42, %v1723_v36  ;;  %v1725_v61 = vpop.f32.mrb[51].mxu1  ;;  %v10594_v62 = vadd.f32 %v1429_v30, %v1427_v41  ;;  %v7976_v63 = vmul.f32 -1.442695, %v1737_v56  ;;  %v1741_v1 = vadd.f32 %v1733_v34, %v1682_v60  ;;  %v9415_v5 = vpop.eup %9414  ;;  %v10613_v60 = vld [vmem:[#allocation10 + $0x2c] ss:$16 sps:$4 sm:$0xff]  }
 0x2a4   :  { %9420 = vpow2.f32 %v7974_v57  ;;  %v7975_v2 = vmul.f32 -1.442695, %v1740_v58  ;;  %v1743_v3 = vadd.f32 %v1735_v48, %v1725_v61  ;;  %v9417_v6 = vpop.eup %9416  ;;  %v7978_v7 = vmul.f32 -1.442695, %v1739_v47  ;;  %v10605_v57 = vld [vmem:[#allocation10] ss:$16 sps:$4 sm:$0xff]  }
 0x2a5   :  { %9422 = vtanh.f32 %v10594_v62  ;;  %v7977_v4 = vmul.f32 -1.442695, %v1741_v1  ;;  %v10607_v58 = vld [vmem:[#allocation10 + $0x8] ss:$16 sps:$4 sm:$0xff]   ;;  %v10619_v61 = vld [vmem:[#allocation10 + $0x20] ss:$16 sps:$4 sm:$0xff]  }
 0x2a6   :  { %9424 = vpow2.f32 %v7976_v63  ;;  %v7979_v13 = vmul.f32 -1.442695, %v1743_v3  ;;  %v10621_v63 = vld [vmem:[#allocation10 + $0x28] ss:$16 sps:$4 sm:$0xff]   ;;  %v10625_v1 = vld [vmem:[#allocation10 + $0x44] ss:$16 sps:$4 sm:$0xff]  }
 0x2a7   :  { %9426 = vpow2.f32 %v7975_v2  ;;  %v10627_v2 = vld [vmem:[#allocation10 + $0x4c] ss:$16 sps:$4 sm:$0xff]   ;;  %v10633_v3 = vld [vmem:[#allocation10 + $0x40] ss:$16 sps:$4 sm:$0xff]  }
 0x2a8   :  { %9428 = vpow2.f32 %v7977_v4  ;;  %v10635_v4 = vld [vmem:[#allocation10 + $0x48] ss:$16 sps:$4 sm:$0xff]  }
 0x2a9   :  { %9430 = vtanh.f32 %v1738_v37 }
 0x2aa   :  { %9432 = vpow2.f32 %v7978_v7  ;;  %v10645_v7 = vld [vmem:[#allocation10 + $0x60] ss:$16 sps:$4 sm:$0xff]  }
 0x2ab   :  { %v9419_v8 = vpop.eup %9418 }
 0x2ac   :  { %v1434_v14 = vmul.f32 %v9419_v8, %v9415_v5  ;;  %v10639_v5 = vld [vmem:[#allocation10 + $0x64] ss:$16 sps:$4 sm:$0xff]   ;;  %v10647_v8 = vld [vmem:[#allocation10 + $0x68] ss:$16 sps:$4 sm:$0xff]  }
 0x2ae   :  { %v9421_v9 = vpop.eup %9420 }
 0x2af   :  { %v9423_v10 = vpop.eup %9422  ;;  %v1750_v11 = vadd.f32 1.0, %v9421_v9  ;;  %v10651_v9 = vld [vmem:[#allocation10 + $0x84] ss:$16 sps:$4 sm:$0xff]  }
 0x2b0   :  { %v9425_v12 = vpop.eup %9424  ;;  %v1435_v15 = vmul.f32 %v9423_v10, %v9417_v6  ;;  %v10641_v6 = vld [vmem:[#allocation10 + $0x6c] ss:$16 sps:$4 sm:$0xff]  }
 0x2b1   :  { %9434 = vrcp.f32 %v1750_v11  ;;  %v1762_v16 = vadd.f32 1.0, %v9425_v12  ;;  %v9427_v17 = vpop.eup %9426  ;;  %v10653_v10 = vld [vmem:[#allocation10 + $0x8c] ss:$16 sps:$4 sm:$0xff]   ;;  %v10657_v11 = vld [vmem:[#allocation10 + $0x80] ss:$16 sps:$4 sm:$0xff]  }
 0x2b2   :  { %9436 = vtanh.f32 %v1742_v59  ;;  %v1803_v18 = vpack.c.bf16 %v1435_v15, %v1434_v14  ;;  %v1751_v19 = vadd.f32 1.0, %v9427_v17  ;;  %v9429_v22 = vpop.eup %9428  ;;  %v10659_v12 = vld [vmem:[#allocation10 + $0x88] ss:$16 sps:$4 sm:$0xff]   ;;  %v10665_v14 = vld [vmem:[#allocation10 + $0xac] ss:$16 sps:$4 sm:$0xff]  }
 0x2b3   :  { %9438 = vrcp.f32 %v1762_v16  ;;  %v1763_v23 = vadd.f32 1.0, %v9429_v22  ;;  %v9431_v24 = vpop.eup %9430  ;;  %v10669_v15 = vld [vmem:[#allocation10 + $0xa0] ss:$16 sps:$4 sm:$0xff]   ;;  %v10671_v16 = vld [vmem:[#allocation10 + $0xa8] ss:$16 sps:$4 sm:$0xff]  }
 0x2b4   :  { %9440 = vpow2.f32 %v7979_v13  ;;  %2220 = vmatprep.mubr.bf16.mxu0 %v1803_v18  ;;  %2263 = vmatprep.mubr.bf16.mxu1 %v1803_v18  ;;  %v9433_v25 = vpop.eup %9432  ;;  %v10663_v13 = vld [vmem:[#allocation10 + $0xa4] ss:$16 sps:$4 sm:$0xff]   ;;  %v10677_v18 = vld [vmem:[#allocation10 + $0xcc] ss:$16 sps:$4 sm:$0xff]   ;;  %v10683_v22 = vld [vmem:[#allocation10 + $0xc8] ss:$16 sps:$4 sm:$0xff]  }
 0x2b5   :  { %9442 = vrcp.f32 %v1751_v19  ;;  %v1776_v32 = vadd.f32 1.0, %v9433_v25  ;;  %v10675_v17 = vld [vmem:[#allocation10 + $0xc4] ss:$16 sps:$4 sm:$0xff]   ;;  %v10681_v19 = vld [vmem:[#allocation10 + $0xc0] ss:$16 sps:$4 sm:$0xff]  }
 0x2b6   :  { %9444 = vrcp.f32 %v1763_v23  ;;  %v10687_v23 = vld [vmem:[#allocation10 + $0xe4] ss:$16 sps:$4 sm:$0xff]   ;;  %v10693_v25 = vld [vmem:[#allocation10 + $0xe0] ss:$16 sps:$4 sm:$0xff]  }
 0x2b7   :  { %9446 = vrcp.f32 %v1776_v32  ;;  %v10719_v32 = vld [vmem:[#allocation11 + $0x20] ss:$16 sps:$4 sm:$0xff]  }
 0x2b8   :  { %12363 = vst [vmem:[#allocation30_spill] sm:$0xff] %v10719_v32 }
 0x2bb   :  { %v9435_v26 = vpop.eup %9434 }
 0x2bc   :  { %v9437_v30 = vpop.eup %9436  ;;  %v1786_v31 = vmul.f32 %v9435_v26, %v9431_v24  ;;  %v10689_v24 = vld [vmem:[#allocation10 + $0xec] ss:$16 sps:$4 sm:$0xff]   ;;  %v10695_v26 = vld [vmem:[#allocation10 + $0xe8] ss:$16 sps:$4 sm:$0xff]  }
 0x2bd   :  { %v9439_v44 = vpop.eup %9438  ;;  %12356 = vst [vmem:[#allocation23_spill] sm:$0xff] %v10695_v26 }
 0x2be   :  { %v9441_v49 = vpop.eup %9440  ;;  %v1784_v50 = vmul.f32 %v9439_v44, %v10480_v43  ;;  %v10707_v44 = vld [vmem:[#allocation11] ss:$16 sps:$4 sm:$0xff]  }
 0x2bf   :  { %v9443_v34 = vpop.eup %9442  ;;  %v1777_v45 = vadd.f32 1.0, %v9441_v49  ;;  %12359 = vst [vmem:[#allocation26_spill] sm:$0xff] %v10707_v44  ;;  %v10709_v49 = vld [vmem:[#allocation11 + $0x8] ss:$16 sps:$4 sm:$0xff]  }
 0x2c0   :  { %v10598_v39 = vadd.f32 %v1786_v31, %v1784_v50  ;;  %v1787_v37 = vmul.f32 %v9443_v34, %v9437_v30  ;;  %v9445_v53 = vpop.eup %9444  ;;  %v10703_v30 = vld [vmem:[#allocation11 + $0x4] ss:$16 sps:$4 sm:$0xff]   ;;  %v10705_v31 = vld [vmem:[#allocation11 + $0xc] ss:$16 sps:$4 sm:$0xff]   ;;  %12360 = vst [vmem:[#allocation27_spill] sm:$0xff] %v10709_v49 }
 0x2c1   :  { %v1785_v42 = vmul.f32 %v9445_v53, %v10483_v38  ;;  %v9447_v41 = vpop.eup %9446  ;;  %v10611_v38 = vld [vmem:[#allocation10 + $0x24] ss:$16 sps:$4 sm:$0xff]   ;;  %12357 = vst [vmem:[#allocation24_spill] sm:$0xff] %v10703_v30  ;;  %12358 = vst [vmem:[#allocation25_spill] sm:$0xff] %v10705_v31  ;;  %v10717_v34 = vld [vmem:[#allocation11 + $0x2c] ss:$16 sps:$4 sm:$0xff]  }
 0x2c2   :  { %9448 = vtanh.f32 %v10598_v39  ;;  %v10715_v50 = vld [vmem:[#allocation11 + $0x24] ss:$16 sps:$4 sm:$0xff]   ;;  %12362 = vst [vmem:[#allocation29_spill] sm:$0xff] %v10717_v34 }
 0x2c3   :  { %v10602_v48 = vadd.f32 %v1787_v37, %v1785_v42  ;;  %9450 = vrcp.f32 %v1777_v45  ;;  %12361 = vst [vmem:[#allocation28_spill] sm:$0xff] %v10715_v50  ;;  %v10721_v37 = vld [vmem:[#allocation11 + $0x28] ss:$16 sps:$4 sm:$0xff]   ;;  %v10727_v53 = vld [vmem:[#allocation11 + $0x44] ss:$16 sps:$4 sm:$0xff]  }
 0x2c4   :  { %12364 = vst [vmem:[#allocation31_spill] sm:$0xff] %v10721_v37  ;;  %12365 = vst [vmem:[#allocation32_spill] sm:$0xff] %v10727_v53  ;;  %v10729_v45 = vld [vmem:[#allocation11 + $0x4c] ss:$16 sps:$4 sm:$0xff]   ;;  %v10731_v42 = vld [vmem:[#allocation11 + $0x40] ss:$16 sps:$4 sm:$0xff]  }
 0x2c5   :  { %9452 = vtanh.f32 %v10602_v48  ;;  %12366 = vst [vmem:[#allocation34_spill] sm:$0xff] %v10729_v45  ;;  %12367 = vst [vmem:[#allocation36_spill] sm:$0xff] %v10731_v42 }
 0x2cc   :  { %v9449_v56 = vpop.eup %9448 }
 0x2cd   :  { %v9451_v43 = vpop.eup %9450  ;;  %v1792_v51 = vmul.f32 %v9449_v56, %v9447_v41  ;;  %v10733_v41 = vld [vmem:[#allocation11 + $0x48] ss:$16 sps:$4 sm:$0xff]   ;;  %v10739_v56 = vld [vmem:[#allocation11 + $0x64] ss:$16 sps:$4 sm:$0xff]  }
 0x2ce   :  { %12368 = vst [vmem:[#allocation33_spill] sm:$0xff] %v10733_v41  ;;  %12369 = vst [vmem:[#allocation35_spill] sm:$0xff] %v10739_v56 }
 0x2cf   :  { %v9453_v47 = vpop.eup %9452 }
 0x2d0   :  { %v1793_v36 = vmul.f32 %v9453_v47, %v9451_v43  ;;  %v10741_v43 = vld [vmem:[#allocation11 + $0x6c] ss:$16 sps:$4 sm:$0xff]   ;;  %v10743_v47 = vld [vmem:[#allocation11 + $0x60] ss:$16 sps:$4 sm:$0xff]  }
 0x2d1   :  { %12370 = vst [vmem:[#allocation37_spill] sm:$0xff] %v10741_v43  ;;  %12371 = vst [vmem:[#allocation38_spill] sm:$0xff] %v10743_v47 }
 0x2d2   :  { %v10609_v59 = vpack.c.bf16 %v1793_v36, %v1792_v51  ;;  %v10745_v51 = vld [vmem:[#allocation11 + $0x68] ss:$16 sps:$4 sm:$0xff]   ;;  %v10751_v36 = vld [vmem:[#allocation11 + $0x84] ss:$16 sps:$4 sm:$0xff]  }
 0x2d3   :  { %12372 = vst [vmem:[#allocation39_spill] sm:$0xff] %v10745_v51  ;;  %12373 = vst [vmem:[#allocation40_spill] sm:$0xff] %v10751_v36 }
 0x2d4   :  { %2221 = vmatmul.mubr.bf16.vlgmr.msra.gmra.mrb[36].mxu0 %v10609_v59  ;;  %2264 = vmatmul.mubr.bf16.vlgmr.msra.gmra.mrb[52].mxu1 %v10609_v59 }
 0x2d5   :  { %2531 = vmatpush1.bf16.msra.mxu0 %v10605_v57  ;;  %2574 = vmatpush1.bf16.msra.mxu1 %v10607_v58 }
 0x2d6   :  { %2532 = vmatprep.subr.bf16.mxu0 %v10611_v38  ;;  %2575 = vmatprep.subr.bf16.mxu1 %v10613_v60 }
 0x2d7   :  { %2562 = vmatprep.mubr.bf16.mxu0 %v12321_v33  ;;  %2605 = vmatprep.mubr.bf16.mxu1 %v12321_v33 }
 0x2d9   :  { %2533 = vmatpush1.bf16.msra.mxu0 %v10619_v61  ;;  %2576 = vmatpush1.bf16.msra.mxu1 %v10621_v63 }
 0x2da   :  { %2534 = vmatprep.subr.bf16.mxu0 %v10625_v1  ;;  %2577 = vmatprep.subr.bf16.mxu1 %v10627_v2 }
 0x2dd   :  { %2535 = vmatpush1.bf16.msra.mxu0 %v10633_v3  ;;  %2578 = vmatpush1.bf16.msra.mxu1 %v10635_v4 }
 0x2de   :  { %2536 = vmatprep.subr.bf16.mxu0 %v10639_v5  ;;  %2579 = vmatprep.subr.bf16.mxu1 %v10641_v6 }
 0x2e1   :  { %2537 = vmatpush1.bf16.msra.mxu0 %v10645_v7  ;;  %2580 = vmatpush1.bf16.msra.mxu1 %v10647_v8 }
 0x2e2   :  { %2538 = vmatprep.subr.bf16.mxu0 %v10651_v9  ;;  %2581 = vmatprep.subr.bf16.mxu1 %v10653_v10 }
 0x2e5   :  { %2539 = vmatpush1.bf16.msra.mxu0 %v10657_v11  ;;  %2582 = vmatpush1.bf16.msra.mxu1 %v10659_v12 }
 0x2e6   :  { %2540 = vmatprep.subr.bf16.mxu0 %v10663_v13  ;;  %2583 = vmatprep.subr.bf16.mxu1 %v10665_v14 }
 0x2e9   :  { %2541 = vmatpush1.bf16.msra.mxu0 %v10669_v15  ;;  %2584 = vmatpush1.bf16.msra.mxu1 %v10671_v16 }
 0x2ea   :  { %2542 = vmatprep.subr.bf16.mxu0 %v10675_v17  ;;  %2585 = vmatprep.subr.bf16.mxu1 %v10677_v18 }
 0x2ed   :  { %2543 = vmatpush1.bf16.msra.mxu0 %v10681_v19  ;;  %2586 = vmatpush1.bf16.msra.mxu1 %v10683_v22 }
 0x2ee   :  { %2544 = vmatprep.subr.bf16.mxu0 %v10687_v23  ;;  %2587 = vmatprep.subr.bf16.mxu1 %v10689_v24 }
 0x2f1   :  { %2545 = vmatpush1.bf16.msra.mxu0 %v10693_v25  ;;  %2588 = vmatpush1.bf16.msra.mxu1 %v10695_v26 }
 0x2f2   :  { %3076 = vmatprep.subr.bf16.mxu0 %v10703_v30  ;;  %3119 = vmatprep.subr.bf16.mxu1 %v10705_v31 }
 0x2f4   :  { %2563 = vmatmul.mubr.bf16.vlgmr.msra.gmra.mrb[40].mxu0 %v10609_v59  ;;  %2606 = vmatmul.mubr.bf16.vlgmr.msra.gmra.mrb[56].mxu1 %v10609_v59  ;;  %v10753_v59 = vld [vmem:[#allocation11 + $0x8c] ss:$16 sps:$4 sm:$0xff]  }
 0x2f5   :  { %3077 = vmatpush1.bf16.msra.mxu0 %v10707_v44  ;;  %3120 = vmatpush1.bf16.msra.mxu1 %v10709_v49  ;;  %12374 = vst [vmem:[#allocation41_spill] sm:$0xff] %v10753_v59 }
 0x2f6   :  { %3078 = vmatprep.subr.bf16.mxu0 %v10715_v50  ;;  %3121 = vmatprep.subr.bf16.mxu1 %v10717_v34 }
 0x2f9   :  { %3079 = vmatpush1.bf16.msra.mxu0 %v10719_v32  ;;  %3122 = vmatpush1.bf16.msra.mxu1 %v10721_v37 }
 0x2fa   :  { %3080 = vmatprep.subr.bf16.mxu0 %v10727_v53  ;;  %3123 = vmatprep.subr.bf16.mxu1 %v10729_v45 }
 0x2fd   :  { %3081 = vmatpush1.bf16.msra.mxu0 %v10731_v42  ;;  %3124 = vmatpush1.bf16.msra.mxu1 %v10733_v41 }
 0x2fe   :  { %3082 = vmatprep.subr.bf16.mxu0 %v10739_v56  ;;  %3125 = vmatprep.subr.bf16.mxu1 %v10741_v43  ;;  %v10858_v43 = vld [vmem:[#allocation11 + $0x1ac] ss:$16 sps:$4 sm:$0xff]  }
 0x2ff   :  { %12410 = vst [vmem:[#allocation101_spill] sm:$0xff] %v10858_v43 }
 0x301   :  { %3083 = vmatpush1.bf16.msra.mxu0 %v10743_v47  ;;  %3126 = vmatpush1.bf16.msra.mxu1 %v10745_v51  ;;  %v10769_v51 = vld [vmem:[#allocation11 + $0xa8] ss:$16 sps:$4 sm:$0xff]   ;;  %v10855_v47 = vld [vmem:[#allocation11 + $0x1a4] ss:$16 sps:$4 sm:$0xff]  }
 0x302   :  { %3084 = vmatprep.subr.bf16.mxu0 %v10751_v36  ;;  %3127 = vmatprep.subr.bf16.mxu1 %v10753_v59  ;;  %12380 = vst [vmem:[#allocation50_spill] sm:$0xff] %v10769_v51  ;;  %v10775_v59 = vld [vmem:[#allocation11 + $0xc4] ss:$16 sps:$4 sm:$0xff]   ;;  %v10781_v36 = vld [vmem:[#allocation11 + $0xc8] ss:$16 sps:$4 sm:$0xff]   ;;  %12409 = vst [vmem:[#allocation100_spill] sm:$0xff] %v10855_v47 }
 0x303   :  { %12381 = vst [vmem:[#allocation55_spill] sm:$0xff] %v10775_v59  ;;  %12384 = vst [vmem:[#allocation75_spill] sm:$0xff] %v10781_v36 }
 0x305   :  { %3085 = vmatpush1.bf16.msra.mxu0 %v10755_v52  ;;  %3128 = vmatpush1.bf16.msra.mxu1 %v10757_v54  ;;  %v10777_v52 = vld [vmem:[#allocation11 + $0xcc] ss:$16 sps:$4 sm:$0xff]   ;;  %v10779_v54 = vld [vmem:[#allocation11 + $0xc0] ss:$16 sps:$4 sm:$0xff]  }
 0x306   :  { %3086 = vmatprep.subr.bf16.mxu0 %v10763_v35  ;;  %3129 = vmatprep.subr.bf16.mxu1 %v10765_v40  ;;  %12382 = vst [vmem:[#allocation73_spill] sm:$0xff] %v10777_v52  ;;  %12383 = vst [vmem:[#allocation74_spill] sm:$0xff] %v10779_v54  ;;  %v10787_v40 = vld [vmem:[#allocation11 + $0xe4] ss:$16 sps:$4 sm:$0xff]   ;;  %v10793_v35 = vld [vmem:[#allocation11 + $0xe8] ss:$16 sps:$4 sm:$0xff]  }
 0x307   :  { %12385 = vst [vmem:[#allocation76_spill] sm:$0xff] %v10787_v40  ;;  %12388 = vst [vmem:[#allocation79_spill] sm:$0xff] %v10793_v35 }
 0x309   :  { %3087 = vmatpush1.bf16.msra.mxu0 %v10767_v55  ;;  %3130 = vmatpush1.bf16.msra.mxu1 %v10769_v51  ;;  %v10789_v55 = vld [vmem:[#allocation11 + $0xec] ss:$16 sps:$4 sm:$0xff]   ;;  %v10791_v51 = vld [vmem:[#allocation11 + $0xe0] ss:$16 sps:$4 sm:$0xff]  }
 0x30a   :  { %3088 = vmatprep.subr.bf16.mxu0 %v10775_v59  ;;  %3131 = vmatprep.subr.bf16.mxu1 %v10777_v52  ;;  %12386 = vst [vmem:[#allocation77_spill] sm:$0xff] %v10789_v55  ;;  %12387 = vst [vmem:[#allocation78_spill] sm:$0xff] %v10791_v51  ;;  %v10799_v52 = vld [vmem:[#allocation11 + $0x104] ss:$16 sps:$4 sm:$0xff]   ;;  %v10805_v59 = vld [vmem:[#allocation11 + $0x108] ss:$16 sps:$4 sm:$0xff]  }
 0x30b   :  { %12389 = vst [vmem:[#allocation80_spill] sm:$0xff] %v10799_v52  ;;  %12392 = vst [vmem:[#allocation83_spill] sm:$0xff] %v10805_v59 }
 0x30d   :  { %3089 = vmatpush1.bf16.msra.mxu0 %v10779_v54  ;;  %3132 = vmatpush1.bf16.msra.mxu1 %v10781_v36  ;;  %v10801_v54 = vld [vmem:[#allocation11 + $0x10c] ss:$16 sps:$4 sm:$0xff]   ;;  %v10803_v36 = vld [vmem:[#allocation11 + $0x100] ss:$16 sps:$4 sm:$0xff]  }
 0x30e   :  { %3090 = vmatprep.subr.bf16.mxu0 %v10787_v40  ;;  %3133 = vmatprep.subr.bf16.mxu1 %v10789_v55  ;;  %12390 = vst [vmem:[#allocation81_spill] sm:$0xff] %v10801_v54  ;;  %12391 = vst [vmem:[#allocation82_spill] sm:$0xff] %v10803_v36  ;;  %v10811_v55 = vld [vmem:[#allocation11 + $0x124] ss:$16 sps:$4 sm:$0xff]   ;;  %v10817_v40 = vld [vmem:[#allocation11 + $0x128] ss:$16 sps:$4 sm:$0xff]  }
 0x30f   :  { %12393 = vst [vmem:[#allocation84_spill] sm:$0xff] %v10811_v55  ;;  %12396 = vst [vmem:[#allocation87_spill] sm:$0xff] %v10817_v40 }
 0x311   :  { %3091 = vmatpush1.bf16.msra.mxu0 %v10791_v51  ;;  %3134 = vmatpush1.bf16.msra.mxu1 %v10793_v35  ;;  %v10813_v51 = vld [vmem:[#allocation11 + $0x12c] ss:$16 sps:$4 sm:$0xff]   ;;  %v10815_v35 = vld [vmem:[#allocation11 + $0x120] ss:$16 sps:$4 sm:$0xff]  }
 0x312   :  { %3092 = vmatprep.subr.bf16.mxu0 %v10799_v52  ;;  %3135 = vmatprep.subr.bf16.mxu1 %v10801_v54  ;;  %12394 = vst [vmem:[#allocation85_spill] sm:$0xff] %v10813_v51  ;;  %12395 = vst [vmem:[#allocation86_spill] sm:$0xff] %v10815_v35  ;;  %v10823_v54 = vld [vmem:[#allocation11 + $0x144] ss:$16 sps:$4 sm:$0xff]   ;;  %v10829_v52 = vld [vmem:[#allocation11 + $0x148] ss:$16 sps:$4 sm:$0xff]  }
 0x313   :  { %12397 = vst [vmem:[#allocation88_spill] sm:$0xff] %v10823_v54  ;;  %12400 = vst [vmem:[#allocation91_spill] sm:$0xff] %v10829_v52 }
 0x315   :  { %3093 = vmatpush1.bf16.msra.mxu0 %v10803_v36  ;;  %3136 = vmatpush1.bf16.msra.mxu1 %v10805_v59  ;;  %v10825_v36 = vld [vmem:[#allocation11 + $0x14c] ss:$16 sps:$4 sm:$0xff]   ;;  %v10827_v59 = vld [vmem:[#allocation11 + $0x140] ss:$16 sps:$4 sm:$0xff]  }
 0x316   :  { %3094 = vmatprep.subr.bf16.mxu0 %v10811_v55  ;;  %3137 = vmatprep.subr.bf16.mxu1 %v10813_v51  ;;  %12398 = vst [vmem:[#allocation89_spill] sm:$0xff] %v10825_v36  ;;  %12399 = vst [vmem:[#allocation90_spill] sm:$0xff] %v10827_v59  ;;  %v10835_v51 = vld [vmem:[#allocation11 + $0x164] ss:$16 sps:$4 sm:$0xff]   ;;  %v10841_v55 = vld [vmem:[#allocation11 + $0x168] ss:$16 sps:$4 sm:$0xff]  }
 0x317   :  { %12401 = vst [vmem:[#allocation92_spill] sm:$0xff] %v10835_v51  ;;  %12404 = vst [vmem:[#allocation95_spill] sm:$0xff] %v10841_v55 }
 0x319   :  { %3095 = vmatpush1.bf16.msra.mxu0 %v10815_v35  ;;  %3138 = vmatpush1.bf16.msra.mxu1 %v10817_v40  ;;  %v10837_v35 = vld [vmem:[#allocation11 + $0x16c] ss:$16 sps:$4 sm:$0xff]   ;;  %v10839_v40 = vld [vmem:[#allocation11 + $0x160] ss:$16 sps:$4 sm:$0xff]  }
 0x31a   :  { %3096 = vmatprep.subr.bf16.mxu0 %v10823_v54  ;;  %3139 = vmatprep.subr.bf16.mxu1 %v10825_v36  ;;  %12402 = vst [vmem:[#allocation93_spill] sm:$0xff] %v10837_v35  ;;  %12403 = vst [vmem:[#allocation94_spill] sm:$0xff] %v10839_v40  ;;  %v10847_v36 = vld [vmem:[#allocation11 + $0x180] ss:$16 sps:$4 sm:$0xff]   ;;  %v10853_v54 = vld [vmem:[#allocation11 + $0x18c] ss:$16 sps:$4 sm:$0xff]  }
 0x31b   :  { %12405 = vst [vmem:[#allocation96_spill] sm:$0xff] %v10847_v36  ;;  %12408 = vst [vmem:[#allocation99_spill] sm:$0xff] %v10853_v54 }
 0x31d   :  { %3097 = vmatpush1.bf16.msra.mxu0 %v10827_v59  ;;  %3140 = vmatpush1.bf16.msra.mxu1 %v10829_v52  ;;  %v10849_v59 = vld [vmem:[#allocation11 + $0x184] ss:$16 sps:$4 sm:$0xff]   ;;  %v10851_v52 = vld [vmem:[#allocation11 + $0x188] ss:$16 sps:$4 sm:$0xff]  }
 0x31e   :  { %3098 = vmatprep.subr.bf16.mxu0 %v10835_v51  ;;  %3141 = vmatprep.subr.bf16.mxu1 %v10837_v35  ;;  %12406 = vst [vmem:[#allocation97_spill] sm:$0xff] %v10849_v59  ;;  %12407 = vst [vmem:[#allocation98_spill] sm:$0xff] %v10851_v52  ;;  %v10869_v35 = vld [vmem:[#allocation11 + $0x1c4] ss:$16 sps:$4 sm:$0xff]   ;;  %v10871_v51 = vld [vmem:[#allocation11 + $0x1cc] ss:$16 sps:$4 sm:$0xff]  }
 0x31f   :  { %12413 = vst [vmem:[#allocation104_spill] sm:$0xff] %v10869_v35  ;;  %12414 = vst [vmem:[#allocation105_spill] sm:$0xff] %v10871_v51 }
 0x321   :  { %3099 = vmatpush1.bf16.msra.mxu0 %v10839_v40  ;;  %3142 = vmatpush1.bf16.msra.mxu1 %v10841_v55  ;;  %v10863_v55 = vld [vmem:[#allocation11 + $0x1a0] ss:$16 sps:$4 sm:$0xff]   ;;  %v10865_v40 = vld [vmem:[#allocation11 + $0x1a8] ss:$16 sps:$4 sm:$0xff]  }
 0x322   :  { %3100 = vmatprep.subr.bf16.mxu0 %v10849_v59  ;;  %3143 = vmatprep.subr.bf16.mxu1 %v10853_v54  ;;  %12411 = vst [vmem:[#allocation102_spill] sm:$0xff] %v10863_v55  ;;  %12412 = vst [vmem:[#allocation103_spill] sm:$0xff] %v10865_v40  ;;  %v10875_v54 = vld [vmem:[#allocation11 + $0x1c0] ss:$16 sps:$4 sm:$0xff]  }
 0x323   :  { %12415 = vst [vmem:[#allocation106_spill] sm:$0xff] %v10875_v54 }
 0x325   :  { %3101 = vmatpush1.bf16.msra.mxu0 %v10847_v36  ;;  %3144 = vmatpush1.bf16.msra.mxu1 %v10851_v52  ;;  %v10877_v36 = vld [vmem:[#allocation11 + $0x1c8] ss:$16 sps:$4 sm:$0xff]   ;;  %v10881_v52 = vld [vmem:[#allocation11 + $0x1e4] ss:$16 sps:$4 sm:$0xff]  }
 0x326   :  { %3102 = vmatprep.subr.bf16.mxu0 %v10855_v47  ;;  %3145 = vmatprep.subr.bf16.mxu1 %v10858_v43  ;;  %12416 = vst [vmem:[#allocation107_spill] sm:$0xff] %v10877_v36  ;;  %12417 = vst [vmem:[#allocation108_spill] sm:$0xff] %v10881_v52  ;;  %v10883_v47 = vld [vmem:[#allocation11 + $0x1ec] ss:$16 sps:$4 sm:$0xff]   ;;  %v10887_v43 = vld [vmem:[#allocation11 + $0x1e0] ss:$16 sps:$4 sm:$0xff]  }
 0x327   :  { %12418 = vst [vmem:[#allocation109_spill] sm:$0xff] %v10883_v47  ;;  %12419 = vst [vmem:[#allocation110_spill] sm:$0xff] %v10887_v43 }
 0x329   :  { %3103 = vmatpush1.bf16.msra.mxu0 %v10863_v55  ;;  %3146 = vmatpush1.bf16.msra.mxu1 %v10865_v40  ;;  %v10889_v55 = vld [vmem:[#allocation11 + $0x1e8] ss:$16 sps:$4 sm:$0xff]  }
 0x32a   :  { %3104 = vmatprep.subr.bf16.mxu0 %v10869_v35  ;;  %3147 = vmatprep.subr.bf16.mxu1 %v10871_v51  ;;  %12420 = vst [vmem:[#allocation111_spill] sm:$0xff] %v10889_v55 }
 0x32d   :  { %3105 = vmatpush1.bf16.msra.mxu0 %v10875_v54  ;;  %3148 = vmatpush1.bf16.msra.mxu1 %v10877_v36 }
 0x32e   :  { %3106 = vmatprep.subr.bf16.mxu0 %v10881_v52  ;;  %3149 = vmatprep.subr.bf16.mxu1 %v10883_v47 }
 0x331   :  { %3107 = vmatpush1.bf16.msra.mxu0 %v10887_v43  ;;  %3150 = vmatpush1.bf16.msra.mxu1 %v10889_v55 }
 0x332   :  { %3418 = vmatprep.subr.bf16.mxu0 %v10558_v20  ;;  %3461 = vmatprep.subr.bf16.mxu1 %v10560_v21 }
 0x3a7   :  { %v2222_v51 = vpop.f32.mrb[36].mxu0  ;;  %v2265_v54 = vpop.f32.mrb[52].mxu1 }
 0x3a8   :  { %v2223_v36 = vadd.f32 %v2222_v51, %v10567_v27  ;;  %v2224_v35 = vpop.f32.mrb[37].mxu0  ;;  %v2267_v40 = vpop.f32.mrb[53].mxu1  ;;  %v2266_v51 = vadd.f32 %v2265_v54, %v10577_v46 }
 0x3a9   :  { %v2225_v59 = vadd.f32 %v2224_v35, %v10569_v28  ;;  %v2226_v56 = vpop.f32.mrb[38].mxu0  ;;  %v2269_v52 = vpop.f32.mrb[54].mxu1  ;;  %v2268_v35 = vadd.f32 %v2267_v40, %v10574_v0 }
 0x3aa   :  { %v8044_v41 = vmul.f32 -1.442695, %v2223_v36  ;;  %v2227_v47 = vadd.f32 %v2226_v56, %v10567_v27  ;;  %v2228_v43 = vpop.f32.mrb[39].mxu0  ;;  %v2271_v42 = vpop.f32.mrb[55].mxu1  ;;  %v2270_v56 = vadd.f32 %v2269_v52, %v10577_v46 }
 0x3ab   :  { %v8046_v55 = vmul.f32 -1.442695, %v2225_v59  ;;  %v2229_v20 = vadd.f32 %v2228_v43, %v10569_v28  ;;  %v8048_v43 = vmul.f32 -1.442695, %v2268_v35  ;;  %v12421_v35 = vld [vmem:[#allocation51_spill] sm:$0xff] }
 0x3ac   :  { %9454 = vpow2.f32 %v8044_v41  ;;  %v8045_v21 = vmul.f32 -1.442695, %v2227_v47  ;;  %v2272_v41 = vadd.f32 %v2271_v42, %v10574_v0  ;;  %v2616_v42 = vunpack.c.l.bf16 %v12421_v35  ;;  %v12424_v0 = vld [vmem:[#allocation59_spill] sm:$0xff] }
 0x3ad   :  { %9456 = vpow2.f32 %v8046_v55  ;;  %v8047_v45 = vmul.f32 -1.442695, %v2229_v20  ;;  %v2623_v50 = vunpack.c.h.bf16 %v12424_v0 }
 0x3ae   :  { %9458 = vpow2.f32 %v8045_v21  ;;  %v8049_v40 = vmul.f32 -1.442695, %v2272_v41 }
 0x3af   :  { %9460 = vpow2.f32 %v8047_v45 }
 0x3b0   :  { %9462 = vtanh.f32 %v2266_v51 }
 0x3b6   :  { %v9455_v53 = vpop.eup %9454 }
 0x3b7   :  { %v9457_v37 = vpop.eup %9456  ;;  %v2280_v36 = vadd.f32 1.0, %v9455_v53 }
 0x3b8   :  { %v2292_v27 = vadd.f32 1.0, %v9457_v37  ;;  %v9459_v59 = vpop.eup %9458 }
 0x3b9   :  { %9464 = vrcp.f32 %v2280_v36  ;;  %v2281_v55 = vadd.f32 1.0, %v9459_v59  ;;  %v9461_v47 = vpop.eup %9460 }
 0x3ba   :  { %9466 = vrcp.f32 %v2292_v27  ;;  %v2293_v54 = vadd.f32 1.0, %v9461_v47  ;;  %v9463_v53 = vpop.eup %9462  ;;  %v12422_v27 = vld [vmem:[#allocation57_spill] sm:$0xff] }
 0x3bb   :  { %9468 = vtanh.f32 %v2270_v56  ;;  %v2618_v36 = vunpack.c.l.bf16 %v12422_v27  ;;  %v2620_v56 = vunpack.c.h.bf16 %v12421_v35  ;;  %v2622_v32 = vunpack.c.h.bf16 %v12422_v27 }
 0x3bc   :  { %9470 = vrcp.f32 %v2281_v55 }
 0x3bd   :  { %9472 = vpow2.f32 %v8048_v43 }
 0x3be   :  { %9474 = vrcp.f32 %v2293_v54  ;;  %v12423_v54 = vld [vmem:[#allocation52_spill] sm:$0xff] }
 0x3bf   :  { %9476 = vpow2.f32 %v8049_v40  ;;  %v2617_v40 = vunpack.c.l.bf16 %v12423_v54  ;;  %v2621_v34 = vunpack.c.h.bf16 %v12423_v54 }
 0x3c3   :  { %v9465_v45 = vpop.eup %9464 }
 0x3c4   :  { %v9467_v52 = vpop.eup %9466  ;;  %v2316_v20 = vmul.f32 %v9465_v45, %v9463_v53  ;;  %v2619_v53 = vunpack.c.l.bf16 %v12424_v0 }
 0x3c5   :  { %v9469_v37 = vpop.eup %9468  ;;  %v2314_v21 = vmul.f32 %v9467_v52, %v10587_v29 }
 0x3c6   :  { %v9471_v51 = vpop.eup %9470 }
 0x3c7   :  { %v9473_v59 = vpop.eup %9472  ;;  %v10909_v55 = vadd.f32 %v2316_v20, %v2314_v21  ;;  %v2317_v43 = vmul.f32 %v9471_v51, %v9469_v37  ;;  %v2564_v41 = vpop.f32.mrb[40].mxu0 }
 0x3c8   :  { %v2607_v47 = vpop.f32.mrb[56].mxu1  ;;  %v9475_v45 = vpop.eup %9474  ;;  %v2624_v46 = vadd.f32 %v2616_v42, %v2564_v41  ;;  %v2306_v49 = vadd.f32 1.0, %v9473_v59 }
 0x3c9   :  { %v2626_v29 = vadd.f32 %v2618_v36, %v2607_v47  ;;  %v2566_v52 = vpop.f32.mrb[41].mxu0  ;;  %v2609_v28 = vpop.f32.mrb[57].mxu1  ;;  %v2315_v35 = vmul.f32 %v9475_v45, %v10594_v62 }
 0x3ca   :  { %v2625_v20 = vadd.f32 %v2617_v40, %v2566_v52  ;;  %v2627_v21 = vadd.f32 %v2619_v53, %v2609_v28  ;;  %v2568_v37 = vpop.f32.mrb[42].mxu0  ;;  %v2611_v51 = vpop.f32.mrb[58].mxu1  ;;  %v8082_v44 = vmul.f32 -1.442695, %v2624_v46 }
 0x3cb   :  { %v2628_v31 = vadd.f32 %v2620_v56, %v2568_v37  ;;  %v2630_v30 = vadd.f32 %v2622_v32, %v2611_v51  ;;  %v2570_v42 = vpop.f32.mrb[43].mxu0  ;;  %v2613_v36 = vpop.f32.mrb[59].mxu1  ;;  %v10917_v47 = vadd.f32 %v2317_v43, %v2315_v35 }
 0x3cc   :  { %v9477_v41 = vpop.eup %9476  ;;  %v8084_v27 = vmul.f32 -1.442695, %v2625_v20  ;;  %v2629_v26 = vadd.f32 %v2621_v34, %v2570_v42  ;;  %9478 = vpow2.f32 %v8082_v44  ;;  %v2631_v62 = vadd.f32 %v2623_v50, %v2613_v36 }
 0x3cd   :  { %v8083_v54 = vmul.f32 -1.442695, %v2628_v31  ;;  %v2307_v40 = vadd.f32 1.0, %v9477_v41  ;;  %v8086_v0 = vmul.f32 -1.442695, %v2627_v21 }
 0x3ce   :  { %9480 = vpow2.f32 %v8084_v27  ;;  %v8085_v28 = vmul.f32 -1.442695, %v2629_v26  ;;  %v8087_v44 = vmul.f32 -1.442695, %v2631_v62 }
 0x3cf   :  { %9482 = vrcp.f32 %v2306_v49 }
 0x3d0   :  { %9484 = vpow2.f32 %v8083_v54 }
 0x3d1   :  { %9486 = vtanh.f32 %v10909_v55 }
 0x3d2   :  { %9488 = vpow2.f32 %v8085_v28 }
 0x3d3   :  { %9490 = vrcp.f32 %v2307_v40 }
 0x3d4   :  { %9492 = vtanh.f32 %v10917_v47 }
 0x3d5   :  { %9494 = vtanh.f32 %v2626_v29 }
 0x3d6   :  { %v9479_v46 = vpop.eup %9478  ;;  %9496 = vpow2.f32 %v8086_v0 }
 0x3d7   :  { %v2638_v56 = vadd.f32 1.0, %v9479_v46  ;;  %9498 = vtanh.f32 %v2630_v30 }
 0x3d8   :  { %v9481_v32 = vpop.eup %9480 }
 0x3d9   :  { %v9483_v31 = vpop.eup %9482  ;;  %v2650_v50 = vadd.f32 1.0, %v9481_v32  ;;  %9500 = vrcp.f32 %v2638_v56 }
 0x3da   :  { %v9485_v26 = vpop.eup %9484 }
 0x3db   :  { %v9487_v49 = vpop.eup %9486  ;;  %9502 = vrcp.f32 %v2650_v50  ;;  %v2639_v34 = vadd.f32 1.0, %v9485_v26 }
 0x3dc   :  { %v9489_v59 = vpop.eup %9488  ;;  %9504 = vpow2.f32 %v8087_v44  ;;  %v2322_v29 = vmul.f32 %v9487_v49, %v9483_v31 }
 0x3dd   :  { %v9491_v43 = vpop.eup %9490  ;;  %9506 = vrcp.f32 %v2639_v34  ;;  %v2651_v53 = vadd.f32 1.0, %v9489_v59  ;;  %v12455_v34 = vld [vmem:[#allocation77_spill] sm:$0xff]  ;;  %v12456_v59 = vld [vmem:[#allocation78_spill] sm:$0xff] }
 0x3de   :  { %v9493_v45 = vpop.eup %9492 }
 0x3df   :  { %9508 = vrcp.f32 %v2651_v53  ;;  %v2323_v52 = vmul.f32 %v9493_v45, %v9491_v43  ;;  %v9495_v35 = vpop.eup %9494  ;;  %v12457_v43 = vld [vmem:[#allocation79_spill] sm:$0xff]  ;;  %v12458_v53 = vld [vmem:[#allocation80_spill] sm:$0xff]  ;;  %v12459_v45 = vld [vmem:[#allocation81_spill] sm:$0xff] }
 0x3e0   :  { %v9497_v21 = vpop.eup %9496 }
 0x3e1   :  { %v2691_v20 = vpack.c.bf16 %v2323_v52, %v2322_v29  ;;  %v9499_v37 = vpop.eup %9498  ;;  %v2664_v54 = vadd.f32 1.0, %v9497_v21  ;;  %v12460_v29 = vld [vmem:[#allocation82_spill] sm:$0xff]  ;;  %v12461_v52 = vld [vmem:[#allocation83_spill] sm:$0xff] }
 0x3e2   :  { %v12464_v21 = vld [vmem:[#allocation86_spill] sm:$0xff] }
 0x3e3   :  { %3108 = vmatprep.mubr.bf16.mxu0 %v2691_v20  ;;  %3151 = vmatprep.mubr.bf16.mxu1 %v2691_v20  ;;  %v9501_v30 = vpop.eup %9500  ;;  %9510 = vrcp.f32 %v2664_v54  ;;  %v12463_v20 = vld [vmem:[#allocation85_spill] sm:$0xff]  ;;  %v12472_v54 = vld [vmem:[#allocation94_spill] sm:$0xff] }
 0x3e4   :  { %v2674_v42 = vmul.f32 %v9501_v30, %v9495_v35  ;;  %v12462_v35 = vld [vmem:[#allocation84_spill] sm:$0xff] }
 0x3e5   :  { %v9503_v51 = vpop.eup %9502  ;;  %v12466_v30 = vld [vmem:[#allocation88_spill] sm:$0xff] }
 0x3e6   :  { %v9505_v36 = vpop.eup %9504  ;;  %v2672_v41 = vmul.f32 %v9503_v51, %v10598_v39  ;;  %v12467_v51 = vld [vmem:[#allocation89_spill] sm:$0xff] }
 0x3e7   :  { %v9507_v27 = vpop.eup %9506  ;;  %v2665_v0 = vadd.f32 1.0, %v9505_v36  ;;  %v12469_v36 = vld [vmem:[#allocation91_spill] sm:$0xff] }
 0x3e8   :  { %v10922_v62 = vadd.f32 %v2674_v42, %v2672_v41  ;;  %v2675_v28 = vmul.f32 %v9507_v27, %v9499_v37  ;;  %v12465_v37 = vld [vmem:[#allocation87_spill] sm:$0xff]  ;;  %v12468_v42 = vld [vmem:[#allocation90_spill] sm:$0xff]  ;;  %v12470_v41 = vld [vmem:[#allocation92_spill] sm:$0xff] }
 0x3e9   :  { %v9509_v40 = vpop.eup %9508  ;;  %v12471_v27 = vld [vmem:[#allocation93_spill] sm:$0xff] }
 0x3ea   :  { %v2673_v46 = vmul.f32 %v9509_v40, %v10602_v48  ;;  %9512 = vtanh.f32 %v10922_v62  ;;  %v12425_v48 = vld [vmem:[#allocation23_spill] sm:$0xff]  ;;  %v12474_v40 = vld [vmem:[#allocation97_spill] sm:$0xff] }
 0x3eb   :  { %9514 = vrcp.f32 %v2665_v0  ;;  %v12475_v0 = vld [vmem:[#allocation99_spill] sm:$0xff] }
 0x3ec   :  { %v10926_v32 = vadd.f32 %v2675_v28, %v2673_v46  ;;  %v12473_v28 = vld [vmem:[#allocation95_spill] sm:$0xff]  ;;  %v12476_v46 = vld [vmem:[#allocation96_spill] sm:$0xff] }
 0x3ed   :  { %v9511_v56 = vpop.eup %9510 }
 0x3ee   :  { %9516 = vtanh.f32 %v10926_v32 }
 0x3f4   :  { %v9513_v44 = vpop.eup %9512 }
 0x3f5   :  { %v9515_v39 = vpop.eup %9514  ;;  %v2680_v50 = vmul.f32 %v9513_v44, %v9511_v56  ;;  %v12477_v56 = vld [vmem:[#allocation98_spill] sm:$0xff]  ;;  %v12478_v44 = vld [vmem:[#allocation100_spill] sm:$0xff] }
 0x3f8   :  { %v9517_v31 = vpop.eup %9516 }
 0x3f9   :  { %v2681_v26 = vmul.f32 %v9517_v31, %v9515_v39  ;;  %v12479_v39 = vld [vmem:[#allocation101_spill] sm:$0xff]  ;;  %v12480_v31 = vld [vmem:[#allocation102_spill] sm:$0xff] }
 0x3fb   :  { %v2690_v49 = vpack.c.bf16 %v2681_v26, %v2680_v50  ;;  %v12481_v50 = vld [vmem:[#allocation103_spill] sm:$0xff]  ;;  %v12482_v26 = vld [vmem:[#allocation104_spill] sm:$0xff] }
 0x3fd   :  { %3109 = vmatmul.mubr.bf16.vlgmr.msra.gmra.mrb[44].mxu0 %v2690_v49  ;;  %3152 = vmatmul.mubr.bf16.vlgmr.msra.gmra.mrb[60].mxu1 %v2690_v49 }
 0x3fe   :  { %3419 = vmatpush1.bf16.msra.mxu0 %v10605_v57  ;;  %3462 = vmatpush1.bf16.msra.mxu1 %v10607_v58  ;;  %v12426_v57 = vld [vmem:[#allocation24_spill] sm:$0xff]  ;;  %v12427_v58 = vld [vmem:[#allocation25_spill] sm:$0xff] }
 0x3ff   :  { %3420 = vmatprep.subr.bf16.mxu0 %v10611_v38  ;;  %3463 = vmatprep.subr.bf16.mxu1 %v10613_v60  ;;  %v12428_v38 = vld [vmem:[#allocation26_spill] sm:$0xff]  ;;  %v12429_v60 = vld [vmem:[#allocation27_spill] sm:$0xff] }
 0x400   :  { %3450 = vmatprep.mubr.bf16.mxu0 %v12321_v33  ;;  %3493 = vmatprep.mubr.bf16.mxu1 %v12321_v33 }
 0x402   :  { %3421 = vmatpush1.bf16.msra.mxu0 %v10619_v61  ;;  %3464 = vmatpush1.bf16.msra.mxu1 %v10621_v63  ;;  %v12430_v61 = vld [vmem:[#allocation28_spill] sm:$0xff]  ;;  %v12431_v63 = vld [vmem:[#allocation29_spill] sm:$0xff] }
 0x403   :  { %3422 = vmatprep.subr.bf16.mxu0 %v10625_v1  ;;  %3465 = vmatprep.subr.bf16.mxu1 %v10627_v2  ;;  %v12432_v1 = vld [vmem:[#allocation30_spill] sm:$0xff]  ;;  %v12433_v2 = vld [vmem:[#allocation31_spill] sm:$0xff] }
 0x406   :  { %3423 = vmatpush1.bf16.msra.mxu0 %v10633_v3  ;;  %3466 = vmatpush1.bf16.msra.mxu1 %v10635_v4  ;;  %v12434_v3 = vld [vmem:[#allocation32_spill] sm:$0xff]  ;;  %v12435_v4 = vld [vmem:[#allocation34_spill] sm:$0xff] }
 0x407   :  { %3424 = vmatprep.subr.bf16.mxu0 %v10639_v5  ;;  %3467 = vmatprep.subr.bf16.mxu1 %v10641_v6  ;;  %v12436_v5 = vld [vmem:[#allocation36_spill] sm:$0xff]  ;;  %v12437_v6 = vld [vmem:[#allocation33_spill] sm:$0xff] }
 0x40a   :  { %3425 = vmatpush1.bf16.msra.mxu0 %v10645_v7  ;;  %3468 = vmatpush1.bf16.msra.mxu1 %v10647_v8  ;;  %v12438_v7 = vld [vmem:[#allocation35_spill] sm:$0xff]  ;;  %v12439_v8 = vld [vmem:[#allocation37_spill] sm:$0xff] }
 0x40b   :  { %3426 = vmatprep.subr.bf16.mxu0 %v10651_v9  ;;  %3469 = vmatprep.subr.bf16.mxu1 %v10653_v10  ;;  %v12440_v9 = vld [vmem:[#allocation38_spill] sm:$0xff]  ;;  %v12441_v10 = vld [vmem:[#allocation39_spill] sm:$0xff] }
 0x40e   :  { %3427 = vmatpush1.bf16.msra.mxu0 %v10657_v11  ;;  %3470 = vmatpush1.bf16.msra.mxu1 %v10659_v12  ;;  %v12442_v11 = vld [vmem:[#allocation40_spill] sm:$0xff]  ;;  %v12443_v12 = vld [vmem:[#allocation41_spill] sm:$0xff] }
 0x40f   :  { %3428 = vmatprep.subr.bf16.mxu0 %v10663_v13  ;;  %3471 = vmatprep.subr.bf16.mxu1 %v10665_v14  ;;  %v12444_v13 = vld [vmem:[#allocation42_spill] sm:$0xff]  ;;  %v12445_v14 = vld [vmem:[#allocation43_spill] sm:$0xff] }
 0x412   :  { %3429 = vmatpush1.bf16.msra.mxu0 %v10669_v15  ;;  %3472 = vmatpush1.bf16.msra.mxu1 %v10671_v16  ;;  %v12446_v15 = vld [vmem:[#allocation44_spill] sm:$0xff] }
 0x413   :  { %3430 = vmatprep.subr.bf16.mxu0 %v10675_v17  ;;  %3473 = vmatprep.subr.bf16.mxu1 %v10677_v18  ;;  %v12447_v16 = vld [vmem:[#allocation48_spill] sm:$0xff]  ;;  %v12448_v17 = vld [vmem:[#allocation53_spill] sm:$0xff]  ;;  %v12449_v18 = vld [vmem:[#allocation50_spill] sm:$0xff] }
 0x416   :  { %3431 = vmatpush1.bf16.msra.mxu0 %v10681_v19  ;;  %3474 = vmatpush1.bf16.msra.mxu1 %v10683_v22  ;;  %v12450_v19 = vld [vmem:[#allocation55_spill] sm:$0xff]  ;;  %v12451_v22 = vld [vmem:[#allocation73_spill] sm:$0xff] }
 0x417   :  { %3432 = vmatprep.subr.bf16.mxu0 %v10687_v23  ;;  %3475 = vmatprep.subr.bf16.mxu1 %v10689_v24  ;;  %v12452_v23 = vld [vmem:[#allocation74_spill] sm:$0xff]  ;;  %v12453_v24 = vld [vmem:[#allocation75_spill] sm:$0xff] }
 0x41a   :  { %3433 = vmatpush1.bf16.msra.mxu0 %v10693_v25  ;;  %3476 = vmatpush1.bf16.msra.mxu1 %v12425_v48  ;;  %v12454_v25 = vld [vmem:[#allocation76_spill] sm:$0xff]  ;;  %v12484_v48 = vld [vmem:[#allocation106_spill] sm:$0xff] }
 0x41b   :  { %3964 = vmatprep.subr.bf16.mxu0 %v12426_v57  ;;  %4007 = vmatprep.subr.bf16.mxu1 %v12427_v58  ;;  %v12485_v57 = vld [vmem:[#allocation107_spill] sm:$0xff]  ;;  %v12486_v58 = vld [vmem:[#allocation108_spill] sm:$0xff] }
 0x41d   :  { %3451 = vmatmul.mubr.bf16.vlgmr.msra.gmra.mrb[48].mxu0 %v2690_v49  ;;  %3494 = vmatmul.mubr.bf16.vlgmr.msra.gmra.mrb[64].mxu1 %v2690_v49  ;;  %v12483_v49 = vld [vmem:[#allocation105_spill] sm:$0xff] }
 0x41e   :  { %3965 = vmatpush1.bf16.msra.mxu0 %v12428_v38  ;;  %4008 = vmatpush1.bf16.msra.mxu1 %v12429_v60  ;;  %v12487_v38 = vld [vmem:[#allocation109_spill] sm:$0xff]  ;;  %v12488_v60 = vld [vmem:[#allocation110_spill] sm:$0xff] }
 0x41f   :  { %3966 = vmatprep.subr.bf16.mxu0 %v12430_v61  ;;  %4009 = vmatprep.subr.bf16.mxu1 %v12431_v63  ;;  %v12489_v61 = vld [vmem:[#allocation111_spill] sm:$0xff] }
 0x420   :  { %v11025_v63 = vld [vmem:[#allocation10 + $0x4] ss:$16 sps:$4 sm:$0xff]  }
 0x422   :  { %3967 = vmatpush1.bf16.msra.mxu0 %v12432_v1  ;;  %4010 = vmatpush1.bf16.msra.mxu1 %v12433_v2  ;;  %v11027_v1 = vld [vmem:[#allocation10 + $0xc] ss:$16 sps:$4 sm:$0xff]  }
 0x423   :  { %3968 = vmatprep.subr.bf16.mxu0 %v12434_v3  ;;  %4011 = vmatprep.subr.bf16.mxu1 %v12435_v4  ;;  %v12490_v4 = vld [vmem:[#allocation19_spill] sm:$0xff] }
 0x426   :  { %3969 = vmatpush1.bf16.msra.mxu0 %v12436_v5  ;;  %4012 = vmatpush1.bf16.msra.mxu1 %v12437_v6 }
 0x427   :  { %3970 = vmatprep.subr.bf16.mxu0 %v12438_v7  ;;  %4013 = vmatprep.subr.bf16.mxu1 %v12439_v8  ;;  %v12491_v8 = vld [vmem:[#allocation20_spill] sm:$0xff] }
 0x42a   :  { %3971 = vmatpush1.bf16.msra.mxu0 %v12440_v9  ;;  %4014 = vmatpush1.bf16.msra.mxu1 %v12441_v10 }
 0x42b   :  { %3972 = vmatprep.subr.bf16.mxu0 %v12442_v11  ;;  %4015 = vmatprep.subr.bf16.mxu1 %v12443_v12 }
 0x42e   :  { %3973 = vmatpush1.bf16.msra.mxu0 %v12444_v13  ;;  %4016 = vmatpush1.bf16.msra.mxu1 %v12445_v14 }
 0x42f   :  { %3974 = vmatprep.subr.bf16.mxu0 %v12446_v15  ;;  %4017 = vmatprep.subr.bf16.mxu1 %v12447_v16 }
 0x432   :  { %3975 = vmatpush1.bf16.msra.mxu0 %v12448_v17  ;;  %4018 = vmatpush1.bf16.msra.mxu1 %v12449_v18 }
 0x433   :  { %3976 = vmatprep.subr.bf16.mxu0 %v12450_v19  ;;  %4019 = vmatprep.subr.bf16.mxu1 %v12451_v22  ;;  %v12492_v22 = vld [vmem:[#allocation22_spill] sm:$0xff] }
 0x436   :  { %3977 = vmatpush1.bf16.msra.mxu0 %v12452_v23  ;;  %4020 = vmatpush1.bf16.msra.mxu1 %v12453_v24  ;;  %v12493_v24 = vld [vmem:[#allocation21_spill] sm:$0xff] }
 0x437   :  { %3978 = vmatprep.subr.bf16.mxu0 %v12454_v25  ;;  %4021 = vmatprep.subr.bf16.mxu1 %v12455_v34 }
 0x43a   :  { %3979 = vmatpush1.bf16.msra.mxu0 %v12456_v59  ;;  %4022 = vmatpush1.bf16.msra.mxu1 %v12457_v43 }
 0x43b   :  { %3980 = vmatprep.subr.bf16.mxu0 %v12458_v53  ;;  %4023 = vmatprep.subr.bf16.mxu1 %v12459_v45 }
 0x43e   :  { %3981 = vmatpush1.bf16.msra.mxu0 %v12460_v29  ;;  %4024 = vmatpush1.bf16.msra.mxu1 %v12461_v52 }
 0x43f   :  { %3982 = vmatprep.subr.bf16.mxu0 %v12462_v35  ;;  %4025 = vmatprep.subr.bf16.mxu1 %v12463_v20 }
 0x442   :  { %3983 = vmatpush1.bf16.msra.mxu0 %v12464_v21  ;;  %4026 = vmatpush1.bf16.msra.mxu1 %v12465_v37 }
 0x443   :  { %3984 = vmatprep.subr.bf16.mxu0 %v12466_v30  ;;  %4027 = vmatprep.subr.bf16.mxu1 %v12467_v51 }
 0x446   :  { %3985 = vmatpush1.bf16.msra.mxu0 %v12468_v42  ;;  %4028 = vmatpush1.bf16.msra.mxu1 %v12469_v36 }
 0x447   :  { %3986 = vmatprep.subr.bf16.mxu0 %v12470_v41  ;;  %4029 = vmatprep.subr.bf16.mxu1 %v12471_v27 }
 0x44a   :  { %3987 = vmatpush1.bf16.msra.mxu0 %v12472_v54  ;;  %4030 = vmatpush1.bf16.msra.mxu1 %v12473_v28 }
 0x44b   :  { %3988 = vmatprep.subr.bf16.mxu0 %v12474_v40  ;;  %4031 = vmatprep.subr.bf16.mxu1 %v12475_v0  ;;  %v12494_v40 = vld [vmem:[#allocation54_spill] sm:$0xff] }
 0x44c   :  { %v3504_v0 = vunpack.c.l.bf16 %v12494_v40 }
 0x44e   :  { %3989 = vmatpush1.bf16.msra.mxu0 %v12476_v46  ;;  %4032 = vmatpush1.bf16.msra.mxu1 %v12477_v56  ;;  %v12495_v46 = vld [vmem:[#allocation61_spill] sm:$0xff] }
 0x44f   :  { %3990 = vmatprep.subr.bf16.mxu0 %v12478_v44  ;;  %4033 = vmatprep.subr.bf16.mxu1 %v12479_v39  ;;  %v3506_v56 = vunpack.c.l.bf16 %v12495_v46  ;;  %v3508_v44 = vunpack.c.h.bf16 %v12494_v40 }
 0x452   :  { %3991 = vmatpush1.bf16.msra.mxu0 %v12480_v31  ;;  %4034 = vmatpush1.bf16.msra.mxu1 %v12481_v50 }
 0x453   :  { %3992 = vmatprep.subr.bf16.mxu0 %v12482_v26  ;;  %4035 = vmatprep.subr.bf16.mxu1 %v12483_v49 }
 0x456   :  { %3993 = vmatpush1.bf16.msra.mxu0 %v12484_v48  ;;  %4036 = vmatpush1.bf16.msra.mxu1 %v12485_v57  ;;  %v12496_v48 = vld [vmem:[#allocation56_spill] sm:$0xff] }
 0x457   :  { %3994 = vmatprep.subr.bf16.mxu0 %v12486_v58  ;;  %4037 = vmatprep.subr.bf16.mxu1 %v12487_v38  ;;  %v3505_v57 = vunpack.c.l.bf16 %v12496_v48  ;;  %v12497_v58 = vld [vmem:[#allocation63_spill] sm:$0xff] }
 0x458   :  { %v3507_v38 = vunpack.c.l.bf16 %v12497_v58 }
 0x45a   :  { %3995 = vmatpush1.bf16.msra.mxu0 %v12488_v60  ;;  %4038 = vmatpush1.bf16.msra.mxu1 %v12489_v61 }
 0x45b   :  { %4306 = vmatprep.subr.bf16.mxu0 %v11025_v63  ;;  %4349 = vmatprep.subr.bf16.mxu1 %v11027_v1 }
 0x4d0   :  { %v3110_v2 = vpop.f32.mrb[44].mxu0  ;;  %v3153_v3 = vpop.f32.mrb[60].mxu1 }
 0x4d1   :  { %v3111_v5 = vadd.f32 %v3110_v2, %v12490_v4  ;;  %v3112_v6 = vpop.f32.mrb[45].mxu0  ;;  %v3155_v7 = vpop.f32.mrb[61].mxu1  ;;  %v3154_v23 = vadd.f32 %v3153_v3, %v12492_v22 }
 0x4d2   :  { %v3113_v9 = vadd.f32 %v3112_v6, %v12491_v8  ;;  %v3114_v10 = vpop.f32.mrb[46].mxu0  ;;  %v3157_v11 = vpop.f32.mrb[62].mxu1  ;;  %v3156_v25 = vadd.f32 %v3155_v7, %v12493_v24  ;;  %v3509_v6 = vunpack.c.h.bf16 %v12496_v48 }
 0x4d3   :  { %v8152_v12 = vmul.f32 -1.442695, %v3111_v5  ;;  %v3115_v13 = vadd.f32 %v3114_v10, %v12490_v4  ;;  %v3116_v14 = vpop.f32.mrb[47].mxu0  ;;  %v3159_v15 = vpop.f32.mrb[63].mxu1  ;;  %v3158_v53 = vadd.f32 %v3157_v11, %v12492_v22  ;;  %v3510_v5 = vunpack.c.h.bf16 %v12495_v46 }
 0x4d4   :  { %v8154_v16 = vmul.f32 -1.442695, %v3113_v9  ;;  %v3117_v17 = vadd.f32 %v3116_v14, %v12491_v8  ;;  %v8156_v52 = vmul.f32 -1.442695, %v3156_v25  ;;  %v3160_v35 = vadd.f32 %v3159_v15, %v12493_v24 }
 0x4d5   :  { %9518 = vpow2.f32 %v8152_v12  ;;  %v8153_v18 = vmul.f32 -1.442695, %v3115_v13  ;;  %v3511_v13 = vunpack.c.h.bf16 %v12497_v58 }
 0x4d6   :  { %9520 = vpow2.f32 %v8154_v16  ;;  %v8155_v19 = vmul.f32 -1.442695, %v3117_v17  ;;  %v8157_v30 = vmul.f32 -1.442695, %v3160_v35 }
 0x4d7   :  { %9522 = vpow2.f32 %v8153_v18 }
 0x4d8   :  { %9524 = vpow2.f32 %v8155_v19 }
 0x4d9   :  { %9526 = vtanh.f32 %v3154_v23 }
 0x4df   :  { %v9519_v34 = vpop.eup %9518 }
 0x4e0   :  { %v9521_v59 = vpop.eup %9520  ;;  %v3168_v43 = vadd.f32 1.0, %v9519_v34 }
 0x4e1   :  { %v3180_v45 = vadd.f32 1.0, %v9521_v59  ;;  %v9523_v29 = vpop.eup %9522 }
 0x4e2   :  { %9528 = vrcp.f32 %v3168_v43  ;;  %v3169_v20 = vadd.f32 1.0, %v9523_v29  ;;  %v9525_v21 = vpop.eup %9524 }
 0x4e3   :  { %9530 = vrcp.f32 %v3180_v45  ;;  %v3181_v37 = vadd.f32 1.0, %v9525_v21  ;;  %v9527_v51 = vpop.eup %9526 }
 0x4e4   :  { %9532 = vtanh.f32 %v3158_v53 }
 0x4e5   :  { %9534 = vrcp.f32 %v3169_v20 }
 0x4e6   :  { %9536 = vpow2.f32 %v8156_v52 }
 0x4e7   :  { %9538 = vrcp.f32 %v3181_v37 }
 0x4e8   :  { %9540 = vpow2.f32 %v8157_v30 }
 0x4ec   :  { %v9529_v42 = vpop.eup %9528 }
 0x4ed   :  { %v9531_v36 = vpop.eup %9530  ;;  %v3204_v41 = vmul.f32 %v9529_v42, %v9527_v51 }
 0x4ee   :  { %v9533_v27 = vpop.eup %9532  ;;  %v3202_v54 = vmul.f32 %v9531_v36, %v10909_v55 }
 0x4ef   :  { %v9535_v28 = vpop.eup %9534 }
 0x4f0   :  { %v9537_v39 = vpop.eup %9536  ;;  %v11043_v31 = vadd.f32 %v3204_v41, %v3202_v54  ;;  %v3205_v50 = vmul.f32 %v9535_v28, %v9533_v27  ;;  %v3452_v26 = vpop.f32.mrb[48].mxu0 }
 0x4f1   :  { %v3495_v49 = vpop.f32.mrb[64].mxu1  ;;  %v9539_v60 = vpop.eup %9538  ;;  %v3512_v61 = vadd.f32 %v3504_v0, %v3452_v26  ;;  %v3194_v14 = vadd.f32 1.0, %v9537_v39 }
 0x4f2   :  { %v3514_v55 = vadd.f32 %v3506_v56, %v3495_v49  ;;  %v3454_v2 = vpop.f32.mrb[49].mxu0  ;;  %v3497_v3 = vpop.f32.mrb[65].mxu1  ;;  %v3203_v7 = vmul.f32 %v9539_v60, %v10917_v47 }
 0x4f3   :  { %v3513_v9 = vadd.f32 %v3505_v57, %v3454_v2  ;;  %v3515_v10 = vadd.f32 %v3507_v38, %v3497_v3  ;;  %v3456_v11 = vpop.f32.mrb[50].mxu0  ;;  %v3499_v12 = vpop.f32.mrb[66].mxu1  ;;  %v8190_v15 = vmul.f32 -1.442695, %v3512_v61 }
 0x4f4   :  { %v3516_v16 = vadd.f32 %v3508_v44, %v3456_v11  ;;  %v3518_v17 = vadd.f32 %v3510_v5, %v3499_v12  ;;  %v3458_v18 = vpop.f32.mrb[51].mxu0  ;;  %v3501_v19 = vpop.f32.mrb[67].mxu1  ;;  %v11051_v25 = vadd.f32 %v3205_v50, %v3203_v7  ;;  %v11063_v12 = vld [vmem:[#allocation10] ss:$16 sps:$4 sm:$0xff]  }
 0x4f5   :  { %v9541_v23 = vpop.eup %9540  ;;  %v8192_v34 = vmul.f32 -1.442695, %v3513_v9  ;;  %v3517_v59 = vadd.f32 %v3509_v6, %v3458_v18  ;;  %9542 = vpow2.f32 %v8190_v15  ;;  %v3519_v47 = vadd.f32 %v3511_v13, %v3501_v19  ;;  %v11065_v13 = vld [vmem:[#allocation10 + $0x8] ss:$16 sps:$4 sm:$0xff]   ;;  %v11071_v15 = vld [vmem:[#allocation10 + $0x2c] ss:$16 sps:$4 sm:$0xff]  }
 0x4f6   :  { %v8191_v43 = vmul.f32 -1.442695, %v3516_v16  ;;  %v3195_v45 = vadd.f32 1.0, %v9541_v23  ;;  %v8194_v29 = vmul.f32 -1.442695, %v3515_v10 }
 0x4f7   :  { %9544 = vpow2.f32 %v8192_v34  ;;  %v8193_v53 = vmul.f32 -1.442695, %v3517_v59  ;;  %v8195_v21 = vmul.f32 -1.442695, %v3519_v47  ;;  %v11077_v16 = vld [vmem:[#allocation10 + $0x20] ss:$16 sps:$4 sm:$0xff]  }
 0x4f8   :  { %9546 = vrcp.f32 %v3194_v14  ;;  %v11083_v18 = vld [vmem:[#allocation10 + $0x44] ss:$16 sps:$4 sm:$0xff]   ;;  %v11085_v19 = vld [vmem:[#allocation10 + $0x4c] ss:$16 sps:$4 sm:$0xff]   ;;  %v11091_v23 = vld [vmem:[#allocation10 + $0x40] ss:$16 sps:$4 sm:$0xff]  }
 0x4f9   :  { %9548 = vpow2.f32 %v8191_v43  ;;  %v11093_v34 = vld [vmem:[#allocation10 + $0x48] ss:$16 sps:$4 sm:$0xff]   ;;  %v11097_v59 = vld [vmem:[#allocation10 + $0x64] ss:$16 sps:$4 sm:$0xff]   ;;  %v11099_v43 = vld [vmem:[#allocation10 + $0x6c] ss:$16 sps:$4 sm:$0xff]  }
 0x4fa   :  { %9550 = vtanh.f32 %v11043_v31  ;;  %v11103_v47 = vld [vmem:[#allocation10 + $0x60] ss:$16 sps:$4 sm:$0xff]  }
 0x4fb   :  { %9552 = vpow2.f32 %v8193_v53  ;;  %v11105_v53 = vld [vmem:[#allocation10 + $0x68] ss:$16 sps:$4 sm:$0xff]  }
 0x4fc   :  { %9554 = vrcp.f32 %v3195_v45  ;;  %v11109_v45 = vld [vmem:[#allocation10 + $0x84] ss:$16 sps:$4 sm:$0xff]  }
 0x4fd   :  { %9556 = vtanh.f32 %v11051_v25 }
 0x4fe   :  { %9558 = vtanh.f32 %v3514_v55 }
 0x4ff   :  { %v9543_v52 = vpop.eup %9542  ;;  %9560 = vpow2.f32 %v8194_v29  ;;  %v11111_v29 = vld [vmem:[#allocation10 + $0x8c] ss:$16 sps:$4 sm:$0xff]  }
 0x500   :  { %v3526_v20 = vadd.f32 1.0, %v9543_v52  ;;  %9562 = vtanh.f32 %v3518_v17  ;;  %v11079_v17 = vld [vmem:[#allocation10 + $0x28] ss:$16 sps:$4 sm:$0xff]   ;;  %v11115_v52 = vld [vmem:[#allocation10 + $0x80] ss:$16 sps:$4 sm:$0xff]  }
 0x501   :  { %v9545_v35 = vpop.eup %9544 }
 0x502   :  { %v9547_v37 = vpop.eup %9546  ;;  %v3538_v30 = vadd.f32 1.0, %v9545_v35  ;;  %9564 = vrcp.f32 %v3526_v20  ;;  %v11117_v35 = vld [vmem:[#allocation10 + $0x88] ss:$16 sps:$4 sm:$0xff]   ;;  %v11121_v20 = vld [vmem:[#allocation10 + $0xa4] ss:$16 sps:$4 sm:$0xff]  }
 0x503   :  { %v9549_v51 = vpop.eup %9548 }
 0x504   :  { %v9551_v42 = vpop.eup %9550  ;;  %9566 = vrcp.f32 %v3538_v30  ;;  %v3527_v36 = vadd.f32 1.0, %v9549_v51  ;;  %v11129_v30 = vld [vmem:[#allocation10 + $0xa8] ss:$16 sps:$4 sm:$0xff]   ;;  %v11133_v51 = vld [vmem:[#allocation10 + $0xc4] ss:$16 sps:$4 sm:$0xff]  }
 0x505   :  { %v9553_v41 = vpop.eup %9552  ;;  %9568 = vpow2.f32 %v8195_v21  ;;  %v3210_v40 = vmul.f32 %v9551_v42, %v9547_v37  ;;  %v11123_v21 = vld [vmem:[#allocation10 + $0xac] ss:$16 sps:$4 sm:$0xff]   ;;  %v11127_v37 = vld [vmem:[#allocation10 + $0xa0] ss:$16 sps:$4 sm:$0xff]  }
 0x506   :  { %v9555_v27 = vpop.eup %9554  ;;  %9570 = vrcp.f32 %v3527_v36  ;;  %v3539_v54 = vadd.f32 1.0, %v9553_v41  ;;  %v11135_v42 = vld [vmem:[#allocation10 + $0xcc] ss:$16 sps:$4 sm:$0xff]   ;;  %v11139_v36 = vld [vmem:[#allocation10 + $0xc0] ss:$16 sps:$4 sm:$0xff]  }
 0x507   :  { %v9557_v28 = vpop.eup %9556  ;;  %v11141_v41 = vld [vmem:[#allocation10 + $0xc8] ss:$16 sps:$4 sm:$0xff]  }
 0x508   :  { %9572 = vrcp.f32 %v3539_v54  ;;  %v3211_v0 = vmul.f32 %v9557_v28, %v9555_v27  ;;  %v9559_v46 = vpop.eup %9558  ;;  %v11145_v27 = vld [vmem:[#allocation10 + $0xe4] ss:$16 sps:$4 sm:$0xff]   ;;  %v11147_v54 = vld [vmem:[#allocation10 + $0xec] ss:$16 sps:$4 sm:$0xff]   ;;  %v11151_v28 = vld [vmem:[#allocation10 + $0xe0] ss:$16 sps:$4 sm:$0xff]  }
 0x509   :  { %v9561_v44 = vpop.eup %9560 }
 0x50a   :  { %v3579_v56 = vpack.c.bf16 %v3211_v0, %v3210_v40  ;;  %v9563_v39 = vpop.eup %9562  ;;  %v3552_v38 = vadd.f32 1.0, %v9561_v44  ;;  %v11153_v40 = vld [vmem:[#allocation10 + $0xe8] ss:$16 sps:$4 sm:$0xff]   ;;  %v11161_v0 = vld [vmem:[#allocation11 + $0x4] ss:$16 sps:$4 sm:$0xff]  }
 0x50b   :  { %12498 = vst [vmem:[#allocation51_spill] sm:$0xff] %v11153_v40  ;;  %12499 = vst [vmem:[#allocation57_spill] sm:$0xff] %v11161_v0  ;;  %v11167_v44 = vld [vmem:[#allocation11 + $0x8] ss:$16 sps:$4 sm:$0xff]  }
 0x50c   :  { %3996 = vmatprep.mubr.bf16.mxu0 %v3579_v56  ;;  %4039 = vmatprep.mubr.bf16.mxu1 %v3579_v56  ;;  %v9565_v50 = vpop.eup %9564  ;;  %9574 = vrcp.f32 %v3552_v38  ;;  %v11165_v56 = vld [vmem:[#allocation11] ss:$16 sps:$4 sm:$0xff]   ;;  %12502 = vst [vmem:[#allocation23_spill] sm:$0xff] %v11167_v44  ;;  %v11191_v38 = vld [vmem:[#allocation11 + $0x48] ss:$16 sps:$4 sm:$0xff]  }
 0x50d   :  { %v3562_v49 = vmul.f32 %v9565_v50, %v9559_v46  ;;  %v11163_v46 = vld [vmem:[#allocation11 + $0xc] ss:$16 sps:$4 sm:$0xff]   ;;  %12501 = vst [vmem:[#allocation59_spill] sm:$0xff] %v11165_v56  ;;  %12510 = vst [vmem:[#allocation31_spill] sm:$0xff] %v11191_v38 }
 0x50e   :  { %v9567_v26 = vpop.eup %9566  ;;  %12500 = vst [vmem:[#allocation52_spill] sm:$0xff] %v11163_v46  ;;  %v11175_v50 = vld [vmem:[#allocation11 + $0x2c] ss:$16 sps:$4 sm:$0xff]  }
 0x50f   :  { %v9569_v48 = vpop.eup %9568  ;;  %v3560_v57 = vmul.f32 %v9567_v26, %v10922_v62  ;;  %12504 = vst [vmem:[#allocation25_spill] sm:$0xff] %v11175_v50  ;;  %v11177_v26 = vld [vmem:[#allocation11 + $0x20] ss:$16 sps:$4 sm:$0xff]  }
 0x510   :  { %v9571_v58 = vpop.eup %9570  ;;  %v3553_v2 = vadd.f32 1.0, %v9569_v48  ;;  %12505 = vst [vmem:[#allocation26_spill] sm:$0xff] %v11177_v26  ;;  %v11185_v48 = vld [vmem:[#allocation11 + $0x44] ss:$16 sps:$4 sm:$0xff]  }
 0x511   :  { %v11056_v60 = vadd.f32 %v3562_v49, %v3560_v57  ;;  %v3563_v61 = vmul.f32 %v9571_v58, %v9563_v39  ;;  %v11173_v39 = vld [vmem:[#allocation11 + $0x24] ss:$16 sps:$4 sm:$0xff]   ;;  %v11179_v49 = vld [vmem:[#allocation11 + $0x28] ss:$16 sps:$4 sm:$0xff]   ;;  %12507 = vst [vmem:[#allocation28_spill] sm:$0xff] %v11185_v48 }
 0x512   :  { %v9573_v55 = vpop.eup %9572  ;;  %12503 = vst [vmem:[#allocation24_spill] sm:$0xff] %v11173_v39  ;;  %12506 = vst [vmem:[#allocation27_spill] sm:$0xff] %v11179_v49  ;;  %v11187_v57 = vld [vmem:[#allocation11 + $0x4c] ss:$16 sps:$4 sm:$0xff]   ;;  %v11189_v58 = vld [vmem:[#allocation11 + $0x40] ss:$16 sps:$4 sm:$0xff]  }
 0x513   :  { %v3561_v3 = vmul.f32 %v9573_v55, %v10926_v32  ;;  %9576 = vtanh.f32 %v11056_v60  ;;  %v11069_v32 = vld [vmem:[#allocation10 + $0x24] ss:$16 sps:$4 sm:$0xff]   ;;  %12508 = vst [vmem:[#allocation29_spill] sm:$0xff] %v11187_v57  ;;  %12509 = vst [vmem:[#allocation30_spill] sm:$0xff] %v11189_v58  ;;  %v11199_v55 = vld [vmem:[#allocation11 + $0x6c] ss:$16 sps:$4 sm:$0xff]  }
 0x514   :  { %9578 = vrcp.f32 %v3553_v2  ;;  %12512 = vst [vmem:[#allocation34_spill] sm:$0xff] %v11199_v55  ;;  %v11201_v2 = vld [vmem:[#allocation11 + $0x60] ss:$16 sps:$4 sm:$0xff]  }
 0x515   :  { %v11060_v5 = vadd.f32 %v3563_v61, %v3561_v3  ;;  %v11197_v61 = vld [vmem:[#allocation11 + $0x64] ss:$16 sps:$4 sm:$0xff]   ;;  %12513 = vst [vmem:[#allocation36_spill] sm:$0xff] %v11201_v2  ;;  %v11203_v3 = vld [vmem:[#allocation11 + $0x68] ss:$16 sps:$4 sm:$0xff]  }
 0x516   :  { %v9575_v6 = vpop.eup %9574  ;;  %12511 = vst [vmem:[#allocation32_spill] sm:$0xff] %v11197_v61  ;;  %12514 = vst [vmem:[#allocation33_spill] sm:$0xff] %v11203_v3 }
 0x517   :  { %9580 = vtanh.f32 %v11060_v5 }
 0x51d   :  { %v9577_v7 = vpop.eup %9576 }
 0x51e   :  { %v9579_v62 = vpop.eup %9578  ;;  %v3568_v10 = vmul.f32 %v9577_v7, %v9575_v6  ;;  %v11209_v6 = vld [vmem:[#allocation11 + $0x84] ss:$16 sps:$4 sm:$0xff]   ;;  %v11211_v7 = vld [vmem:[#allocation11 + $0x8c] ss:$16 sps:$4 sm:$0xff]  }
 0x51f   :  { %12515 = vst [vmem:[#allocation35_spill] sm:$0xff] %v11209_v6  ;;  %12516 = vst [vmem:[#allocation37_spill] sm:$0xff] %v11211_v7 }
 0x521   :  { %v9581_v9 = vpop.eup %9580 }
 0x522   :  { %v3569_v11 = vmul.f32 %v9581_v9, %v9579_v62  ;;  %v11213_v62 = vld [vmem:[#allocation11 + $0x80] ss:$16 sps:$4 sm:$0xff]   ;;  %v11215_v9 = vld [vmem:[#allocation11 + $0x88] ss:$16 sps:$4 sm:$0xff]  }
 0x523   :  { %12517 = vst [vmem:[#allocation38_spill] sm:$0xff] %v11213_v62  ;;  %12518 = vst [vmem:[#allocation39_spill] sm:$0xff] %v11215_v9 }
 0x524   :  { %v11067_v14 = vpack.c.bf16 %v3569_v11, %v3568_v10  ;;  %v11221_v10 = vld [vmem:[#allocation11 + $0xa4] ss:$16 sps:$4 sm:$0xff]   ;;  %v11223_v11 = vld [vmem:[#allocation11 + $0xac] ss:$16 sps:$4 sm:$0xff]  }
 0x525   :  { %12519 = vst [vmem:[#allocation40_spill] sm:$0xff] %v11221_v10  ;;  %12520 = vst [vmem:[#allocation41_spill] sm:$0xff] %v11223_v11 }
 0x526   :  { %3997 = vmatmul.mubr.bf16.vlgmr.msra.gmra.mrb[52].mxu0 %v11067_v14  ;;  %4040 = vmatmul.mubr.bf16.vlgmr.msra.gmra.mrb[68].mxu1 %v11067_v14 }
 0x527   :  { %4307 = vmatpush1.bf16.msra.mxu0 %v11063_v12  ;;  %4350 = vmatpush1.bf16.msra.mxu1 %v11065_v13 }
 0x528   :  { %4308 = vmatprep.subr.bf16.mxu0 %v11069_v32  ;;  %4351 = vmatprep.subr.bf16.mxu1 %v11071_v15 }
 0x529   :  { %4338 = vmatprep.mubr.bf16.mxu0 %v12321_v33  ;;  %4381 = vmatprep.mubr.bf16.mxu1 %v12321_v33 }
 0x52b   :  { %4309 = vmatpush1.bf16.msra.mxu0 %v11077_v16  ;;  %4352 = vmatpush1.bf16.msra.mxu1 %v11079_v17 }
 0x52c   :  { %4310 = vmatprep.subr.bf16.mxu0 %v11083_v18  ;;  %4353 = vmatprep.subr.bf16.mxu1 %v11085_v19 }
 0x52f   :  { %4311 = vmatpush1.bf16.msra.mxu0 %v11091_v23  ;;  %4354 = vmatpush1.bf16.msra.mxu1 %v11093_v34 }
 0x530   :  { %4312 = vmatprep.subr.bf16.mxu0 %v11097_v59  ;;  %4355 = vmatprep.subr.bf16.mxu1 %v11099_v43 }
 0x533   :  { %4313 = vmatpush1.bf16.msra.mxu0 %v11103_v47  ;;  %4356 = vmatpush1.bf16.msra.mxu1 %v11105_v53 }
 0x534   :  { %4314 = vmatprep.subr.bf16.mxu0 %v11109_v45  ;;  %4357 = vmatprep.subr.bf16.mxu1 %v11111_v29 }
 0x537   :  { %4315 = vmatpush1.bf16.msra.mxu0 %v11115_v52  ;;  %4358 = vmatpush1.bf16.msra.mxu1 %v11117_v35 }
 0x538   :  { %4316 = vmatprep.subr.bf16.mxu0 %v11121_v20  ;;  %4359 = vmatprep.subr.bf16.mxu1 %v11123_v21 }
 0x53b   :  { %4317 = vmatpush1.bf16.msra.mxu0 %v11127_v37  ;;  %4360 = vmatpush1.bf16.msra.mxu1 %v11129_v30 }
 0x53c   :  { %4318 = vmatprep.subr.bf16.mxu0 %v11133_v51  ;;  %4361 = vmatprep.subr.bf16.mxu1 %v11135_v42 }
 0x53f   :  { %4319 = vmatpush1.bf16.msra.mxu0 %v11139_v36  ;;  %4362 = vmatpush1.bf16.msra.mxu1 %v11141_v41 }
 0x540   :  { %4320 = vmatprep.subr.bf16.mxu0 %v11145_v27  ;;  %4363 = vmatprep.subr.bf16.mxu1 %v11147_v54 }
 0x543   :  { %4321 = vmatpush1.bf16.msra.mxu0 %v11151_v28  ;;  %4364 = vmatpush1.bf16.msra.mxu1 %v11153_v40 }
 0x544   :  { %4852 = vmatprep.subr.bf16.mxu0 %v11161_v0  ;;  %4895 = vmatprep.subr.bf16.mxu1 %v11163_v46 }
 0x546   :  { %4339 = vmatmul.mubr.bf16.vlgmr.msra.gmra.mrb[56].mxu0 %v11067_v14  ;;  %4382 = vmatmul.mubr.bf16.vlgmr.msra.gmra.mrb[72].mxu1 %v11067_v14  ;;  %v11225_v14 = vld [vmem:[#allocation11 + $0xa0] ss:$16 sps:$4 sm:$0xff]  }
 0x547   :  { %4853 = vmatpush1.bf16.msra.mxu0 %v11165_v56  ;;  %4896 = vmatpush1.bf16.msra.mxu1 %v11167_v44  ;;  %12521 = vst [vmem:[#allocation42_spill] sm:$0xff] %v11225_v14 }
 0x548   :  { %4854 = vmatprep.subr.bf16.mxu0 %v11173_v39  ;;  %4897 = vmatprep.subr.bf16.mxu1 %v11175_v50 }
 0x54b   :  { %4855 = vmatpush1.bf16.msra.mxu0 %v11177_v26  ;;  %4898 = vmatpush1.bf16.msra.mxu1 %v11179_v49 }
 0x54c   :  { %4856 = vmatprep.subr.bf16.mxu0 %v11185_v48  ;;  %4899 = vmatprep.subr.bf16.mxu1 %v11187_v57 }
 0x54f   :  { %4857 = vmatpush1.bf16.msra.mxu0 %v11189_v58  ;;  %4900 = vmatpush1.bf16.msra.mxu1 %v11191_v38 }
 0x550   :  { %4858 = vmatprep.subr.bf16.mxu0 %v11197_v61  ;;  %4901 = vmatprep.subr.bf16.mxu1 %v11199_v55  ;;  %v11316_v55 = vld [vmem:[#allocation11 + $0x1ac] ss:$16 sps:$4 sm:$0xff]  }
 0x551   :  { %12552 = vst [vmem:[#allocation99_spill] sm:$0xff] %v11316_v55 }
 0x553   :  { %4859 = vmatpush1.bf16.msra.mxu0 %v11201_v2  ;;  %4902 = vmatpush1.bf16.msra.mxu1 %v11203_v3  ;;  %v11227_v3 = vld [vmem:[#allocation11 + $0xa8] ss:$16 sps:$4 sm:$0xff]   ;;  %v11313_v2 = vld [vmem:[#allocation11 + $0x1a4] ss:$16 sps:$4 sm:$0xff]  }
 0x554   :  { %4860 = vmatprep.subr.bf16.mxu0 %v11209_v6  ;;  %4903 = vmatprep.subr.bf16.mxu1 %v11211_v7  ;;  %12522 = vst [vmem:[#allocation43_spill] sm:$0xff] %v11227_v3  ;;  %v11233_v7 = vld [vmem:[#allocation11 + $0xc4] ss:$16 sps:$4 sm:$0xff]   ;;  %v11239_v6 = vld [vmem:[#allocation11 + $0xc8] ss:$16 sps:$4 sm:$0xff]   ;;  %12551 = vst [vmem:[#allocation97_spill] sm:$0xff] %v11313_v2 }
 0x555   :  { %12523 = vst [vmem:[#allocation44_spill] sm:$0xff] %v11233_v7  ;;  %12526 = vst [vmem:[#allocation50_spill] sm:$0xff] %v11239_v6 }
 0x557   :  { %4861 = vmatpush1.bf16.msra.mxu0 %v11213_v62  ;;  %4904 = vmatpush1.bf16.msra.mxu1 %v11215_v9  ;;  %v11235_v62 = vld [vmem:[#allocation11 + $0xcc] ss:$16 sps:$4 sm:$0xff]   ;;  %v11237_v9 = vld [vmem:[#allocation11 + $0xc0] ss:$16 sps:$4 sm:$0xff]  }
 0x558   :  { %4862 = vmatprep.subr.bf16.mxu0 %v11221_v10  ;;  %4905 = vmatprep.subr.bf16.mxu1 %v11223_v11  ;;  %12524 = vst [vmem:[#allocation48_spill] sm:$0xff] %v11235_v62  ;;  %12525 = vst [vmem:[#allocation53_spill] sm:$0xff] %v11237_v9  ;;  %v11245_v11 = vld [vmem:[#allocation11 + $0xe4] ss:$16 sps:$4 sm:$0xff]   ;;  %v11251_v10 = vld [vmem:[#allocation11 + $0xe8] ss:$16 sps:$4 sm:$0xff]  }
 0x559   :  { %12527 = vst [vmem:[#allocation55_spill] sm:$0xff] %v11245_v11  ;;  %12530 = vst [vmem:[#allocation75_spill] sm:$0xff] %v11251_v10 }
 0x55b   :  { %4863 = vmatpush1.bf16.msra.mxu0 %v11225_v14  ;;  %4906 = vmatpush1.bf16.msra.mxu1 %v11227_v3  ;;  %v11247_v14 = vld [vmem:[#allocation11 + $0xec] ss:$16 sps:$4 sm:$0xff]   ;;  %v11249_v3 = vld [vmem:[#allocation11 + $0xe0] ss:$16 sps:$4 sm:$0xff]  }
 0x55c   :  { %4864 = vmatprep.subr.bf16.mxu0 %v11233_v7  ;;  %4907 = vmatprep.subr.bf16.mxu1 %v11235_v62  ;;  %12528 = vst [vmem:[#allocation73_spill] sm:$0xff] %v11247_v14  ;;  %12529 = vst [vmem:[#allocation74_spill] sm:$0xff] %v11249_v3  ;;  %v11257_v62 = vld [vmem:[#allocation11 + $0x104] ss:$16 sps:$4 sm:$0xff]   ;;  %v11263_v7 = vld [vmem:[#allocation11 + $0x108] ss:$16 sps:$4 sm:$0xff]  }
 0x55d   :  { %12531 = vst [vmem:[#allocation76_spill] sm:$0xff] %v11257_v62  ;;  %12534 = vst [vmem:[#allocation79_spill] sm:$0xff] %v11263_v7 }
 0x55f   :  { %4865 = vmatpush1.bf16.msra.mxu0 %v11237_v9  ;;  %4908 = vmatpush1.bf16.msra.mxu1 %v11239_v6  ;;  %v11259_v9 = vld [vmem:[#allocation11 + $0x10c] ss:$16 sps:$4 sm:$0xff]   ;;  %v11261_v6 = vld [vmem:[#allocation11 + $0x100] ss:$16 sps:$4 sm:$0xff]  }
 0x560   :  { %4866 = vmatprep.subr.bf16.mxu0 %v11245_v11  ;;  %4909 = vmatprep.subr.bf16.mxu1 %v11247_v14  ;;  %12532 = vst [vmem:[#allocation77_spill] sm:$0xff] %v11259_v9  ;;  %12533 = vst [vmem:[#allocation78_spill] sm:$0xff] %v11261_v6  ;;  %v11269_v14 = vld [vmem:[#allocation11 + $0x124] ss:$16 sps:$4 sm:$0xff]   ;;  %v11275_v11 = vld [vmem:[#allocation11 + $0x128] ss:$16 sps:$4 sm:$0xff]  }
 0x561   :  { %12535 = vst [vmem:[#allocation80_spill] sm:$0xff] %v11269_v14  ;;  %12538 = vst [vmem:[#allocation83_spill] sm:$0xff] %v11275_v11 }
 0x563   :  { %4867 = vmatpush1.bf16.msra.mxu0 %v11249_v3  ;;  %4910 = vmatpush1.bf16.msra.mxu1 %v11251_v10  ;;  %v11271_v3 = vld [vmem:[#allocation11 + $0x12c] ss:$16 sps:$4 sm:$0xff]   ;;  %v11273_v10 = vld [vmem:[#allocation11 + $0x120] ss:$16 sps:$4 sm:$0xff]  }
 0x564   :  { %4868 = vmatprep.subr.bf16.mxu0 %v11257_v62  ;;  %4911 = vmatprep.subr.bf16.mxu1 %v11259_v9  ;;  %12536 = vst [vmem:[#allocation81_spill] sm:$0xff] %v11271_v3  ;;  %12537 = vst [vmem:[#allocation82_spill] sm:$0xff] %v11273_v10  ;;  %v11281_v9 = vld [vmem:[#allocation11 + $0x144] ss:$16 sps:$4 sm:$0xff]   ;;  %v11287_v62 = vld [vmem:[#allocation11 + $0x148] ss:$16 sps:$4 sm:$0xff]  }
 0x565   :  { %12539 = vst [vmem:[#allocation84_spill] sm:$0xff] %v11281_v9  ;;  %12542 = vst [vmem:[#allocation87_spill] sm:$0xff] %v11287_v62 }
 0x567   :  { %4869 = vmatpush1.bf16.msra.mxu0 %v11261_v6  ;;  %4912 = vmatpush1.bf16.msra.mxu1 %v11263_v7  ;;  %v11283_v6 = vld [vmem:[#allocation11 + $0x14c] ss:$16 sps:$4 sm:$0xff]   ;;  %v11285_v7 = vld [vmem:[#allocation11 + $0x140] ss:$16 sps:$4 sm:$0xff]  }
 0x568   :  { %4870 = vmatprep.subr.bf16.mxu0 %v11269_v14  ;;  %4913 = vmatprep.subr.bf16.mxu1 %v11271_v3  ;;  %12540 = vst [vmem:[#allocation85_spill] sm:$0xff] %v11283_v6  ;;  %12541 = vst [vmem:[#allocation86_spill] sm:$0xff] %v11285_v7  ;;  %v11293_v3 = vld [vmem:[#allocation11 + $0x164] ss:$16 sps:$4 sm:$0xff]   ;;  %v11299_v14 = vld [vmem:[#allocation11 + $0x168] ss:$16 sps:$4 sm:$0xff]  }
 0x569   :  { %12543 = vst [vmem:[#allocation88_spill] sm:$0xff] %v11293_v3  ;;  %12546 = vst [vmem:[#allocation91_spill] sm:$0xff] %v11299_v14 }
 0x56b   :  { %4871 = vmatpush1.bf16.msra.mxu0 %v11273_v10  ;;  %4914 = vmatpush1.bf16.msra.mxu1 %v11275_v11  ;;  %v11295_v10 = vld [vmem:[#allocation11 + $0x16c] ss:$16 sps:$4 sm:$0xff]   ;;  %v11297_v11 = vld [vmem:[#allocation11 + $0x160] ss:$16 sps:$4 sm:$0xff]  }
 0x56c   :  { %4872 = vmatprep.subr.bf16.mxu0 %v11281_v9  ;;  %4915 = vmatprep.subr.bf16.mxu1 %v11283_v6  ;;  %12544 = vst [vmem:[#allocation89_spill] sm:$0xff] %v11295_v10  ;;  %12545 = vst [vmem:[#allocation90_spill] sm:$0xff] %v11297_v11  ;;  %v11305_v6 = vld [vmem:[#allocation11 + $0x180] ss:$16 sps:$4 sm:$0xff]   ;;  %v11311_v9 = vld [vmem:[#allocation11 + $0x18c] ss:$16 sps:$4 sm:$0xff]  }
 0x56d   :  { %12547 = vst [vmem:[#allocation92_spill] sm:$0xff] %v11305_v6  ;;  %12550 = vst [vmem:[#allocation95_spill] sm:$0xff] %v11311_v9 }
 0x56f   :  { %4873 = vmatpush1.bf16.msra.mxu0 %v11285_v7  ;;  %4916 = vmatpush1.bf16.msra.mxu1 %v11287_v62  ;;  %v11307_v7 = vld [vmem:[#allocation11 + $0x184] ss:$16 sps:$4 sm:$0xff]   ;;  %v11309_v62 = vld [vmem:[#allocation11 + $0x188] ss:$16 sps:$4 sm:$0xff]  }
 0x570   :  { %4874 = vmatprep.subr.bf16.mxu0 %v11293_v3  ;;  %4917 = vmatprep.subr.bf16.mxu1 %v11295_v10  ;;  %12548 = vst [vmem:[#allocation93_spill] sm:$0xff] %v11307_v7  ;;  %12549 = vst [vmem:[#allocation94_spill] sm:$0xff] %v11309_v62  ;;  %v11327_v10 = vld [vmem:[#allocation11 + $0x1c4] ss:$16 sps:$4 sm:$0xff]   ;;  %v11329_v3 = vld [vmem:[#allocation11 + $0x1cc] ss:$16 sps:$4 sm:$0xff]  }
 0x571   :  { %12555 = vst [vmem:[#allocation100_spill] sm:$0xff] %v11327_v10  ;;  %12556 = vst [vmem:[#allocation101_spill] sm:$0xff] %v11329_v3 }
 0x573   :  { %4875 = vmatpush1.bf16.msra.mxu0 %v11297_v11  ;;  %4918 = vmatpush1.bf16.msra.mxu1 %v11299_v14  ;;  %v11321_v14 = vld [vmem:[#allocation11 + $0x1a0] ss:$16 sps:$4 sm:$0xff]   ;;  %v11323_v11 = vld [vmem:[#allocation11 + $0x1a8] ss:$16 sps:$4 sm:$0xff]  }
 0x574   :  { %4876 = vmatprep.subr.bf16.mxu0 %v11307_v7  ;;  %4919 = vmatprep.subr.bf16.mxu1 %v11311_v9  ;;  %12553 = vst [vmem:[#allocation96_spill] sm:$0xff] %v11321_v14  ;;  %12554 = vst [vmem:[#allocation98_spill] sm:$0xff] %v11323_v11  ;;  %v11333_v9 = vld [vmem:[#allocation11 + $0x1c0] ss:$16 sps:$4 sm:$0xff]  }
 0x575   :  { %12557 = vst [vmem:[#allocation102_spill] sm:$0xff] %v11333_v9 }
 0x577   :  { %4877 = vmatpush1.bf16.msra.mxu0 %v11305_v6  ;;  %4920 = vmatpush1.bf16.msra.mxu1 %v11309_v62  ;;  %v11335_v6 = vld [vmem:[#allocation11 + $0x1c8] ss:$16 sps:$4 sm:$0xff]   ;;  %v11339_v62 = vld [vmem:[#allocation11 + $0x1e4] ss:$16 sps:$4 sm:$0xff]  }
 0x578   :  { %4878 = vmatprep.subr.bf16.mxu0 %v11313_v2  ;;  %4921 = vmatprep.subr.bf16.mxu1 %v11316_v55  ;;  %12558 = vst [vmem:[#allocation103_spill] sm:$0xff] %v11335_v6  ;;  %12559 = vst [vmem:[#allocation104_spill] sm:$0xff] %v11339_v62  ;;  %v11341_v2 = vld [vmem:[#allocation11 + $0x1ec] ss:$16 sps:$4 sm:$0xff]   ;;  %v11345_v55 = vld [vmem:[#allocation11 + $0x1e0] ss:$16 sps:$4 sm:$0xff]  }
 0x579   :  { %12560 = vst [vmem:[#allocation105_spill] sm:$0xff] %v11341_v2  ;;  %12561 = vst [vmem:[#allocation106_spill] sm:$0xff] %v11345_v55 }
 0x57b   :  { %4879 = vmatpush1.bf16.msra.mxu0 %v11321_v14  ;;  %4922 = vmatpush1.bf16.msra.mxu1 %v11323_v11  ;;  %v11347_v14 = vld [vmem:[#allocation11 + $0x1e8] ss:$16 sps:$4 sm:$0xff]  }
 0x57c   :  { %4880 = vmatprep.subr.bf16.mxu0 %v11327_v10  ;;  %4923 = vmatprep.subr.bf16.mxu1 %v11329_v3  ;;  %12562 = vst [vmem:[#allocation107_spill] sm:$0xff] %v11347_v14 }
 0x57f   :  { %4881 = vmatpush1.bf16.msra.mxu0 %v11333_v9  ;;  %4924 = vmatpush1.bf16.msra.mxu1 %v11335_v6 }
 0x580   :  { %4882 = vmatprep.subr.bf16.mxu0 %v11339_v62  ;;  %4925 = vmatprep.subr.bf16.mxu1 %v11341_v2 }
 0x583   :  { %4883 = vmatpush1.bf16.msra.mxu0 %v11345_v55  ;;  %4926 = vmatpush1.bf16.msra.mxu1 %v11347_v14 }
 0x584   :  { %5194 = vmatprep.subr.bf16.mxu0 %v11025_v63  ;;  %5237 = vmatprep.subr.bf16.mxu1 %v11027_v1 }
 0x5f9   :  { %v3998_v3 = vpop.f32.mrb[52].mxu0  ;;  %v4041_v9 = vpop.f32.mrb[68].mxu1 }
 0x5fa   :  { %v3999_v6 = vadd.f32 %v3998_v3, %v12490_v4  ;;  %v4000_v10 = vpop.f32.mrb[53].mxu0  ;;  %v4043_v11 = vpop.f32.mrb[69].mxu1  ;;  %v4042_v3 = vadd.f32 %v4041_v9, %v12492_v22 }
 0x5fb   :  { %v4001_v7 = vadd.f32 %v4000_v10, %v12491_v8  ;;  %v4002_v61 = vpop.f32.mrb[54].mxu0  ;;  %v4045_v62 = vpop.f32.mrb[70].mxu1  ;;  %v4044_v10 = vadd.f32 %v4043_v11, %v12493_v24 }
 0x5fc   :  { %v8260_v38 = vmul.f32 -1.442695, %v3999_v6  ;;  %v4003_v2 = vadd.f32 %v4002_v61, %v12490_v4  ;;  %v4004_v55 = vpop.f32.mrb[55].mxu0  ;;  %v4047_v58 = vpop.f32.mrb[71].mxu1  ;;  %v4046_v61 = vadd.f32 %v4045_v62, %v12492_v22 }
 0x5fd   :  { %v8262_v14 = vmul.f32 -1.442695, %v4001_v7  ;;  %v4005_v63 = vadd.f32 %v4004_v55, %v12491_v8  ;;  %v8264_v55 = vmul.f32 -1.442695, %v4044_v10  ;;  %v12563_v10 = vld [vmem:[#allocation58_spill] sm:$0xff] }
 0x5fe   :  { %9582 = vpow2.f32 %v8260_v38  ;;  %v8261_v1 = vmul.f32 -1.442695, %v4003_v2  ;;  %v4048_v38 = vadd.f32 %v4047_v58, %v12493_v24  ;;  %v4392_v58 = vunpack.c.l.bf16 %v12563_v10  ;;  %v12566_v24 = vld [vmem:[#allocation66_spill] sm:$0xff] }
 0x5ff   :  { %9584 = vpow2.f32 %v8262_v14  ;;  %v8263_v57 = vmul.f32 -1.442695, %v4005_v63  ;;  %v4399_v39 = vunpack.c.h.bf16 %v12566_v24 }
 0x600   :  { %9586 = vpow2.f32 %v8261_v1  ;;  %v8265_v9 = vmul.f32 -1.442695, %v4048_v38 }
 0x601   :  { %9588 = vpow2.f32 %v8263_v57 }
 0x602   :  { %9590 = vtanh.f32 %v4042_v3 }
 0x608   :  { %v9583_v48 = vpop.eup %9582 }
 0x609   :  { %v9585_v49 = vpop.eup %9584  ;;  %v4056_v6 = vadd.f32 1.0, %v9583_v48 }
 0x60a   :  { %v4068_v4 = vadd.f32 1.0, %v9585_v49  ;;  %v9587_v7 = vpop.eup %9586 }
 0x60b   :  { %9592 = vrcp.f32 %v4056_v6  ;;  %v4057_v2 = vadd.f32 1.0, %v9587_v7  ;;  %v9589_v14 = vpop.eup %9588 }
 0x60c   :  { %9594 = vrcp.f32 %v4068_v4  ;;  %v4069_v57 = vadd.f32 1.0, %v9589_v14  ;;  %v9591_v48 = vpop.eup %9590  ;;  %v12564_v4 = vld [vmem:[#allocation65_spill] sm:$0xff] }
 0x60d   :  { %9596 = vtanh.f32 %v4046_v61  ;;  %v4394_v6 = vunpack.c.l.bf16 %v12564_v4  ;;  %v4396_v61 = vunpack.c.h.bf16 %v12563_v10  ;;  %v4398_v26 = vunpack.c.h.bf16 %v12564_v4 }
 0x60e   :  { %9598 = vrcp.f32 %v4057_v2 }
 0x60f   :  { %9600 = vpow2.f32 %v8264_v55 }
 0x610   :  { %9602 = vrcp.f32 %v4069_v57  ;;  %v12565_v57 = vld [vmem:[#allocation60_spill] sm:$0xff] }
 0x611   :  { %9604 = vpow2.f32 %v8265_v9  ;;  %v4393_v9 = vunpack.c.l.bf16 %v12565_v57  ;;  %v4397_v50 = vunpack.c.h.bf16 %v12565_v57 }
 0x615   :  { %v9593_v11 = vpop.eup %9592 }
 0x616   :  { %v9595_v62 = vpop.eup %9594  ;;  %v4092_v63 = vmul.f32 %v9593_v11, %v9591_v48  ;;  %v4395_v48 = vunpack.c.l.bf16 %v12566_v24 }
 0x617   :  { %v9597_v49 = vpop.eup %9596  ;;  %v4090_v1 = vmul.f32 %v9595_v62, %v11043_v31 }
 0x618   :  { %v9599_v3 = vpop.eup %9598 }
 0x619   :  { %v9601_v7 = vpop.eup %9600  ;;  %v11367_v2 = vadd.f32 %v4092_v63, %v4090_v1  ;;  %v4093_v55 = vmul.f32 %v9599_v3, %v9597_v49  ;;  %v4340_v38 = vpop.f32.mrb[56].mxu0 }
 0x61a   :  { %v4383_v14 = vpop.f32.mrb[72].mxu1  ;;  %v9603_v11 = vpop.eup %9602  ;;  %v4400_v22 = vadd.f32 %v4392_v58, %v4340_v38  ;;  %v4082_v44 = vadd.f32 1.0, %v9601_v7 }
 0x61b   :  { %v4402_v31 = vadd.f32 %v4394_v6, %v4383_v14  ;;  %v4342_v62 = vpop.f32.mrb[57].mxu0  ;;  %v4385_v8 = vpop.f32.mrb[73].mxu1  ;;  %v4091_v10 = vmul.f32 %v9603_v11, %v11051_v25 }
 0x61c   :  { %v4401_v63 = vadd.f32 %v4393_v9, %v4342_v62  ;;  %v4403_v1 = vadd.f32 %v4395_v48, %v4385_v8  ;;  %v4344_v49 = vpop.f32.mrb[58].mxu0  ;;  %v4387_v3 = vpop.f32.mrb[74].mxu1  ;;  %v8298_v56 = vmul.f32 -1.442695, %v4400_v22 }
 0x61d   :  { %v4404_v46 = vadd.f32 %v4396_v61, %v4344_v49  ;;  %v4406_v0 = vadd.f32 %v4398_v26, %v4387_v3  ;;  %v4346_v58 = vpop.f32.mrb[59].mxu0  ;;  %v4389_v6 = vpop.f32.mrb[75].mxu1  ;;  %v11375_v14 = vadd.f32 %v4093_v55, %v4091_v10 }
 0x61e   :  { %v9605_v38 = vpop.eup %9604  ;;  %v8300_v4 = vmul.f32 -1.442695, %v4401_v63  ;;  %v4405_v40 = vadd.f32 %v4397_v50, %v4346_v58  ;;  %9606 = vpow2.f32 %v8298_v56  ;;  %v4407_v25 = vadd.f32 %v4399_v39, %v4389_v6 }
 0x61f   :  { %v8299_v57 = vmul.f32 -1.442695, %v4404_v46  ;;  %v4083_v9 = vadd.f32 1.0, %v9605_v38  ;;  %v8302_v22 = vmul.f32 -1.442695, %v4403_v1 }
 0x620   :  { %9608 = vpow2.f32 %v8300_v4  ;;  %v8301_v8 = vmul.f32 -1.442695, %v4405_v40  ;;  %v8303_v56 = vmul.f32 -1.442695, %v4407_v25 }
 0x621   :  { %9610 = vrcp.f32 %v4082_v44 }
 0x622   :  { %9612 = vpow2.f32 %v8299_v57 }
 0x623   :  { %9614 = vtanh.f32 %v11367_v2 }
 0x624   :  { %9616 = vpow2.f32 %v8301_v8 }
 0x625   :  { %9618 = vrcp.f32 %v4083_v9 }
 0x626   :  { %9620 = vtanh.f32 %v11375_v14 }
 0x627   :  { %9622 = vtanh.f32 %v4402_v31 }
 0x628   :  { %v9607_v24 = vpop.eup %9606  ;;  %9624 = vpow2.f32 %v8302_v22 }
 0x629   :  { %v4414_v61 = vadd.f32 1.0, %v9607_v24  ;;  %9626 = vtanh.f32 %v4406_v0 }
 0x62a   :  { %v9609_v26 = vpop.eup %9608 }
 0x62b   :  { %v9611_v46 = vpop.eup %9610  ;;  %v4426_v39 = vadd.f32 1.0, %v9609_v26  ;;  %9628 = vrcp.f32 %v4414_v61 }
 0x62c   :  { %v9613_v40 = vpop.eup %9612 }
 0x62d   :  { %v9615_v44 = vpop.eup %9614  ;;  %9630 = vrcp.f32 %v4426_v39  ;;  %v4415_v50 = vadd.f32 1.0, %v9613_v40 }
 0x62e   :  { %v9617_v7 = vpop.eup %9616  ;;  %9632 = vpow2.f32 %v8303_v56  ;;  %v4098_v31 = vmul.f32 %v9615_v44, %v9611_v46 }
 0x62f   :  { %v9619_v55 = vpop.eup %9618  ;;  %9634 = vrcp.f32 %v4415_v50  ;;  %v4427_v48 = vadd.f32 1.0, %v9617_v7  ;;  %v12597_v50 = vld [vmem:[#allocation73_spill] sm:$0xff]  ;;  %v12598_v7 = vld [vmem:[#allocation74_spill] sm:$0xff] }
 0x630   :  { %v9621_v11 = vpop.eup %9620 }
 0x631   :  { %9636 = vrcp.f32 %v4427_v48  ;;  %v4099_v62 = vmul.f32 %v9621_v11, %v9619_v55  ;;  %v9623_v10 = vpop.eup %9622  ;;  %v12599_v55 = vld [vmem:[#allocation75_spill] sm:$0xff]  ;;  %v12600_v48 = vld [vmem:[#allocation76_spill] sm:$0xff]  ;;  %v12601_v11 = vld [vmem:[#allocation77_spill] sm:$0xff] }
 0x632   :  { %v9625_v1 = vpop.eup %9624 }
 0x633   :  { %v4467_v63 = vpack.c.bf16 %v4099_v62, %v4098_v31  ;;  %v9627_v49 = vpop.eup %9626  ;;  %v4440_v57 = vadd.f32 1.0, %v9625_v1  ;;  %v12602_v31 = vld [vmem:[#allocation78_spill] sm:$0xff]  ;;  %v12603_v62 = vld [vmem:[#allocation79_spill] sm:$0xff] }
 0x634   :  { %v12606_v1 = vld [vmem:[#allocation82_spill] sm:$0xff] }
 0x635   :  { %4884 = vmatprep.mubr.bf16.mxu0 %v4467_v63  ;;  %4927 = vmatprep.mubr.bf16.mxu1 %v4467_v63  ;;  %v9629_v0 = vpop.eup %9628  ;;  %9638 = vrcp.f32 %v4440_v57  ;;  %v12605_v63 = vld [vmem:[#allocation81_spill] sm:$0xff]  ;;  %v12614_v57 = vld [vmem:[#allocation90_spill] sm:$0xff] }
 0x636   :  { %v4450_v58 = vmul.f32 %v9629_v0, %v9623_v10  ;;  %v12604_v10 = vld [vmem:[#allocation80_spill] sm:$0xff] }
 0x637   :  { %v9631_v3 = vpop.eup %9630  ;;  %v12608_v0 = vld [vmem:[#allocation84_spill] sm:$0xff] }
 0x638   :  { %v9633_v6 = vpop.eup %9632  ;;  %v4448_v38 = vmul.f32 %v9631_v3, %v11056_v60  ;;  %v12609_v3 = vld [vmem:[#allocation85_spill] sm:$0xff] }
 0x639   :  { %v9635_v4 = vpop.eup %9634  ;;  %v4441_v22 = vadd.f32 1.0, %v9633_v6  ;;  %v12611_v6 = vld [vmem:[#allocation87_spill] sm:$0xff] }
 0x63a   :  { %v11380_v25 = vadd.f32 %v4450_v58, %v4448_v38  ;;  %v4451_v8 = vmul.f32 %v9635_v4, %v9627_v49  ;;  %v12607_v49 = vld [vmem:[#allocation83_spill] sm:$0xff]  ;;  %v12610_v58 = vld [vmem:[#allocation86_spill] sm:$0xff]  ;;  %v12612_v38 = vld [vmem:[#allocation88_spill] sm:$0xff] }
 0x63b   :  { %v9637_v9 = vpop.eup %9636  ;;  %v12613_v4 = vld [vmem:[#allocation89_spill] sm:$0xff] }
 0x63c   :  { %v4449_v24 = vmul.f32 %v9637_v9, %v11060_v5  ;;  %9640 = vtanh.f32 %v11380_v25  ;;  %v12567_v5 = vld [vmem:[#allocation51_spill] sm:$0xff]  ;;  %v12616_v9 = vld [vmem:[#allocation93_spill] sm:$0xff] }
 0x63d   :  { %9642 = vrcp.f32 %v4441_v22  ;;  %v12617_v22 = vld [vmem:[#allocation95_spill] sm:$0xff] }
 0x63e   :  { %v11384_v26 = vadd.f32 %v4451_v8, %v4449_v24  ;;  %v12615_v8 = vld [vmem:[#allocation91_spill] sm:$0xff]  ;;  %v12618_v24 = vld [vmem:[#allocation92_spill] sm:$0xff] }
 0x63f   :  { %v9639_v61 = vpop.eup %9638 }
 0x640   :  { %9644 = vtanh.f32 %v11384_v26 }
 0x646   :  { %v9641_v56 = vpop.eup %9640 }
 0x647   :  { %v9643_v60 = vpop.eup %9642  ;;  %v4456_v39 = vmul.f32 %v9641_v56, %v9639_v61  ;;  %v12619_v61 = vld [vmem:[#allocation94_spill] sm:$0xff]  ;;  %v12620_v56 = vld [vmem:[#allocation97_spill] sm:$0xff] }
 0x64a   :  { %v9645_v46 = vpop.eup %9644 }
 0x64b   :  { %v4457_v40 = vmul.f32 %v9645_v46, %v9643_v60  ;;  %v12621_v60 = vld [vmem:[#allocation99_spill] sm:$0xff]  ;;  %v12622_v46 = vld [vmem:[#allocation96_spill] sm:$0xff] }
 0x64d   :  { %v4466_v44 = vpack.c.bf16 %v4457_v40, %v4456_v39  ;;  %v12623_v39 = vld [vmem:[#allocation98_spill] sm:$0xff]  ;;  %v12624_v40 = vld [vmem:[#allocation100_spill] sm:$0xff] }
 0x64f   :  { %4885 = vmatmul.mubr.bf16.vlgmr.msra.gmra.mrb[60].mxu0 %v4466_v44  ;;  %4928 = vmatmul.mubr.bf16.vlgmr.msra.gmra.mrb[76].mxu1 %v4466_v44 }
 0x650   :  { %5195 = vmatpush1.bf16.msra.mxu0 %v11063_v12  ;;  %5238 = vmatpush1.bf16.msra.mxu1 %v11065_v13  ;;  %v12568_v12 = vld [vmem:[#allocation57_spill] sm:$0xff]  ;;  %v12569_v13 = vld [vmem:[#allocation52_spill] sm:$0xff] }
 0x651   :  { %5196 = vmatprep.subr.bf16.mxu0 %v11069_v32  ;;  %5239 = vmatprep.subr.bf16.mxu1 %v11071_v15  ;;  %v12570_v32 = vld [vmem:[#allocation59_spill] sm:$0xff] }
 0x652   :  { %5226 = vmatprep.mubr.bf16.mxu0 %v12321_v33  ;;  %5269 = vmatprep.mubr.bf16.mxu1 %v12321_v33  ;;  %v12571_v15 = vld [vmem:[#allocation23_spill] sm:$0xff] }
 0x654   :  { %5197 = vmatpush1.bf16.msra.mxu0 %v11077_v16  ;;  %5240 = vmatpush1.bf16.msra.mxu1 %v11079_v17  ;;  %v12572_v16 = vld [vmem:[#allocation24_spill] sm:$0xff]  ;;  %v12573_v17 = vld [vmem:[#allocation25_spill] sm:$0xff] }
 0x655   :  { %5198 = vmatprep.subr.bf16.mxu0 %v11083_v18  ;;  %5241 = vmatprep.subr.bf16.mxu1 %v11085_v19  ;;  %v12574_v18 = vld [vmem:[#allocation26_spill] sm:$0xff]  ;;  %v12575_v19 = vld [vmem:[#allocation27_spill] sm:$0xff] }
 0x658   :  { %5199 = vmatpush1.bf16.msra.mxu0 %v11091_v23  ;;  %5242 = vmatpush1.bf16.msra.mxu1 %v11093_v34  ;;  %v12576_v23 = vld [vmem:[#allocation28_spill] sm:$0xff]  ;;  %v12577_v34 = vld [vmem:[#allocation29_spill] sm:$0xff] }
 0x659   :  { %5200 = vmatprep.subr.bf16.mxu0 %v11097_v59  ;;  %5243 = vmatprep.subr.bf16.mxu1 %v11099_v43  ;;  %v12578_v59 = vld [vmem:[#allocation30_spill] sm:$0xff]  ;;  %v12579_v43 = vld [vmem:[#allocation31_spill] sm:$0xff] }
 0x65c   :  { %5201 = vmatpush1.bf16.msra.mxu0 %v11103_v47  ;;  %5244 = vmatpush1.bf16.msra.mxu1 %v11105_v53  ;;  %v12580_v47 = vld [vmem:[#allocation32_spill] sm:$0xff]  ;;  %v12581_v53 = vld [vmem:[#allocation34_spill] sm:$0xff] }
 0x65d   :  { %5202 = vmatprep.subr.bf16.mxu0 %v11109_v45  ;;  %5245 = vmatprep.subr.bf16.mxu1 %v11111_v29  ;;  %v12582_v45 = vld [vmem:[#allocation36_spill] sm:$0xff]  ;;  %v12583_v29 = vld [vmem:[#allocation33_spill] sm:$0xff] }
 0x660   :  { %5203 = vmatpush1.bf16.msra.mxu0 %v11115_v52  ;;  %5246 = vmatpush1.bf16.msra.mxu1 %v11117_v35  ;;  %v12584_v52 = vld [vmem:[#allocation35_spill] sm:$0xff]  ;;  %v12585_v35 = vld [vmem:[#allocation37_spill] sm:$0xff] }
 0x661   :  { %5204 = vmatprep.subr.bf16.mxu0 %v11121_v20  ;;  %5247 = vmatprep.subr.bf16.mxu1 %v11123_v21  ;;  %v12586_v20 = vld [vmem:[#allocation38_spill] sm:$0xff]  ;;  %v12587_v21 = vld [vmem:[#allocation39_spill] sm:$0xff] }
 0x664   :  { %5205 = vmatpush1.bf16.msra.mxu0 %v11127_v37  ;;  %5248 = vmatpush1.bf16.msra.mxu1 %v11129_v30  ;;  %v12588_v37 = vld [vmem:[#allocation40_spill] sm:$0xff]  ;;  %v12589_v30 = vld [vmem:[#allocation41_spill] sm:$0xff] }
 0x665   :  { %5206 = vmatprep.subr.bf16.mxu0 %v11133_v51  ;;  %5249 = vmatprep.subr.bf16.mxu1 %v11135_v42  ;;  %v12590_v51 = vld [vmem:[#allocation42_spill] sm:$0xff]  ;;  %v12591_v42 = vld [vmem:[#allocation43_spill] sm:$0xff] }
 0x668   :  { %5207 = vmatpush1.bf16.msra.mxu0 %v11139_v36  ;;  %5250 = vmatpush1.bf16.msra.mxu1 %v11141_v41  ;;  %v12592_v36 = vld [vmem:[#allocation44_spill] sm:$0xff] }
 0x669   :  { %5208 = vmatprep.subr.bf16.mxu0 %v11145_v27  ;;  %5251 = vmatprep.subr.bf16.mxu1 %v11147_v54  ;;  %v12593_v41 = vld [vmem:[#allocation48_spill] sm:$0xff]  ;;  %v12594_v27 = vld [vmem:[#allocation53_spill] sm:$0xff]  ;;  %v12595_v54 = vld [vmem:[#allocation50_spill] sm:$0xff] }
 0x66c   :  { %5209 = vmatpush1.bf16.msra.mxu0 %v11151_v28  ;;  %5252 = vmatpush1.bf16.msra.mxu1 %v12567_v5  ;;  %v12596_v28 = vld [vmem:[#allocation55_spill] sm:$0xff]  ;;  %v12626_v5 = vld [vmem:[#allocation102_spill] sm:$0xff] }
 0x66d   :  { %5740 = vmatprep.subr.bf16.mxu0 %v12568_v12  ;;  %5783 = vmatprep.subr.bf16.mxu1 %v12569_v13  ;;  %v12627_v12 = vld [vmem:[#allocation103_spill] sm:$0xff]  ;;  %v12628_v13 = vld [vmem:[#allocation104_spill] sm:$0xff] }
 0x66f   :  { %5227 = vmatmul.mubr.bf16.vlgmr.msra.gmra.mrb[64].mxu0 %v4466_v44  ;;  %5270 = vmatmul.mubr.bf16.vlgmr.msra.gmra.mrb[80].mxu1 %v4466_v44  ;;  %v12625_v44 = vld [vmem:[#allocation101_spill] sm:$0xff] }
 0x670   :  { %5741 = vmatpush1.bf16.msra.mxu0 %v12570_v32  ;;  %5784 = vmatpush1.bf16.msra.mxu1 %v12571_v15  ;;  %v12629_v32 = vld [vmem:[#allocation105_spill] sm:$0xff]  ;;  %v12630_v15 = vld [vmem:[#allocation106_spill] sm:$0xff] }
 0x671   :  { %5742 = vmatprep.subr.bf16.mxu0 %v12572_v16  ;;  %5785 = vmatprep.subr.bf16.mxu1 %v12573_v17  ;;  %v12631_v16 = vld [vmem:[#allocation107_spill] sm:$0xff] }
 0x672   :  { %v11483_v17 = vld [vmem:[#allocation10 + $0x4] ss:$16 sps:$4 sm:$0xff]  }
 0x674   :  { %5743 = vmatpush1.bf16.msra.mxu0 %v12574_v18  ;;  %5786 = vmatpush1.bf16.msra.mxu1 %v12575_v19  ;;  %v11485_v18 = vld [vmem:[#allocation10 + $0xc] ss:$16 sps:$4 sm:$0xff]  }
 0x675   :  { %5744 = vmatprep.subr.bf16.mxu0 %v12576_v23  ;;  %5787 = vmatprep.subr.bf16.mxu1 %v12577_v34  ;;  %v12632_v34 = vld [vmem:[#allocation19_spill] sm:$0xff] }
 0x678   :  { %5745 = vmatpush1.bf16.msra.mxu0 %v12578_v59  ;;  %5788 = vmatpush1.bf16.msra.mxu1 %v12579_v43 }
 0x679   :  { %5746 = vmatprep.subr.bf16.mxu0 %v12580_v47  ;;  %5789 = vmatprep.subr.bf16.mxu1 %v12581_v53  ;;  %v12633_v53 = vld [vmem:[#allocation20_spill] sm:$0xff] }
 0x67c   :  { %5747 = vmatpush1.bf16.msra.mxu0 %v12582_v45  ;;  %5790 = vmatpush1.bf16.msra.mxu1 %v12583_v29 }
 0x67d   :  { %5748 = vmatprep.subr.bf16.mxu0 %v12584_v52  ;;  %5791 = vmatprep.subr.bf16.mxu1 %v12585_v35 }
 0x680   :  { %5749 = vmatpush1.bf16.msra.mxu0 %v12586_v20  ;;  %5792 = vmatpush1.bf16.msra.mxu1 %v12587_v21 }
 0x681   :  { %5750 = vmatprep.subr.bf16.mxu0 %v12588_v37  ;;  %5793 = vmatprep.subr.bf16.mxu1 %v12589_v30 }
 0x684   :  { %5751 = vmatpush1.bf16.msra.mxu0 %v12590_v51  ;;  %5794 = vmatpush1.bf16.msra.mxu1 %v12591_v42 }
 0x685   :  { %5752 = vmatprep.subr.bf16.mxu0 %v12592_v36  ;;  %5795 = vmatprep.subr.bf16.mxu1 %v12593_v41  ;;  %v12634_v41 = vld [vmem:[#allocation22_spill] sm:$0xff] }
 0x688   :  { %5753 = vmatpush1.bf16.msra.mxu0 %v12594_v27  ;;  %5796 = vmatpush1.bf16.msra.mxu1 %v12595_v54  ;;  %v12635_v54 = vld [vmem:[#allocation21_spill] sm:$0xff] }
 0x689   :  { %5754 = vmatprep.subr.bf16.mxu0 %v12596_v28  ;;  %5797 = vmatprep.subr.bf16.mxu1 %v12597_v50 }
 0x68c   :  { %5755 = vmatpush1.bf16.msra.mxu0 %v12598_v7  ;;  %5798 = vmatpush1.bf16.msra.mxu1 %v12599_v55 }
 0x68d   :  { %5756 = vmatprep.subr.bf16.mxu0 %v12600_v48  ;;  %5799 = vmatprep.subr.bf16.mxu1 %v12601_v11 }
 0x690   :  { %5757 = vmatpush1.bf16.msra.mxu0 %v12602_v31  ;;  %5800 = vmatpush1.bf16.msra.mxu1 %v12603_v62 }
 0x691   :  { %5758 = vmatprep.subr.bf16.mxu0 %v12604_v10  ;;  %5801 = vmatprep.subr.bf16.mxu1 %v12605_v63 }
 0x694   :  { %5759 = vmatpush1.bf16.msra.mxu0 %v12606_v1  ;;  %5802 = vmatpush1.bf16.msra.mxu1 %v12607_v49 }
 0x695   :  { %5760 = vmatprep.subr.bf16.mxu0 %v12608_v0  ;;  %5803 = vmatprep.subr.bf16.mxu1 %v12609_v3 }
 0x698   :  { %5761 = vmatpush1.bf16.msra.mxu0 %v12610_v58  ;;  %5804 = vmatpush1.bf16.msra.mxu1 %v12611_v6 }
 0x699   :  { %5762 = vmatprep.subr.bf16.mxu0 %v12612_v38  ;;  %5805 = vmatprep.subr.bf16.mxu1 %v12613_v4 }
 0x69c   :  { %5763 = vmatpush1.bf16.msra.mxu0 %v12614_v57  ;;  %5806 = vmatpush1.bf16.msra.mxu1 %v12615_v8 }
 0x69d   :  { %5764 = vmatprep.subr.bf16.mxu0 %v12616_v9  ;;  %5807 = vmatprep.subr.bf16.mxu1 %v12617_v22  ;;  %v12636_v9 = vld [vmem:[#allocation62_spill] sm:$0xff] }
 0x69e   :  { %v5280_v22 = vunpack.c.l.bf16 %v12636_v9 }
 0x6a0   :  { %5765 = vmatpush1.bf16.msra.mxu0 %v12618_v24  ;;  %5808 = vmatpush1.bf16.msra.mxu1 %v12619_v61  ;;  %v12637_v24 = vld [vmem:[#allocation67_spill] sm:$0xff] }
 0x6a1   :  { %5766 = vmatprep.subr.bf16.mxu0 %v12620_v56  ;;  %5809 = vmatprep.subr.bf16.mxu1 %v12621_v60  ;;  %v5282_v61 = vunpack.c.l.bf16 %v12637_v24  ;;  %v5284_v56 = vunpack.c.h.bf16 %v12636_v9 }
 0x6a4   :  { %5767 = vmatpush1.bf16.msra.mxu0 %v12622_v46  ;;  %5810 = vmatpush1.bf16.msra.mxu1 %v12623_v39 }
 0x6a5   :  { %5768 = vmatprep.subr.bf16.mxu0 %v12624_v40  ;;  %5811 = vmatprep.subr.bf16.mxu1 %v12625_v44 }
 0x6a8   :  { %5769 = vmatpush1.bf16.msra.mxu0 %v12626_v5  ;;  %5812 = vmatpush1.bf16.msra.mxu1 %v12627_v12  ;;  %v12638_v5 = vld [vmem:[#allocation64_spill] sm:$0xff] }
 0x6a9   :  { %5770 = vmatprep.subr.bf16.mxu0 %v12628_v13  ;;  %5813 = vmatprep.subr.bf16.mxu1 %v12629_v32  ;;  %v5281_v12 = vunpack.c.l.bf16 %v12638_v5  ;;  %v12639_v13 = vld [vmem:[#allocation68_spill] sm:$0xff] }
 0x6aa   :  { %v5283_v32 = vunpack.c.l.bf16 %v12639_v13 }
 0x6ac   :  { %5771 = vmatpush1.bf16.msra.mxu0 %v12630_v15  ;;  %5814 = vmatpush1.bf16.msra.mxu1 %v12631_v16 }
 0x6ad   :  { %6082 = vmatprep.subr.bf16.mxu0 %v11483_v17  ;;  %6125 = vmatprep.subr.bf16.mxu1 %v11485_v18 }
 0x722   :  { %v4886_v19 = vpop.f32.mrb[60].mxu0  ;;  %v4929_v23 = vpop.f32.mrb[76].mxu1 }
 0x723   :  { %v4887_v59 = vadd.f32 %v4886_v19, %v12632_v34  ;;  %v4888_v43 = vpop.f32.mrb[61].mxu0  ;;  %v4931_v47 = vpop.f32.mrb[77].mxu1  ;;  %v4930_v27 = vadd.f32 %v4929_v23, %v12634_v41 }
 0x724   :  { %v4889_v45 = vadd.f32 %v4888_v43, %v12633_v53  ;;  %v4890_v29 = vpop.f32.mrb[62].mxu0  ;;  %v4933_v52 = vpop.f32.mrb[78].mxu1  ;;  %v4932_v28 = vadd.f32 %v4931_v47, %v12635_v54  ;;  %v5285_v43 = vunpack.c.h.bf16 %v12638_v5 }
 0x725   :  { %v8368_v35 = vmul.f32 -1.442695, %v4887_v59  ;;  %v4891_v20 = vadd.f32 %v4890_v29, %v12632_v34  ;;  %v4892_v21 = vpop.f32.mrb[63].mxu0  ;;  %v4935_v37 = vpop.f32.mrb[79].mxu1  ;;  %v4934_v48 = vadd.f32 %v4933_v52, %v12634_v41  ;;  %v5286_v59 = vunpack.c.h.bf16 %v12637_v24 }
 0x726   :  { %v8370_v30 = vmul.f32 -1.442695, %v4889_v45  ;;  %v4893_v51 = vadd.f32 %v4892_v21, %v12633_v53  ;;  %v8372_v62 = vmul.f32 -1.442695, %v4932_v28  ;;  %v4936_v10 = vadd.f32 %v4935_v37, %v12635_v54 }
 0x727   :  { %9646 = vpow2.f32 %v8368_v35  ;;  %v8369_v42 = vmul.f32 -1.442695, %v4891_v20  ;;  %v5287_v20 = vunpack.c.h.bf16 %v12639_v13 }
 0x728   :  { %9648 = vpow2.f32 %v8370_v30  ;;  %v8371_v36 = vmul.f32 -1.442695, %v4893_v51  ;;  %v8373_v0 = vmul.f32 -1.442695, %v4936_v10 }
 0x729   :  { %9650 = vpow2.f32 %v8369_v42 }
 0x72a   :  { %9652 = vpow2.f32 %v8371_v36 }
 0x72b   :  { %9654 = vtanh.f32 %v4930_v27 }
 0x731   :  { %v9647_v50 = vpop.eup %9646 }
 0x732   :  { %v9649_v7 = vpop.eup %9648  ;;  %v4944_v55 = vadd.f32 1.0, %v9647_v50 }
 0x733   :  { %v4956_v11 = vadd.f32 1.0, %v9649_v7  ;;  %v9651_v31 = vpop.eup %9650 }
 0x734   :  { %9656 = vrcp.f32 %v4944_v55  ;;  %v4945_v63 = vadd.f32 1.0, %v9651_v31  ;;  %v9653_v1 = vpop.eup %9652 }
 0x735   :  { %9658 = vrcp.f32 %v4956_v11  ;;  %v4957_v49 = vadd.f32 1.0, %v9653_v1  ;;  %v9655_v3 = vpop.eup %9654 }
 0x736   :  { %9660 = vtanh.f32 %v4934_v48 }
 0x737   :  { %9662 = vrcp.f32 %v4945_v63 }
 0x738   :  { %9664 = vpow2.f32 %v8372_v62 }
 0x739   :  { %9666 = vrcp.f32 %v4957_v49 }
 0x73a   :  { %9668 = vpow2.f32 %v8373_v0 }
 0x73e   :  { %v9657_v58 = vpop.eup %9656 }
 0x73f   :  { %v9659_v6 = vpop.eup %9658  ;;  %v4980_v38 = vmul.f32 %v9657_v58, %v9655_v3 }
 0x740   :  { %v9661_v4 = vpop.eup %9660  ;;  %v4978_v57 = vmul.f32 %v9659_v6, %v11367_v2 }
 0x741   :  { %v9663_v8 = vpop.eup %9662 }
 0x742   :  { %v9665_v60 = vpop.eup %9664  ;;  %v11501_v46 = vadd.f32 %v4980_v38, %v4978_v57  ;;  %v4981_v39 = vmul.f32 %v9663_v8, %v9661_v4  ;;  %v5228_v40 = vpop.f32.mrb[64].mxu0 }
 0x743   :  { %v5271_v44 = vpop.f32.mrb[80].mxu1  ;;  %v9667_v15 = vpop.eup %9666  ;;  %v5288_v16 = vadd.f32 %v5280_v22, %v5228_v40  ;;  %v4970_v21 = vadd.f32 1.0, %v9665_v60 }
 0x744   :  { %v5290_v2 = vadd.f32 %v5282_v61, %v5271_v44  ;;  %v5230_v19 = vpop.f32.mrb[65].mxu0  ;;  %v5273_v23 = vpop.f32.mrb[81].mxu1  ;;  %v4979_v47 = vmul.f32 %v9667_v15, %v11375_v14 }
 0x745   :  { %v5289_v45 = vadd.f32 %v5281_v12, %v5230_v19  ;;  %v5291_v29 = vadd.f32 %v5283_v32, %v5273_v23  ;;  %v5232_v52 = vpop.f32.mrb[66].mxu0  ;;  %v5275_v35 = vpop.f32.mrb[82].mxu1  ;;  %v8406_v37 = vmul.f32 -1.442695, %v5288_v16 }
 0x746   :  { %v5292_v30 = vadd.f32 %v5284_v56, %v5232_v52  ;;  %v5294_v51 = vadd.f32 %v5286_v59, %v5275_v35  ;;  %v5234_v42 = vpop.f32.mrb[67].mxu0  ;;  %v5277_v36 = vpop.f32.mrb[83].mxu1  ;;  %v11509_v28 = vadd.f32 %v4981_v39, %v4979_v47  ;;  %v11521_v35 = vld [vmem:[#allocation10] ss:$16 sps:$4 sm:$0xff]  }
 0x747   :  { %v9669_v27 = vpop.eup %9668  ;;  %v8408_v50 = vmul.f32 -1.442695, %v5289_v45  ;;  %v5293_v7 = vadd.f32 %v5285_v43, %v5234_v42  ;;  %9670 = vpow2.f32 %v8406_v37  ;;  %v5295_v14 = vadd.f32 %v5287_v20, %v5277_v36  ;;  %v11523_v20 = vld [vmem:[#allocation10 + $0x8] ss:$16 sps:$4 sm:$0xff]   ;;  %v11529_v37 = vld [vmem:[#allocation10 + $0x2c] ss:$16 sps:$4 sm:$0xff]  }
 0x748   :  { %v8407_v55 = vmul.f32 -1.442695, %v5292_v30  ;;  %v4971_v11 = vadd.f32 1.0, %v9669_v27  ;;  %v8410_v31 = vmul.f32 -1.442695, %v5291_v29 }
 0x749   :  { %9672 = vpow2.f32 %v8408_v50  ;;  %v8409_v48 = vmul.f32 -1.442695, %v5293_v7  ;;  %v8411_v1 = vmul.f32 -1.442695, %v5295_v14  ;;  %v11535_v30 = vld [vmem:[#allocation10 + $0x20] ss:$16 sps:$4 sm:$0xff]  }
 0x74a   :  { %9674 = vrcp.f32 %v4970_v21  ;;  %v11541_v42 = vld [vmem:[#allocation10 + $0x44] ss:$16 sps:$4 sm:$0xff]   ;;  %v11543_v36 = vld [vmem:[#allocation10 + $0x4c] ss:$16 sps:$4 sm:$0xff]   ;;  %v11549_v27 = vld [vmem:[#allocation10 + $0x40] ss:$16 sps:$4 sm:$0xff]  }
 0x74b   :  { %9676 = vpow2.f32 %v8407_v55  ;;  %v11551_v50 = vld [vmem:[#allocation10 + $0x48] ss:$16 sps:$4 sm:$0xff]   ;;  %v11555_v7 = vld [vmem:[#allocation10 + $0x64] ss:$16 sps:$4 sm:$0xff]   ;;  %v11557_v55 = vld [vmem:[#allocation10 + $0x6c] ss:$16 sps:$4 sm:$0xff]  }
 0x74c   :  { %9678 = vtanh.f32 %v11501_v46  ;;  %v11561_v14 = vld [vmem:[#allocation10 + $0x60] ss:$16 sps:$4 sm:$0xff]  }
 0x74d   :  { %9680 = vpow2.f32 %v8409_v48  ;;  %v11563_v48 = vld [vmem:[#allocation10 + $0x68] ss:$16 sps:$4 sm:$0xff]  }
 0x74e   :  { %9682 = vrcp.f32 %v4971_v11  ;;  %v11567_v11 = vld [vmem:[#allocation10 + $0x84] ss:$16 sps:$4 sm:$0xff]  }
 0x74f   :  { %9684 = vtanh.f32 %v11509_v28 }
 0x750   :  { %9686 = vtanh.f32 %v5290_v2 }
 0x751   :  { %v9671_v62 = vpop.eup %9670  ;;  %9688 = vpow2.f32 %v8410_v31  ;;  %v11569_v31 = vld [vmem:[#allocation10 + $0x8c] ss:$16 sps:$4 sm:$0xff]  }
 0x752   :  { %v5302_v63 = vadd.f32 1.0, %v9671_v62  ;;  %9690 = vtanh.f32 %v5294_v51  ;;  %v11537_v51 = vld [vmem:[#allocation10 + $0x28] ss:$16 sps:$4 sm:$0xff]   ;;  %v11573_v62 = vld [vmem:[#allocation10 + $0x80] ss:$16 sps:$4 sm:$0xff]  }
 0x753   :  { %v9673_v10 = vpop.eup %9672 }
 0x754   :  { %v9675_v49 = vpop.eup %9674  ;;  %v5314_v0 = vadd.f32 1.0, %v9673_v10  ;;  %9692 = vrcp.f32 %v5302_v63  ;;  %v11575_v10 = vld [vmem:[#allocation10 + $0x88] ss:$16 sps:$4 sm:$0xff]   ;;  %v11579_v63 = vld [vmem:[#allocation10 + $0xa4] ss:$16 sps:$4 sm:$0xff]  }
 0x755   :  { %v9677_v3 = vpop.eup %9676 }
 0x756   :  { %v9679_v58 = vpop.eup %9678  ;;  %9694 = vrcp.f32 %v5314_v0  ;;  %v5303_v6 = vadd.f32 1.0, %v9677_v3  ;;  %v11587_v0 = vld [vmem:[#allocation10 + $0xa8] ss:$16 sps:$4 sm:$0xff]   ;;  %v11591_v3 = vld [vmem:[#allocation10 + $0xc4] ss:$16 sps:$4 sm:$0xff]  }
 0x757   :  { %v9681_v38 = vpop.eup %9680  ;;  %9696 = vpow2.f32 %v8411_v1  ;;  %v4986_v9 = vmul.f32 %v9679_v58, %v9675_v49  ;;  %v11581_v1 = vld [vmem:[#allocation10 + $0xac] ss:$16 sps:$4 sm:$0xff]   ;;  %v11585_v49 = vld [vmem:[#allocation10 + $0xa0] ss:$16 sps:$4 sm:$0xff]  }
 0x758   :  { %v9683_v4 = vpop.eup %9682  ;;  %9698 = vrcp.f32 %v5303_v6  ;;  %v5315_v57 = vadd.f32 1.0, %v9681_v38  ;;  %v11593_v58 = vld [vmem:[#allocation10 + $0xcc] ss:$16 sps:$4 sm:$0xff]   ;;  %v11597_v6 = vld [vmem:[#allocation10 + $0xc0] ss:$16 sps:$4 sm:$0xff]  }
 0x759   :  { %v9685_v8 = vpop.eup %9684  ;;  %v11599_v38 = vld [vmem:[#allocation10 + $0xc8] ss:$16 sps:$4 sm:$0xff]  }
 0x75a   :  { %9700 = vrcp.f32 %v5315_v57  ;;  %v4987_v22 = vmul.f32 %v9685_v8, %v9683_v4  ;;  %v9687_v24 = vpop.eup %9686  ;;  %v11603_v4 = vld [vmem:[#allocation10 + $0xe4] ss:$16 sps:$4 sm:$0xff]   ;;  %v11605_v57 = vld [vmem:[#allocation10 + $0xec] ss:$16 sps:$4 sm:$0xff]   ;;  %v11609_v8 = vld [vmem:[#allocation10 + $0xe0] ss:$16 sps:$4 sm:$0xff]  }
 0x75b   :  { %v9689_v56 = vpop.eup %9688 }
 0x75c   :  { %v5355_v61 = vpack.c.bf16 %v4987_v22, %v4986_v9  ;;  %v9691_v60 = vpop.eup %9690  ;;  %v5328_v32 = vadd.f32 1.0, %v9689_v56  ;;  %v11611_v9 = vld [vmem:[#allocation10 + $0xe8] ss:$16 sps:$4 sm:$0xff]   ;;  %v11619_v22 = vld [vmem:[#allocation11 + $0x4] ss:$16 sps:$4 sm:$0xff]  }
 0x75d   :  { %12640 = vst [vmem:[#allocation108_spill] sm:$0xff] %v11611_v9  ;;  %12641 = vst [vmem:[#allocation109_spill] sm:$0xff] %v11619_v22  ;;  %v11625_v56 = vld [vmem:[#allocation11 + $0x8] ss:$16 sps:$4 sm:$0xff]  }
 0x75e   :  { %5772 = vmatprep.mubr.bf16.mxu0 %v5355_v61  ;;  %5815 = vmatprep.mubr.bf16.mxu1 %v5355_v61  ;;  %v9693_v39 = vpop.eup %9692  ;;  %9702 = vrcp.f32 %v5328_v32  ;;  %v11623_v61 = vld [vmem:[#allocation11] ss:$16 sps:$4 sm:$0xff]   ;;  %12644 = vst [vmem:[#allocation54_spill] sm:$0xff] %v11625_v56  ;;  %v11649_v32 = vld [vmem:[#allocation11 + $0x48] ss:$16 sps:$4 sm:$0xff]  }
 0x75f   :  { %v5338_v44 = vmul.f32 %v9693_v39, %v9687_v24  ;;  %v11621_v24 = vld [vmem:[#allocation11 + $0xc] ss:$16 sps:$4 sm:$0xff]   ;;  %12643 = vst [vmem:[#allocation111_spill] sm:$0xff] %v11623_v61  ;;  %12652 = vst [vmem:[#allocation51_spill] sm:$0xff] %v11649_v32 }
 0x760   :  { %v9695_v40 = vpop.eup %9694  ;;  %12642 = vst [vmem:[#allocation110_spill] sm:$0xff] %v11621_v24  ;;  %v11633_v39 = vld [vmem:[#allocation11 + $0x2c] ss:$16 sps:$4 sm:$0xff]  }
 0x761   :  { %v9697_v5 = vpop.eup %9696  ;;  %v5336_v12 = vmul.f32 %v9695_v40, %v11380_v25  ;;  %12646 = vst [vmem:[#allocation56_spill] sm:$0xff] %v11633_v39  ;;  %v11635_v40 = vld [vmem:[#allocation11 + $0x20] ss:$16 sps:$4 sm:$0xff]  }
 0x762   :  { %v9699_v13 = vpop.eup %9698  ;;  %v5329_v19 = vadd.f32 1.0, %v9697_v5  ;;  %12647 = vst [vmem:[#allocation63_spill] sm:$0xff] %v11635_v40  ;;  %v11643_v5 = vld [vmem:[#allocation11 + $0x44] ss:$16 sps:$4 sm:$0xff]  }
 0x763   :  { %v11514_v15 = vadd.f32 %v5338_v44, %v5336_v12  ;;  %v5339_v16 = vmul.f32 %v9699_v13, %v9691_v60  ;;  %v11631_v60 = vld [vmem:[#allocation11 + $0x24] ss:$16 sps:$4 sm:$0xff]   ;;  %v11637_v44 = vld [vmem:[#allocation11 + $0x28] ss:$16 sps:$4 sm:$0xff]   ;;  %12649 = vst [vmem:[#allocation65_spill] sm:$0xff] %v11643_v5 }
 0x764   :  { %v9701_v2 = vpop.eup %9700  ;;  %12645 = vst [vmem:[#allocation61_spill] sm:$0xff] %v11631_v60  ;;  %12648 = vst [vmem:[#allocation58_spill] sm:$0xff] %v11637_v44  ;;  %v11645_v12 = vld [vmem:[#allocation11 + $0x4c] ss:$16 sps:$4 sm:$0xff]   ;;  %v11647_v13 = vld [vmem:[#allocation11 + $0x40] ss:$16 sps:$4 sm:$0xff]  }
 0x765   :  { %v5337_v23 = vmul.f32 %v9701_v2, %v11384_v26  ;;  %9704 = vtanh.f32 %v11514_v15  ;;  %v11527_v26 = vld [vmem:[#allocation10 + $0x24] ss:$16 sps:$4 sm:$0xff]   ;;  %12650 = vst [vmem:[#allocation60_spill] sm:$0xff] %v11645_v12  ;;  %12651 = vst [vmem:[#allocation66_spill] sm:$0xff] %v11647_v13  ;;  %v11657_v2 = vld [vmem:[#allocation11 + $0x6c] ss:$16 sps:$4 sm:$0xff]  }
 0x766   :  { %9706 = vrcp.f32 %v5329_v19  ;;  %12654 = vst [vmem:[#allocation52_spill] sm:$0xff] %v11657_v2  ;;  %v11659_v19 = vld [vmem:[#allocation11 + $0x60] ss:$16 sps:$4 sm:$0xff]  }
 0x767   :  { %v11518_v59 = vadd.f32 %v5339_v16, %v5337_v23  ;;  %v11655_v16 = vld [vmem:[#allocation11 + $0x64] ss:$16 sps:$4 sm:$0xff]   ;;  %12655 = vst [vmem:[#allocation59_spill] sm:$0xff] %v11659_v19  ;;  %v11661_v23 = vld [vmem:[#allocation11 + $0x68] ss:$16 sps:$4 sm:$0xff]  }
 0x768   :  { %v9703_v43 = vpop.eup %9702  ;;  %12653 = vst [vmem:[#allocation57_spill] sm:$0xff] %v11655_v16  ;;  %12656 = vst [vmem:[#allocation23_spill] sm:$0xff] %v11661_v23 }
 0x769   :  { %9708 = vtanh.f32 %v11518_v59 }
 0x76f   :  { %v9705_v47 = vpop.eup %9704 }
 0x770   :  { %v9707_v25 = vpop.eup %9706  ;;  %v5344_v29 = vmul.f32 %v9705_v47, %v9703_v43  ;;  %v11667_v43 = vld [vmem:[#allocation11 + $0x84] ss:$16 sps:$4 sm:$0xff]   ;;  %v11669_v47 = vld [vmem:[#allocation11 + $0x8c] ss:$16 sps:$4 sm:$0xff]  }
 0x771   :  { %12657 = vst [vmem:[#allocation24_spill] sm:$0xff] %v11667_v43  ;;  %12658 = vst [vmem:[#allocation25_spill] sm:$0xff] %v11669_v47 }
 0x773   :  { %v9709_v45 = vpop.eup %9708 }
 0x774   :  { %v5345_v52 = vmul.f32 %v9709_v45, %v9707_v25  ;;  %v11671_v25 = vld [vmem:[#allocation11 + $0x80] ss:$16 sps:$4 sm:$0xff]   ;;  %v11673_v45 = vld [vmem:[#allocation11 + $0x88] ss:$16 sps:$4 sm:$0xff]  }
 0x775   :  { %12659 = vst [vmem:[#allocation26_spill] sm:$0xff] %v11671_v25  ;;  %12660 = vst [vmem:[#allocation27_spill] sm:$0xff] %v11673_v45 }
 0x776   :  { %v11525_v21 = vpack.c.bf16 %v5345_v52, %v5344_v29  ;;  %v11679_v29 = vld [vmem:[#allocation11 + $0xa4] ss:$16 sps:$4 sm:$0xff]   ;;  %v11681_v52 = vld [vmem:[#allocation11 + $0xac] ss:$16 sps:$4 sm:$0xff]  }
 0x777   :  { %12661 = vst [vmem:[#allocation28_spill] sm:$0xff] %v11679_v29  ;;  %12662 = vst [vmem:[#allocation29_spill] sm:$0xff] %v11681_v52 }
 0x778   :  { %5773 = vmatmul.mubr.bf16.vlgmr.msra.gmra.mrb[68].mxu0 %v11525_v21  ;;  %5816 = vmatmul.mubr.bf16.vlgmr.msra.gmra.mrb[84].mxu1 %v11525_v21 }
 0x779   :  { %6083 = vmatpush1.bf16.msra.mxu0 %v11521_v35  ;;  %6126 = vmatpush1.bf16.msra.mxu1 %v11523_v20 }
 0x77a   :  { %6084 = vmatprep.subr.bf16.mxu0 %v11527_v26  ;;  %6127 = vmatprep.subr.bf16.mxu1 %v11529_v37 }
 0x77b   :  { %6114 = vmatprep.mubr.bf16.mxu0 %v12321_v33  ;;  %6157 = vmatprep.mubr.bf16.mxu1 %v12321_v33 }
 0x77d   :  { %6085 = vmatpush1.bf16.msra.mxu0 %v11535_v30  ;;  %6128 = vmatpush1.bf16.msra.mxu1 %v11537_v51 }
 0x77e   :  { %6086 = vmatprep.subr.bf16.mxu0 %v11541_v42  ;;  %6129 = vmatprep.subr.bf16.mxu1 %v11543_v36 }
 0x781   :  { %6087 = vmatpush1.bf16.msra.mxu0 %v11549_v27  ;;  %6130 = vmatpush1.bf16.msra.mxu1 %v11551_v50 }
 0x782   :  { %6088 = vmatprep.subr.bf16.mxu0 %v11555_v7  ;;  %6131 = vmatprep.subr.bf16.mxu1 %v11557_v55 }
 0x785   :  { %6089 = vmatpush1.bf16.msra.mxu0 %v11561_v14  ;;  %6132 = vmatpush1.bf16.msra.mxu1 %v11563_v48 }
 0x786   :  { %6090 = vmatprep.subr.bf16.mxu0 %v11567_v11  ;;  %6133 = vmatprep.subr.bf16.mxu1 %v11569_v31 }
 0x789   :  { %6091 = vmatpush1.bf16.msra.mxu0 %v11573_v62  ;;  %6134 = vmatpush1.bf16.msra.mxu1 %v11575_v10 }
 0x78a   :  { %6092 = vmatprep.subr.bf16.mxu0 %v11579_v63  ;;  %6135 = vmatprep.subr.bf16.mxu1 %v11581_v1 }
 0x78d   :  { %6093 = vmatpush1.bf16.msra.mxu0 %v11585_v49  ;;  %6136 = vmatpush1.bf16.msra.mxu1 %v11587_v0 }
 0x78e   :  { %6094 = vmatprep.subr.bf16.mxu0 %v11591_v3  ;;  %6137 = vmatprep.subr.bf16.mxu1 %v11593_v58 }
 0x791   :  { %6095 = vmatpush1.bf16.msra.mxu0 %v11597_v6  ;;  %6138 = vmatpush1.bf16.msra.mxu1 %v11599_v38 }
 0x792   :  { %6096 = vmatprep.subr.bf16.mxu0 %v11603_v4  ;;  %6139 = vmatprep.subr.bf16.mxu1 %v11605_v57 }
 0x795   :  { %6097 = vmatpush1.bf16.msra.mxu0 %v11609_v8  ;;  %6140 = vmatpush1.bf16.msra.mxu1 %v11611_v9 }
 0x796   :  { %6628 = vmatprep.subr.bf16.mxu0 %v11619_v22  ;;  %6671 = vmatprep.subr.bf16.mxu1 %v11621_v24 }
 0x798   :  { %6115 = vmatmul.mubr.bf16.vlgmr.msra.gmra.mrb[72].mxu0 %v11525_v21  ;;  %6158 = vmatmul.mubr.bf16.vlgmr.msra.gmra.mrb[88].mxu1 %v11525_v21  ;;  %v11683_v21 = vld [vmem:[#allocation11 + $0xa0] ss:$16 sps:$4 sm:$0xff]  }
 0x799   :  { %6629 = vmatpush1.bf16.msra.mxu0 %v11623_v61  ;;  %6672 = vmatpush1.bf16.msra.mxu1 %v11625_v56  ;;  %12663 = vst [vmem:[#allocation30_spill] sm:$0xff] %v11683_v21 }
 0x79a   :  { %6630 = vmatprep.subr.bf16.mxu0 %v11631_v60  ;;  %6673 = vmatprep.subr.bf16.mxu1 %v11633_v39 }
 0x79d   :  { %6631 = vmatpush1.bf16.msra.mxu0 %v11635_v40  ;;  %6674 = vmatpush1.bf16.msra.mxu1 %v11637_v44 }
 0x79e   :  { %6632 = vmatprep.subr.bf16.mxu0 %v11643_v5  ;;  %6675 = vmatprep.subr.bf16.mxu1 %v11645_v12 }
 0x7a1   :  { %6633 = vmatpush1.bf16.msra.mxu0 %v11647_v13  ;;  %6676 = vmatpush1.bf16.msra.mxu1 %v11649_v32 }
 0x7a2   :  { %6634 = vmatprep.subr.bf16.mxu0 %v11655_v16  ;;  %6677 = vmatprep.subr.bf16.mxu1 %v11657_v2  ;;  %v11774_v2 = vld [vmem:[#allocation11 + $0x1ac] ss:$16 sps:$4 sm:$0xff]  }
 0x7a3   :  { %12694 = vst [vmem:[#allocation85_spill] sm:$0xff] %v11774_v2 }
 0x7a5   :  { %6635 = vmatpush1.bf16.msra.mxu0 %v11659_v19  ;;  %6678 = vmatpush1.bf16.msra.mxu1 %v11661_v23  ;;  %v11685_v23 = vld [vmem:[#allocation11 + $0xa8] ss:$16 sps:$4 sm:$0xff]   ;;  %v11771_v19 = vld [vmem:[#allocation11 + $0x1a4] ss:$16 sps:$4 sm:$0xff]  }
 0x7a6   :  { %6636 = vmatprep.subr.bf16.mxu0 %v11667_v43  ;;  %6679 = vmatprep.subr.bf16.mxu1 %v11669_v47  ;;  %12664 = vst [vmem:[#allocation31_spill] sm:$0xff] %v11685_v23  ;;  %v11691_v47 = vld [vmem:[#allocation11 + $0xc4] ss:$16 sps:$4 sm:$0xff]   ;;  %v11697_v43 = vld [vmem:[#allocation11 + $0xc8] ss:$16 sps:$4 sm:$0xff]   ;;  %12693 = vst [vmem:[#allocation84_spill] sm:$0xff] %v11771_v19 }
 0x7a7   :  { %12665 = vst [vmem:[#allocation32_spill] sm:$0xff] %v11691_v47  ;;  %12668 = vst [vmem:[#allocation33_spill] sm:$0xff] %v11697_v43 }
 0x7a9   :  { %6637 = vmatpush1.bf16.msra.mxu0 %v11671_v25  ;;  %6680 = vmatpush1.bf16.msra.mxu1 %v11673_v45  ;;  %v11693_v25 = vld [vmem:[#allocation11 + $0xcc] ss:$16 sps:$4 sm:$0xff]   ;;  %v11695_v45 = vld [vmem:[#allocation11 + $0xc0] ss:$16 sps:$4 sm:$0xff]  }
 0x7aa   :  { %6638 = vmatprep.subr.bf16.mxu0 %v11679_v29  ;;  %6681 = vmatprep.subr.bf16.mxu1 %v11681_v52  ;;  %12666 = vst [vmem:[#allocation34_spill] sm:$0xff] %v11693_v25  ;;  %12667 = vst [vmem:[#allocation36_spill] sm:$0xff] %v11695_v45  ;;  %v11703_v52 = vld [vmem:[#allocation11 + $0xe4] ss:$16 sps:$4 sm:$0xff]   ;;  %v11709_v29 = vld [vmem:[#allocation11 + $0xe8] ss:$16 sps:$4 sm:$0xff]  }
 0x7ab   :  { %12669 = vst [vmem:[#allocation35_spill] sm:$0xff] %v11703_v52  ;;  %12672 = vst [vmem:[#allocation39_spill] sm:$0xff] %v11709_v29 }
 0x7ad   :  { %6639 = vmatpush1.bf16.msra.mxu0 %v11683_v21  ;;  %6682 = vmatpush1.bf16.msra.mxu1 %v11685_v23  ;;  %v11705_v21 = vld [vmem:[#allocation11 + $0xec] ss:$16 sps:$4 sm:$0xff]   ;;  %v11707_v23 = vld [vmem:[#allocation11 + $0xe0] ss:$16 sps:$4 sm:$0xff]  }
 0x7ae   :  { %6640 = vmatprep.subr.bf16.mxu0 %v11691_v47  ;;  %6683 = vmatprep.subr.bf16.mxu1 %v11693_v25  ;;  %12670 = vst [vmem:[#allocation37_spill] sm:$0xff] %v11705_v21  ;;  %12671 = vst [vmem:[#allocation38_spill] sm:$0xff] %v11707_v23  ;;  %v11715_v25 = vld [vmem:[#allocation11 + $0x104] ss:$16 sps:$4 sm:$0xff]   ;;  %v11721_v47 = vld [vmem:[#allocation11 + $0x108] ss:$16 sps:$4 sm:$0xff]  }
 0x7af   :  { %12673 = vst [vmem:[#allocation40_spill] sm:$0xff] %v11715_v25  ;;  %12676 = vst [vmem:[#allocation43_spill] sm:$0xff] %v11721_v47 }
 0x7b1   :  { %6641 = vmatpush1.bf16.msra.mxu0 %v11695_v45  ;;  %6684 = vmatpush1.bf16.msra.mxu1 %v11697_v43  ;;  %v11717_v45 = vld [vmem:[#allocation11 + $0x10c] ss:$16 sps:$4 sm:$0xff]   ;;  %v11719_v43 = vld [vmem:[#allocation11 + $0x100] ss:$16 sps:$4 sm:$0xff]  }
 0x7b2   :  { %6642 = vmatprep.subr.bf16.mxu0 %v11703_v52  ;;  %6685 = vmatprep.subr.bf16.mxu1 %v11705_v21  ;;  %12674 = vst [vmem:[#allocation41_spill] sm:$0xff] %v11717_v45  ;;  %12675 = vst [vmem:[#allocation42_spill] sm:$0xff] %v11719_v43  ;;  %v11727_v21 = vld [vmem:[#allocation11 + $0x124] ss:$16 sps:$4 sm:$0xff]   ;;  %v11733_v52 = vld [vmem:[#allocation11 + $0x128] ss:$16 sps:$4 sm:$0xff]  }
 0x7b3   :  { %12677 = vst [vmem:[#allocation44_spill] sm:$0xff] %v11727_v21  ;;  %12680 = vst [vmem:[#allocation50_spill] sm:$0xff] %v11733_v52 }
 0x7b5   :  { %6643 = vmatpush1.bf16.msra.mxu0 %v11707_v23  ;;  %6686 = vmatpush1.bf16.msra.mxu1 %v11709_v29  ;;  %v11729_v23 = vld [vmem:[#allocation11 + $0x12c] ss:$16 sps:$4 sm:$0xff]   ;;  %v11731_v29 = vld [vmem:[#allocation11 + $0x120] ss:$16 sps:$4 sm:$0xff]  }
 0x7b6   :  { %6644 = vmatprep.subr.bf16.mxu0 %v11715_v25  ;;  %6687 = vmatprep.subr.bf16.mxu1 %v11717_v45  ;;  %12678 = vst [vmem:[#allocation48_spill] sm:$0xff] %v11729_v23  ;;  %12679 = vst [vmem:[#allocation53_spill] sm:$0xff] %v11731_v29  ;;  %v11739_v45 = vld [vmem:[#allocation11 + $0x144] ss:$16 sps:$4 sm:$0xff]   ;;  %v11745_v25 = vld [vmem:[#allocation11 + $0x148] ss:$16 sps:$4 sm:$0xff]  }
 0x7b7   :  { %12681 = vst [vmem:[#allocation55_spill] sm:$0xff] %v11739_v45  ;;  %12684 = vst [vmem:[#allocation75_spill] sm:$0xff] %v11745_v25 }
 0x7b9   :  { %6645 = vmatpush1.bf16.msra.mxu0 %v11719_v43  ;;  %6688 = vmatpush1.bf16.msra.mxu1 %v11721_v47  ;;  %v11741_v43 = vld [vmem:[#allocation11 + $0x14c] ss:$16 sps:$4 sm:$0xff]   ;;  %v11743_v47 = vld [vmem:[#allocation11 + $0x140] ss:$16 sps:$4 sm:$0xff]  }
 0x7ba   :  { %6646 = vmatprep.subr.bf16.mxu0 %v11727_v21  ;;  %6689 = vmatprep.subr.bf16.mxu1 %v11729_v23  ;;  %12682 = vst [vmem:[#allocation73_spill] sm:$0xff] %v11741_v43  ;;  %12683 = vst [vmem:[#allocation74_spill] sm:$0xff] %v11743_v47  ;;  %v11751_v23 = vld [vmem:[#allocation11 + $0x164] ss:$16 sps:$4 sm:$0xff]   ;;  %v11757_v21 = vld [vmem:[#allocation11 + $0x168] ss:$16 sps:$4 sm:$0xff]  }
 0x7bb   :  { %12685 = vst [vmem:[#allocation76_spill] sm:$0xff] %v11751_v23  ;;  %12688 = vst [vmem:[#allocation79_spill] sm:$0xff] %v11757_v21 }
 0x7bd   :  { %6647 = vmatpush1.bf16.msra.mxu0 %v11731_v29  ;;  %6690 = vmatpush1.bf16.msra.mxu1 %v11733_v52  ;;  %v11753_v29 = vld [vmem:[#allocation11 + $0x16c] ss:$16 sps:$4 sm:$0xff]   ;;  %v11755_v52 = vld [vmem:[#allocation11 + $0x160] ss:$16 sps:$4 sm:$0xff]  }
 0x7be   :  { %6648 = vmatprep.subr.bf16.mxu0 %v11739_v45  ;;  %6691 = vmatprep.subr.bf16.mxu1 %v11741_v43  ;;  %12686 = vst [vmem:[#allocation77_spill] sm:$0xff] %v11753_v29  ;;  %12687 = vst [vmem:[#allocation78_spill] sm:$0xff] %v11755_v52  ;;  %v11763_v43 = vld [vmem:[#allocation11 + $0x180] ss:$16 sps:$4 sm:$0xff]   ;;  %v11769_v45 = vld [vmem:[#allocation11 + $0x18c] ss:$16 sps:$4 sm:$0xff]  }
 0x7bf   :  { %12689 = vst [vmem:[#allocation80_spill] sm:$0xff] %v11763_v43  ;;  %12692 = vst [vmem:[#allocation83_spill] sm:$0xff] %v11769_v45 }
 0x7c1   :  { %6649 = vmatpush1.bf16.msra.mxu0 %v11743_v47  ;;  %6692 = vmatpush1.bf16.msra.mxu1 %v11745_v25  ;;  %v11765_v47 = vld [vmem:[#allocation11 + $0x184] ss:$16 sps:$4 sm:$0xff]   ;;  %v11767_v25 = vld [vmem:[#allocation11 + $0x188] ss:$16 sps:$4 sm:$0xff]  }
 0x7c2   :  { %6650 = vmatprep.subr.bf16.mxu0 %v11751_v23  ;;  %6693 = vmatprep.subr.bf16.mxu1 %v11753_v29  ;;  %12690 = vst [vmem:[#allocation81_spill] sm:$0xff] %v11765_v47  ;;  %12691 = vst [vmem:[#allocation82_spill] sm:$0xff] %v11767_v25  ;;  %v11785_v29 = vld [vmem:[#allocation11 + $0x1c4] ss:$16 sps:$4 sm:$0xff]   ;;  %v11787_v23 = vld [vmem:[#allocation11 + $0x1cc] ss:$16 sps:$4 sm:$0xff]  }
 0x7c3   :  { %12697 = vst [vmem:[#allocation88_spill] sm:$0xff] %v11785_v29  ;;  %12698 = vst [vmem:[#allocation89_spill] sm:$0xff] %v11787_v23 }
 0x7c5   :  { %6651 = vmatpush1.bf16.msra.mxu0 %v11755_v52  ;;  %6694 = vmatpush1.bf16.msra.mxu1 %v11757_v21  ;;  %v11779_v21 = vld [vmem:[#allocation11 + $0x1a0] ss:$16 sps:$4 sm:$0xff]   ;;  %v11781_v52 = vld [vmem:[#allocation11 + $0x1a8] ss:$16 sps:$4 sm:$0xff]  }
 0x7c6   :  { %6652 = vmatprep.subr.bf16.mxu0 %v11765_v47  ;;  %6695 = vmatprep.subr.bf16.mxu1 %v11769_v45  ;;  %12695 = vst [vmem:[#allocation86_spill] sm:$0xff] %v11779_v21  ;;  %12696 = vst [vmem:[#allocation87_spill] sm:$0xff] %v11781_v52  ;;  %v11791_v45 = vld [vmem:[#allocation11 + $0x1c0] ss:$16 sps:$4 sm:$0xff]  }
 0x7c7   :  { %12699 = vst [vmem:[#allocation90_spill] sm:$0xff] %v11791_v45 }
 0x7c9   :  { %6653 = vmatpush1.bf16.msra.mxu0 %v11763_v43  ;;  %6696 = vmatpush1.bf16.msra.mxu1 %v11767_v25  ;;  %v11793_v43 = vld [vmem:[#allocation11 + $0x1c8] ss:$16 sps:$4 sm:$0xff]   ;;  %v11797_v25 = vld [vmem:[#allocation11 + $0x1e4] ss:$16 sps:$4 sm:$0xff]  }
 0x7ca   :  { %6654 = vmatprep.subr.bf16.mxu0 %v11771_v19  ;;  %6697 = vmatprep.subr.bf16.mxu1 %v11774_v2  ;;  %12700 = vst [vmem:[#allocation91_spill] sm:$0xff] %v11793_v43  ;;  %12701 = vst [vmem:[#allocation93_spill] sm:$0xff] %v11797_v25  ;;  %v11799_v19 = vld [vmem:[#allocation11 + $0x1ec] ss:$16 sps:$4 sm:$0xff]   ;;  %v11803_v2 = vld [vmem:[#allocation11 + $0x1e0] ss:$16 sps:$4 sm:$0xff]  }
 0x7cb   :  { %12702 = vst [vmem:[#allocation95_spill] sm:$0xff] %v11799_v19  ;;  %12703 = vst [vmem:[#allocation92_spill] sm:$0xff] %v11803_v2 }
 0x7cd   :  { %6655 = vmatpush1.bf16.msra.mxu0 %v11779_v21  ;;  %6698 = vmatpush1.bf16.msra.mxu1 %v11781_v52  ;;  %v11805_v21 = vld [vmem:[#allocation11 + $0x1e8] ss:$16 sps:$4 sm:$0xff]  }
 0x7ce   :  { %6656 = vmatprep.subr.bf16.mxu0 %v11785_v29  ;;  %6699 = vmatprep.subr.bf16.mxu1 %v11787_v23  ;;  %12704 = vst [vmem:[#allocation94_spill] sm:$0xff] %v11805_v21 }
 0x7d1   :  { %6657 = vmatpush1.bf16.msra.mxu0 %v11791_v45  ;;  %6700 = vmatpush1.bf16.msra.mxu1 %v11793_v43 }
 0x7d2   :  { %6658 = vmatprep.subr.bf16.mxu0 %v11797_v25  ;;  %6701 = vmatprep.subr.bf16.mxu1 %v11799_v19 }
 0x7d5   :  { %6659 = vmatpush1.bf16.msra.mxu0 %v11803_v2  ;;  %6702 = vmatpush1.bf16.msra.mxu1 %v11805_v21 }
 0x7d6   :  { %6970 = vmatprep.subr.bf16.mxu0 %v11483_v17  ;;  %7013 = vmatprep.subr.bf16.mxu1 %v11485_v18 }
 0x84b   :  { %v5774_v23 = vpop.f32.mrb[68].mxu0  ;;  %v5817_v45 = vpop.f32.mrb[84].mxu1 }
 0x84c   :  { %v5775_v43 = vadd.f32 %v5774_v23, %v12632_v34  ;;  %v5776_v29 = vpop.f32.mrb[69].mxu0  ;;  %v5819_v52 = vpop.f32.mrb[85].mxu1  ;;  %v5818_v23 = vadd.f32 %v5817_v45, %v12634_v41 }
 0x84d   :  { %v5777_v47 = vadd.f32 %v5776_v29, %v12633_v53  ;;  %v5778_v16 = vpop.f32.mrb[70].mxu0  ;;  %v5821_v25 = vpop.f32.mrb[86].mxu1  ;;  %v5820_v29 = vadd.f32 %v5819_v52, %v12635_v54 }
 0x84e   :  { %v8476_v32 = vmul.f32 -1.442695, %v5775_v43  ;;  %v5779_v19 = vadd.f32 %v5778_v16, %v12632_v34  ;;  %v5780_v2 = vpop.f32.mrb[71].mxu0  ;;  %v5823_v13 = vpop.f32.mrb[87].mxu1  ;;  %v5822_v16 = vadd.f32 %v5821_v25, %v12634_v41 }
 0x84f   :  { %v8478_v21 = vmul.f32 -1.442695, %v5777_v47  ;;  %v5781_v17 = vadd.f32 %v5780_v2, %v12633_v53  ;;  %v8480_v2 = vmul.f32 -1.442695, %v5820_v29  ;;  %v12705_v29 = vld [vmem:[#allocation45_spill] sm:$0xff] }
 0x850   :  { %9710 = vpow2.f32 %v8476_v32  ;;  %v8477_v18 = vmul.f32 -1.442695, %v5779_v19  ;;  %v5824_v32 = vadd.f32 %v5823_v13, %v12635_v54  ;;  %v6168_v13 = vunpack.c.l.bf16 %v12705_v29  ;;  %v12708_v54 = vld [vmem:[#allocation70_spill] sm:$0xff] }
 0x851   :  { %9712 = vpow2.f32 %v8478_v21  ;;  %v8479_v12 = vmul.f32 -1.442695, %v5781_v17  ;;  %v6175_v60 = vunpack.c.h.bf16 %v12708_v54 }
 0x852   :  { %9714 = vpow2.f32 %v8477_v18  ;;  %v8481_v45 = vmul.f32 -1.442695, %v5824_v32 }
 0x853   :  { %9716 = vpow2.f32 %v8479_v12 }
 0x854   :  { %9718 = vtanh.f32 %v5818_v23 }
 0x85a   :  { %v9711_v5 = vpop.eup %9710 }
 0x85b   :  { %v9713_v44 = vpop.eup %9712  ;;  %v5832_v43 = vadd.f32 1.0, %v9711_v5 }
 0x85c   :  { %v5844_v34 = vadd.f32 1.0, %v9713_v44  ;;  %v9715_v47 = vpop.eup %9714 }
 0x85d   :  { %9720 = vrcp.f32 %v5832_v43  ;;  %v5833_v19 = vadd.f32 1.0, %v9715_v47  ;;  %v9717_v21 = vpop.eup %9716 }
 0x85e   :  { %9722 = vrcp.f32 %v5844_v34  ;;  %v5845_v12 = vadd.f32 1.0, %v9717_v21  ;;  %v9719_v5 = vpop.eup %9718  ;;  %v12706_v34 = vld [vmem:[#allocation69_spill] sm:$0xff] }
 0x85f   :  { %9724 = vtanh.f32 %v5822_v16  ;;  %v6170_v43 = vunpack.c.l.bf16 %v12706_v34  ;;  %v6172_v16 = vunpack.c.h.bf16 %v12705_v29  ;;  %v6174_v40 = vunpack.c.h.bf16 %v12706_v34 }
 0x860   :  { %9726 = vrcp.f32 %v5833_v19 }
 0x861   :  { %9728 = vpow2.f32 %v8480_v2 }
 0x862   :  { %9730 = vrcp.f32 %v5845_v12  ;;  %v12707_v12 = vld [vmem:[#allocation46_spill] sm:$0xff] }
 0x863   :  { %9732 = vpow2.f32 %v8481_v45  ;;  %v6169_v45 = vunpack.c.l.bf16 %v12707_v12  ;;  %v6173_v39 = vunpack.c.h.bf16 %v12707_v12 }
 0x867   :  { %v9721_v52 = vpop.eup %9720 }
 0x868   :  { %v9723_v25 = vpop.eup %9722  ;;  %v5868_v17 = vmul.f32 %v9721_v52, %v9719_v5  ;;  %v6171_v5 = vunpack.c.l.bf16 %v12708_v54 }
 0x869   :  { %v9725_v44 = vpop.eup %9724  ;;  %v5866_v18 = vmul.f32 %v9723_v25, %v11501_v46 }
 0x86a   :  { %v9727_v23 = vpop.eup %9726 }
 0x86b   :  { %v9729_v47 = vpop.eup %9728  ;;  %v11825_v19 = vadd.f32 %v5868_v17, %v5866_v18  ;;  %v5869_v2 = vmul.f32 %v9727_v23, %v9725_v44  ;;  %v6116_v32 = vpop.f32.mrb[72].mxu0 }
 0x86c   :  { %v6159_v21 = vpop.f32.mrb[88].mxu1  ;;  %v9731_v52 = vpop.eup %9730  ;;  %v6176_v41 = vadd.f32 %v6168_v13, %v6116_v32  ;;  %v5858_v56 = vadd.f32 1.0, %v9729_v47 }
 0x86d   :  { %v6178_v46 = vadd.f32 %v6170_v43, %v6159_v21  ;;  %v6118_v25 = vpop.f32.mrb[73].mxu0  ;;  %v6161_v53 = vpop.f32.mrb[89].mxu1  ;;  %v5867_v29 = vmul.f32 %v9731_v52, %v11509_v28 }
 0x86e   :  { %v6177_v17 = vadd.f32 %v6169_v45, %v6118_v25  ;;  %v6179_v18 = vadd.f32 %v6171_v5, %v6161_v53  ;;  %v6120_v44 = vpop.f32.mrb[74].mxu0  ;;  %v6163_v23 = vpop.f32.mrb[90].mxu1  ;;  %v8514_v61 = vmul.f32 -1.442695, %v6176_v41 }
 0x86f   :  { %v6180_v24 = vadd.f32 %v6172_v16, %v6120_v44  ;;  %v6182_v22 = vadd.f32 %v6174_v40, %v6163_v23  ;;  %v6122_v13 = vpop.f32.mrb[75].mxu0  ;;  %v6165_v43 = vpop.f32.mrb[91].mxu1  ;;  %v11833_v21 = vadd.f32 %v5869_v2, %v5867_v29 }
 0x870   :  { %v9733_v32 = vpop.eup %9732  ;;  %v8516_v34 = vmul.f32 -1.442695, %v6177_v17  ;;  %v6181_v9 = vadd.f32 %v6173_v39, %v6122_v13  ;;  %9734 = vpow2.f32 %v8514_v61  ;;  %v6183_v28 = vadd.f32 %v6175_v60, %v6165_v43 }
 0x871   :  { %v8515_v12 = vmul.f32 -1.442695, %v6180_v24  ;;  %v5859_v45 = vadd.f32 1.0, %v9733_v32  ;;  %v8518_v41 = vmul.f32 -1.442695, %v6179_v18 }
 0x872   :  { %9736 = vpow2.f32 %v8516_v34  ;;  %v8517_v53 = vmul.f32 -1.442695, %v6181_v9  ;;  %v8519_v61 = vmul.f32 -1.442695, %v6183_v28 }
 0x873   :  { %9738 = vrcp.f32 %v5858_v56 }
 0x874   :  { %9740 = vpow2.f32 %v8515_v12 }
 0x875   :  { %9742 = vtanh.f32 %v11825_v19 }
 0x876   :  { %9744 = vpow2.f32 %v8517_v53 }
 0x877   :  { %9746 = vrcp.f32 %v5859_v45 }
 0x878   :  { %9748 = vtanh.f32 %v11833_v21 }
 0x879   :  { %9750 = vtanh.f32 %v6178_v46 }
 0x87a   :  { %v9735_v54 = vpop.eup %9734  ;;  %9752 = vpow2.f32 %v8518_v41 }
 0x87b   :  { %v6190_v16 = vadd.f32 1.0, %v9735_v54  ;;  %9754 = vtanh.f32 %v6182_v22 }
 0x87c   :  { %v9737_v40 = vpop.eup %9736 }
 0x87d   :  { %v9739_v24 = vpop.eup %9738  ;;  %v6202_v60 = vadd.f32 1.0, %v9737_v40  ;;  %9756 = vrcp.f32 %v6190_v16 }
 0x87e   :  { %v9741_v9 = vpop.eup %9740 }
 0x87f   :  { %v9743_v56 = vpop.eup %9742  ;;  %9758 = vrcp.f32 %v6202_v60  ;;  %v6191_v39 = vadd.f32 1.0, %v9741_v9 }
 0x880   :  { %v9745_v47 = vpop.eup %9744  ;;  %9760 = vpow2.f32 %v8519_v61  ;;  %v5874_v46 = vmul.f32 %v9743_v56, %v9739_v24 }
 0x881   :  { %v9747_v2 = vpop.eup %9746  ;;  %9762 = vrcp.f32 %v6191_v39  ;;  %v6203_v5 = vadd.f32 1.0, %v9745_v47  ;;  %v12740_v39 = vld [vmem:[#allocation38_spill] sm:$0xff]  ;;  %v12741_v47 = vld [vmem:[#allocation39_spill] sm:$0xff] }
 0x882   :  { %v9749_v52 = vpop.eup %9748 }
 0x883   :  { %9764 = vrcp.f32 %v6203_v5  ;;  %v5875_v25 = vmul.f32 %v9749_v52, %v9747_v2  ;;  %v9751_v29 = vpop.eup %9750  ;;  %v12742_v2 = vld [vmem:[#allocation40_spill] sm:$0xff]  ;;  %v12743_v5 = vld [vmem:[#allocation41_spill] sm:$0xff]  ;;  %v12744_v52 = vld [vmem:[#allocation42_spill] sm:$0xff] }
 0x884   :  { %v9753_v18 = vpop.eup %9752 }
 0x885   :  { %v6243_v17 = vpack.c.bf16 %v5875_v25, %v5874_v46  ;;  %v9755_v44 = vpop.eup %9754  ;;  %v6216_v12 = vadd.f32 1.0, %v9753_v18  ;;  %v12745_v46 = vld [vmem:[#allocation43_spill] sm:$0xff]  ;;  %v12746_v25 = vld [vmem:[#allocation44_spill] sm:$0xff]  ;;  %v12749_v18 = vld [vmem:[#allocation50_spill] sm:$0xff] }
 0x887   :  { %6660 = vmatprep.mubr.bf16.mxu0 %v6243_v17  ;;  %6703 = vmatprep.mubr.bf16.mxu1 %v6243_v17  ;;  %v9757_v22 = vpop.eup %9756  ;;  %9766 = vrcp.f32 %v6216_v12  ;;  %v12748_v17 = vld [vmem:[#allocation53_spill] sm:$0xff]  ;;  %v12757_v12 = vld [vmem:[#allocation79_spill] sm:$0xff] }
 0x888   :  { %v6226_v13 = vmul.f32 %v9757_v22, %v9751_v29  ;;  %v12747_v29 = vld [vmem:[#allocation48_spill] sm:$0xff]  ;;  %v12751_v22 = vld [vmem:[#allocation73_spill] sm:$0xff] }
 0x889   :  { %v9759_v23 = vpop.eup %9758 }
 0x88a   :  { %v9761_v43 = vpop.eup %9760  ;;  %v6224_v32 = vmul.f32 %v9759_v23, %v11514_v15  ;;  %v12752_v23 = vld [vmem:[#allocation74_spill] sm:$0xff] }
 0x88b   :  { %v9763_v34 = vpop.eup %9762  ;;  %v6217_v41 = vadd.f32 1.0, %v9761_v43  ;;  %v12754_v43 = vld [vmem:[#allocation76_spill] sm:$0xff] }
 0x88c   :  { %v11838_v28 = vadd.f32 %v6226_v13, %v6224_v32  ;;  %v6227_v53 = vmul.f32 %v9763_v34, %v9755_v44  ;;  %v12750_v44 = vld [vmem:[#allocation55_spill] sm:$0xff]  ;;  %v12755_v32 = vld [vmem:[#allocation77_spill] sm:$0xff]  ;;  %v12756_v34 = vld [vmem:[#allocation78_spill] sm:$0xff] }
 0x88d   :  { %v9765_v45 = vpop.eup %9764  ;;  %v12753_v13 = vld [vmem:[#allocation75_spill] sm:$0xff] }
 0x88e   :  { %v6225_v54 = vmul.f32 %v9765_v45, %v11518_v59  ;;  %9768 = vtanh.f32 %v11838_v28  ;;  %v12710_v59 = vld [vmem:[#allocation109_spill] sm:$0xff]  ;;  %v12759_v45 = vld [vmem:[#allocation83_spill] sm:$0xff] }
 0x88f   :  { %9770 = vrcp.f32 %v6217_v41  ;;  %v12760_v41 = vld [vmem:[#allocation80_spill] sm:$0xff] }
 0x890   :  { %v11842_v40 = vadd.f32 %v6227_v53, %v6225_v54  ;;  %v12758_v53 = vld [vmem:[#allocation81_spill] sm:$0xff]  ;;  %v12761_v54 = vld [vmem:[#allocation82_spill] sm:$0xff] }
 0x891   :  { %v9767_v16 = vpop.eup %9766 }
 0x892   :  { %9772 = vtanh.f32 %v11842_v40 }
 0x898   :  { %v9769_v61 = vpop.eup %9768 }
 0x899   :  { %v9771_v15 = vpop.eup %9770  ;;  %v6232_v60 = vmul.f32 %v9769_v61, %v9767_v16  ;;  %v12762_v16 = vld [vmem:[#allocation84_spill] sm:$0xff]  ;;  %v12763_v61 = vld [vmem:[#allocation85_spill] sm:$0xff] }
 0x89c   :  { %v9773_v24 = vpop.eup %9772 }
 0x89d   :  { %v6233_v9 = vmul.f32 %v9773_v24, %v9771_v15  ;;  %v12764_v15 = vld [vmem:[#allocation86_spill] sm:$0xff]  ;;  %v12765_v24 = vld [vmem:[#allocation87_spill] sm:$0xff] }
 0x89f   :  { %v6242_v56 = vpack.c.bf16 %v6233_v9, %v6232_v60  ;;  %v12766_v60 = vld [vmem:[#allocation88_spill] sm:$0xff]  ;;  %v12767_v9 = vld [vmem:[#allocation89_spill] sm:$0xff] }
 0x8a1   :  { %6661 = vmatmul.mubr.bf16.vlgmr.msra.gmra.mrb[76].mxu0 %v6242_v56  ;;  %6704 = vmatmul.mubr.bf16.vlgmr.msra.gmra.mrb[92].mxu1 %v6242_v56 }
 0x8a2   :  { %6971 = vmatpush1.bf16.msra.mxu0 %v11521_v35  ;;  %7014 = vmatpush1.bf16.msra.mxu1 %v11523_v20  ;;  %v12711_v35 = vld [vmem:[#allocation110_spill] sm:$0xff]  ;;  %v12712_v20 = vld [vmem:[#allocation111_spill] sm:$0xff] }
 0x8a3   :  { %6972 = vmatprep.subr.bf16.mxu0 %v11527_v26  ;;  %7015 = vmatprep.subr.bf16.mxu1 %v11529_v37  ;;  %v12713_v26 = vld [vmem:[#allocation54_spill] sm:$0xff]  ;;  %v12714_v37 = vld [vmem:[#allocation61_spill] sm:$0xff] }
 0x8a4   :  { %7002 = vmatprep.mubr.bf16.mxu0 %v12321_v33  ;;  %7045 = vmatprep.mubr.bf16.mxu1 %v12321_v33  ;;  %v12709_v33 = vld [vmem:[#allocation108_spill] sm:$0xff] }
 0x8a6   :  { %6973 = vmatpush1.bf16.msra.mxu0 %v11535_v30  ;;  %7016 = vmatpush1.bf16.msra.mxu1 %v11537_v51  ;;  %v12715_v30 = vld [vmem:[#allocation56_spill] sm:$0xff]  ;;  %v12716_v51 = vld [vmem:[#allocation63_spill] sm:$0xff] }
 0x8a7   :  { %6974 = vmatprep.subr.bf16.mxu0 %v11541_v42  ;;  %7017 = vmatprep.subr.bf16.mxu1 %v11543_v36  ;;  %v12717_v42 = vld [vmem:[#allocation58_spill] sm:$0xff]  ;;  %v12718_v36 = vld [vmem:[#allocation65_spill] sm:$0xff] }
 0x8aa   :  { %6975 = vmatpush1.bf16.msra.mxu0 %v11549_v27  ;;  %7018 = vmatpush1.bf16.msra.mxu1 %v11551_v50  ;;  %v12719_v27 = vld [vmem:[#allocation60_spill] sm:$0xff]  ;;  %v12720_v50 = vld [vmem:[#allocation66_spill] sm:$0xff] }
 0x8ab   :  { %6976 = vmatprep.subr.bf16.mxu0 %v11555_v7  ;;  %7019 = vmatprep.subr.bf16.mxu1 %v11557_v55  ;;  %v12721_v7 = vld [vmem:[#allocation51_spill] sm:$0xff]  ;;  %v12722_v55 = vld [vmem:[#allocation57_spill] sm:$0xff] }
 0x8ae   :  { %6977 = vmatpush1.bf16.msra.mxu0 %v11561_v14  ;;  %7020 = vmatpush1.bf16.msra.mxu1 %v11563_v48  ;;  %v12723_v14 = vld [vmem:[#allocation52_spill] sm:$0xff]  ;;  %v12724_v48 = vld [vmem:[#allocation59_spill] sm:$0xff] }
 0x8af   :  { %6978 = vmatprep.subr.bf16.mxu0 %v11567_v11  ;;  %7021 = vmatprep.subr.bf16.mxu1 %v11569_v31  ;;  %v12725_v11 = vld [vmem:[#allocation23_spill] sm:$0xff]  ;;  %v12726_v31 = vld [vmem:[#allocation24_spill] sm:$0xff] }
 0x8b2   :  { %6979 = vmatpush1.bf16.msra.mxu0 %v11573_v62  ;;  %7022 = vmatpush1.bf16.msra.mxu1 %v11575_v10  ;;  %v12727_v62 = vld [vmem:[#allocation25_spill] sm:$0xff]  ;;  %v12728_v10 = vld [vmem:[#allocation26_spill] sm:$0xff] }
 0x8b3   :  { %6980 = vmatprep.subr.bf16.mxu0 %v11579_v63  ;;  %7023 = vmatprep.subr.bf16.mxu1 %v11581_v1  ;;  %v12729_v63 = vld [vmem:[#allocation27_spill] sm:$0xff]  ;;  %v12730_v1 = vld [vmem:[#allocation28_spill] sm:$0xff] }
 0x8b6   :  { %6981 = vmatpush1.bf16.msra.mxu0 %v11585_v49  ;;  %7024 = vmatpush1.bf16.msra.mxu1 %v11587_v0  ;;  %v12731_v49 = vld [vmem:[#allocation29_spill] sm:$0xff]  ;;  %v12732_v0 = vld [vmem:[#allocation30_spill] sm:$0xff] }
 0x8b7   :  { %6982 = vmatprep.subr.bf16.mxu0 %v11591_v3  ;;  %7025 = vmatprep.subr.bf16.mxu1 %v11593_v58  ;;  %v12733_v3 = vld [vmem:[#allocation31_spill] sm:$0xff]  ;;  %v12734_v58 = vld [vmem:[#allocation32_spill] sm:$0xff] }
 0x8ba   :  { %6983 = vmatpush1.bf16.msra.mxu0 %v11597_v6  ;;  %7026 = vmatpush1.bf16.msra.mxu1 %v11599_v38  ;;  %v12735_v6 = vld [vmem:[#allocation34_spill] sm:$0xff]  ;;  %v12736_v38 = vld [vmem:[#allocation36_spill] sm:$0xff] }
 0x8bb   :  { %6984 = vmatprep.subr.bf16.mxu0 %v11603_v4  ;;  %7027 = vmatprep.subr.bf16.mxu1 %v11605_v57  ;;  %v12737_v4 = vld [vmem:[#allocation33_spill] sm:$0xff]  ;;  %v12738_v57 = vld [vmem:[#allocation35_spill] sm:$0xff] }
 0x8be   :  { %6985 = vmatpush1.bf16.msra.mxu0 %v11609_v8  ;;  %7028 = vmatpush1.bf16.msra.mxu1 %v12709_v33  ;;  %v12739_v8 = vld [vmem:[#allocation37_spill] sm:$0xff]  ;;  %v12769_v33 = vld [vmem:[#allocation91_spill] sm:$0xff] }
 0x8bf   :  { %7516 = vmatprep.subr.bf16.mxu0 %v12710_v59  ;;  %7559 = vmatprep.subr.bf16.mxu1 %v12711_v35  ;;  %v12770_v59 = vld [vmem:[#allocation93_spill] sm:$0xff]  ;;  %v12771_v35 = vld [vmem:[#allocation95_spill] sm:$0xff] }
 0x8c1   :  { %7003 = vmatmul.mubr.bf16.vlgmr.msra.gmra.mrb[80].mxu0 %v6242_v56  ;;  %7046 = vmatmul.mubr.bf16.vlgmr.msra.gmra.mrb[96].mxu1 %v6242_v56  ;;  %v12768_v56 = vld [vmem:[#allocation90_spill] sm:$0xff] }
 0x8c2   :  { %7517 = vmatpush1.bf16.msra.mxu0 %v12712_v20  ;;  %7560 = vmatpush1.bf16.msra.mxu1 %v12713_v26  ;;  %v12772_v20 = vld [vmem:[#allocation92_spill] sm:$0xff]  ;;  %v12773_v26 = vld [vmem:[#allocation94_spill] sm:$0xff] }
 0x8c3   :  { %7518 = vmatprep.subr.bf16.mxu0 %v12714_v37  ;;  %7561 = vmatprep.subr.bf16.mxu1 %v12715_v30 }
 0x8c6   :  { %7519 = vmatpush1.bf16.msra.mxu0 %v12716_v51  ;;  %7562 = vmatpush1.bf16.msra.mxu1 %v12717_v42  ;;  %v12774_v51 = vld [vmem:[#allocation19_spill] sm:$0xff] }
 0x8c7   :  { %7520 = vmatprep.subr.bf16.mxu0 %v12718_v36  ;;  %7563 = vmatprep.subr.bf16.mxu1 %v12719_v27 }
 0x8ca   :  { %7521 = vmatpush1.bf16.msra.mxu0 %v12720_v50  ;;  %7564 = vmatpush1.bf16.msra.mxu1 %v12721_v7  ;;  %v12775_v50 = vld [vmem:[#allocation20_spill] sm:$0xff] }
 0x8cb   :  { %7522 = vmatprep.subr.bf16.mxu0 %v12722_v55  ;;  %7565 = vmatprep.subr.bf16.mxu1 %v12723_v14 }
 0x8ce   :  { %7523 = vmatpush1.bf16.msra.mxu0 %v12724_v48  ;;  %7566 = vmatpush1.bf16.msra.mxu1 %v12725_v11 }
 0x8cf   :  { %7524 = vmatprep.subr.bf16.mxu0 %v12726_v31  ;;  %7567 = vmatprep.subr.bf16.mxu1 %v12727_v62 }
 0x8d2   :  { %7525 = vmatpush1.bf16.msra.mxu0 %v12728_v10  ;;  %7568 = vmatpush1.bf16.msra.mxu1 %v12729_v63 }
 0x8d3   :  { %7526 = vmatprep.subr.bf16.mxu0 %v12730_v1  ;;  %7569 = vmatprep.subr.bf16.mxu1 %v12731_v49 }
 0x8d6   :  { %7527 = vmatpush1.bf16.msra.mxu0 %v12732_v0  ;;  %7570 = vmatpush1.bf16.msra.mxu1 %v12733_v3  ;;  %v12776_v0 = vld [vmem:[#allocation22_spill] sm:$0xff] }
 0x8d7   :  { %7528 = vmatprep.subr.bf16.mxu0 %v12734_v58  ;;  %7571 = vmatprep.subr.bf16.mxu1 %v12735_v6  ;;  %v12777_v58 = vld [vmem:[#allocation21_spill] sm:$0xff] }
 0x8da   :  { %7529 = vmatpush1.bf16.msra.mxu0 %v12736_v38  ;;  %7572 = vmatpush1.bf16.msra.mxu1 %v12737_v4 }
 0x8db   :  { %7530 = vmatprep.subr.bf16.mxu0 %v12738_v57  ;;  %7573 = vmatprep.subr.bf16.mxu1 %v12739_v8 }
 0x8de   :  { %7531 = vmatpush1.bf16.msra.mxu0 %v12740_v39  ;;  %7574 = vmatpush1.bf16.msra.mxu1 %v12741_v47 }
 0x8df   :  { %7532 = vmatprep.subr.bf16.mxu0 %v12742_v2  ;;  %7575 = vmatprep.subr.bf16.mxu1 %v12743_v5 }
 0x8e2   :  { %7533 = vmatpush1.bf16.msra.mxu0 %v12744_v52  ;;  %7576 = vmatpush1.bf16.msra.mxu1 %v12745_v46 }
 0x8e3   :  { %7534 = vmatprep.subr.bf16.mxu0 %v12746_v25  ;;  %7577 = vmatprep.subr.bf16.mxu1 %v12747_v29 }
 0x8e6   :  { %7535 = vmatpush1.bf16.msra.mxu0 %v12748_v17  ;;  %7578 = vmatpush1.bf16.msra.mxu1 %v12749_v18 }
 0x8e7   :  { %7536 = vmatprep.subr.bf16.mxu0 %v12750_v44  ;;  %7579 = vmatprep.subr.bf16.mxu1 %v12751_v22 }
 0x8ea   :  { %7537 = vmatpush1.bf16.msra.mxu0 %v12752_v23  ;;  %7580 = vmatpush1.bf16.msra.mxu1 %v12753_v13 }
 0x8eb   :  { %7538 = vmatprep.subr.bf16.mxu0 %v12754_v43  ;;  %7581 = vmatprep.subr.bf16.mxu1 %v12755_v32  ;;  %v12778_v32 = vld [vmem:[#allocation47_spill] sm:$0xff] }
 0x8ee   :  { %7539 = vmatpush1.bf16.msra.mxu0 %v12756_v34  ;;  %7582 = vmatpush1.bf16.msra.mxu1 %v12757_v12  ;;  %v7056_v34 = vunpack.c.l.bf16 %v12778_v32  ;;  %v12779_v12 = vld [vmem:[#allocation71_spill] sm:$0xff] }
 0x8ef   :  { %7540 = vmatprep.subr.bf16.mxu0 %v12758_v53  ;;  %7583 = vmatprep.subr.bf16.mxu1 %v12759_v45  ;;  %v7058_v53 = vunpack.c.l.bf16 %v12779_v12  ;;  %v7060_v45 = vunpack.c.h.bf16 %v12778_v32 }
 0x8f2   :  { %7541 = vmatpush1.bf16.msra.mxu0 %v12760_v41  ;;  %7584 = vmatpush1.bf16.msra.mxu1 %v12761_v54 }
 0x8f3   :  { %7542 = vmatprep.subr.bf16.mxu0 %v12762_v16  ;;  %7585 = vmatprep.subr.bf16.mxu1 %v12763_v61 }
 0x8f6   :  { %7543 = vmatpush1.bf16.msra.mxu0 %v12764_v15  ;;  %7586 = vmatpush1.bf16.msra.mxu1 %v12765_v24  ;;  %v12780_v24 = vld [vmem:[#allocation49_spill] sm:$0xff] }
 0x8f7   :  { %7544 = vmatprep.subr.bf16.mxu0 %v12766_v60  ;;  %7587 = vmatprep.subr.bf16.mxu1 %v12767_v9  ;;  %v7057_v60 = vunpack.c.l.bf16 %v12780_v24  ;;  %v12781_v9 = vld [vmem:[#allocation72_spill] sm:$0xff] }
 0x8fa   :  { %7545 = vmatpush1.bf16.msra.mxu0 %v12768_v56  ;;  %7588 = vmatpush1.bf16.msra.mxu1 %v12769_v33  ;;  %v7059_v56 = vunpack.c.l.bf16 %v12781_v9 }
 0x8fb   :  { %7546 = vmatprep.subr.bf16.mxu0 %v12770_v59  ;;  %7589 = vmatprep.subr.bf16.mxu1 %v12771_v35 }
 0x8fe   :  { %7547 = vmatpush1.bf16.msra.mxu0 %v12772_v20  ;;  %7590 = vmatpush1.bf16.msra.mxu1 %v12773_v26  ;;  %v7062_v26 = vunpack.c.h.bf16 %v12779_v12 }
 0x974   :  { %v6662_v37 = vpop.f32.mrb[76].mxu0  ;;  %v6705_v30 = vpop.f32.mrb[92].mxu1 }
 0x975   :  { %v6663_v42 = vadd.f32 %v6662_v37, %v12774_v51  ;;  %v6664_v36 = vpop.f32.mrb[77].mxu0  ;;  %v6707_v27 = vpop.f32.mrb[93].mxu1  ;;  %v6706_v3 = vadd.f32 %v6705_v30, %v12776_v0  ;;  %v7061_v37 = vunpack.c.h.bf16 %v12780_v24 }
 0x976   :  { %v6665_v7 = vadd.f32 %v6664_v36, %v12775_v50  ;;  %v6666_v55 = vpop.f32.mrb[78].mxu0  ;;  %v6709_v14 = vpop.f32.mrb[94].mxu1  ;;  %v6708_v6 = vadd.f32 %v6707_v27, %v12777_v58 }
 0x977   :  { %v8584_v48 = vmul.f32 -1.442695, %v6663_v42  ;;  %v6667_v11 = vadd.f32 %v6666_v55, %v12774_v51  ;;  %v6668_v31 = vpop.f32.mrb[79].mxu0  ;;  %v6711_v62 = vpop.f32.mrb[95].mxu1  ;;  %v6710_v8 = vadd.f32 %v6709_v14, %v12776_v0  ;;  %v7063_v55 = vunpack.c.h.bf16 %v12781_v9 }
 0x978   :  { %v8586_v10 = vmul.f32 -1.442695, %v6665_v7  ;;  %v6669_v63 = vadd.f32 %v6668_v31, %v12775_v50  ;;  %v8588_v2 = vmul.f32 -1.442695, %v6708_v6  ;;  %v6712_v5 = vadd.f32 %v6711_v62, %v12777_v58 }
 0x979   :  { %9774 = vpow2.f32 %v8584_v48  ;;  %v8585_v1 = vmul.f32 -1.442695, %v6667_v11 }
 0x97a   :  { %9776 = vpow2.f32 %v8586_v10  ;;  %v8587_v49 = vmul.f32 -1.442695, %v6669_v63  ;;  %v8589_v29 = vmul.f32 -1.442695, %v6712_v5 }
 0x97b   :  { %9778 = vpow2.f32 %v8585_v1 }
 0x97c   :  { %9780 = vpow2.f32 %v8587_v49 }
 0x97d   :  { %9782 = vtanh.f32 %v6706_v3 }
 0x983   :  { %v9775_v38 = vpop.eup %9774 }
 0x984   :  { %v9777_v4 = vpop.eup %9776  ;;  %v6720_v57 = vadd.f32 1.0, %v9775_v38 }
 0x985   :  { %v6732_v39 = vadd.f32 1.0, %v9777_v4  ;;  %v9779_v47 = vpop.eup %9778 }
 0x986   :  { %9784 = vrcp.f32 %v6720_v57  ;;  %v6721_v52 = vadd.f32 1.0, %v9779_v47  ;;  %v9781_v46 = vpop.eup %9780 }
 0x987   :  { %9786 = vrcp.f32 %v6732_v39  ;;  %v6733_v25 = vadd.f32 1.0, %v9781_v46  ;;  %v9783_v17 = vpop.eup %9782 }
 0x988   :  { %9788 = vtanh.f32 %v6710_v8 }
 0x989   :  { %9790 = vrcp.f32 %v6721_v52 }
 0x98a   :  { %9792 = vpow2.f32 %v8588_v2 }
 0x98b   :  { %9794 = vrcp.f32 %v6733_v25 }
 0x98c   :  { %9796 = vpow2.f32 %v8589_v29 }
 0x990   :  { %v9785_v18 = vpop.eup %9784 }
 0x991   :  { %v9787_v44 = vpop.eup %9786  ;;  %v6756_v22 = vmul.f32 %v9785_v18, %v9783_v17 }
 0x992   :  { %v9789_v23 = vpop.eup %9788  ;;  %v6754_v13 = vmul.f32 %v9787_v44, %v11825_v19 }
 0x993   :  { %v9791_v43 = vpop.eup %9790 }
 0x994   :  { %v9793_v41 = vpop.eup %9792  ;;  %v11953_v54 = vadd.f32 %v6756_v22, %v6754_v13  ;;  %v6757_v16 = vmul.f32 %v9791_v43, %v9789_v23  ;;  %v7004_v61 = vpop.f32.mrb[80].mxu0 }
 0x995   :  { %v7047_v15 = vpop.f32.mrb[96].mxu1  ;;  %v9795_v33 = vpop.eup %9794  ;;  %v7064_v59 = vadd.f32 %v7056_v34, %v7004_v61  ;;  %v6746_v14 = vadd.f32 1.0, %v9793_v41 }
 0x996   :  { %v7066_v19 = vadd.f32 %v7058_v53, %v7047_v15  ;;  %v7006_v35 = vpop.f32.mrb[81].mxu0  ;;  %v7049_v20 = vpop.f32.mrb[97].mxu1  ;;  %v6755_v30 = vmul.f32 %v9795_v33, %v11833_v21 }
 0x997   :  { %v7065_v42 = vadd.f32 %v7057_v60, %v7006_v35  ;;  %v7067_v36 = vadd.f32 %v7059_v56, %v7049_v20  ;;  %v7008_v27 = vpop.f32.mrb[82].mxu0  ;;  %v7051_v7 = vpop.f32.mrb[98].mxu1  ;;  %v8622_v48 = vmul.f32 -1.442695, %v7064_v59 }
 0x998   :  { %v7068_v11 = vadd.f32 %v7060_v45, %v7008_v27  ;;  %v7070_v31 = vadd.f32 %v7062_v26, %v7051_v7  ;;  %v7010_v62 = vpop.f32.mrb[83].mxu0  ;;  %v7053_v10 = vpop.f32.mrb[99].mxu1  ;;  %v11961_v1 = vadd.f32 %v6757_v16, %v6755_v30  ;;  %v10053_v27 = vmov 0.0   ;;  %v9351_v7 = vld [vmem:[#allocation13 + $0x8] sm:$0xff]  }
 0x999   :  { %v9797_v63 = vpop.eup %9796  ;;  %v8624_v49 = vmul.f32 -1.442695, %v7065_v42  ;;  %v7069_v3 = vadd.f32 %v7061_v37, %v7010_v62  ;;  %9798 = vpow2.f32 %v8622_v48  ;;  %v7071_v21 = vadd.f32 %v7063_v55, %v7053_v10  ;;  %8716 = vmatprep.subr.bf16.mxu0 %v10053_v27  ;;  %v9353_v55 = vld [vmem:[#allocation13 + $0x18] sm:$0xff]   ;;  %v9355_v48 = vld [vmem:[#allocation13 + $0x28] sm:$0xff]  }
 0x99a   :  { %v8623_v6 = vmul.f32 -1.442695, %v7068_v11  ;;  %v6747_v4 = vadd.f32 1.0, %v9797_v63  ;;  %v8626_v57 = vmul.f32 -1.442695, %v7067_v36  ;;  %v9356_v11 = vld [vmem:[#allocation13 + $0x30] sm:$0xff]  }
 0x99b   :  { %9800 = vpow2.f32 %v8624_v49  ;;  %v8625_v38 = vmul.f32 -1.442695, %v7069_v3  ;;  %v8627_v2 = vmul.f32 -1.442695, %v7071_v21 }
 0x99c   :  { %9802 = vrcp.f32 %v6746_v14  ;;  %v9354_v14 = vld [vmem:[#allocation13 + $0x20] sm:$0xff]  }
 0x99d   :  { %9804 = vpow2.f32 %v8623_v6 }
 0x99e   :  { %9806 = vtanh.f32 %v11953_v54 }
 0x99f   :  { %9808 = vpow2.f32 %v8625_v38 }
 0x9a0   :  { %9810 = vrcp.f32 %v6747_v4 }
 0x9a1   :  { %9812 = vtanh.f32 %v11961_v1 }
 0x9a2   :  { %9814 = vtanh.f32 %v7066_v19 }
 0x9a3   :  { %v9799_v8 = vpop.eup %9798  ;;  %9816 = vpow2.f32 %v8626_v57 }
 0x9a4   :  { %v7078_v47 = vadd.f32 1.0, %v9799_v8  ;;  %9818 = vtanh.f32 %v7070_v31  ;;  %v9357_v31 = vld [vmem:[#allocation13 + $0x38] sm:$0xff]  }
 0x9a5   :  { %v9801_v39 = vpop.eup %9800 }
 0x9a6   :  { %v9803_v5 = vpop.eup %9802  ;;  %v7090_v52 = vadd.f32 1.0, %v9801_v39  ;;  %9820 = vrcp.f32 %v7078_v47 }
 0x9a7   :  { %v9805_v46 = vpop.eup %9804 }
 0x9a8   :  { %v9807_v25 = vpop.eup %9806  ;;  %9822 = vrcp.f32 %v7090_v52  ;;  %v7079_v29 = vadd.f32 1.0, %v9805_v46 }
 0x9a9   :  { %v9809_v17 = vpop.eup %9808  ;;  %9824 = vpow2.f32 %v8627_v2  ;;  %v6762_v23 = vmul.f32 %v9807_v25, %v9803_v5 }
 0x9aa   :  { %v9811_v18 = vpop.eup %9810  ;;  %9826 = vrcp.f32 %v7079_v29  ;;  %v7091_v44 = vadd.f32 1.0, %v9809_v17 }
 0x9ab   :  { %v9813_v22 = vpop.eup %9812 }
 0x9ac   :  { %9828 = vrcp.f32 %v7091_v44  ;;  %v6763_v13 = vmul.f32 %v9813_v22, %v9811_v18  ;;  %v9815_v43 = vpop.eup %9814 }
 0x9ad   :  { %v9817_v34 = vpop.eup %9816 }
 0x9ae   :  { %v7131_v32 = vpack.c.bf16 %v6763_v13, %v6762_v23  ;;  %v9819_v12 = vpop.eup %9818  ;;  %v7104_v16 = vadd.f32 1.0, %v9817_v34 }
 0x9b0   :  { %7548 = vmatprep.mubr.bf16.mxu0 %v7131_v32  ;;  %7591 = vmatprep.mubr.bf16.mxu1 %v7131_v32  ;;  %v9821_v53 = vpop.eup %9820  ;;  %9830 = vrcp.f32 %v7104_v16 }
 0x9b1   :  { %v7114_v41 = vmul.f32 %v9821_v53, %v9815_v43 }
 0x9b2   :  { %v9823_v45 = vpop.eup %9822 }
 0x9b3   :  { %v9825_v61 = vpop.eup %9824  ;;  %v7112_v15 = vmul.f32 %v9823_v45, %v11838_v28  ;;  %v9350_v28 = vld [vmem:[#allocation13] sm:$0xff]  }
 0x9b4   :  { %v9827_v24 = vpop.eup %9826  ;;  %v7105_v33 = vadd.f32 1.0, %v9825_v61 }
 0x9b5   :  { %v7116_v60 = vadd.f32 %v7114_v41, %v7112_v15  ;;  %v7115_v9 = vmul.f32 %v9827_v24, %v9819_v12 }
 0x9b6   :  { %v9829_v56 = vpop.eup %9828 }
 0x9b7   :  { %9832 = vtanh.f32 %v7116_v60  ;;  %v7113_v59 = vmul.f32 %v9829_v56, %v11842_v40  ;;  %v9352_v40 = vld [vmem:[#allocation13 + $0x10] sm:$0xff]  }
 0x9b8   :  { %9834 = vrcp.f32 %v7105_v33 }
 0x9b9   :  { %v7117_v19 = vadd.f32 %v7115_v9, %v7113_v59 }
 0x9ba   :  { %v9831_v35 = vpop.eup %9830 }
 0x9bb   :  { %9836 = vtanh.f32 %v7117_v19 }
 0x9c1   :  { %v9833_v20 = vpop.eup %9832 }
 0x9c2   :  { %v7120_v26 = vmul.f32 %v9833_v20, %v9831_v35  ;;  %v9835_v37 = vpop.eup %9834 }
 0x9c5   :  { %v9837_v30 = vpop.eup %9836 }
 0x9c6   :  { %v7121_v42 = vmul.f32 %v9837_v30, %v9835_v37 }
 0x9c8   :  { %v7130_v36 = vpack.c.bf16 %v7121_v42, %v7120_v26 }
 0x9ca   :  { %7549 = vmatmul.mubr.bf16.vlgmr.msra.gmra.mrb[84].mxu0 %v7130_v36  ;;  %7592 = vmatmul.mubr.bf16.vlgmr.msra.gmra.mrb[100].mxu1 %v7130_v36 }
 0x9cb   :  { %8717 = vmatpush3.bf16.msra.mxu0 %v9350_v28  ;;  %8732 = vmatprep.mubr.msk.bf16.mxu0 %vm10054_vm2, %v10053_v27 }
 0x9cc   :  { %8718 = vmatprep.subr.bf16.mxu0 %v10053_v27 }
 0x9cf   :  { %8719 = vmatpush3.bf16.msra.mxu0 %v9351_v7 }
 0x9d0   :  { %8720 = vmatprep.subr.bf16.mxu0 %v10053_v27 }
 0x9d3   :  { %8721 = vmatpush3.bf16.msra.mxu0 %v9352_v40 }
 0x9d4   :  { %8722 = vmatprep.subr.bf16.mxu0 %v10053_v27 }
 0x9d7   :  { %8723 = vmatpush3.bf16.msra.mxu0 %v9353_v55 }
 0x9d8   :  { %8724 = vmatprep.subr.bf16.mxu0 %v10053_v27 }
 0x9db   :  { %8725 = vmatpush3.bf16.msra.mxu0 %v9354_v14 }
 0x9dc   :  { %8726 = vmatprep.subr.bf16.mxu0 %v10053_v27 }
 0x9df   :  { %8727 = vmatpush3.bf16.msra.mxu0 %v9355_v48 }
 0x9e0   :  { %8728 = vmatprep.subr.bf16.mxu0 %v10053_v27 }
 0x9e3   :  { %8729 = vmatpush3.bf16.msra.mxu0 %v9356_v11 }
 0x9e4   :  { %8730 = vmatprep.subr.bf16.mxu0 %v10053_v27 }
 0x9e7   :  { %8731 = vmatpush3.bf16.msra.mxu0 %v9357_v31 }
 0xa9d   :  { %v7550_v62 = vpop.f32.mrb[84].mxu0  ;;  %v7593_v10 = vpop.f32.mrb[100].mxu1 }
 0xa9e   :  { %v7551_v63 = vadd.f32 %v7550_v62, %v12774_v51  ;;  %v7552_v49 = vpop.f32.mrb[85].mxu0  ;;  %v7595_v3 = vpop.f32.mrb[101].mxu1  ;;  %v7594_v25 = vadd.f32 %v7593_v10, %v12776_v0 }
 0xa9f   :  { %v7553_v6 = vadd.f32 %v7552_v49, %v12775_v50  ;;  %v7554_v21 = vpop.f32.mrb[86].mxu0  ;;  %v7597_v38 = vpop.f32.mrb[102].mxu1  ;;  %v7596_v46 = vadd.f32 %v7595_v3, %v12777_v58 }
 0xaa0   :  { %v8692_v4 = vmul.f32 -1.442695, %v7551_v63  ;;  %v7555_v57 = vadd.f32 %v7554_v21, %v12774_v51  ;;  %v7556_v8 = vpop.f32.mrb[87].mxu0  ;;  %v7599_v39 = vpop.f32.mrb[103].mxu1  ;;  %v7598_v51 = vadd.f32 %v7597_v38, %v12776_v0 }
 0xaa1   :  { %v8694_v47 = vmul.f32 -1.442695, %v7553_v6  ;;  %v7557_v2 = vadd.f32 %v7556_v8, %v12775_v50  ;;  %v8696_v29 = vmul.f32 -1.442695, %v7596_v46  ;;  %v7600_v17 = vadd.f32 %v7599_v39, %v12777_v58 }
 0xaa2   :  { %9838 = vpow2.f32 %v8692_v4  ;;  %v8693_v5 = vmul.f32 -1.442695, %v7555_v57 }
 0xaa3   :  { %9840 = vpow2.f32 %v8694_v47  ;;  %v8695_v52 = vmul.f32 -1.442695, %v7557_v2  ;;  %v8697_v50 = vmul.f32 -1.442695, %v7600_v17 }
 0xaa4   :  { %9842 = vpow2.f32 %v8693_v5 }
 0xaa5   :  { %9844 = vpow2.f32 %v8695_v52 }
 0xaa6   :  { %9846 = vtanh.f32 %v7594_v25 }
 0xaa7   :  { %9848 = vpow2.f32 %v8696_v29 }
 0xaa8   :  { %9850 = vtanh.f32 %v7598_v51 }
 0xaac   :  { %v9839_v18 = vpop.eup %9838 }
 0xaad   :  { %v9841_v44 = vpop.eup %9840  ;;  %v7608_v22 = vadd.f32 1.0, %v9839_v18 }
 0xaae   :  { %v7620_v23 = vadd.f32 1.0, %v9841_v44  ;;  %v9843_v13 = vpop.eup %9842 }
 0xaaf   :  { %9852 = vrcp.f32 %v7608_v22  ;;  %v7609_v43 = vadd.f32 1.0, %v9843_v13  ;;  %v9845_v32 = vpop.eup %9844 }
 0xab0   :  { %9854 = vrcp.f32 %v7620_v23  ;;  %v7621_v34 = vadd.f32 1.0, %v9845_v32  ;;  %v9847_v58 = vpop.eup %9846 }
 0xab1   :  { %9856 = vpow2.f32 %v8697_v50  ;;  %v9849_v12 = vpop.eup %9848 }
 0xab2   :  { %9858 = vrcp.f32 %v7609_v43  ;;  %v9851_v0 = vpop.eup %9850  ;;  %v7634_v16 = vadd.f32 1.0, %v9849_v12 }
 0xab3   :  { %9860 = vrcp.f32 %v7621_v34 }
 0xab4   :  { %9862 = vrcp.f32 %v7634_v16 }
 0xab9   :  { %v9853_v53 = vpop.eup %9852 }
 0xaba   :  { %v9855_v45 = vpop.eup %9854  ;;  %v7644_v41 = vmul.f32 %v9853_v53, %v9847_v58 }
 0xabb   :  { %v9857_v61 = vpop.eup %9856  ;;  %v7642_v15 = vmul.f32 %v9855_v45, %v11953_v54  ;;  %v8698_v54 = vld [vmem:[%s11998_s6] ss:$0 sm:$0xff] }
 0xabc   :  { %v9859_v24 = vpop.eup %9858  ;;  %v7635_v33 = vadd.f32 1.0, %v9857_v61 }
 0xabd   :  { %v7646_v60 = vadd.f32 %v7644_v41, %v7642_v15  ;;  %v7645_v9 = vmul.f32 %v9859_v24, %v9851_v0  ;;  %v9861_v56 = vpop.eup %9860 }
 0xabe   :  { %v7643_v59 = vmul.f32 %v9861_v56, %v11961_v1  ;;  %v9863_v35 = vpop.eup %9862 }
 0xabf   :  { %9864 = vtanh.f32 %v7646_v60 }
 0xac0   :  { %v7647_v19 = vadd.f32 %v7645_v9, %v7643_v59  ;;  %9866 = vrcp.f32 %v7635_v33 }
 0xac2   :  { %9868 = vtanh.f32 %v7647_v19 }
 0xac9   :  { %v9865_v20 = vpop.eup %9864 }
 0xaca   :  { %v7650_v26 = vmul.f32 %v9865_v20, %v9863_v35  ;;  %v9867_v37 = vpop.eup %9866 }
 0xacc   :  { %v9869_v30 = vpop.eup %9868 }
 0xacd   :  { %v7651_v42 = vmul.f32 %v9869_v30, %v9867_v37 }
 0xacf   :  { %v7661_v36 = vpack.c.bf16 %v7651_v42, %v7650_v26 }
 0xad1   :  { %8733 = vmatmul.mubr.bf16.vlgmr.msra.gmra.mrb[88].mxu0 %v7661_v36 }
 0xba4   :  { %v7767_v28 = vpop.f32.mrb[88].mxu0 }
 0xba5   :  { %v7768_v27 = vadd.f32 %v8698_v54, %v7767_v28  ;;  %v8734_v1 = vpop.f32.mrb[89].mxu0 }
 0xba6   :  { %v7770_v7 = vpop.f32.mrb[90].mxu0 }
 0xba7   :  { %7774 = vst [vmem:[#allocation14] sm:$0xff] %v7768_v27  ;;  %v7771_v40 = vadd.f32 %v8698_v54, %v7770_v7  ;;  %v8735_v55 = vpop.f32.mrb[91].mxu0 }
 0xba9   :  { %7775 = vst [vmem:[#allocation14 + $0x8] sm:$0xff] %v7771_v40 }
 0xbaa   :  { %10023 = shalt.err (!%p10020_p2)
}
 0xbab   :  { %s10024_s22 = scalar_lea.hbm %s11999_s7, 256 }
 0xbac   :  { %p10025_p3 = scmp.ne.s32.totalorder %s11999_s7, %s10024_s22  ;;  %p10028_p4 = scmp.lt.u32.totalorder %s10024_s22, %s11999_s7 }
 0xbae   :  { %p10030_p5 = pnand %p10028_p4, %p10025_p3 }
 0xbb0   :  { %10033 = shalt.err (!%p10030_p5)
}
 0xbb1   :  { %s10056_s25 = smov 128   ;;  %s10057_s27 = smov 8  }
 0xbb2   :  { %7787 = dma.vmem_to_hbm [thread:$0]  %s7782_s19, 256, %s11999_s7, [#allocation7], %s10056_s25, %s10056_s25, %s10057_s27  }
 0xbb3   :  { %10040 = dma.done.wait [#allocation7], 256  }
 0xbb4   :  { %10041 = vsyncadd [#allocation7], 4294967040 }
 0xbb5   :  { %7791 = vsyncpa [#allocation6], 1 }
 0xbb6   :  { %7792 = vsyncpa [#allocation9], 1 }
 0xbb7   :  { %7793 = vsyncpa [#allocation12], 1 }
 0xbb8   :  { %7794 = vsyncpa [#allocation7], 1 }

</bundles_post_ra>
